<compile_context>
chip_gen: v5e
topology: v5e:2x2
jax: 0.10.0
libtpu: 0.0.40
codegen_flags: <defaults>
</compile_context>

<pallas_src>
import functools

import jax
import jax.numpy as jnp
from jax.experimental import pallas as pl
from jax.experimental.pallas import tpu as pltpu

BN_EPS = 1e-3      # scvi FCLayers BatchNorm1d eps
ZINB_EPS = 1e-8    # scvi ZINB numerical eps


def _softplus(v):
    # numerically stable softplus (matches torch.nn.functional.softplus)
    return jnp.maximum(v, 0.0) + jnp.log(1.0 + jnp.exp(-jnp.abs(v)))


def _round_up(n, m):
    return ((n + m - 1) // m) * m


def _device_kind():
    try:
        return jax.devices()[0].device_kind.lower()
    except Exception:
        return ""


def _vmem_capacity_bytes():
    try:
        return int(pltpu.get_tpu_info().vmem_capacity_bytes)
    except Exception:
        return 64 << 20   # conservative (v7x-sized) fallback


def vae_gene_cell_kernel(
    # -------- streamed (tiled along batch) --------
    x_ref, eps_ref, lg_ref,
    # -------- resident parameters --------
    w1e_ref, b1e_ref,          # encoder Linear (BN folded), bf16 weight (Gp, H)
    wmv_ref, bmv_ref,          # fused [mean | logvar] head   (H, 2L)
    w1d_ref, b1d_ref,          # decoder Linear (BN folded)   (L, H)
    wsd_ref, bsd_ref,          # fused [px_scale | px_dropout] head (H, 2Gp), bf16
    theta_ref, lte_ref,        # theta = exp(px_r) (1,Gp), log(theta+eps) (1,Gp)
    # -------- outputs --------
    recon_ref, kl_ref,
    *, n_valid_genes, tail_dtype,
):
    ct = tail_dtype                                          # ZINB-tail compute dtype
    x = x_ref[...]                                           # (TB, Gp) f32
    Gp = x.shape[-1]
    L = eps_ref.shape[-1]

    # ---------------- encoder ----------------
    xl = jnp.log(1.0 + x)                                    # log_variational
    h = jnp.dot(xl.astype(jnp.bfloat16), w1e_ref[...],
                preferred_element_type=jnp.float32) + b1e_ref[...]
    h = jnp.maximum(h, 0.0)                                  # ReLU (BN folded)

    qmv = jnp.dot(h, wmv_ref[...], preferred_element_type=jnp.float32) + bmv_ref[...]
    qz_m = qmv[:, :L]
    logvar = qmv[:, L:]
    qz_v = jnp.exp(logvar)
    z = qz_m + jnp.sqrt(qz_v) * eps_ref[...]                 # reparameterization

    # ---------------- decoder ----------------
    hd = jnp.dot(z, w1d_ref[...], preferred_element_type=jnp.float32) + b1d_ref[...]
    hd = jnp.maximum(hd, 0.0)

    head = jnp.dot(hd.astype(jnp.bfloat16), wsd_ref[...],
                   preferred_element_type=jnp.float32) + bsd_ref[...]
    logits = head[:, :Gp]
    pi = head[:, Gp:].astype(ct)                             # px_dropout logits

    # softmax pieces in log space; mu = e / sum_e is never materialized.
    m = jnp.max(logits, axis=-1, keepdims=True)
    sh = (logits - m).astype(ct)
    e = jnp.exp(sh)                                          # (TB, Gp) ct
    sum_e = jnp.sum(e, axis=-1, keepdims=True, dtype=jnp.float32)   # (TB,1) f32
    log_sum_e = jnp.log(sum_e)
    sum_e_c = sum_e.astype(ct)
    log_sum_e_c = log_sum_e.astype(ct)

    theta = theta_ref[...].astype(ct)                        # (1, Gp)
    log_theta_eps = lte_ref[...].astype(ct)                  # log(theta + eps)
    eps_c = jnp.asarray(ZINB_EPS, ct)

    # log(mu + eps) and log(theta + mu + eps), exact rewrites of the reference.
    log_mu_eps = jnp.log(e + eps_c * sum_e_c) - log_sum_e_c
    log_theta_mu_eps = jnp.log((theta + eps_c) * sum_e_c + e) - log_sum_e_c

    # ---------------- ZINB negative log-likelihood ----------------
    softplus_pi = _softplus(-pi)
    pi_theta_log = -pi + theta * (log_theta_eps - log_theta_mu_eps)

    case_zero = _softplus(pi_theta_log) - softplus_pi
    case_non_zero = (
        -softplus_pi
        + pi_theta_log
        + x.astype(ct) * (log_mu_eps - log_theta_mu_eps)
        + lg_ref[...].astype(ct)     # lgamma(x+theta) - lgamma(theta) - lgamma(x+1)
    )
    zero_c = jnp.asarray(0.0, ct)
    log_prob = (jnp.where(x < ZINB_EPS, case_zero, zero_c)
                + jnp.where(x > ZINB_EPS, case_non_zero, zero_c))
    if n_valid_genes != Gp:
        gene_idx = jax.lax.broadcasted_iota(jnp.int32, (1, Gp), 1)
        log_prob = jnp.where(gene_idx < n_valid_genes, log_prob, zero_c)
    recon_ref[...] = -jnp.sum(log_prob, axis=-1, keepdims=True, dtype=jnp.float32)

    # ---------------- KL( N(qz_m, sqrt(qz_v)) || N(0, 1) ) ----------------
    kl_elem = 0.5 * (qz_v + qz_m * qz_m - 1.0 - logvar)      # log(qz_v) == logvar
    kl_ref[...] = jnp.sum(kl_elem, axis=-1, keepdims=True)


def vae_gene_cell_forward(x, eps, params, *, block_b=None, tail_bf16=None):
    """Fused VAEGeneCell forward. Returns (reconst_loss, kl_divergence, 0.0)."""
    B, G = x.shape
    L = eps.shape[1]
    H = params["w1e"].shape[1]

    kind = _device_kind()
    vmem_cap = _vmem_capacity_bytes()
    if block_b is None:
        # v6e (128 MiB VMEM, 1 TC, 256-wide MXU): 256-row tiles.
        # v5e (MXU full at 128 rows) / v7x (64 MiB VMEM, keep >=2 grid steps so
        # the "parallel" batch axis splits across both TensorCores): 128.
        block_b = 256 if "v6" in kind else 128
    if tail_bf16 is None:
        # bf16 VALU/EUP exists on v6e/v7x only; f32 elsewhere (and when unknown).
        tail_bf16 = ("v6" in kind) or ("v7" in kind) or ("tpu7" in kind)
    ct = jnp.bfloat16 if tail_bf16 else jnp.float32

    TB = int(block_b)
    Bp = _round_up(max(B, 1), TB)          # pad batch -> MXU-shaped tiles, no TB=8 fallback
    Gp = _round_up(G, 128)                 # pad genes -> lane-aligned slices of the 2G head

    def pad2(a, rows, cols, val=0.0):
        return jnp.pad(a, ((0, rows - a.shape[0]), (0, cols - a.shape[1])),
                       constant_values=val)

    xp = pad2(x.astype(jnp.float32), Bp, Gp)
    epsp = pad2(eps.astype(jnp.float32), Bp, L)

    # ---- fold eval-mode BatchNorm affine into the preceding Linear ----
    # NOTE: uses running_mean=0 / running_var=1 (fresh module); a trained
    # checkpoint must fold its real running stats here instead.
    inv_std = 1.0 / jnp.sqrt(1.0 + BN_EPS)
    scale_e = params["gamma_e"] * inv_std                        # (1, H)
    w1e = pad2(params["w1e"] * scale_e, Gp, H).astype(jnp.bfloat16)
    b1e = params["b1e"] * scale_e + params["beta_e"]
    scale_d = params["gamma_d"] * inv_std
    w1d = params["w1d"] * scale_d                                # (L, H) tiny, keep f32
    b1d = params["b1d"] * scale_d + params["beta_d"]

    # ---- fuse paired heads (with gene padding) ----
    wmv = jnp.concatenate([params["wm"], params["wv"]], axis=1)  # (H, 2L)
    bmv = jnp.concatenate([params["bm"], params["bv"]], axis=1)  # (1, 2L)
    ws = pad2(params["ws"], H, Gp)
    bs = pad2(params["bs"], 1, Gp, val=-1e30)   # padded genes get ~0 softmax mass
    wdp = pad2(params["wdp"], H, Gp)
    bdp = pad2(params["bdp"], 1, Gp)
    wsd = jnp.concatenate([ws, wdp], axis=1).astype(jnp.bfloat16)  # (H, 2Gp)
    bsd = jnp.concatenate([bs, bdp], axis=1)                       # (1, 2Gp)

    theta = pad2(jnp.exp(params["px_r"]), 1, Gp, val=1.0)        # dispersion='gene'
    log_theta_eps = jnp.log(theta + ZINB_EPS)                    # per-gene constant

    # combined lgamma constant, streamed in bf16 (padded rows/cols are exactly 0)
    # TODO(synk): an in-kernel Stirling-series lgamma would remove this B x G
    # stream entirely (no lgamma primitive is exposed to Pallas today).
    lg_const = (jax.scipy.special.gammaln(xp + theta)
                - jax.scipy.special.gammaln(theta)
                - jax.scipy.special.gammaln(xp + 1.0)).astype(jnp.bfloat16)

    n_tiles = Bp // TB

    streamed = [xp, epsp, lg_const]
    resident = [w1e, b1e, wmv, bmv, w1d, b1d, wsd, bsd, theta, log_theta_eps]

    stream_specs = [
        pl.BlockSpec((TB, Gp), lambda i: (i, 0)),
        pl.BlockSpec((TB, L), lambda i: (i, 0)),
        pl.BlockSpec((TB, Gp), lambda i: (i, 0)),
    ]
    resident_specs = [pl.BlockSpec(a.shape, lambda i: (0, 0)) for a in resident]

    out_shape = (
        jax.ShapeDtypeStruct((Bp, 1), jnp.float32),
        jax.ShapeDtypeStruct((Bp, 1), jnp.float32),
    )
    out_specs = [
        pl.BlockSpec((TB, 1), lambda i: (i, 0)),
        pl.BlockSpec((TB, 1), lambda i: (i, 0)),
    ]

    # ---- VMEM budget: double-buffered residents + streams, fused head, and
    #      ~16 live (TB, Gp) ZINB-tail temporaries in the tail dtype. ----
    def nbytes(a):
        return a.size * a.dtype.itemsize
    tail_bytes = 2 if tail_bf16 else 4
    est = (2 * sum(nbytes(a) for a in resident)
           + 2 * (TB * Gp * 4 + TB * Gp * 2 + TB * L * 4 + 2 * TB * 4)
           + TB * 2 * Gp * 4
           + 16 * TB * Gp * tail_bytes
           + 6 * TB * H * 4
           + (4 << 20))
    # leave headroom below physical VMEM: ~56 MiB on 64 MiB parts (v7x),
    # ~100 MiB on 128 MiB parts (v5e / v6e).
    ceiling = (56 << 20) if vmem_cap <= (80 << 20) else (100 << 20)
    vmem_limit = int(min(ceiling, max(32 << 20, est)))
    # TODO(synk): when `est` exceeds `ceiling` (G >~ 5k at TB=128 on v7x), add a
    # second grid axis tiling G with an online-softmax / recon accumulator.

    kernel = functools.partial(vae_gene_cell_kernel,
                               n_valid_genes=G, tail_dtype=ct)

    recon, kl = pl.pallas_call(
        kernel,
        out_shape=out_shape,
        grid_spec=pltpu.PrefetchScalarGridSpec(
            num_scalar_prefetch=0,
            grid=(n_tiles,),
            in_specs=stream_specs + resident_specs,
            out_specs=out_specs,
        ),
        compiler_params=pltpu.CompilerParams(
            dimension_semantics=("parallel",),
            vmem_limit_bytes=vmem_limit,
        ),
    )(*streamed, *resident)

    return recon[:B, 0], kl[:B, 0], 0.0


def init_params(key, n_input, n_hidden, n_latent):
    """Deterministic synthetic parameter init (shapes follow VAEGeneCell.__init__)."""
    ks = jax.random.split(key, 16)

    def lin(k, n_in, n_out):
        kw, kb = jax.random.split(k)
        bound = 1.0 / jnp.sqrt(n_in)
        w = jax.random.uniform(kw, (n_in, n_out), jnp.float32, -bound, bound)
        b = jax.random.uniform(kb, (1, n_out), jnp.float32, -bound, bound)
        return w, b

    p = {}
    # encoder FCLayers: Linear(G -> H) + BatchNorm1d(H)  (dropout = eval-mode identity)
    p["w1e"], p["b1e"] = lin(ks[0], n_input, n_hidden)
    p["gamma_e"] = 1.0 + 0.05 * jax.random.normal(ks[1], (1, n_hidden), jnp.float32)
    p["beta_e"] = 0.05 * jax.random.normal(ks[2], (1, n_hidden), jnp.float32)
    # mean / var heads: Linear(H -> L)
    p["wm"], p["bm"] = lin(ks[3], n_hidden, n_latent)
    p["wv"], p["bv"] = lin(ks[4], n_hidden, n_latent)
    # decoder FCLayers: Linear(L -> H) + BatchNorm1d(H)
    p["w1d"], p["b1d"] = lin(ks[5], n_latent, n_hidden)
    p["gamma_d"] = 1.0 + 0.05 * jax.random.normal(ks[6], (1, n_hidden), jnp.float32)
    p["beta_d"] = 0.05 * jax.random.normal(ks[7], (1, n_hidden), jnp.float32)
    # px_scale head / px_dropout head: Linear(H -> G)
    p["ws"], p["bs"] = lin(ks[8], n_hidden, n_input)
    p["wdp"], p["bdp"] = lin(ks[9], n_hidden, n_input)
    # px_r parameter (dispersion='gene'): shape (n_input,), kept as (1, G)
    p["px_r"] = jax.random.normal(ks[10], (1, n_input), jnp.float32)
    return p


def reference_forward(x, eps, params):
    """Pure-JAX (f32) reference of the PyTorch forward, for a tolerance check."""
    inv_std = 1.0 / jnp.sqrt(1.0 + BN_EPS)
    xl = jnp.log(1.0 + x)
    h = xl @ params["w1e"] + params["b1e"]
    h = params["gamma_e"] * (h * inv_std) + params["beta_e"]
    h = jnp.maximum(h, 0.0)
    qz_m = h @ params["wm"] + params["bm"]
    qz_v = jnp.exp(h @ params["wv"] + params["bv"])
    z = qz_m + jnp.sqrt(qz_v) * eps
    hd = z @ params["w1d"] + params["b1d"]
    hd = params["gamma_d"] * (hd * inv_std) + params["beta_d"]
    hd = jnp.maximum(hd, 0.0)
    logits = hd @ params["ws"] + params["bs"]
    px_scale = jax.nn.softmax(logits, axis=-1)
    pi = hd @ params["wdp"] + params["bdp"]
    mu = px_scale                                   # exp(0) * 1 * px_scale * 1
    theta = jnp.exp(params["px_r"])
    softplus_pi = jax.nn.softplus(-pi)
    log_theta_eps = jnp.log(theta + ZINB_EPS)
    log_theta_mu_eps = jnp.log(theta + mu + ZINB_EPS)
    pi_theta_log = -pi + theta * (log_theta_eps - log_theta_mu_eps)
    case_zero = jax.nn.softplus(pi_theta_log) - softplus_pi
    case_non_zero = (-softplus_pi + pi_theta_log
                     + x * (jnp.log(mu + ZINB_EPS) - log_theta_mu_eps)
                     + jax.scipy.special.gammaln(x + theta)
                     - jax.scipy.special.gammaln(theta)
                     - jax.scipy.special.gammaln(x + 1.0))
    log_prob = (jnp.where(x < ZINB_EPS, case_zero, 0.0)
                + jnp.where(x > ZINB_EPS, case_non_zero, 0.0))
    recon = -jnp.sum(log_prob, axis=-1)
    kl = jnp.sum(0.5 * (qz_v + qz_m * qz_m - 1.0) - 0.5 * jnp.log(qz_v), axis=-1)
    return recon, kl


if __name__ == "__main__":
    # B=200 deliberately NOT a multiple of 128 to exercise the batch padding;
    # 512 genes, scVI-default 128 hidden units, 16-dim latent.
    B, G, H, L = 200, 512, 128, 16

    key = jax.random.PRNGKey(0)
    k_x, k_eps, k_p = jax.random.split(key, 3)

    # synthetic count-like data (non-negative integers as floats)
    x = jnp.floor(
        10.0 * jax.random.uniform(k_x, (B, G), jnp.float32) ** 2
    ).astype(jnp.float32)
    # deterministic reparameterization noise (replaces Normal.rsample in Encoder)
    eps = jax.random.normal(k_eps, (B, L), jnp.float32)

    params = init_params(k_p, G, H, L)

    fwd = jax.jit(vae_gene_cell_forward)
    reconst_loss, kl_div, zero = fwd(x, eps, params)
    jax.block_until_ready((reconst_loss, kl_div))

    recon_ref, kl_ref = reference_forward(x, eps, params)

    assert reconst_loss.shape == (B,) and kl_div.shape == (B,)
    assert bool(jnp.all(jnp.isfinite(reconst_loss))) and bool(jnp.all(jnp.isfinite(kl_div)))
    # loose tolerance: bf16 weights (+ bf16 ZINB tail on v6e/v7x) vs f32 reference
    assert bool(jnp.allclose(reconst_loss, recon_ref, rtol=0.1, atol=2.0))
    assert bool(jnp.allclose(kl_div, kl_ref, rtol=0.1, atol=2.0))
    # TODO(synk): encoder dropout (rate 0.1) is treated as eval-mode (identity).
    print("KERNEL_OK")
</pallas_src>

<mosaic_0001>
module attributes {stable_mosaic.version = 11 : i64} {
  func.func @vae_gene_cell_kernel(%arg0: i32, %arg1: memref<128x512xf32, #tpu.memory_space<vmem>>, %arg2: memref<128x16xf32, #tpu.memory_space<vmem>>, %arg3: memref<128x512xbf16, #tpu.memory_space<vmem>>, %arg4: memref<512x128xbf16, #tpu.memory_space<vmem>>, %arg5: memref<1x128xf32, #tpu.memory_space<vmem>>, %arg6: memref<128x32xf32, #tpu.memory_space<vmem>>, %arg7: memref<1x32xf32, #tpu.memory_space<vmem>>, %arg8: memref<16x128xf32, #tpu.memory_space<vmem>>, %arg9: memref<1x128xf32, #tpu.memory_space<vmem>>, %arg10: memref<128x1024xbf16, #tpu.memory_space<vmem>>, %arg11: memref<1x1024xf32, #tpu.memory_space<vmem>>, %arg12: memref<1x512xf32, #tpu.memory_space<vmem>>, %arg13: memref<1x512xf32, #tpu.memory_space<vmem>>, %arg14: memref<128x1xf32, #tpu.memory_space<vmem>>, %arg15: memref<128x1xf32, #tpu.memory_space<vmem>>) attributes {dimension_semantics = [#tpu.dimension_semantics<parallel>], iteration_bounds = array<i64: 2>, scalar_prefetch = 0 : i64, scratch_operands = 0 : i64, tpu.core_type = #tpu.core_type<tc>, window_params = [{transform_indices = @transform_0, window_bounds = array<i64: 128, 512>}, {transform_indices = @transform_1, window_bounds = array<i64: 128, 16>}, {transform_indices = @transform_2, window_bounds = array<i64: 128, 512>}, {pipeline_mode = #tpu.pipeline_mode<synchronous>, transform_indices = @transform_3, window_bounds = array<i64: 512, 128>}, {pipeline_mode = #tpu.pipeline_mode<synchronous>, transform_indices = @transform_4, window_bounds = array<i64: 1, 128>}, {pipeline_mode = #tpu.pipeline_mode<synchronous>, transform_indices = @transform_5, window_bounds = array<i64: 128, 32>}, {pipeline_mode = #tpu.pipeline_mode<synchronous>, transform_indices = @transform_6, window_bounds = array<i64: 1, 32>}, {pipeline_mode = #tpu.pipeline_mode<synchronous>, transform_indices = @transform_7, window_bounds = array<i64: 16, 128>}, {pipeline_mode = #tpu.pipeline_mode<synchronous>, transform_indices = @transform_8, window_bounds = array<i64: 1, 128>}, {pipeline_mode = #tpu.pipeline_mode<synchronous>, transform_indices = @transform_9, window_bounds = array<i64: 128, 1024>}, {pipeline_mode = #tpu.pipeline_mode<synchronous>, transform_indices = @transform_10, window_bounds = array<i64: 1, 1024>}, {pipeline_mode = #tpu.pipeline_mode<synchronous>, transform_indices = @transform_11, window_bounds = array<i64: 1, 512>}, {pipeline_mode = #tpu.pipeline_mode<synchronous>, transform_indices = @transform_12, window_bounds = array<i64: 1, 512>}, {transform_indices = @transform_13, window_bounds = array<i64: 128, 1>}, {transform_indices = @transform_14, window_bounds = array<i64: 128, 1>}]} {
    %c0 = arith.constant 0 : index
    %c0_0 = arith.constant 0 : index
    %0 = vector.load %arg1[%c0, %c0_0] : memref<128x512xf32, #tpu.memory_space<vmem>>, vector<128x512xf32>
    %cst = arith.constant 1.000000e+00 : f32
    %1 = vector.broadcast %cst : f32 to vector<128x512xf32>
    %2 = arith.addf %1, %0 : vector<128x512xf32>
    %3 = math.log %2 : vector<128x512xf32>
    %4 = arith.truncf %3 : vector<128x512xf32> to vector<128x512xbf16>
    %c0_1 = arith.constant 0 : index
    %c0_2 = arith.constant 0 : index
    %5 = vector.load %arg4[%c0_1, %c0_2] : memref<512x128xbf16, #tpu.memory_space<vmem>>, vector<512x128xbf16>
    %cst_3 = arith.constant dense<0.000000e+00> : vector<128x128xf32>
    %6 = tpu.matmul %4, %5, %cst_3 {dimension_numbers = #tpu.dot_dimension_numbers<[1], [0], [0], [1], [0, 0, 1, 1], [], []>} : vector<128x512xbf16>, vector<512x128xbf16>, vector<128x128xf32> -> vector<128x128xf32>
    %c0_4 = arith.constant 0 : index
    %c0_5 = arith.constant 0 : index
    %7 = vector.load %arg5[%c0_4, %c0_5] : memref<1x128xf32, #tpu.memory_space<vmem>>, vector<1x128xf32>
    %8 = vector.broadcast %7 : vector<1x128xf32> to vector<128x128xf32>
    %9 = arith.addf %6, %8 : vector<128x128xf32>
    %cst_6 = arith.constant 0.000000e+00 : f32
    %10 = vector.broadcast %cst_6 : f32 to vector<128x128xf32>
    %11 = arith.maximumf %9, %10 : vector<128x128xf32>
    %c0_7 = arith.constant 0 : index
    %c0_8 = arith.constant 0 : index
    %12 = vector.load %arg6[%c0_7, %c0_8] : memref<128x32xf32, #tpu.memory_space<vmem>>, vector<128x32xf32>
    %cst_9 = arith.constant dense<0.000000e+00> : vector<128x32xf32>
    %13 = tpu.matmul %11, %12, %cst_9 {dimension_numbers = #tpu.dot_dimension_numbers<[1], [0], [0], [1], [0, 0, 1, 1], [], []>} : vector<128x128xf32>, vector<128x32xf32>, vector<128x32xf32> -> vector<128x32xf32>
    %c0_10 = arith.constant 0 : index
    %c0_11 = arith.constant 0 : index
    %14 = vector.load %arg7[%c0_10, %c0_11] : memref<1x32xf32, #tpu.memory_space<vmem>>, vector<1x32xf32>
    %15 = vector.broadcast %14 : vector<1x32xf32> to vector<128x32xf32>
    %16 = arith.addf %13, %15 : vector<128x32xf32>
    %17 = vector.extract_strided_slice %16 {offsets = [0, 0], sizes = [128, 16], strides = [1, 1]} : vector<128x32xf32> to vector<128x16xf32>
    %18 = vector.extract_strided_slice %16 {offsets = [0, 16], sizes = [128, 16], strides = [1, 1]} : vector<128x32xf32> to vector<128x16xf32>
    %19 = math.exp %18 : vector<128x16xf32>
    %20 = math.sqrt %19 : vector<128x16xf32>
    %c0_12 = arith.constant 0 : index
    %c0_13 = arith.constant 0 : index
    %21 = vector.load %arg2[%c0_12, %c0_13] : memref<128x16xf32, #tpu.memory_space<vmem>>, vector<128x16xf32>
    %22 = arith.mulf %20, %21 : vector<128x16xf32>
    %23 = arith.addf %17, %22 : vector<128x16xf32>
    %c0_14 = arith.constant 0 : index
    %c0_15 = arith.constant 0 : index
    %24 = vector.load %arg8[%c0_14, %c0_15] : memref<16x128xf32, #tpu.memory_space<vmem>>, vector<16x128xf32>
    %cst_16 = arith.constant dense<0.000000e+00> : vector<128x128xf32>
    %25 = tpu.matmul %23, %24, %cst_16 {dimension_numbers = #tpu.dot_dimension_numbers<[1], [0], [0], [1], [0, 0, 1, 1], [], []>} : vector<128x16xf32>, vector<16x128xf32>, vector<128x128xf32> -> vector<128x128xf32>
    %c0_17 = arith.constant 0 : index
    %c0_18 = arith.constant 0 : index
    %26 = vector.load %arg9[%c0_17, %c0_18] : memref<1x128xf32, #tpu.memory_space<vmem>>, vector<1x128xf32>
    %27 = vector.broadcast %26 : vector<1x128xf32> to vector<128x128xf32>
    %28 = arith.addf %25, %27 : vector<128x128xf32>
    %cst_19 = arith.constant 0.000000e+00 : f32
    %29 = vector.broadcast %cst_19 : f32 to vector<128x128xf32>
    %30 = arith.maximumf %28, %29 : vector<128x128xf32>
    %31 = arith.truncf %30 : vector<128x128xf32> to vector<128x128xbf16>
    %c0_20 = arith.constant 0 : index
    %c0_21 = arith.constant 0 : index
    %32 = vector.load %arg10[%c0_20, %c0_21] : memref<128x1024xbf16, #tpu.memory_space<vmem>>, vector<128x1024xbf16>
    %cst_22 = arith.constant dense<0.000000e+00> : vector<128x1024xf32>
    %33 = tpu.matmul %31, %32, %cst_22 {dimension_numbers = #tpu.dot_dimension_numbers<[1], [0], [0], [1], [0, 0, 1, 1], [], []>} : vector<128x128xbf16>, vector<128x1024xbf16>, vector<128x1024xf32> -> vector<128x1024xf32>
    %c0_23 = arith.constant 0 : index
    %c0_24 = arith.constant 0 : index
    %34 = vector.load %arg11[%c0_23, %c0_24] : memref<1x1024xf32, #tpu.memory_space<vmem>>, vector<1x1024xf32>
    %35 = vector.broadcast %34 : vector<1x1024xf32> to vector<128x1024xf32>
    %36 = arith.addf %33, %35 : vector<128x1024xf32>
    %37 = vector.extract_strided_slice %36 {offsets = [0, 0], sizes = [128, 512], strides = [1, 1]} : vector<128x1024xf32> to vector<128x512xf32>
    %38 = vector.extract_strided_slice %36 {offsets = [0, 512], sizes = [128, 512], strides = [1, 1]} : vector<128x1024xf32> to vector<128x512xf32>
    %cst_25 = arith.constant dense<0xFF800000> : vector<128xf32>
    %39 = vector.multi_reduction <maximumf>, %37, %cst_25 [1] : vector<128x512xf32> to vector<128xf32>
    %40 = vector.shape_cast %39 : vector<128xf32> to vector<128x1xf32>
    %41 = vector.broadcast %40 : vector<128x1xf32> to vector<128x512xf32>
    %42 = arith.subf %37, %41 : vector<128x512xf32>
    %43 = math.exp %42 : vector<128x512xf32>
    %cst_26 = arith.constant dense<0.000000e+00> : vector<128xf32>
    %44 = vector.multi_reduction <add>, %43, %cst_26 [1] : vector<128x512xf32> to vector<128xf32>
    %45 = vector.shape_cast %44 : vector<128xf32> to vector<128x1xf32>
    %46 = math.log %45 : vector<128x1xf32>
    %c0_27 = arith.constant 0 : index
    %c0_28 = arith.constant 0 : index
    %47 = vector.load %arg12[%c0_27, %c0_28] : memref<1x512xf32, #tpu.memory_space<vmem>>, vector<1x512xf32>
    %c0_29 = arith.constant 0 : index
    %c0_30 = arith.constant 0 : index
    %48 = vector.load %arg13[%c0_29, %c0_30] : memref<1x512xf32, #tpu.memory_space<vmem>>, vector<1x512xf32>
    %cst_31 = arith.constant 9.99999993E-9 : f32
    %49 = vector.broadcast %cst_31 : f32 to vector<128x1xf32>
    %50 = arith.mulf %49, %45 : vector<128x1xf32>
    %51 = vector.broadcast %50 : vector<128x1xf32> to vector<128x512xf32>
    %52 = arith.addf %43, %51 : vector<128x512xf32>
    %53 = math.log %52 : vector<128x512xf32>
    %54 = vector.broadcast %46 : vector<128x1xf32> to vector<128x512xf32>
    %55 = arith.subf %53, %54 : vector<128x512xf32>
    %cst_32 = arith.constant 9.99999993E-9 : f32
    %56 = vector.broadcast %cst_32 : f32 to vector<1x512xf32>
    %57 = arith.addf %47, %56 : vector<1x512xf32>
    %58 = vector.broadcast %57 : vector<1x512xf32> to vector<128x512xf32>
    %59 = vector.broadcast %45 : vector<128x1xf32> to vector<128x512xf32>
    %60 = arith.mulf %58, %59 : vector<128x512xf32>
    %61 = arith.addf %60, %43 : vector<128x512xf32>
    %62 = math.log %61 : vector<128x512xf32>
    %63 = vector.broadcast %46 : vector<128x1xf32> to vector<128x512xf32>
    %64 = arith.subf %62, %63 : vector<128x512xf32>
    %cst_33 = arith.constant 0.000000e+00 : f32
    %65 = vector.broadcast %cst_33 : f32 to vector<128x512xf32>
    %66 = arith.subf %65, %38 : vector<128x512xf32>
    %cst_34 = arith.constant 0.000000e+00 : f32
    %67 = vector.broadcast %cst_34 : f32 to vector<128x512xf32>
    %68 = arith.maximumf %66, %67 : vector<128x512xf32>
    %69 = math.absf %66 : vector<128x512xf32>
    %cst_35 = arith.constant 0.000000e+00 : f32
    %70 = vector.broadcast %cst_35 : f32 to vector<128x512xf32>
    %71 = arith.subf %70, %69 : vector<128x512xf32>
    %72 = math.exp %71 : vector<128x512xf32>
    %cst_36 = arith.constant 1.000000e+00 : f32
    %73 = vector.broadcast %cst_36 : f32 to vector<128x512xf32>
    %74 = arith.addf %73, %72 : vector<128x512xf32>
    %75 = math.log %74 : vector<128x512xf32>
    %76 = arith.addf %68, %75 : vector<128x512xf32>
    %cst_37 = arith.constant 0.000000e+00 : f32
    %77 = vector.broadcast %cst_37 : f32 to vector<128x512xf32>
    %78 = arith.subf %77, %38 : vector<128x512xf32>
    %79 = vector.broadcast %48 : vector<1x512xf32> to vector<128x512xf32>
    %80 = arith.subf %79, %64 : vector<128x512xf32>
    %81 = vector.broadcast %47 : vector<1x512xf32> to vector<128x512xf32>
    %82 = arith.mulf %81, %80 : vector<128x512xf32>
    %83 = arith.addf %78, %82 : vector<128x512xf32>
    %cst_38 = arith.constant 0.000000e+00 : f32
    %84 = vector.broadcast %cst_38 : f32 to vector<128x512xf32>
    %85 = arith.maximumf %83, %84 : vector<128x512xf32>
    %86 = math.absf %83 : vector<128x512xf32>
    %cst_39 = arith.constant 0.000000e+00 : f32
    %87 = vector.broadcast %cst_39 : f32 to vector<128x512xf32>
    %88 = arith.subf %87, %86 : vector<128x512xf32>
    %89 = math.exp %88 : vector<128x512xf32>
    %cst_40 = arith.constant 1.000000e+00 : f32
    %90 = vector.broadcast %cst_40 : f32 to vector<128x512xf32>
    %91 = arith.addf %90, %89 : vector<128x512xf32>
    %92 = math.log %91 : vector<128x512xf32>
    %93 = arith.addf %85, %92 : vector<128x512xf32>
    %94 = arith.subf %93, %76 : vector<128x512xf32>
    %cst_41 = arith.constant 0.000000e+00 : f32
    %95 = vector.broadcast %cst_41 : f32 to vector<128x512xf32>
    %96 = arith.subf %95, %76 : vector<128x512xf32>
    %97 = arith.addf %96, %83 : vector<128x512xf32>
    %98 = arith.subf %55, %64 : vector<128x512xf32>
    %99 = arith.mulf %0, %98 : vector<128x512xf32>
    %100 = arith.addf %97, %99 : vector<128x512xf32>
    %c0_42 = arith.constant 0 : index
    %c0_43 = arith.constant 0 : index
    %101 = vector.load %arg3[%c0_42, %c0_43] : memref<128x512xbf16, #tpu.memory_space<vmem>>, vector<128x512xbf16>
    %102 = arith.extf %101 : vector<128x512xbf16> to vector<128x512xf32>
    %103 = arith.addf %100, %102 : vector<128x512xf32>
    %cst_44 = arith.constant 9.99999993E-9 : f32
    %104 = vector.broadcast %cst_44 : f32 to vector<128x512xf32>
    %105 = arith.cmpf olt, %0, %104 : vector<128x512xf32>
    %cst_45 = arith.constant 0.000000e+00 : f32
    %106 = vector.broadcast %cst_45 : f32 to vector<128x512xf32>
    %107 = arith.select %105, %94, %106 : vector<128x512xi1>, vector<128x512xf32>
    %cst_46 = arith.constant 9.99999993E-9 : f32
    %108 = vector.broadcast %cst_46 : f32 to vector<128x512xf32>
    %109 = arith.cmpf ogt, %0, %108 : vector<128x512xf32>
    %cst_47 = arith.constant 0.000000e+00 : f32
    %110 = vector.broadcast %cst_47 : f32 to vector<128x512xf32>
    %111 = arith.select %109, %103, %110 : vector<128x512xi1>, vector<128x512xf32>
    %112 = arith.addf %107, %111 : vector<128x512xf32>
    %cst_48 = arith.constant dense<0.000000e+00> : vector<128xf32>
    %113 = vector.multi_reduction <add>, %112, %cst_48 [1] : vector<128x512xf32> to vector<128xf32>
    %114 = vector.shape_cast %113 : vector<128xf32> to vector<128x1xf32>
    %cst_49 = arith.constant 0.000000e+00 : f32
    %115 = vector.broadcast %cst_49 : f32 to vector<128x1xf32>
    %116 = arith.subf %115, %114 : vector<128x1xf32>
    %c0_50 = arith.constant 0 : index
    %c0_51 = arith.constant 0 : index
    %117 = vector.load %arg14[%c0_50, %c0_51] : memref<128x1xf32, #tpu.memory_space<vmem>>, vector<128x1xf32>
    tpu.vector_store %arg14[%c0_50, %c0_51], %116 {strides = array<i32>} : memref<128x1xf32, #tpu.memory_space<vmem>>, vector<128x1xf32>,
    %118 = arith.mulf %17, %17 : vector<128x16xf32>
    %119 = arith.addf %19, %118 : vector<128x16xf32>
    %cst_52 = arith.constant 1.000000e+00 : f32
    %120 = vector.broadcast %cst_52 : f32 to vector<128x16xf32>
    %121 = arith.subf %119, %120 : vector<128x16xf32>
    %122 = arith.subf %121, %18 : vector<128x16xf32>
    %cst_53 = arith.constant 5.000000e-01 : f32
    %123 = vector.broadcast %cst_53 : f32 to vector<128x16xf32>
    %124 = arith.mulf %123, %122 : vector<128x16xf32>
    %cst_54 = arith.constant dense<0.000000e+00> : vector<128xf32>
    %125 = vector.multi_reduction <add>, %124, %cst_54 [1] : vector<128x16xf32> to vector<128xf32>
    %126 = vector.shape_cast %125 : vector<128xf32> to vector<128x1xf32>
    %c0_55 = arith.constant 0 : index
    %c0_56 = arith.constant 0 : index
    %127 = vector.load %arg15[%c0_55, %c0_56] : memref<128x1xf32, #tpu.memory_space<vmem>>, vector<128x1xf32>
    tpu.vector_store %arg15[%c0_55, %c0_56], %126 {strides = array<i32>} : memref<128x1xf32, #tpu.memory_space<vmem>>, vector<128x1xf32>,
    return
  }
  func.func @transform_0(%arg0: i32) -> (i32, i32) {
    %c0_i32 = arith.constant 0 : i32
    %c0_i32_0 = arith.constant 0 : i32
    return %arg0, %c0_i32 : i32, i32
  }
  func.func @transform_1(%arg0: i32) -> (i32, i32) {
    %c0_i32 = arith.constant 0 : i32
    %c0_i32_0 = arith.constant 0 : i32
    return %arg0, %c0_i32 : i32, i32
  }
  func.func @transform_2(%arg0: i32) -> (i32, i32) {
    %c0_i32 = arith.constant 0 : i32
    %c0_i32_0 = arith.constant 0 : i32
    return %arg0, %c0_i32 : i32, i32
  }
  func.func @transform_3(%arg0: i32) -> (i32, i32) {
    %c0_i32 = arith.constant 0 : i32
    %c0_i32_0 = arith.constant 0 : i32
    %c0_i32_1 = arith.constant 0 : i32
    return %c0_i32, %c0_i32_0 : i32, i32
  }
  func.func @transform_4(%arg0: i32) -> (i32, i32) {
    %c0_i32 = arith.constant 0 : i32
    %c0_i32_0 = arith.constant 0 : i32
    %c0_i32_1 = arith.constant 0 : i32
    return %c0_i32, %c0_i32_0 : i32, i32
  }
  func.func @transform_5(%arg0: i32) -> (i32, i32) {
    %c0_i32 = arith.constant 0 : i32
    %c0_i32_0 = arith.constant 0 : i32
    %c0_i32_1 = arith.constant 0 : i32
    return %c0_i32, %c0_i32_0 : i32, i32
  }
  func.func @transform_6(%arg0: i32) -> (i32, i32) {
    %c0_i32 = arith.constant 0 : i32
    %c0_i32_0 = arith.constant 0 : i32
    %c0_i32_1 = arith.constant 0 : i32
    return %c0_i32, %c0_i32_0 : i32, i32
  }
  func.func @transform_7(%arg0: i32) -> (i32, i32) {
    %c0_i32 = arith.constant 0 : i32
    %c0_i32_0 = arith.constant 0 : i32
    %c0_i32_1 = arith.constant 0 : i32
    return %c0_i32, %c0_i32_0 : i32, i32
  }
  func.func @transform_8(%arg0: i32) -> (i32, i32) {
    %c0_i32 = arith.constant 0 : i32
    %c0_i32_0 = arith.constant 0 : i32
    %c0_i32_1 = arith.constant 0 : i32
    return %c0_i32, %c0_i32_0 : i32, i32
  }
  func.func @transform_9(%arg0: i32) -> (i32, i32) {
    %c0_i32 = arith.constant 0 : i32
    %c0_i32_0 = arith.constant 0 : i32
    %c0_i32_1 = arith.constant 0 : i32
    return %c0_i32, %c0_i32_0 : i32, i32
  }
  func.func @transform_10(%arg0: i32) -> (i32, i32) {
    %c0_i32 = arith.constant 0 : i32
    %c0_i32_0 = arith.constant 0 : i32
    %c0_i32_1 = arith.constant 0 : i32
    return %c0_i32, %c0_i32_0 : i32, i32
  }
  func.func @transform_11(%arg0: i32) -> (i32, i32) {
    %c0_i32 = arith.constant 0 : i32
    %c0_i32_0 = arith.constant 0 : i32
    %c0_i32_1 = arith.constant 0 : i32
    return %c0_i32, %c0_i32_0 : i32, i32
  }
  func.func @transform_12(%arg0: i32) -> (i32, i32) {
    %c0_i32 = arith.constant 0 : i32
    %c0_i32_0 = arith.constant 0 : i32
    %c0_i32_1 = arith.constant 0 : i32
    return %c0_i32, %c0_i32_0 : i32, i32
  }
  func.func @transform_13(%arg0: i32) -> (i32, i32) {
    %c0_i32 = arith.constant 0 : i32
    %c0_i32_0 = arith.constant 0 : i32
    return %arg0, %c0_i32 : i32, i32
  }
  func.func @transform_14(%arg0: i32) -> (i32, i32) {
    %c0_i32 = arith.constant 0 : i32
    %c0_i32_0 = arith.constant 0 : i32
    return %arg0, %c0_i32 : i32, i32
  }
}

</mosaic_0001>

<bundles_post_ra>
// kernel: vae_gene_cell_forward.1
= control target key start
LH: loop header
LB: loop body
LE: loop exit
PB: predicated region body
PF: predicated region fallthrough
CT: control target
= control target key end

     0   :  { %s8327_s29 = smov 0   ;;  %s13650_s0 = inlined_call_operand.vmem [shape: f32[256,512], index: 0, kind: input, shape index: {}]   ;;  %s13651_s1 = inlined_call_operand.vmem [shape: f32[256,16], index: 1, kind: input, shape index: {}]   ;;  %s13652_s2 = inlined_call_operand.vmem [shape: bf16[256,512], index: 2, kind: input, shape index: {}]   ;;  %s13653_s3 = inlined_call_operand.vmem [shape: bf16[512,128], index: 3, kind: input, shape index: {}]   ;;  %s13654_s4 = inlined_call_operand.vmem [shape: f32[1,128], index: 4, kind: input, shape index: {}]   ;;  %s13655_s5 = inlined_call_operand.vmem [shape: f32[128,32], index: 5, kind: input, shape index: {}]   ;;  %s13656_s6 = inlined_call_operand.vmem [shape: f32[1,32], index: 6, kind: input, shape index: {}]   ;;  %s13657_s7 = inlined_call_operand.vmem [shape: f32[16,128], index: 7, kind: input, shape index: {}]   ;;  %s13658_s8 = inlined_call_operand.vmem [shape: f32[1,128], index: 8, kind: input, shape index: {}]   ;;  %s13659_s9 = inlined_call_operand.vmem [shape: bf16[128,1024], index: 9, kind: input, shape index: {}]   ;;  %s13660_s10 = inlined_call_operand.vmem [shape: f32[1,1024], index: 10, kind: input, shape index: {}]   ;;  %s13661_s11 = inlined_call_operand.vmem [shape: f32[1,512], index: 11, kind: input, shape index: {}]   ;;  %s13662_s12 = inlined_call_operand.vmem [shape: f32[1,512], index: 12, kind: input, shape index: {}]   ;;  %s13663_s13 = inlined_call_operand.vmem [shape: f32[256,1], index: 13, kind: output, shape index: {0}]   ;;  %s13664_s14 = inlined_call_operand.vmem [shape: f32[256,1], index: 14, kind: output, shape index: {1}]  }
   0x1 LB: > { %s6495_s30 = sadd.s32 4294967295, %s8248_s29   ;;  %p6499_p0 = scmp.ge.s32.totalorder %s8248_s29, 1  ;;  %s8248_s29 = sphi %s8327_s29, %s25_s29  }
   0x2   : > { %p440_p1 = scmp.lt.s32.totalorder %s8248_s29, 3 }
   0x4   : > { %p441_p2 = pnand %p6499_p0, %p440_p1 }
   0x6   : > { %444 = sbr.rel (%p441_p2) target bundleno = 1984 (0x7c0), region = 72 }
   0xb   : > { %v6939_v0 = vld [vmem:[%s13653_s3 + $0x38] sm:$0xff]  ;;  %s6500_s19 = sshll.u32 %s6495_s30, 4  ;;  %v6938_v2 = vld [vmem:[%s13653_s3 + $0x30] sm:$0xff]  ;;  %v6937_v4 = vld [vmem:[%s13653_s3 + $0x28] sm:$0xff]  ;;  %s8250_s15 = smov 16  }
   0xc   : > { %v6947_v1 = vld [vmem:[%s13653_s3 + $0x78] sm:$0xff]  ;;  %p504_p3 = scmp.lt.s32.totalorder %s6500_s19, 31  ;;  %7028 = vmatpush.bf16.msra.mxu2 %v6939_v0  ;;  %v6946_v3 = vld [vmem:[%s13653_s3 + $0x70] sm:$0xff]  ;;  %1083 = vmatpush.bf16.msra.mxu0 %v6939_v0  ;;  %v6945_v5 = vld [vmem:[%s13653_s3 + $0x68] sm:$0xff]  ;;  %s13665_s20 = smov 112  }
   0xd   : > { %7036 = vmatpush.bf16.msra.mxu3 %v6947_v1  ;;  %1132 = vmatpush.bf16.msra.mxu1 %v6947_v1  ;;  %v6936_v9 = vld [vmem:[%s13653_s3 + $0x20] sm:$0xff]  ;;  %v6935_v16 = vld [vmem:[%s13653_s3 + $0x18] sm:$0xff]  ;;  %v6934_v18 = vld [vmem:[%s13653_s3 + $0x10] sm:$0xff]  ;;  %s14112_s27 = smov 112  }
   0xe   : > { %s15015_s19 = smov (!%p504_p3, %s6500_s19), 31  ;;  %v6944_v12 = vld [vmem:[%s13653_s3 + $0x60] sm:$0xff]  ;;  %v6943_v17 = vld [vmem:[%s13653_s3 + $0x58] sm:$0xff]  ;;  %v6942_v19 = vld [vmem:[%s13653_s3 + $0x50] sm:$0xff] }
   0xf   : > { %s6930_s24 = sshll.u32 %s15015_s19, 5  ;;  %v6933_v25 = vld [vmem:[%s13653_s3 + $0x8] sm:$0xff]  ;;  %v6932_v35 = vld [vmem:[%s13653_s3] sm:$0xff]  ;;  %v6955_v38 = vld [vmem:[%s13653_s3 + $0xb8] sm:$0xff]  ;;  %s8588_s26 = sshll.u32 %s15015_s19, 3 }
  0x10   : > { %7029 = vmatpush.bf16.msra.mxu2 %v6938_v2  ;;  %s8359_s16 = scalar_lea.vmem %s13650_s0, %s6930_s24  ;;  %1084 = vmatpush.bf16.msra.mxu0 %v6938_v2  ;;  %v6941_v26 = vld [vmem:[%s13653_s3 + $0x48] sm:$0xff]  ;;  %v6940_v36 = vld [vmem:[%s13653_s3 + $0x40] sm:$0xff]  ;;  %v6963_v39 = vld [vmem:[%s13653_s3 + $0xf8] sm:$0xff]  ;;  %s8594_s30 = scalar_lea.vmem %s13651_s1, %s8588_s26 }
  0x11   : > { %7037 = vmatpush.bf16.msra.mxu3 %v6946_v3  ;;  %v567_v6 = vld [vmem:[%s8359_s16 + $0x100] sm:$0xff]  ;;  %1133 = vmatpush.bf16.msra.mxu1 %v6946_v3  ;;  %v568_v8 = vld [vmem:[%s8359_s16 + $0x108] sm:$0xff]  ;;  %v6954_v44 = vld [vmem:[%s13653_s3 + $0xb0] sm:$0xff]  ;;  %s13314_s22 = scalar_lea.vmem %s13664_s14, %s8588_s26  ;;  %s13468_s25 = scalar_lea.vmem %s13663_s13, %s8588_s26 }
  0x12   : > { %v571_v7 = vld [vmem:[%s8359_s16 + $0x120] sm:$0xff]  ;;  %v631_v10 = vadd.f32 1.0, %v567_v6  ;;  %v572_v11 = vld [vmem:[%s8359_s16 + $0x128] sm:$0xff]  ;;  %v632_v14 = vadd.f32 1.0, %v568_v8  ;;  %v6962_v45 = vld [vmem:[%s13653_s3 + $0xf0] sm:$0xff] }
  0x13   : > { %v635_v13 = vadd.f32 1.0, %v571_v7  ;;  %v636_v15 = vadd.f32 1.0, %v572_v11  ;;  %v575_v23 = vld [vmem:[%s8359_s16 + $0x140] sm:$0xff]  ;;  %v576_v30 = vld [vmem:[%s8359_s16 + $0x148] sm:$0xff]  ;;  %v6951_v2 = vld [vmem:[%s13653_s3 + $0x98] sm:$0xff] }
  0x14   : > { %7030 = vmatpush.bf16.msra.mxu2 %v6937_v4  ;;  %1085 = vmatpush.bf16.msra.mxu0 %v6937_v4  ;;  %7057 = vlog2.f32 %v631_v10  ;;  %v579_v27 = vld [vmem:[%s8359_s16 + $0x160] sm:$0xff]  ;;  %v639_v29 = vadd.f32 1.0, %v575_v23  ;;  %v580_v31 = vld [vmem:[%s8359_s16 + $0x168] sm:$0xff]  ;;  %v640_v40 = vadd.f32 1.0, %v576_v30  ;;  %v6959_v3 = vld [vmem:[%s13653_s3 + $0xd8] sm:$0xff] }
  0x15   : > { %7038 = vmatpush.bf16.msra.mxu3 %v6945_v5  ;;  %1134 = vmatpush.bf16.msra.mxu1 %v6945_v5  ;;  %7059 = vlog2.f32 %v635_v13  ;;  %v643_v37 = vadd.f32 1.0, %v579_v27  ;;  %v644_v41 = vadd.f32 1.0, %v580_v31  ;;  %v6953_v47 = vld [vmem:[%s13653_s3 + $0xa8] sm:$0xff]  ;;  %v583_v51 = vld [vmem:[%s8359_s16 + $0x180] sm:$0xff]  ;;  %v6950_v8 = vld [vmem:[%s13653_s3 + $0x90] sm:$0xff] }
  0x16   : > { %7061 = vlog2.f32 %v632_v14  ;;  %v6961_v48 = vld [vmem:[%s13653_s3 + $0xe8] sm:$0xff]  ;;  %v587_v52 = vld [vmem:[%s8359_s16 + $0x1a0] sm:$0xff]  ;;  %v647_v58 = vadd.f32 1.0, %v583_v51  ;;  %v6958_v11 = vld [vmem:[%s13653_s3 + $0xd0] sm:$0xff] }
  0x17   : > { %7063 = vlog2.f32 %v636_v15  ;;  %v6952_v54 = vld [vmem:[%s13653_s3 + $0xa0] sm:$0xff]  ;;  %v584_v56 = vld [vmem:[%s8359_s16 + $0x188] sm:$0xff]  ;;  %v651_v59 = vadd.f32 1.0, %v587_v52 }
  0x18   : > { %7031 = vmatpush.bf16.msra.mxu2 %v6936_v9  ;;  %1086 = vmatpush.bf16.msra.mxu0 %v6936_v9  ;;  %7065 = vlog2.f32 %v639_v29  ;;  %v6960_v55 = vld [vmem:[%s13653_s3 + $0xe0] sm:$0xff]  ;;  %v588_v60 = vld [vmem:[%s8359_s16 + $0x1a8] sm:$0xff]  ;;  %v648_v0 = vadd.f32 1.0, %v584_v56 }
  0x19   : > { %7039 = vmatpush.bf16.msra.mxu3 %v6944_v12  ;;  %1135 = vmatpush.bf16.msra.mxu1 %v6944_v12  ;;  %7067 = vlog2.f32 %v643_v37  ;;  %v652_v1 = vadd.f32 1.0, %v588_v60  ;;  %v535_v6 = vld [vmem:[%s8359_s16] sm:$0xff]  ;;  %v536_v12 = vld [vmem:[%s8359_s16 + $0x8] sm:$0xff] }
  0x1a   : > { %v7058_v20 = vpop.eup %7057  ;;  %7069 = vlog2.f32 %v640_v40  ;;  %v539_v7 = vld [vmem:[%s8359_s16 + $0x20] sm:$0xff]  ;;  %v599_v9 = vadd.f32 1.0, %v535_v6  ;;  %v540_v13 = vld [vmem:[%s8359_s16 + $0x28] sm:$0xff]  ;;  %v600_v14 = vadd.f32 1.0, %v536_v12 }
  0x1b   : > { %v7060_v21 = vpop.eup %7059  ;;  %v728_v28 = vmul.f32 0.6931472, %v7058_v20  ;;  %7071 = vlog2.f32 %v644_v41  ;;  %v603_v10 = vadd.f32 1.0, %v539_v7  ;;  %v604_v15 = vadd.f32 1.0, %v540_v13  ;;  %v595_v27 = vld [vmem:[%s8359_s16 + $0x1e0] sm:$0xff]  ;;  %v548_v60 = vld [vmem:[%s8359_s16 + $0x68] sm:$0xff] }
  0x1c   : > { %7032 = vmatpush.bf16.msra.mxu2 %v6935_v16  ;;  %1087 = vmatpush.bf16.msra.mxu0 %v6935_v16  ;;  %v7062_v22 = vpop.eup %7061  ;;  %v736_v32 = vmul.f32 0.6931472, %v7060_v21  ;;  %7073 = vlog2.f32 %v647_v58  ;;  %v6956_v30 = vld [vmem:[%s13653_s3 + $0xc0] sm:$0xff]  ;;  %v659_v40 = vadd.f32 1.0, %v595_v27 }
  0x1d   : > { %7040 = vmatpush.bf16.msra.mxu3 %v6943_v17  ;;  %1136 = vmatpush.bf16.msra.mxu1 %v6943_v17  ;;  %v7064_v24 = vpop.eup %7063  ;;  %v730_v33 = vmul.f32 0.6931472, %v7062_v22  ;;  %7075 = vlog2.f32 %v651_v59  ;;  %v543_v52 = vld [vmem:[%s8359_s16 + $0x40] sm:$0xff]  ;;  %v544_v59 = vld [vmem:[%s8359_s16 + $0x48] sm:$0xff] }
  0x1e   : > { %v738_v34 = vmul.f32 0.6931472, %v7064_v24  ;;  %v807_v42 = vpack.c.bf16 %v736_v32, %v728_v28  ;;  %v7066_v46 = vpop.eup %7065  ;;  %7077 = vlog2.f32 %v648_v0  ;;  %v6948_v28 = vld [vmem:[%s13653_s3 + $0x80] sm:$0xff]  ;;  %v608_v0 = vadd.f32 1.0, %v544_v59 }
  0x1f   : > { %v7068_v49 = vpop.eup %7067  ;;  %v744_v57 = vmul.f32 0.6931472, %v7066_v46  ;;  %7079 = vlog2.f32 %v652_v1  ;;  %v559_v59 = vld [vmem:[%s8359_s16 + $0xc0] sm:$0xff] }
  0x20   : > { %7033 = vmatpush.bf16.msra.mxu2 %v6934_v18  ;;  %1088 = vmatpush.bf16.msra.mxu0 %v6934_v18  ;;  %v808_v43 = vpack.c.bf16 %v738_v34, %v730_v33  ;;  %v7070_v50 = vpop.eup %7069  ;;  %v752_v61 = vmul.f32 0.6931472, %v7068_v49  ;;  %7081 = vlog2.f32 %v599_v9  ;;  %v6949_v18 = vld [vmem:[%s13653_s3 + $0x88] sm:$0xff] }
  0x21   : > { %7041 = vmatpush.bf16.msra.mxu3 %v6942_v19  ;;  %1137 = vmatpush.bf16.msra.mxu1 %v6942_v19  ;;  %v7072_v53 = vpop.eup %7071  ;;  %v746_v62 = vmul.f32 0.6931472, %v7070_v50  ;;  %7083 = vlog2.f32 %v603_v10  ;;  %v6957_v19 = vld [vmem:[%s13653_s3 + $0xc8] sm:$0xff]  ;;  %v537_v50 = vld [vmem:[%s8359_s16 + $0x10] sm:$0xff] }
  0x22   : > { %v754_v63 = vmul.f32 0.6931472, %v7072_v53  ;;  %v811_v4 = vpack.c.bf16 %v752_v61, %v744_v57  ;;  %v7074_v16 = vpop.eup %7073  ;;  %7085 = vlog2.f32 %v600_v14  ;;  %v592_v33 = vld [vmem:[%s8359_s16 + $0x1c8] sm:$0xff]  ;;  %v547_v53 = vld [vmem:[%s8359_s16 + $0x60] sm:$0xff]  ;;  %v541_v57 = vld [vmem:[%s8359_s16 + $0x30] sm:$0xff]  ;;  %v601_v58 = vadd.f32 1.0, %v537_v50 }
  0x23   : > { %v7076_v17 = vpop.eup %7075  ;;  %7087 = vlog2.f32 %v604_v15  ;;  %v760_v23 = vmul.f32 0.6931472, %v7074_v16  ;;  %v611_v56 = vadd.f32 1.0, %v547_v53 }
  0x24   : > { %7034 = vmatpush.bf16.msra.mxu2 %v6933_v25  ;;  %1089 = vmatpush.bf16.msra.mxu0 %v6933_v25  ;;  %v812_v5 = vpack.c.bf16 %v754_v63, %v746_v62  ;;  %v7078_v20 = vpop.eup %7077  ;;  %v768_v24 = vmul.f32 0.6931472, %v7076_v17  ;;  %v591_v25 = vld [vmem:[%s8359_s16 + $0x1c0] sm:$0xff]  ;;  %v538_v63 = vld [vmem:[%s8359_s16 + $0x18] sm:$0xff] }
  0x25   : > { %7042 = vmatpush.bf16.msra.mxu3 %v6941_v26  ;;  %1138 = vmatpush.bf16.msra.mxu1 %v6941_v26  ;;  %v7080_v21 = vpop.eup %7079  ;;  %v762_v32 = vmul.f32 0.6931472, %v7078_v20  ;;  %v655_v37 = vadd.f32 1.0, %v591_v25  ;;  %v602_v6 = vadd.f32 1.0, %v538_v63  ;;  %v545_v20 = vld [vmem:[%s8359_s16 + $0x50] sm:$0xff]  ;;  %v623_v63 = vadd.f32 1.0, %v559_v59 }
  0x26   : > { %v7082_v22 = vpop.eup %7081  ;;  %v815_v46 = vpack.c.bf16 %v768_v24, %v760_v23  ;;  %v551_v23 = vld [vmem:[%s8359_s16 + $0x80] sm:$0xff]  ;;  %v574_v59 = vld [vmem:[%s8359_s16 + $0x138] sm:$0xff] }
  0x27   : > { %v7084_v26 = vpop.eup %7083  ;;  %v664_v29 = vmul.f32 0.6931472, %v7082_v22  ;;  %7089 = vlog2.f32 %v655_v37  ;;  %v555_v24 = vld [vmem:[%s8359_s16 + $0xa0] sm:$0xff]  ;;  %v615_v27 = vadd.f32 1.0, %v551_v23 }
  0x28   : > { %7035 = vmatpush.bf16.msra.mxu2 %v6932_v35  ;;  %1090 = vmatpush.bf16.msra.mxu0 %v6932_v35  ;;  %v7086_v31 = vpop.eup %7085  ;;  %v672_v34 = vmul.f32 0.6931472, %v7084_v26  ;;  %7091 = vlog2.f32 %v659_v40 }
  0x29   : > { %7043 = vmatpush.bf16.msra.mxu3 %v6940_v36  ;;  %1139 = vmatpush.bf16.msra.mxu1 %v6940_v36  ;;  %v7088_v35 = vpop.eup %7087  ;;  %v770_v36 = vmul.f32 0.6931472, %v7080_v21 }
  0x2a   : > { %v791_v41 = vpack.c.bf16 %v672_v34, %v664_v29  ;;  %v549_v29 = vld [vmem:[%s8359_s16 + $0x70] sm:$0xff] }
  0x2b   : > { %1111 = vmatmul.bf16.vlgmr.msra.gmra.mxu2 %v807_v42  ;;  %v674_v42 = vmul.f32 0.6931472, %v7088_v35  ;;  %v546_v35 = vld [vmem:[%s8359_s16 + $0x58] sm:$0xff] }
  0x2c   : > { %1181 = vmatpush.bf16.msrb.mxu2 %v6955_v38  ;;  %1160 = vmatmul.bf16.vlgmr.msra.gmra.mxu3 %v808_v43  ;;  %v596_v38 = vld [vmem:[%s8359_s16 + $0x1e8] sm:$0xff]  ;;  %v656_v43 = vadd.f32 1.0, %v592_v33 }
  0x2d   : > { %1230 = vmatpush.bf16.msrb.mxu3 %v6963_v39  ;;  %v666_v39 = vmul.f32 0.6931472, %v7086_v31  ;;  %1091 = vmatmul.bf16.vlgmr.msra.gmra.mxu0 %v791_v41  ;;  %v552_v31 = vld [vmem:[%s8359_s16 + $0x88] sm:$0xff]  ;;  %v613_v41 = vadd.f32 1.0, %v549_v29 }
  0x2e   : > { %7093 = vlog2.f32 %v656_v43 }
  0x30   : > { %1182 = vmatpush.bf16.msrb.mxu2 %v6954_v44  ;;  %v660_v44 = vadd.f32 1.0, %v596_v38 }
  0x31   : > { %1231 = vmatpush.bf16.msrb.mxu3 %v6962_v45  ;;  %v792_v45 = vpack.c.bf16 %v674_v42, %v666_v39  ;;  %v550_v39 = vld [vmem:[%s8359_s16 + $0x78] sm:$0xff]  ;;  %v610_v42 = vadd.f32 1.0, %v546_v35 }
  0x32   : > { %7095 = vlog2.f32 %v660_v44  ;;  %v614_v43 = vadd.f32 1.0, %v550_v39 }
  0x33   : > { %1140 = vmatmul.bf16.vlgmr.msra.gmra.mxu1 %v792_v45 }
  0x34   : > { %1183 = vmatpush.bf16.msrb.mxu2 %v6953_v47  ;;  %v816_v47 = vpack.c.bf16 %v770_v36, %v762_v32  ;;  %v556_v32 = vld [vmem:[%s8359_s16 + $0xa8] sm:$0xff]  ;;  %v616_v36 = vadd.f32 1.0, %v552_v31  ;;  %v561_v31 = vld [vmem:[%s8359_s16 + $0xd0] sm:$0xff] }
  0x35   : > { %1232 = vmatpush.bf16.msrb.mxu3 %v6961_v48  ;;  %v7090_v48 = vpop.eup %7089  ;;  %v620_v40 = vadd.f32 1.0, %v556_v32  ;;  %v625_v39 = vadd.f32 1.0, %v561_v31 }
  0x36   : > { %v7092_v49 = vpop.eup %7091  ;;  %v776_v61 = vmul.f32 0.6931472, %v7090_v48 }
  0x37   : > { %v7094_v51 = vpop.eup %7093  ;;  %v784_v62 = vmul.f32 0.6931472, %v7092_v49 }
  0x38   : > { %1184 = vmatpush.bf16.msrb.mxu2 %v6952_v54  ;;  %v7096_v54 = vpop.eup %7095  ;;  %v778_v1 = vmul.f32 0.6931472, %v7094_v51 }
  0x39   : > { %1233 = vmatpush.bf16.msrb.mxu3 %v6960_v55  ;;  %v607_v55 = vadd.f32 1.0, %v543_v52 }
  0x3b   : > { %1116 = vmatmul.bf16.gmra.mxu2 %v811_v4  ;;  %7097 = vlog2.f32 %v607_v55  ;;  %v612_v4 = vadd.f32 1.0, %v548_v60  ;;  %v563_v60 = vld [vmem:[%s8359_s16 + $0xe0] sm:$0xff] }
  0x3c   : > { %1185 = vmatpush.bf16.msrb.mxu2 %v6951_v2  ;;  %1165 = vmatmul.bf16.gmra.mxu3 %v812_v5  ;;  %v786_v2 = vmul.f32 0.6931472, %v7096_v54  ;;  %7099 = vlog2.f32 %v611_v56  ;;  %v605_v5 = vadd.f32 1.0, %v541_v57  ;;  %v553_v56 = vld [vmem:[%s8359_s16 + $0x90] sm:$0xff] }
  0x3d   : > { %1234 = vmatpush.bf16.msrb.mxu3 %v6959_v3  ;;  %v542_v3 = vld [vmem:[%s8359_s16 + $0x38] sm:$0xff]  ;;  %7101 = vlog2.f32 %v601_v58 }
  0x3e   : > { %v606_v7 = vadd.f32 1.0, %v542_v3  ;;  %7103 = vlog2.f32 %v608_v0  ;;  %v820_v9 = vpack.c.bf16 %v786_v2, %v778_v1  ;;  %v627_v0 = vadd.f32 1.0, %v563_v60  ;;  %v557_v1 = vld [vmem:[%s8359_s16 + $0xb0] sm:$0xff]  ;;  %v560_v3 = vld [vmem:[%s8359_s16 + $0xc8] sm:$0xff] }
  0x3f   : > { %7105 = vlog2.f32 %v612_v4  ;;  %v617_v2 = vadd.f32 1.0, %v553_v56  ;;  %v564_v4 = vld [vmem:[%s8359_s16 + $0xe8] sm:$0xff] }
  0x40   : > { %1186 = vmatpush.bf16.msrb.mxu2 %v6950_v8  ;;  %v819_v8 = vpack.c.bf16 %v784_v62, %v776_v61  ;;  %7107 = vlog2.f32 %v605_v5 }
  0x41   : > { %1235 = vmatpush.bf16.msrb.mxu3 %v6958_v11  ;;  %v7098_v10 = vpop.eup %7097  ;;  %7109 = vlog2.f32 %v602_v6 }
  0x42   : > { %v7100_v11 = vpop.eup %7099  ;;  %v680_v12 = vmul.f32 0.6931472, %v7098_v10  ;;  %7111 = vlog2.f32 %v606_v7  ;;  %v554_v7 = vld [vmem:[%s8359_s16 + $0x98] sm:$0xff] }
  0x43   : > { %v688_v13 = vmul.f32 0.6931472, %v7100_v11  ;;  %v7102_v14 = vpop.eup %7101  ;;  %7113 = vlog2.f32 %v615_v27  ;;  %v558_v11 = vld [vmem:[%s8359_s16 + $0xb8] sm:$0xff] }
  0x44   : > { %1187 = vmatpush.bf16.msrb.mxu2 %v6949_v18  ;;  %v7104_v15 = vpop.eup %7103  ;;  %v668_v33 = vmul.f32 0.6931472, %v7102_v14  ;;  %v618_v14 = vadd.f32 1.0, %v554_v7  ;;  %v577_v7 = vld [vmem:[%s8359_s16 + $0x150] sm:$0xff] }
  0x45   : > { %1236 = vmatpush.bf16.msrb.mxu3 %v6957_v19  ;;  %v795_v16 = vpack.c.bf16 %v688_v13, %v680_v12  ;;  %v7106_v17 = vpop.eup %7105  ;;  %v682_v18 = vmul.f32 0.6931472, %v7104_v15  ;;  %v628_v12 = vadd.f32 1.0, %v564_v4  ;;  %v621_v13 = vadd.f32 1.0, %v557_v1  ;;  %v1309_v1 = vld [vmem:[%s13655_s5 + $0x70] sm:$0xff] }
  0x46   : > { %v7108_v19 = vpop.eup %7107  ;;  %v690_v21 = vmul.f32 0.6931472, %v7106_v17  ;;  %v622_v15 = vadd.f32 1.0, %v558_v11 }
  0x47   : > { %1096 = vmatmul.bf16.gmra.mxu0 %v795_v16  ;;  %v7110_v22 = vpop.eup %7109  ;;  %v676_v34 = vmul.f32 0.6931472, %v7108_v19 }
  0x48   : > { %1188 = vmatpush.bf16.msrb.mxu2 %v6948_v28  ;;  %v7112_v25 = vpop.eup %7111  ;;  %v796_v26 = vpack.c.bf16 %v690_v21, %v682_v18  ;;  %v619_v28 = vadd.f32 1.0, %v555_v24  ;;  %v670_v37 = vmul.f32 0.6931472, %v7110_v22 }
  0x49   : > { %1237 = vmatpush.bf16.msrb.mxu3 %v6956_v30  ;;  %v609_v30 = vadd.f32 1.0, %v545_v20  ;;  %v678_v38 = vmul.f32 0.6931472, %v7112_v25  ;;  %v793_v44 = vpack.c.bf16 %v676_v34, %v668_v33  ;;  %v565_v33 = vld [vmem:[%s8359_s16 + $0xf0] sm:$0xff] }
  0x4a   : > { %1145 = vmatmul.bf16.gmra.mxu1 %v796_v26  ;;  %7115 = vlog2.f32 %v619_v28 }
  0x4b   : > { %1121 = vmatmul.bf16.gmra.mxu2 %v815_v46  ;;  %7117 = vlog2.f32 %v609_v30  ;;  %v794_v45 = vpack.c.bf16 %v678_v38, %v670_v37  ;;  %v7114_v46 = vpop.eup %7113 }
  0x4c   : > { %1170 = vmatmul.bf16.gmra.mxu3 %v816_v47  ;;  %7119 = vlog2.f32 %v616_v36  ;;  %v696_v48 = vmul.f32 0.6931472, %v7114_v46  ;;  %v562_v36 = vld [vmem:[%s8359_s16 + $0xd8] sm:$0xff] }
  0x4d   : > { %7121 = vlog2.f32 %v620_v40  ;;  %v566_v40 = vld [vmem:[%s8359_s16 + $0xf8] sm:$0xff] }
  0x4e   : > { %7123 = vlog2.f32 %v613_v41  ;;  %v629_v41 = vadd.f32 1.0, %v565_v33  ;;  %v585_v33 = vld [vmem:[%s8359_s16 + $0x190] sm:$0xff] }
  0x4f   : > { %7125 = vlog2.f32 %v610_v42  ;;  %v626_v42 = vadd.f32 1.0, %v562_v36  ;;  %v1303_v36 = vld [vmem:[%s13655_s5 + $0x40] sm:$0xff] }
  0x50   : > { %v7116_v47 = vpop.eup %7115  ;;  %7127 = vlog2.f32 %v614_v43  ;;  %v630_v43 = vadd.f32 1.0, %v566_v40  ;;  %v586_v40 = vld [vmem:[%s8359_s16 + $0x198] sm:$0xff] }
  0x51   : > { %v704_v49 = vmul.f32 0.6931472, %v7116_v47  ;;  %v7118_v50 = vpop.eup %7117  ;;  %7129 = vlog2.f32 %v623_v63 }
  0x52   : > { %v7120_v51 = vpop.eup %7119  ;;  %v684_v5 = vmul.f32 0.6931472, %v7118_v50  ;;  %7131 = vlog2.f32 %v627_v0  ;;  %v569_v50 = vld [vmem:[%s8359_s16 + $0x110] sm:$0xff] }
  0x53   : > { %v799_v52 = vpack.c.bf16 %v704_v49, %v696_v48  ;;  %v7122_v53 = vpop.eup %7121  ;;  %v698_v54 = vmul.f32 0.6931472, %v7120_v51  ;;  %7133 = vlog2.f32 %v617_v2  ;;  %v573_v51 = vld [vmem:[%s8359_s16 + $0x130] sm:$0xff]  ;;  %v1308_v2 = vld [vmem:[%s13655_s5 + $0x68] sm:$0xff] }
  0x54   : > { %v7124_v55 = vpop.eup %7123  ;;  %v706_v57 = vmul.f32 0.6931472, %v7122_v53  ;;  %v637_v60 = vadd.f32 1.0, %v573_v51 }
  0x55   : > { %v7126_v58 = vpop.eup %7125  ;;  %v692_v6 = vmul.f32 0.6931472, %v7124_v55  ;;  %v570_v55 = vld [vmem:[%s8359_s16 + $0x118] sm:$0xff] }
  0x56   : > { %v7128_v61 = vpop.eup %7127  ;;  %v800_v62 = vpack.c.bf16 %v706_v57, %v698_v54 }
  0x57   : > { %1101 = vmatmul.bf16.gmra.mxu0 %v799_v52  ;;  %v694_v10 = vmul.f32 0.6931472, %v7128_v61  ;;  %v797_v16 = vpack.c.bf16 %v692_v6, %v684_v5  ;;  %v7130_v18 = vpop.eup %7129  ;;  %v1310_v52 = vld [vmem:[%s13655_s5 + $0x78] sm:$0xff]  ;;  %v634_v61 = vadd.f32 1.0, %v570_v55 }
  0x58   : > { %v7132_v19 = vpop.eup %7131  ;;  %v712_v20 = vmul.f32 0.6931472, %v7130_v18  ;;  %1315 = vmatpush.msrb.mxu0 %v1310_v52  ;;  %v1301_v52 = vld [vmem:[%s13655_s5 + $0x30] sm:$0xff] }
  0x59   : > { %v720_v21 = vmul.f32 0.6931472, %v7132_v19  ;;  %v7134_v22 = vpop.eup %7133 }
  0x5a   : > { %1150 = vmatmul.bf16.gmra.mxu1 %v800_v62  ;;  %v700_v34 = vmul.f32 0.6931472, %v7134_v22  ;;  %v638_v62 = vadd.f32 1.0, %v574_v59  ;;  %1316 = vmatpush.msrb.mxu0 %v1309_v1  ;;  %v1298_v1 = vld [vmem:[%s13655_s5 + $0x18] sm:$0xff] }
  0x5b   : > { %1126 = vmatmul.bf16.gmra.mxu2 %v819_v8  ;;  %v624_v8 = vadd.f32 1.0, %v560_v3  ;;  %v803_v24 = vpack.c.bf16 %v720_v21, %v712_v20 }
  0x5c   : > { %1175 = vmatmul.bf16.gmra.mxu3 %v820_v9  ;;  %v686_v9 = vmul.f32 0.6931472, %v7126_v58  ;;  %v633_v58 = vadd.f32 1.0, %v569_v50  ;;  %1317 = vmatpush.msrb.mxu0 %v1308_v2 }
  0x5d   : > { %7135 = vlog2.f32 %v624_v8  ;;  %v581_v8 = vld [vmem:[%s8359_s16 + $0x170] sm:$0xff] }
  0x5e   : > { %v798_v17 = vpack.c.bf16 %v694_v10, %v686_v9  ;;  %7137 = vlog2.f32 %v628_v12  ;;  %v1307_v9 = vld [vmem:[%s13655_s5 + $0x60] sm:$0xff]  ;;  %v1306_v10 = vld [vmem:[%s13655_s5 + $0x58] sm:$0xff]  ;;  %v645_v18 = vadd.f32 1.0, %v581_v8 }
  0x5f   : > { %7139 = vlog2.f32 %v621_v13  ;;  %v578_v13 = vld [vmem:[%s8359_s16 + $0x158] sm:$0xff]  ;;  %1318 = vmatpush.msrb.mxu0 %v1307_v9 }
  0x60   : > { %7141 = vlog2.f32 %v618_v14  ;;  %v642_v19 = vadd.f32 1.0, %v578_v13  ;;  %v598_v8 = vld [vmem:[%s8359_s16 + $0x1f8] sm:$0xff] }
  0x61   : > { %7143 = vlog2.f32 %v622_v15  ;;  %1319 = vmatpush.msrb.mxu0 %v1306_v10  ;;  %v662_v13 = vadd.f32 1.0, %v598_v8 }
  0x62   : > { %7145 = vlog2.f32 %v625_v39 }
  0x63   : > { %v7136_v23 = vpop.eup %7135  ;;  %7147 = vlog2.f32 %v629_v41 }
  0x64   : > { %v7138_v25 = vpop.eup %7137  ;;  %v714_v26 = vmul.f32 0.6931472, %v7136_v23  ;;  %7149 = vlog2.f32 %v626_v42  ;;  %v1305_v23 = vld [vmem:[%s13655_s5 + $0x50] sm:$0xff] }
  0x65   : > { %v7140_v27 = vpop.eup %7139  ;;  %v722_v28 = vmul.f32 0.6931472, %v7138_v25  ;;  %7151 = vlog2.f32 %v630_v43  ;;  %1320 = vmatpush.msrb.mxu0 %v1305_v23  ;;  %v1304_v25 = vld [vmem:[%s13655_s5 + $0x48] sm:$0xff]  ;;  %v649_v43 = vadd.f32 1.0, %v585_v33 }
  0x66   : > { %v7142_v29 = vpop.eup %7141  ;;  %v708_v35 = vmul.f32 0.6931472, %v7140_v27  ;;  %7153 = vlog2.f32 %v633_v58 }
  0x67   : > { %1106 = vmatmul.bf16.gmra.mxu0 %v803_v24  ;;  %v7144_v30 = vpop.eup %7143  ;;  %v804_v32 = vpack.c.bf16 %v722_v28, %v714_v26  ;;  %v702_v37 = vmul.f32 0.6931472, %v7142_v29  ;;  %7155 = vlog2.f32 %v637_v60  ;;  %v8516_v24 = vld [vmem:[%s13654_s4] ss:$0 sm:$0xff] }
  0x68   : > { %v710_v38 = vmul.f32 0.6931472, %v7144_v30  ;;  %v7146_v46 = vpop.eup %7145  ;;  %7157 = vlog2.f32 %v634_v61  ;;  %1321 = vmatpush.msrb.mxu0 %v1304_v25  ;;  %v593_v61 = vld [vmem:[%s8359_s16 + $0x1d0] sm:$0xff] }
  0x69   : > { %v7148_v47 = vpop.eup %7147  ;;  %v716_v53 = vmul.f32 0.6931472, %v7146_v46  ;;  %7159 = vlog2.f32 %v638_v62  ;;  %v650_v46 = vadd.f32 1.0, %v586_v40 }
  0x6a   : > { %1155 = vmatmul.bf16.gmra.mxu1 %v804_v32  ;;  %v7150_v48 = vpop.eup %7149  ;;  %v724_v54 = vmul.f32 0.6931472, %v7148_v47  ;;  %1322 = vmatpush.msrb.mxu0 %v1303_v36 }
  0x6b   : > { %1189 = vmatmul.bf16.vlgmr.msrb.gmra.mxu2 %v793_v44  ;;  %v801_v44 = vpack.c.bf16 %v708_v35, %v700_v34  ;;  %v7152_v49 = vpop.eup %7151  ;;  %v718_v56 = vmul.f32 0.6931472, %v7150_v48  ;;  %v589_v35 = vld [vmem:[%s8359_s16 + $0x1b0] sm:$0xff] }
  0x6c   : > { %1238 = vmatmul.bf16.vlgmr.msrb.gmra.mxu3 %v794_v45  ;;  %v802_v45 = vpack.c.bf16 %v710_v38, %v702_v37  ;;  %v726_v57 = vmul.f32 0.6931472, %v7152_v49  ;;  %v805_v63 = vpack.c.bf16 %v724_v54, %v716_v53  ;;  %v7154_v3 = vpop.eup %7153  ;;  %v1302_v37 = vld [vmem:[%s13655_s5 + $0x38] sm:$0xff]  ;;  %v1300_v53 = vld [vmem:[%s13655_s5 + $0x28] sm:$0xff] }
  0x6d   : > { %v7156_v4 = vpop.eup %7155  ;;  %v732_v11 = vmul.f32 0.6931472, %v7154_v3  ;;  %1323 = vmatpush.msrb.mxu0 %v1302_v37 }
  0x6e   : > { %v806_v0 = vpack.c.bf16 %v726_v57, %v718_v56  ;;  %v7158_v5 = vpop.eup %7157  ;;  %v740_v12 = vmul.f32 0.6931472, %v7156_v4  ;;  %v594_v4 = vld [vmem:[%s8359_s16 + $0x1d8] sm:$0xff] }
  0x6f   : > { %v7160_v6 = vpop.eup %7159  ;;  %v734_v14 = vmul.f32 0.6931472, %v7158_v5  ;;  %1324 = vmatpush.msrb.mxu0 %v1301_v52  ;;  %v658_v10 = vadd.f32 1.0, %v594_v4 }
  0x70   : > { %v742_v15 = vmul.f32 0.6931472, %v7160_v6  ;;  %v809_v21 = vpack.c.bf16 %v740_v12, %v732_v11 }
  0x71   : > { %1325 = vmatpush.msrb.mxu0 %v1300_v53 }
  0x72   : > { %v810_v22 = vpack.c.bf16 %v742_v15, %v734_v14 }
  0x7b   : > { %1194 = vmatmul.bf16.gmra.mxu2 %v797_v16  ;;  %v641_v16 = vadd.f32 1.0, %v577_v7  ;;  %v657_v7 = vadd.f32 1.0, %v593_v61 }
  0x7c   : > { %1243 = vmatmul.bf16.gmra.mxu3 %v798_v17  ;;  %v582_v17 = vld [vmem:[%s8359_s16 + $0x178] sm:$0xff] }
  0x7d   : > { %v646_v20 = vadd.f32 1.0, %v582_v17  ;;  %7161 = vlog2.f32 %v641_v16  ;;  %v1297_v16 = vld [vmem:[%s13655_s5 + $0x10] sm:$0xff]  ;;  %v1296_v17 = vld [vmem:[%s13655_s5 + $0x8] sm:$0xff] }
  0x7e   : > { %7163 = vlog2.f32 %v645_v18 }
  0x7f   : > { %7165 = vlog2.f32 %v642_v19 }
  0x80   : > { %7167 = vlog2.f32 %v646_v20 }
  0x81   : > { %7169 = vlog2.f32 %v649_v43 }
  0x83   : > { %v7162_v26 = vpop.eup %7161 }
  0x84   : > { %v7164_v27 = vpop.eup %7163  ;;  %v748_v38 = vmul.f32 0.6931472, %v7162_v26 }
  0x85   : > { %v7166_v30 = vpop.eup %7165  ;;  %v756_v39 = vmul.f32 0.6931472, %v7164_v27 }
  0x86   : > { %v7168_v32 = vpop.eup %7167  ;;  %v750_v41 = vmul.f32 0.6931472, %v7166_v30 }
  0x87   : > { %v758_v42 = vmul.f32 0.6931472, %v7168_v32  ;;  %v813_v50 = vpack.c.bf16 %v756_v39, %v748_v38  ;;  %v7170_v54 = vpop.eup %7169 }
  0x88   : > { %v764_v2 = vmul.f32 0.6931472, %v7170_v54 }
  0x89   : > { %v814_v51 = vpack.c.bf16 %v758_v42, %v750_v41 }
  0x8b   : > { %1199 = vmatmul.bf16.gmra.mxu2 %v801_v44  ;;  %v590_v44 = vld [vmem:[%s8359_s16 + $0x1b8] sm:$0xff] }
  0x8c   : > { %1248 = vmatmul.bf16.gmra.mxu3 %v802_v45  ;;  %v653_v45 = vadd.f32 1.0, %v589_v35  ;;  %v654_v49 = vadd.f32 1.0, %v590_v44 }
  0x8e   : > { %7171 = vlog2.f32 %v653_v45 }
  0x8f   : > { %7173 = vlog2.f32 %v650_v46 }
  0x90   : > { %7175 = vlog2.f32 %v654_v49 }
  0x91   : > { %7177 = vlog2.f32 %v657_v7 }
  0x94   : > { %v7172_v55 = vpop.eup %7171 }
  0x95   : > { %v7174_v58 = vpop.eup %7173  ;;  %v772_v3 = vmul.f32 0.6931472, %v7172_v55 }
  0x96   : > { %v7176_v60 = vpop.eup %7175  ;;  %v766_v5 = vmul.f32 0.6931472, %v7174_v58 }
  0x97   : > { %v774_v6 = vmul.f32 0.6931472, %v7176_v60  ;;  %v817_v14 = vpack.c.bf16 %v772_v3, %v764_v2  ;;  %v7178_v18 = vpop.eup %7177 }
  0x98   : > { %v780_v27 = vmul.f32 0.6931472, %v7178_v18 }
  0x99   : > { %v818_v15 = vpack.c.bf16 %v774_v6, %v766_v5 }
  0x9b   : > { %1204 = vmatmul.bf16.gmra.mxu2 %v805_v63  ;;  %v597_v63 = vld [vmem:[%s8359_s16 + $0x1f0] sm:$0xff] }
  0x9c   : > { %1253 = vmatmul.bf16.gmra.mxu3 %v806_v0  ;;  %v1299_v0 = vld [vmem:[%s13655_s5 + $0x20] sm:$0xff]  ;;  %v661_v9 = vadd.f32 1.0, %v597_v63 }
  0x9d   : > { %1326 = vmatpush.msrb.mxu0 %v1299_v0 }
  0x9e   : > { %7179 = vlog2.f32 %v661_v9 }
  0x9f   : > { %1327 = vmatpush.msrb.mxu0 %v1298_v1  ;;  %7181 = vlog2.f32 %v658_v10 }
  0xa0   : > { %7183 = vlog2.f32 %v662_v13  ;;  %v1604_v13 = vld [vmem:[%s8594_s30] sm:$0xff] }
  0xa1   : > { %1328 = vmatpush.msrb.mxu0 %v1297_v16  ;;  %1636 = vrot.lane.b32.xlu0 %v1604_v13, %s8250_s15 }
  0xa3   : > { %1329 = vmatpush.msrb.mxu0 %v1296_v17 }
  0xa4   : > { %v7180_v19 = vpop.eup %7179 }
  0xaa   : > { %v1092_v37 = vpop.f32.mrf.mxu0 }
  0xab   : > { %1209 = vmatmul.bf16.gmra.mxu2 %v809_v21  ;;  %v1093_v49 = vadd.f32 %v8516_v24, %v1092_v37  ;;  %v1606_v37 = vld [vmem:[%s8594_s30 + $0x10] sm:$0xff] }
  0xac   : > { %1258 = vmatmul.bf16.gmra.mxu3 %v810_v22  ;;  %v7182_v22 = vpop.eup %7181  ;;  %1640 = vrot.lane.b32.xlu1 %v1606_v37, %s8250_s15 }
  0xad   : > { %v7184_v25 = vpop.eup %7183 }
  0xae   : > { %v1112_v28 = vpop.f32.mrf.mxu2  ;;  %v790_v30 = vmul.f32 0.6931472, %v7184_v25 }
  0xaf   : > { %v1161_v29 = vpop.f32.mrf.mxu3  ;;  %v1113_v31 = vadd.f32 %v8516_v24, %v1112_v28  ;;  %v788_v28 = vmul.f32 0.6931472, %v7180_v19 }
  0xb0   : > { %v1141_v38 = vpop.f32.mrf.mxu1 }
  0xb1   : > { %v8523_v34 = vadd.f32 %v1161_v29, %v1113_v31  ;;  %v782_v29 = vmul.f32 0.6931472, %v7182_v22  ;;  %v1295_v31 = vld [vmem:[%s13655_s5] sm:$0xff]  ;;  %v821_v35 = vpack.c.bf16 %v788_v28, %v780_v27  ;;  %v1605_v22 = vld [vmem:[%s8594_s30 + $0x8] sm:$0xff] }
  0xb2   : > { %1330 = vmatpush.msrb.mxu0 %v1295_v31  ;;  %v1094_v43 = vpop.f32.mrf.mxu0  ;;  %1638 = vrot.lane.b32.xlu0 %v1605_v22, %s8250_s15 }
  0xb3   : > { %v822_v36 = vpack.c.bf16 %v790_v30, %v782_v29 }
  0xb6   : > { %v8534_v47 = vpop.f32.mrf.mxu2 }
  0xb7   : > { %v8536_v48 = vpop.f32.mrf.mxu3  ;;  %v1115_v13 = vadd.f32 %v8516_v24, %v8534_v47  ;;  %v1609_v47 = vld [vmem:[%s8594_s30 + $0x28] sm:$0xff] }
  0xb8   : > { %v1143_v44 = vpop.f32.mrf.mxu1 }
  0xbb   : > { %1214 = vmatmul.bf16.gmra.mxu2 %v813_v50 }
  0xbc   : > { %1263 = vmatmul.bf16.gmra.mxu3 %v814_v51  ;;  %v1142_v51 = vadd.f32 %v1141_v38, %v1093_v49 }
  0xbe   : > { %v1117_v56 = vpop.f32.mrf.mxu2 }
  0xbf   : > { %v1166_v57 = vpop.f32.mrf.mxu3  ;;  %v1118_v59 = vadd.f32 %v8516_v24, %v1117_v56  ;;  %v1095_v56 = vadd.f32 %v8516_v24, %v1094_v43 }
  0xc1   : > { %v8546_v62 = vadd.f32 %v1166_v57, %v1118_v59  ;;  %v1144_v60 = vadd.f32 %v1143_v44, %v1095_v56 }
  0xc4   : > { %v1097_v50 = vpop.f32.mrf.mxu0 }
  0xc5   : > { %v1098_v1 = vadd.f32 %v8516_v24, %v1097_v50 }
  0xc6   : > { %v8557_v11 = vpop.f32.mrf.mxu2 }
  0xc7   : > { %v8559_v12 = vpop.f32.mrf.mxu3  ;;  %v1146_v52 = vpop.f32.mrf.mxu1 }
  0xc8   : > { %v1147_v4 = vadd.f32 %v1146_v52, %v1098_v1  ;;  %v1607_v52 = vld [vmem:[%s8594_s30 + $0x18] sm:$0xff] }
  0xc9   : > { %1642 = vrot.lane.b32.xlu1 %v1607_v52, %s8250_s15 }
  0xcb   : > { %1219 = vmatmul.bf16.gmra.mxu2 %v817_v14 }
  0xcc   : > { %1268 = vmatmul.bf16.gmra.mxu3 %v818_v15  ;;  %v1099_v59 = vpop.f32.mrf.mxu0 }
  0xcd   : > { %v1100_v10 = vadd.f32 %v8516_v24, %v1099_v59 }
  0xce   : > { %v1122_v20 = vpop.f32.mrf.mxu2 }
  0xcf   : > { %v1171_v21 = vpop.f32.mrf.mxu3  ;;  %v1123_v23 = vadd.f32 %v8516_v24, %v1122_v20  ;;  %v1148_v2 = vpop.f32.mrf.mxu1 }
  0xd0   : > { %v1149_v17 = vadd.f32 %v1148_v2, %v1100_v10  ;;  %v1610_v10 = vld [vmem:[%s8594_s30 + $0x30] sm:$0xff] }
  0xd1   : > { %v8568_v26 = vadd.f32 %v1171_v21, %v1123_v23  ;;  %1648 = vrot.lane.b32.xlu1 %v1610_v10, %s8250_s15 }
  0xd4   : > { %v1102_v6 = vpop.f32.mrf.mxu0 }
  0xd5   : > { %v1103_v21 = vadd.f32 %v8516_v24, %v1102_v6 }
  0xd6   : > { %v8573_v32 = vpop.f32.mrf.mxu2 }
  0xd7   : > { %v8575_v33 = vpop.f32.mrf.mxu3  ;;  %v1151_v15 = vpop.f32.mrf.mxu1 }
  0xd8   : > { %v1152_v27 = vadd.f32 %v1151_v15, %v1103_v21 }
  0xdb   : > { %1224 = vmatmul.bf16.gmra.mxu2 %v821_v35 }
  0xdc   : > { %1273 = vmatmul.bf16.gmra.mxu3 %v822_v36  ;;  %v1104_v23 = vpop.f32.mrf.mxu0 }
  0xdd   : > { %v1105_v36 = vadd.f32 %v8516_v24, %v1104_v23 }
  0xde   : > { %v1127_v39 = vpop.f32.mrf.mxu2 }
  0xdf   : > { %v1176_v40 = vpop.f32.mrf.mxu3  ;;  %v1128_v41 = vadd.f32 %v8516_v24, %v1127_v39  ;;  %v1153_v29 = vpop.f32.mrf.mxu1 }
  0xe1   : > { %v8578_v42 = vadd.f32 %v1176_v40, %v1128_v41  ;;  %v1154_v41 = vadd.f32 %v1153_v29, %v1105_v36 }
  0xe4   : > { %v1107_v39 = vpop.f32.mrf.mxu0 }
  0xe6   : > { %v8580_v45 = vpop.f32.mrf.mxu2 }
  0xe7   : > { %v8582_v46 = vpop.f32.mrf.mxu3  ;;  %v1156_v43 = vpop.f32.mrf.mxu1 }
  0xec   : > { %v1109_v56 = vpop.f32.mrf.mxu0 }
  0xee   : > { %v1190_v53 = vpop.f32.mrf.mxu2 }
  0xef   : > { %v1239_v54 = vpop.f32.mrf.mxu3  ;;  %v1191_v55 = vadd.f32 %v1190_v53, %v1142_v51  ;;  %v1108_v51 = vadd.f32 %v8516_v24, %v1107_v39 }
  0xf1   : > { %v1240_v57 = vadd.f32 %v1239_v54, %v1191_v55  ;;  %v1157_v54 = vadd.f32 %v1156_v43, %v1108_v51 }
  0xf3   : > { %v1279_v58 = vmax.f32 %v1240_v57, 0.0 }
  0xf5   : > { %1331 = vmatmul.f32.vlgmr.msrb.gmra.mxu0 %v1279_v58 }
  0xf6   : > { %v1192_v61 = vpop.f32.mrf.mxu2 }
  0xf7   : > { %v1241_v63 = vpop.f32.mrf.mxu3  ;;  %v1193_v0 = vadd.f32 %v1192_v61, %v1144_v60  ;;  %v1110_v60 = vadd.f32 %v8516_v24, %v1109_v56  ;;  %v1158_v61 = vpop.f32.mrf.mxu1 }
  0xf9   : > { %v1242_v3 = vadd.f32 %v1241_v63, %v1193_v0  ;;  %v1159_v1 = vadd.f32 %v1158_v61, %v1110_v60  ;;  %v8634_v61 = vld [vmem:[%s13656_s6] ss:$0 sm:$0xff] }
  0xfb   : > { %v1280_v5 = vmax.f32 %v1242_v3, 0.0 }
  0xfd   : > { %1334 = vmatmul.f32.gmra.mxu0 %v1280_v5 }
  0xfe   : > { %v1195_v7 = vpop.f32.mrf.mxu2 }
  0xff   : > { %v1244_v8 = vpop.f32.mrf.mxu3  ;;  %v1196_v9 = vadd.f32 %v1195_v7, %v1147_v4 }
 0x101   : > { %v1245_v14 = vadd.f32 %v1244_v8, %v1196_v9 }
 0x103   : > { %v1281_v16 = vmax.f32 %v1245_v14, 0.0 }
 0x105   : > { %1337 = vmatmul.f32.gmra.mxu0 %v1281_v16  ;;  %v1164_v16 = vadd.f32 %v8536_v48, %v1115_v13  ;;  %v1120_v48 = vadd.f32 %v8516_v24, %v8557_v11 }
 0x106   : > { %v1197_v18 = vpop.f32.mrf.mxu2 }
 0x107   : > { %v1246_v19 = vpop.f32.mrf.mxu3  ;;  %v1198_v20 = vadd.f32 %v1197_v18, %v1149_v17  ;;  %v1169_v29 = vadd.f32 %v8559_v12, %v1120_v48 }
 0x109   : > { %v1247_v25 = vadd.f32 %v1246_v19, %v1198_v20  ;;  %v1608_v20 = vld [vmem:[%s8594_s30 + $0x20] sm:$0xff] }
 0x10a   : > { %1644 = vrot.lane.b32.xlu2 %v1608_v20, %s8250_s15 }
 0x10b   : > { %v1282_v28 = vmax.f32 %v1247_v25, 0.0 }
 0x10d   : > { %1340 = vmatmul.f32.gmra.mxu0 %v1282_v28 }
 0x10e   : > { %v1200_v30 = vpop.f32.mrf.mxu2 }
 0x10f   : > { %v1249_v31 = vpop.f32.mrf.mxu3  ;;  %v1201_v35 = vadd.f32 %v1200_v30, %v1152_v27 }
 0x111   : > { %v1250_v38 = vadd.f32 %v1249_v31, %v1201_v35 }
 0x112   : > { %1646 = vrot.lane.b32.xlu2 %v1609_v47, %s8250_s15 }
 0x113   : > { %v1283_v40 = vmax.f32 %v1250_v38, 0.0  ;;  %v1637_v20 = vpop.permute.xlu0 %1636 }
 0x115   : > { %1343 = vmatmul.f32.gmra.mxu0 %v1283_v40  ;;  %v1125_v40 = vadd.f32 %v8516_v24, %v8573_v32 }
 0x116   : > { %v1202_v44 = vpop.f32.mrf.mxu2 }
 0x117   : > { %v1251_v49 = vpop.f32.mrf.mxu3  ;;  %v1203_v50 = vadd.f32 %v1202_v44, %v1154_v41  ;;  %v1174_v43 = vadd.f32 %v8575_v33, %v1125_v40 }
 0x119   : > { %v1252_v53 = vadd.f32 %v1251_v49, %v1203_v50 }
 0x11b   : > { %v1284_v55 = vmax.f32 %v1252_v53, 0.0 }
 0x11d   : > { %1346 = vmatmul.f32.gmra.mxu0 %v1284_v55 }
 0x11e   : > { %v1205_v57 = vpop.f32.mrf.mxu2 }
 0x11f   : > { %v1254_v58 = vpop.f32.mrf.mxu3  ;;  %v1206_v59 = vadd.f32 %v1205_v57, %v1157_v54 }
 0x121   : > { %v1255_v63 = vadd.f32 %v1254_v58, %v1206_v59 }
 0x123   : > { %v1285_v0 = vmax.f32 %v1255_v63, 0.0 }
 0x125   : > { %1349 = vmatmul.f32.gmra.mxu0 %v1285_v0 }
 0x126   : > { %v1207_v2 = vpop.f32.mrf.mxu2 }
 0x127   : > { %v1256_v3 = vpop.f32.mrf.mxu3  ;;  %v1208_v4 = vadd.f32 %v1207_v2, %v1159_v1 }
 0x129   : > { %v1257_v5 = vadd.f32 %v1256_v3, %v1208_v4 }
 0x12b   : > { %v1286_v6 = vmax.f32 %v1257_v5, 0.0 }
 0x12d   : > { %1352 = vmatmul.f32.gmra.mxu0 %v1286_v6 }
 0x12e   : > { %v1210_v7 = vpop.f32.mrf.mxu2 }
 0x12f   : > { %v1259_v8 = vpop.f32.mrf.mxu3  ;;  %v1211_v9 = vadd.f32 %v1210_v7, %v8523_v34 }
 0x131   : > { %v1260_v14 = vadd.f32 %v1259_v8, %v1211_v9 }
 0x133   : > { %v1287_v15 = vmax.f32 %v1260_v14, 0.0 }
 0x135   : > { %1355 = vmatmul.f32.gmra.mxu0 %v1287_v15 }
 0x136   : > { %v1212_v17 = vpop.f32.mrf.mxu2 }
 0x137   : > { %v1261_v18 = vpop.f32.mrf.mxu3  ;;  %v1213_v19 = vadd.f32 %v1212_v17, %v1164_v16 }
 0x139   : > { %v1262_v21 = vadd.f32 %v1261_v18, %v1213_v19 }
 0x13b   : > { %v1288_v34 = vmax.f32 %v1262_v21, 0.0 }
 0x13d   : > { %1358 = vmatmul.f32.gmra.mxu0 %v1288_v34 }
 0x13e   : > { %v1215_v22 = vpop.f32.mrf.mxu2 }
 0x13f   : > { %v1264_v23 = vpop.f32.mrf.mxu3  ;;  %v1216_v25 = vadd.f32 %v1215_v22, %v8546_v62 }
 0x141   : > { %v1265_v27 = vadd.f32 %v1264_v23, %v1216_v25 }
 0x143   : > { %v1289_v28 = vmax.f32 %v1265_v27, 0.0 }
 0x145   : > { %1361 = vmatmul.f32.gmra.mxu0 %v1289_v28 }
 0x146   : > { %v1217_v30 = vpop.f32.mrf.mxu2 }
 0x147   : > { %v1266_v31 = vpop.f32.mrf.mxu3  ;;  %v1218_v35 = vadd.f32 %v1217_v30, %v1169_v29 }
 0x149   : > { %v1267_v36 = vadd.f32 %v1266_v31, %v1218_v35 }
 0x14b   : > { %v1290_v37 = vmax.f32 %v1267_v36, 0.0 }
 0x14d   : > { %1364 = vmatmul.f32.gmra.mxu0 %v1290_v37 }
 0x14e   : > { %v1220_v38 = vpop.f32.mrf.mxu2 }
 0x14f   : > { %v1269_v39 = vpop.f32.mrf.mxu3  ;;  %v1221_v62 = vadd.f32 %v1220_v38, %v8568_v26  ;;  %v1130_v26 = vadd.f32 %v8516_v24, %v8580_v45 }
 0x151   : > { %v1270_v41 = vadd.f32 %v1269_v39, %v1221_v62  ;;  %v1179_v56 = vadd.f32 %v8582_v46, %v1130_v26  ;;  %v1639_v62 = vpop.permute.xlu0 %1638 }
 0x153   : > { %v1291_v11 = vmax.f32 %v1270_v41, 0.0 }
 0x155   : > { %1367 = vmatmul.f32.gmra.mxu0 %v1291_v11 }
 0x156   : > { %v1222_v12 = vpop.f32.mrf.mxu2 }
 0x157   : > { %v1271_v44 = vpop.f32.mrf.mxu3  ;;  %v1223_v49 = vadd.f32 %v1222_v12, %v1174_v43 }
 0x159   : > { %v1272_v50 = vadd.f32 %v1271_v44, %v1223_v49  ;;  %v1611_v44 = vld [vmem:[%s8594_s30 + $0x38] sm:$0xff] }
 0x15b   : > { %v1292_v51 = vmax.f32 %v1272_v50, 0.0 }
 0x15d   : > { %1370 = vmatmul.f32.gmra.mxu0 %v1292_v51 }
 0x15e   : > { %v1225_v52 = vpop.f32.mrf.mxu2 }
 0x15f   : > { %v1274_v53 = vpop.f32.mrf.mxu3  ;;  %v1226_v54 = vadd.f32 %v1225_v52, %v8578_v42 }
 0x161   : > { %v1275_v55 = vadd.f32 %v1274_v53, %v1226_v54 }
 0x163   : > { %v1293_v32 = vmax.f32 %v1275_v55, 0.0 }
 0x165   : > { %1373 = vmatmul.f32.gmra.mxu0 %v1293_v32  ;;  %v1641_v32 = vpop.permute.xlu1 %1640 }
 0x166   : > { %v1227_v33 = vpop.f32.mrf.mxu2 }
 0x167   : > { %v1276_v57 = vpop.f32.mrf.mxu3  ;;  %v1228_v58 = vadd.f32 %v1227_v33, %v1179_v56 }
 0x169   : > { %v1277_v59 = vadd.f32 %v1276_v57, %v1228_v58 }
 0x16b   : > { %v1294_v60 = vmax.f32 %v1277_v59, 0.0 }
 0x16d   : > { %1376 = vmatmul.f32.gmra.mxu0 %v1294_v60 }
 0x172   : > { %v1332_v42 = vpop.f32.mrf.mxu0 }
 0x173   : > { %v8637_v63 = vadd.f32 %v8634_v61, %v1332_v42 }
 0x175   : > { %v1380_v24 = vmul.f32 1.442695, %v8637_v63 }
 0x177   : > { %7185 = vpow2.f32 %v1380_v24  ;;  %v1612_v24 = vld [vmem:[%s8594_s30 + $0x40] sm:$0xff] }
 0x17a   : > { %v1335_v45 = vpop.f32.mrf.mxu0 }
 0x17b   : > { %v8641_v46 = vadd.f32 %v8634_v61, %v1335_v45 }
 0x17d   : > { %v8643_v0 = vpop.eup %7185  ;;  %v1382_v1 = vmul.f32 1.442695, %v8641_v46 }
 0x17e   : > { %7187 = vrsqrt.f32 %v8643_v0  ;;  %vm1419_vm0 = vcmp.eq.f32.partialorder %v8643_v0, inf  ;;  %v1422_v22 = vand.u32 2147483648, %v8643_v0  ;;  %vm1421_vm1 = vcmp.eq.f32.partialorder %v8643_v0, 0.0 }
 0x17f   : > { %7189 = vpow2.f32 %v1382_v1 }
 0x182   : > { %v1338_v2 = vpop.f32.mrf.mxu0 }
 0x183   : > { %v8648_v3 = vadd.f32 %v8634_v61, %v1338_v2 }
 0x184   : > { %v7188_v4 = vpop.eup %7187 }
 0x185   : > { %v8650_v5 = vpop.eup %7189  ;;  %v1384_v6 = vmul.f32 1.442695, %v8648_v3  ;;  %v1413_v7 = vmul.f32 %v7188_v4, %v8643_v0 }
 0x186   : > { %7191 = vrsqrt.f32 %v8650_v5  ;;  %vm1431_vm2 = vcmp.eq.f32.partialorder %v8650_v5, inf  ;;  %v1434_v40 = vand.u32 2147483648, %v8650_v5  ;;  %vm1433_vm3 = vcmp.eq.f32.partialorder %v8650_v5, 0.0 }
 0x187   : > { %7193 = vpow2.f32 %v1384_v6  ;;  %v1414_v8 = vmul.f32 %v7188_v4, %v1413_v7 }
 0x189   : > { %v1415_v9 = vmul.f32 0.5, %v1414_v8 }
 0x18a   : > { %v1341_v10 = vpop.f32.mrf.mxu0 }
 0x18b   : > { %v8656_v13 = vadd.f32 %v8634_v61, %v1341_v10  ;;  %v1416_v14 = vsub.f32 1.5, %v1415_v9 }
 0x18c   : > { %v7192_v15 = vpop.eup %7191 }
 0x18d   : > { %v8658_v16 = vpop.eup %7193  ;;  %v1386_v17 = vmul.f32 1.442695, %v8656_v13  ;;  %v1417_v18 = vmul.f32 %v7188_v4, %v1416_v14  ;;  %v1425_v19 = vmul.f32 %v7192_v15, %v8650_v5 }
 0x18e   : > { %7195 = vrsqrt.f32 %v8658_v16  ;;  %vm1443_vm4 = vcmp.eq.f32.partialorder %v8658_v16, inf  ;;  %v1446_v56 = vand.u32 2147483648, %v8658_v16  ;;  %vm1445_vm5 = vcmp.eq.f32.partialorder %v8658_v16, 0.0 }
 0x18f   : > { %7197 = vpow2.f32 %v1386_v17  ;;  %v1418_v21 = vmul.f32 %v8643_v0, %v1417_v18  ;;  %v1426_v34 = vmul.f32 %v7192_v15, %v1425_v19  ;;  %v1643_v17 = vpop.permute.xlu1 %1642 }
 0x191   : > { %v1420_v23 = vsel %vm1419_vm0, %v8643_v0, %v1418_v21  ;;  %v1427_v25 = vmul.f32 0.5, %v1426_v34  ;;  %v1613_v21 = vld [vmem:[%s8594_s30 + $0x48] sm:$0xff]  ;;  %vm1786_vm0 = vcmask 130048  }
 0x192   : > { %v1423_v47 = vsel %vm1421_vm1, %v1422_v22, %v1420_v23  ;;  %v1344_v48 = vpop.f32.mrf.mxu0 }
 0x193   : > { %v1684_v27 = vmul.f32 %v1637_v20, %v1423_v47  ;;  %v8669_v28 = vadd.f32 %v8634_v61, %v1344_v48  ;;  %v1428_v29 = vsub.f32 1.5, %v1427_v25 }
 0x194   : > { %v7196_v30 = vpop.eup %7195 }
 0x195   : > { %v8671_v31 = vpop.eup %7197  ;;  %v1388_v35 = vmul.f32 1.442695, %v8669_v28  ;;  %1716 = vrot.lane.b32.xlu0 %v1684_v27, %s13665_s20  ;;  %v1429_v36 = vmul.f32 %v7192_v15, %v1428_v29  ;;  %v1437_v37 = vmul.f32 %v7196_v30, %v8658_v16  ;;  %v1645_v27 = vpop.permute.xlu2 %1644 }
 0x196   : > { %7199 = vrsqrt.f32 %v8671_v31  ;;  %vm1455_vm6 = vcmp.eq.f32.partialorder %v8671_v31, inf  ;;  %v1458_v10 = vand.u32 2147483648, %v8671_v31  ;;  %vm1457_vm7 = vcmp.eq.f32.partialorder %v8671_v31, 0.0 }
 0x197   : > { %7201 = vpow2.f32 %v1388_v35  ;;  %v1430_v38 = vmul.f32 %v8650_v5, %v1429_v36  ;;  %v1438_v39 = vmul.f32 %v7196_v30, %v1437_v37 }
 0x199   : > { %v1432_v41 = vsel %vm1431_vm2, %v8650_v5, %v1430_v38  ;;  %v1439_v11 = vmul.f32 0.5, %v1438_v39  ;;  %v1614_v39 = vld [vmem:[%s8594_s30 + $0x50] sm:$0xff] }
 0x19a   : > { %v1435_v43 = vsel %vm1433_vm3, %v1434_v40, %v1432_v41  ;;  %v1347_v12 = vpop.f32.mrf.mxu0 }
 0x19b   : > { %v1685_v49 = vmul.f32 %v1639_v62, %v1435_v43  ;;  %v8684_v50 = vadd.f32 %v8634_v61, %v1347_v12  ;;  %v1440_v51 = vsub.f32 1.5, %v1439_v11 }
 0x19c   : > { %v7200_v52 = vpop.eup %7199 }
 0x19d   : > { %v8686_v53 = vpop.eup %7201  ;;  %v1390_v54 = vmul.f32 1.442695, %v8684_v50  ;;  %1718 = vrot.lane.b32.xlu2 %v1685_v49, %s13665_s20  ;;  %1650 = vrot.lane.b32.xlu0 %v1611_v44, %s8250_s15  ;;  %v1441_v26 = vmul.f32 %v7196_v30, %v1440_v51  ;;  %v1449_v55 = vmul.f32 %v7200_v52, %v8671_v31  ;;  %v1647_v51 = vpop.permute.xlu2 %1646 }
 0x19e   : > { %7203 = vrsqrt.f32 %v8686_v53  ;;  %vm1467_vm8 = vcmp.eq.f32.partialorder %v8686_v53, inf  ;;  %v1470_v29 = vand.u32 2147483648, %v8686_v53  ;;  %vm1469_vm9 = vcmp.eq.f32.partialorder %v8686_v53, 0.0 }
 0x19f   : > { %7205 = vpow2.f32 %v1390_v54  ;;  %v1442_v33 = vmul.f32 %v8658_v16, %v1441_v26  ;;  %v1450_v57 = vmul.f32 %v7200_v52, %v1449_v55  ;;  %v1615_v55 = vld [vmem:[%s8594_s30 + $0x58] sm:$0xff] }
 0x1a1   : > { %v1444_v58 = vsel %vm1443_vm4, %v8658_v16, %v1442_v33  ;;  %v1451_v59 = vmul.f32 0.5, %v1450_v57 }
 0x1a2   : > { %v1447_v60 = vsel %vm1445_vm5, %v1446_v56, %v1444_v58  ;;  %v1350_v42 = vpop.f32.mrf.mxu0 }
 0x1a3   : > { %v1686_v45 = vmul.f32 %v1641_v32, %v1447_v60  ;;  %v8700_v1 = vadd.f32 %v8634_v61, %v1350_v42  ;;  %v1452_v2 = vsub.f32 1.5, %v1451_v59  ;;  %v1649_v60 = vpop.permute.xlu1 %1648 }
 0x1a4   : > { %v7204_v4 = vpop.eup %7203 }
 0x1a5   : > { %v8702_v6 = vpop.eup %7205  ;;  %v1392_v7 = vmul.f32 1.442695, %v8700_v1  ;;  %1720 = vrot.lane.b32.xlu1 %v1686_v45, %s13665_s20  ;;  %1652 = vrot.lane.b32.xlu2 %v1612_v24, %s8250_s15  ;;  %v1453_v8 = vmul.f32 %v7200_v52, %v1452_v2  ;;  %v1461_v9 = vmul.f32 %v7204_v4, %v8686_v53  ;;  %v1616_v45 = vld [vmem:[%s8594_s30 + $0x60] sm:$0xff] }
 0x1a6   : > { %7207 = vrsqrt.f32 %v8702_v6  ;;  %vm1479_vm10 = vcmp.eq.f32.partialorder %v8702_v6, inf  ;;  %v1482_v12 = vand.u32 2147483648, %v8702_v6  ;;  %vm1481_vm11 = vcmp.eq.f32.partialorder %v8702_v6, 0.0 }
 0x1a7   : > { %7209 = vpow2.f32 %v1392_v7  ;;  %v1454_v14 = vmul.f32 %v8671_v31, %v1453_v8  ;;  %v1462_v15 = vmul.f32 %v7204_v4, %v1461_v9  ;;  %v1617_v8 = vld [vmem:[%s8594_s30 + $0x68] sm:$0xff] }
 0x1a9   : > { %v1456_v18 = vsel %vm1455_vm6, %v8671_v31, %v1454_v14  ;;  %v1463_v19 = vmul.f32 0.5, %v1462_v15 }
 0x1aa   : > { %v1459_v20 = vsel %vm1457_vm7, %v1458_v10, %v1456_v18  ;;  %v1353_v33 = vpop.f32.mrf.mxu0 }
 0x1ab   : > { %v1687_v34 = vmul.f32 %v1643_v17, %v1459_v20  ;;  %v1464_v22 = vsub.f32 1.5, %v1463_v19  ;;  %v8755_v14 = vadd.f32 %v8634_v61, %v1353_v33  ;;  %v1781_v19 = vld [vmem:[%s13657_s7 + $0x8] sm:$0xff] }
 0x1ac   : > { %v7208_v23 = vpop.eup %7207  ;;  %1849 = vmatpush.msrb.mxu1 %v1781_v19 }
 0x1ad   : > { %v8715_v25 = vpop.eup %7209  ;;  %1654 = vrot.lane.b32.xlu1 %v1613_v21, %s8250_s15  ;;  %1722 = vrot.lane.b32.xlu0 %v1687_v34, %s13665_s20  ;;  %v1465_v47 = vmul.f32 %v7204_v4, %v1464_v22  ;;  %v1473_v48 = vmul.f32 %v7208_v23, %v8702_v6  ;;  %v1394_v17 = vmul.f32 1.442695, %v8755_v14 }
 0x1ae   : > { %7211 = vrsqrt.f32 %v8715_v25  ;;  %vm1491_vm12 = vcmp.eq.f32.partialorder %v8715_v25, inf  ;;  %v1494_v58 = vand.u32 2147483648, %v8715_v25  ;;  %vm1493_vm13 = vcmp.eq.f32.partialorder %v8715_v25, 0.0 }
 0x1af   : > { %v1466_v30 = vmul.f32 %v8686_v53, %v1465_v47  ;;  %v1474_v35 = vmul.f32 %v7208_v23, %v1473_v48  ;;  %v1780_v47 = vld [vmem:[%s13657_s7] sm:$0xff] }
 0x1b0   : > { %1850 = vmatpush.msrb.mxu1 %v1780_v47 }
 0x1b1   : > { %v1468_v36 = vsel %vm1467_vm8, %v8686_v53, %v1466_v30  ;;  %v1475_v37 = vmul.f32 0.5, %v1474_v35 }
 0x1b2   : > { %v1471_v38 = vsel %vm1469_vm9, %v1470_v29, %v1468_v36  ;;  %v1356_v4 = vpop.f32.mrf.mxu0 }
 0x1b3   : > { %v1688_v62 = vmul.f32 %v1645_v27, %v1471_v38  ;;  %v1476_v40 = vsub.f32 1.5, %v1475_v37  ;;  %v8747_v7 = vadd.f32 %v8634_v61, %v1356_v4 }
 0x1b4   : > { %v7212_v41 = vpop.eup %7211 }
 0x1b5   : > { %1724 = vrot.lane.b32.xlu2 %v1688_v62, %s13665_s20  ;;  %1656 = vrot.lane.b32.xlu0 %v1614_v39, %s8250_s15  ;;  %v1477_v11 = vmul.f32 %v7208_v23, %v1476_v40  ;;  %v1485_v43 = vmul.f32 %v7212_v41, %v8715_v25  ;;  %v1396_v9 = vmul.f32 1.442695, %v8747_v7 }
 0x1b7   : > { %v1478_v44 = vmul.f32 %v8702_v6, %v1477_v11  ;;  %v1486_v49 = vmul.f32 %v7212_v41, %v1485_v43  ;;  %7213 = vpow2.f32 %v1396_v9 }
 0x1b9   : > { %v1480_v52 = vsel %vm1479_vm10, %v8702_v6, %v1478_v44  ;;  %v1487_v54 = vmul.f32 0.5, %v1486_v49 }
 0x1ba   : > { %v1483_v26 = vsel %vm1481_vm11, %v1482_v12, %v1480_v52  ;;  %v1359_v15 = vpop.f32.mrf.mxu0 }
 0x1bb   : > { %v1689_v32 = vmul.f32 %v1647_v51, %v1483_v26  ;;  %v1488_v56 = vsub.f32 1.5, %v1487_v54  ;;  %v8764_v34 = vadd.f32 %v8634_v61, %v1359_v15 }
 0x1bd   : > { %1726 = vrot.lane.b32.xlu1 %v1689_v32, %s13665_s20  ;;  %1658 = vrot.lane.b32.xlu2 %v1615_v55, %s8250_s15  ;;  %v1489_v57 = vmul.f32 %v7212_v41, %v1488_v56  ;;  %v8752_v10 = vpop.eup %7213  ;;  %v1398_v48 = vmul.f32 1.442695, %v8764_v34 }
 0x1be   : > { %7215 = vrsqrt.f32 %v8752_v10  ;;  %vm1515_vm14 = vcmp.eq.f32.partialorder %v8752_v10, inf  ;;  %v1518_v52 = vand.u32 2147483648, %v8752_v10  ;;  %vm1517_vm15 = vcmp.eq.f32.partialorder %v8752_v10, 0.0 }
 0x1bf   : > { %v1490_v59 = vmul.f32 %v8715_v25, %v1489_v57  ;;  %7217 = vpow2.f32 %v1394_v17 }
 0x1c1   : > { %v1492_v42 = vsel %vm1491_vm12, %v8715_v25, %v1490_v59 }
 0x1c2   : > { %v1495_v24 = vsel %vm1493_vm13, %v1494_v58, %v1492_v42  ;;  %v1362_v21 = vpop.f32.mrf.mxu0 }
 0x1c3   : > { %v1690_v2 = vmul.f32 %v1649_v60, %v1495_v24  ;;  %v8774_v36 = vadd.f32 %v8634_v61, %v1362_v21 }
 0x1c4   : > { %v7216_v18 = vpop.eup %7215 }
 0x1c5   : > { %1660 = vrot.lane.b32.xlu1 %v1616_v45, %s8250_s15  ;;  %1728 = vrot.lane.b32.xlu0 %v1690_v2, %s13665_s20  ;;  %v1509_v20 = vmul.f32 %v7216_v18, %v8752_v10  ;;  %v8766_v22 = vpop.eup %7217  ;;  %v1400_v40 = vmul.f32 1.442695, %v8774_v36  ;;  %v1619_v2 = vld [vmem:[%s8594_s30 + $0x78] sm:$0xff] }
 0x1c6   : > { %7219 = vrsqrt.f32 %v8766_v22  ;;  %vm1503_vm1 = vcmp.eq.f32.partialorder %v8766_v22, inf  ;;  %v1506_v19 = vand.u32 2147483648, %v8766_v22  ;;  %vm1505_vm2 = vcmp.eq.f32.partialorder %v8766_v22, 0.0 }
 0x1c7   : > { %v1510_v23 = vmul.f32 %v7216_v18, %v1509_v20  ;;  %7221 = vpow2.f32 %v1398_v48 }
 0x1c9   : > { %v1511_v27 = vmul.f32 0.5, %v1510_v23 }
 0x1ca   : > { %v1365_v29 = vpop.f32.mrf.mxu0 }
 0x1cb   : > { %v1512_v30 = vsub.f32 1.5, %v1511_v27  ;;  %v8777_v37 = vadd.f32 %v8634_v61, %v1365_v29 }
 0x1cc   : > { %v7220_v35 = vpop.eup %7219 }
 0x1cd   : > { %1662 = vrot.lane.b32.xlu0 %v1617_v8, %s8250_s15  ;;  %v1513_v38 = vmul.f32 %v7216_v18, %v1512_v30  ;;  %v1497_v39 = vmul.f32 %v7220_v35, %v8766_v22  ;;  %v8780_v62 = vpop.eup %7221  ;;  %v1402_v41 = vmul.f32 1.442695, %v8777_v37 }
 0x1ce   : > { %7223 = vrsqrt.f32 %v8780_v62  ;;  %vm1527_vm3 = vcmp.eq.f32.partialorder %v8780_v62, inf  ;;  %vm1529_vm4 = vcmp.eq.f32.partialorder %v8780_v62, 0.0 }
 0x1cf   : > { %v1514_v43 = vmul.f32 %v8752_v10, %v1513_v38  ;;  %v1498_v12 = vmul.f32 %v7220_v35, %v1497_v39  ;;  %7225 = vpow2.f32 %v1400_v40 }
 0x1d0   : > { %7227 = vpow2.f32 %v1402_v41 }
 0x1d1   : > { %v1516_v44 = vsel %vm1515_vm14, %v8752_v10, %v1514_v43  ;;  %v1499_v49 = vmul.f32 0.5, %v1498_v12 }
 0x1d2   : > { %v1368_v51 = vpop.f32.mrf.mxu0  ;;  %v1519_v55 = vsel %vm1517_vm15, %v1518_v52, %v1516_v44  ;;  %v1618_v52 = vld [vmem:[%s8594_s30 + $0x70] sm:$0xff] }
 0x1d3   : > { %v8795_v33 = vadd.f32 %v8634_v61, %v1368_v51  ;;  %v1500_v58 = vsub.f32 1.5, %v1499_v49 }
 0x1d4   : > { %v7224_v54 = vpop.eup %7223 }
 0x1d5   : > { %v8790_v26 = vpop.eup %7225  ;;  %v1521_v59 = vmul.f32 %v7224_v54, %v8780_v62  ;;  %v1404_v60 = vmul.f32 1.442695, %v8795_v33  ;;  %v1501_v42 = vmul.f32 %v7220_v35, %v1500_v58 }
 0x1d6   : > { %v8792_v56 = vpop.eup %7227  ;;  %7229 = vrsqrt.f32 %v8790_v26  ;;  %vm1539_vm6 = vcmp.eq.f32.partialorder %v8790_v26, inf  ;;  %vm1541_vm8 = vcmp.eq.f32.partialorder %v8790_v26, 0.0 }
 0x1d7   : > { %7231 = vrsqrt.f32 %v8792_v56  ;;  %v1522_v4 = vmul.f32 %v7224_v54, %v1521_v59  ;;  %v1502_v15 = vmul.f32 %v8766_v22, %v1501_v42  ;;  %vm1551_vm5 = vcmp.eq.f32.partialorder %v8792_v56, inf }
 0x1d8   : > { %7233 = vpow2.f32 %v1404_v60  ;;  %vm1553_vm7 = vcmp.eq.f32.partialorder %v8792_v56, 0.0 }
 0x1d9   : > { %v1523_v20 = vmul.f32 0.5, %v1522_v4  ;;  %v1504_v21 = vsel %vm1503_vm1, %v8766_v22, %v1502_v15 }
 0x1da   : > { %v1371_v24 = vpop.f32.mrf.mxu0  ;;  %v1507_v29 = vsel %vm1505_vm2, %v1506_v19, %v1504_v21 }
 0x1db   : > { %v8807_v18 = vadd.f32 %v8634_v61, %v1371_v24  ;;  %v1524_v35 = vsub.f32 1.5, %v1523_v20 }
 0x1dc   : > { %v7230_v8 = vpop.eup %7229 }
 0x1dd   : > { %v7232_v17 = vpop.eup %7231  ;;  %v1533_v47 = vmul.f32 %v7230_v8, %v8790_v26  ;;  %v1406_v27 = vmul.f32 1.442695, %v8807_v18  ;;  %v1525_v12 = vmul.f32 %v7224_v54, %v1524_v35 }
 0x1de   : > { %v1545_v23 = vmul.f32 %v7232_v17, %v8792_v56  ;;  %v8816_v48 = vpop.eup %7233 }
 0x1df   : > { %v1534_v41 = vmul.f32 %v7230_v8, %v1533_v47  ;;  %7235 = vrsqrt.f32 %v8816_v48  ;;  %vm1563_vm9 = vcmp.eq.f32.partialorder %v8816_v48, inf  ;;  %vm1565_vm10 = vcmp.eq.f32.partialorder %v8816_v48, 0.0 }
 0x1e0   : > { %v1546_v40 = vmul.f32 %v7232_v17, %v1545_v23  ;;  %7237 = vpow2.f32 %v1406_v27 }
 0x1e1   : > { %v1535_v44 = vmul.f32 0.5, %v1534_v41 }
 0x1e2   : > { %v1547_v43 = vmul.f32 0.5, %v1546_v40 }
 0x1e3   : > { %v1536_v58 = vsub.f32 1.5, %v1535_v44 }
 0x1e5   : > { %v7236_v49 = vpop.eup %7235  ;;  %v1537_v24 = vmul.f32 %v7230_v8, %v1536_v58 }
 0x1e6   : > { %v1557_v54 = vmul.f32 %v7236_v49, %v8816_v48 }
 0x1e7   : > { %v1538_v23 = vmul.f32 %v8790_v26, %v1537_v24  ;;  %v1374_v24 = vpop.f32.mrf.mxu0 }
 0x1e8   : > { %v1558_v15 = vmul.f32 %v7236_v49, %v1557_v54 }
 0x1e9   : > { %v1540_v27 = vsel %vm1539_vm6, %v8790_v26, %v1538_v23 }
 0x1ea   : > { %v1559_v8 = vmul.f32 0.5, %v1558_v15 }
 0x1f7   : > { %v1719_v11 = vpop.permute.xlu2 %1718 }
 0x1f8   : > { %v1765_v38 = vadd.f32 %v1719_v11, %v8641_v46 }
 0x1ff   : > { %v1653_v32 = vpop.permute.xlu2 %1652 }
 0x200   : > { %v1692_v57 = vmul.f32 %v1653_v32, %v1519_v55  ;;  %v8824_v55 = vpop.eup %7237  ;;  %v1548_v32 = vsub.f32 1.5, %v1547_v43  ;;  %v1560_v43 = vsub.f32 1.5, %v1559_v8  ;;  %v1377_v8 = vpop.f32.mrf.mxu0 }
 0x201   : > { %7239 = vrsqrt.f32 %v8824_v55  ;;  %vm1575_vm11 = vcmp.eq.f32.partialorder %v8824_v55, inf  ;;  %v1578_v23 = vand.u32 2147483648, %v8824_v55  ;;  %vm1577_vm12 = vcmp.eq.f32.partialorder %v8824_v55, 0.0 }
 0x202   : > { %1732 = vrot.lane.b32.xlu1 %v1692_v57, %s13665_s20  ;;  %v1526_v57 = vmul.f32 %v8780_v62, %v1525_v12  ;;  %v1549_v60 = vmul.f32 %v7232_v17, %v1548_v32 }
 0x204   : > { %v1528_v42 = vsel %vm1527_vm3, %v8780_v62, %v1526_v57  ;;  %v1550_v19 = vmul.f32 %v8792_v56, %v1549_v60 }
 0x206   : > { %v1552_v17 = vsel %vm1551_vm5, %v8792_v56, %v1550_v19 }
 0x207   : > { %v1717_v45 = vpop.permute.xlu0 %1716  ;;  %v7240_v47 = vpop.eup %7239 }
 0x208   : > { %v1764_v9 = vadd.f32 %v1717_v45, %v8637_v63  ;;  %v1530_v45 = vand.u32 2147483648, %v8780_v62 }
 0x20a   : > { %1666 = vrot.lane.b32.xlu1 %v1619_v2, %s8250_s15  ;;  %6640 = vmatmul.msk.f32.vlgmr.msrb.gmra.mxu1 %vm1786_vm0, %v1764_v9  ;;  %v1531_v2 = vsel %vm1529_vm4, %v1530_v45, %v1528_v42  ;;  %v1566_v45 = vand.u32 2147483648, %v8816_v48 }
 0x20f   : > { %v1651_v30 = vpop.permute.xlu0 %1650  ;;  %v1725_v59 = vpop.permute.xlu2 %1724 }
 0x210   : > { %v1691_v39 = vmul.f32 %v1651_v30, %v1507_v29  ;;  %v1569_v29 = vmul.f32 %v7240_v47, %v8824_v55  ;;  %v1554_v30 = vand.u32 2147483648, %v8792_v56  ;;  %v1768_v12 = vadd.f32 %v1725_v59, %v8669_v28 }
 0x212   : > { %6641 = vmatmul.msk.f32.gmra.mxu1 %vm1786_vm0, %v1765_v38  ;;  %1730 = vrot.lane.b32.xlu2 %v1691_v39, %s13665_s20  ;;  %v1542_v38 = vand.u32 2147483648, %v8790_v26  ;;  %v1555_v39 = vsel %vm1553_vm7, %v1554_v30, %v1552_v17  ;;  %v8874_v30 = vadd.f32 %v8634_v61, %v1377_v8  ;;  %v6818_v8 = vld [vmem:[%s13659_s9 + $0x140] sm:$0xf] }
 0x214   : > { %v1543_v40 = vsel %vm1541_vm8, %v1542_v38, %v1540_v27 }
 0x217   : > { %v1721_v51 = vpop.permute.xlu1 %1720  ;;  %v1659_v35 = vpop.permute.xlu2 %1658 }
 0x218   : > { %v1766_v11 = vadd.f32 %v1721_v51, %v8648_v3  ;;  %v1695_v44 = vmul.f32 %v1659_v35, %v1555_v39  ;;  %v1410_v35 = vmul.f32 1.442695, %v8874_v30  ;;  %v6110_v39 = vmul.f32 %v8641_v46, %v8641_v46 }
 0x21a   : > { %6642 = vmatmul.msk.f32.gmra.mxu1 %vm1786_vm0, %v1766_v11  ;;  %1664 = vrot.lane.b32.xlu2 %v1618_v52, %s8250_s15  ;;  %v1570_v52 = vmul.f32 %v7240_v47, %v1569_v29  ;;  %v1561_v11 = vmul.f32 %v7236_v49, %v1560_v43 }
 0x21c   : > { %v1571_v32 = vmul.f32 0.5, %v1570_v52  ;;  %v1562_v54 = vmul.f32 %v8816_v48, %v1561_v11  ;;  %v6884_v11 = vld [vmem:[%s13659_s9 + $0x1e0] sm:$0xf0] }
 0x21e   : > { %v1572_v60 = vsub.f32 1.5, %v1571_v32  ;;  %v1564_v59 = vsel %vm1563_vm9, %v8816_v48, %v1562_v54  ;;  %v6890_v32 = vld [vmem:[%s13659_s9 + $0x1c8] sm:$0xf] }
 0x21f   : > { %v1655_v4 = vpop.permute.xlu1 %1654  ;;  %v1723_v9 = vpop.permute.xlu0 %1722  ;;  %v1567_v49 = vsel %vm1565_vm10, %v1566_v45, %v1564_v59  ;;  %v7016_v59 = vld [vmem:[%s13659_s9 + $0x19c] sm:$0xf0] }
 0x220   : > { %v1693_v20 = vmul.f32 %v1655_v4, %v1531_v2  ;;  %v1767_v21 = vadd.f32 %v1723_v9, %v8656_v13  ;;  %v1573_v42 = vmul.f32 %v7240_v47, %v1572_v60  ;;  %v6850_v60 = vld [vmem:[%s13659_s9 + $0x180] sm:$0xf] }
 0x222   : > { %1734 = vrot.lane.b32.xlu0 %v1693_v20, %s13665_s20  ;;  %6643 = vmatmul.msk.f32.gmra.mxu1 %vm1786_vm0, %v1767_v21  ;;  %v1574_v19 = vmul.f32 %v8824_v55, %v1573_v42  ;;  %v8864_v20 = vadd.f32 %v8634_v61, %v1374_v24  ;;  %v6114_v61 = vmul.f32 %v8684_v50, %v8684_v50  ;;  %v7012_v42 = vld [vmem:[%s13659_s9 + $0x184] sm:$0xf] }
 0x223   : > { %v6117_v24 = vmul.f32 %v8747_v7, %v8747_v7 }
 0x224   : > { %v1576_v21 = vsel %vm1575_vm11, %v8824_v55, %v1574_v19  ;;  %v1408_v47 = vmul.f32 1.442695, %v8864_v20 }
 0x225   : > { %v1579_v17 = vsel %vm1577_vm12, %v1578_v23, %v1576_v21 }
 0x226   : > { %7241 = vpow2.f32 %v1408_v47 }
 0x227   : > { %v1657_v41 = vpop.permute.xlu0 %1656  ;;  %7243 = vpow2.f32 %v1410_v35  ;;  %v6820_v35 = vld [vmem:[%s13659_s9 + $0x160] sm:$0xf0] }
 0x228   : > { %v1694_v51 = vmul.f32 %v1657_v41, %v1543_v40 }
 0x22a   : > { %1738 = vrot.lane.b32.xlu0 %v1695_v44, %s13665_s20  ;;  %6644 = vmatmul.msk.f32.gmra.mxu1 %vm1786_vm0, %v1768_v12  ;;  %v6882_v12 = vld [vmem:[%s13659_s9 + $0x1c0] sm:$0xf] }
 0x22b   : > { %1736 = vrot.lane.b32.xlu2 %v1694_v51, %s13665_s20  ;;  %v7024_v44 = vld [vmem:[%s13659_s9 + $0x1dc] sm:$0xf0]  ;;  %v7020_v51 = vld [vmem:[%s13659_s9 + $0x1c4] sm:$0xf] }
 0x22c   : > { %v8878_v38 = vpop.eup %7241  ;;  %v6883_v52 = vor.u32 %v7024_v44, %v6882_v12  ;;  %v6786_v44 = vld [vmem:[%s13659_s9 + $0x100] sm:$0xf] }
 0x22d   : > { %7245 = vrsqrt.f32 %v8878_v38  ;;  %v8884_v40 = vpop.eup %7243  ;;  %vm1587_vm13 = vcmp.eq.f32.partialorder %v8878_v38, inf  ;;  %vm1589_vm14 = vcmp.eq.f32.partialorder %v8878_v38, 0.0 }
 0x22e   : > { %7247 = vrsqrt.f32 %v8884_v40  ;;  %2326 = vmatpush.bf16.msra.mxu2 %v6883_v52  ;;  %v6996_v52 = vld [vmem:[%s13659_s9 + $0x104] sm:$0xf]  ;;  %vm1599_vm15 = vcmp.eq.f32.partialorder %v8884_v40, inf  ;;  %vm1601_vm1 = vcmp.eq.f32.partialorder %v8884_v40, 0.0 }
 0x22f   : > { %v1727_v57 = vpop.permute.xlu1 %1726 }
 0x230   : > { %v1769_v58 = vadd.f32 %v1727_v57, %v8684_v50  ;;  %v7025_v57 = vld [vmem:[%s13659_s9 + $0x1e4] sm:$0xf0] }
 0x231   : > { %v6891_v54 = vor.u32 %v7025_v57, %v6890_v32 }
 0x232   : > { %6645 = vmatmul.msk.f32.gmra.mxu1 %vm1786_vm0, %v1769_v58  ;;  %v6887_v58 = vor.u32 %v7020_v51, %v6884_v11  ;;  %v7000_v51 = vld [vmem:[%s13659_s9 + $0x11c] sm:$0xf0]  ;;  %v6120_v11 = vmul.f32 %v8777_v37, %v8777_v37 }
 0x233   : > { %v8888_v41 = vpop.eup %7245  ;;  %2424 = vmatpush.bf16.msra.mxu0 %v6891_v54  ;;  %v6787_v57 = vor.u32 %v7000_v51, %v6786_v44  ;;  %v6794_v54 = vld [vmem:[%s13659_s9 + $0x108] sm:$0xf] }
 0x234   : > { %v1581_v43 = vmul.f32 %v8888_v41, %v8878_v38  ;;  %2375 = vmatpush.bf16.msra.mxu3 %v6887_v58  ;;  %v6788_v58 = vld [vmem:[%s13659_s9 + $0x120] sm:$0xf0]  ;;  %v6985_v44 = vld [vmem:[%s13659_s9 + $0xa4] sm:$0xf0] }
 0x236   : > { %v1582_v45 = vmul.f32 %v8888_v41, %v1581_v43 }
 0x237   : > { %v1661_v2 = vpop.permute.xlu1 %1660  ;;  %v1729_v4 = vpop.permute.xlu0 %1728 }
 0x238   : > { %v1696_v9 = vmul.f32 %v1661_v2, %v1567_v49  ;;  %v1770_v15 = vadd.f32 %v1729_v4, %v8700_v1  ;;  %v6851_v49 = vor.u32 %v7016_v59, %v6850_v60  ;;  %v6852_v2 = vld [vmem:[%s13659_s9 + $0x1a0] sm:$0xf0]  ;;  %v6858_v4 = vld [vmem:[%s13659_s9 + $0x188] sm:$0xf]  ;;  %v1583_v23 = vmul.f32 0.5, %v1582_v45 }
 0x239   : > { %v6855_v19 = vor.u32 %v7012_v42, %v6852_v2  ;;  %v7001_v60 = vld [vmem:[%s13659_s9 + $0x124] sm:$0xf0]  ;;  %v6791_v59 = vor.u32 %v6996_v52, %v6788_v58  ;;  %v6992_v2 = vld [vmem:[%s13659_s9 + $0xdc] sm:$0xf0] }
 0x23a   : > { %1740 = vrot.lane.b32.xlu1 %v1696_v9, %s13665_s20  ;;  %6646 = vmatmul.msk.f32.gmra.mxu1 %vm1786_vm0, %v1770_v15  ;;  %v7017_v9 = vld [vmem:[%s13659_s9 + $0x1a4] sm:$0xf0]  ;;  %v8933_v15 = vpop.eup %7247  ;;  %v6795_v42 = vor.u32 %v7001_v60, %v6794_v54 }
 0x23b   : > { %v6859_v21 = vor.u32 %v7017_v9, %v6858_v4  ;;  %2327 = vmatpush.bf16.msra.mxu2 %v6851_v49  ;;  %v1593_v47 = vmul.f32 %v8933_v15, %v8884_v40  ;;  %2376 = vmatpush.bf16.msra.mxu3 %v6855_v19  ;;  %v6754_v49 = vld [vmem:[%s13659_s9 + $0xc0] sm:$0xf]  ;;  %v6988_v4 = vld [vmem:[%s13659_s9 + $0xc4] sm:$0xf] }
 0x23c   : > { %v6755_v9 = vor.u32 %v6992_v2, %v6754_v49  ;;  %v6756_v19 = vld [vmem:[%s13659_s9 + $0xe0] sm:$0xf0] }
 0x23d   : > { %2425 = vmatpush.bf16.msra.mxu0 %v6859_v21  ;;  %v1594_v32 = vmul.f32 %v8933_v15, %v1593_v47  ;;  %v6762_v21 = vld [vmem:[%s13659_s9 + $0xc8] sm:$0xf]  ;;  %v6759_v47 = vor.u32 %v6988_v4, %v6756_v19  ;;  %v1590_v4 = vand.u32 2147483648, %v8878_v38 }
 0x23f   : > { %v1663_v27 = vpop.permute.xlu0 %1662  ;;  %v1595_v45 = vmul.f32 0.5, %v1594_v32  ;;  %v6976_v32 = vld [vmem:[%s13659_s9 + $0x5c] sm:$0xf0] }
 0x240   : > { %v1697_v29 = vmul.f32 %v1663_v27, %v1579_v17  ;;  %v7008_v17 = vld [vmem:[%s13659_s9 + $0x15c] sm:$0xf0]  ;;  %v7004_v27 = vld [vmem:[%s13659_s9 + $0x144] sm:$0xf] }
 0x241   : > { %v6823_v43 = vor.u32 %v7004_v27, %v6820_v35  ;;  %v6722_v35 = vld [vmem:[%s13659_s9 + $0x80] sm:$0xf] }
 0x242   : > { %1742 = vrot.lane.b32.xlu2 %v1697_v29, %s13665_s20  ;;  %v6819_v29 = vor.u32 %v7008_v17, %v6818_v8  ;;  %v6123_v17 = vmul.f32 %v8864_v20, %v8864_v20 }
 0x243   : > { %2377 = vmatpush.bf16.msra.mxu3 %v6823_v43 }
 0x244   : > { %2328 = vmatpush.bf16.msra.mxu2 %v6819_v29  ;;  %v1596_v29 = vsub.f32 1.5, %v1595_v45 }
 0x247   : > { %2378 = vmatpush.bf16.msra.mxu3 %v6791_v59  ;;  %v6692_v59 = vld [vmem:[%s13659_s9 + $0x60] sm:$0xf0] }
 0x248   : > { %2329 = vmatpush.bf16.msra.mxu2 %v6787_v57  ;;  %v6972_v57 = vld [vmem:[%s13659_s9 + $0x44] sm:$0xf] }
 0x249   : > { %v6695_v49 = vor.u32 %v6972_v57, %v6692_v59  ;;  %v1602_v57 = vand.u32 2147483648, %v8884_v40  ;;  %v6111_v59 = vmul.f32 %v8648_v3, %v8648_v3 }
 0x24a   : > { %6143 = vrot.lane.b32.xlu2 %v6110_v39, %s8250_s15  ;;  %v6826_v39 = vld [vmem:[%s13659_s9 + $0x148] sm:$0xf] }
 0x24b   : > { %2379 = vmatpush.bf16.msra.mxu3 %v6759_v47  ;;  %v6964_v47 = vld [vmem:[%s13659_s9 + $0x4] sm:$0xf] }
 0x24c   : > { %2330 = vmatpush.bf16.msra.mxu2 %v6755_v9  ;;  %v1597_v9 = vmul.f32 %v8933_v15, %v1596_v29  ;;  %v6660_v15 = vld [vmem:[%s13659_s9 + $0x20] sm:$0xf0] }
 0x24d   : > { %v6663_v29 = vor.u32 %v6964_v47, %v6660_v15 }
 0x252   : > { %6151 = vrot.lane.b32.xlu2 %v6114_v61, %s8250_s15  ;;  %v7009_v61 = vld [vmem:[%s13659_s9 + $0x164] sm:$0xf0] }
 0x253   : > { %v6827_v12 = vor.u32 %v7009_v61, %v6826_v39  ;;  %v6984_v39 = vld [vmem:[%s13659_s9 + $0x9c] sm:$0xf0]  ;;  %v6980_v61 = vld [vmem:[%s13659_s9 + $0x84] sm:$0xf] }
 0x254   : > { %v6723_v43 = vor.u32 %v6984_v39, %v6722_v35 }
 0x255   : > { %2426 = vmatpush.bf16.msra.mxu0 %v6827_v12  ;;  %v6730_v12 = vld [vmem:[%s13659_s9 + $0x88] sm:$0xf] }
 0x256   : > { %v6731_v52 = vor.u32 %v6985_v44, %v6730_v12  ;;  %2331 = vmatpush.bf16.msra.mxu2 %v6723_v43  ;;  %v7021_v12 = vld [vmem:[%s13659_s9 + $0x1cc] sm:$0xf] }
 0x257   : > { %v6892_v44 = vld [vmem:[%s13659_s9 + $0x1e8] sm:$0xf0] }
 0x259   : > { %2427 = vmatpush.bf16.msra.mxu0 %v6795_v42  ;;  %v6698_v42 = vld [vmem:[%s13659_s9 + $0x48] sm:$0xf] }
 0x25a   : > { %6157 = vrot.lane.b32.xlu2 %v6117_v24, %s8250_s15  ;;  %v1584_v24 = vsub.f32 1.5, %v1583_v23  ;;  %v6993_v23 = vld [vmem:[%s13659_s9 + $0xe4] sm:$0xf0] }
 0x25b   : > { %v6763_v8 = vor.u32 %v6993_v23, %v6762_v21  ;;  %v6658_v21 = vld [vmem:[%s13659_s9] sm:$0xf] }
 0x25c   : > { %v1585_v27 = vmul.f32 %v8888_v41, %v1584_v24  ;;  %v6724_v41 = vld [vmem:[%s13659_s9 + $0xa0] sm:$0xf0]  ;;  %v6977_v24 = vld [vmem:[%s13659_s9 + $0x64] sm:$0xf0]  ;;  %v6968_v23 = vld [vmem:[%s13659_s9 + $0x1c] sm:$0xf0] }
 0x25d   : > { %2428 = vmatpush.bf16.msra.mxu0 %v6763_v8  ;;  %v6727_v51 = vor.u32 %v6980_v61, %v6724_v41  ;;  %v6699_v2 = vor.u32 %v6977_v24, %v6698_v42  ;;  %v6659_v8 = vor.u32 %v6968_v23, %v6658_v21  ;;  %v1598_v41 = vmul.f32 %v8884_v40, %v1597_v9  ;;  %v7013_v42 = vld [vmem:[%s13659_s9 + $0x18c] sm:$0xf]  ;;  %v9095_v9 = vld [vmem:[%s13658_s8] ss:$0 sm:$0xff] }
 0x25e   : > { %v1586_v54 = vmul.f32 %v8878_v38, %v1585_v27  ;;  %v6969_v27 = vld [vmem:[%s13659_s9 + $0x24] sm:$0xf0]  ;;  %v6860_v24 = vld [vmem:[%s13659_s9 + $0x1a8] sm:$0xf0]  ;;  %v6116_v21 = vmul.f32 %v8755_v14, %v8755_v14 }
 0x25f   : > { %2380 = vmatpush.bf16.msra.mxu3 %v6727_v51 }
 0x260   : > { %v1588_v19 = vsel %vm1587_vm13, %v8878_v38, %v1586_v54 }
 0x261   : > { %2429 = vmatpush.bf16.msra.mxu0 %v6731_v52  ;;  %v1591_v61 = vsel %vm1589_vm14, %v1590_v4, %v1588_v19  ;;  %v6112_v19 = vmul.f32 %v8656_v13, %v8656_v13 }
 0x262   : > { %6163 = vrot.lane.b32.xlu2 %v6120_v11, %s8250_s15  ;;  %v6690_v11 = vld [vmem:[%s13659_s9 + $0x40] sm:$0xf] }
 0x263   : > { %v6691_v60 = vor.u32 %v6976_v32, %v6690_v11  ;;  %2381 = vmatpush.bf16.msra.mxu3 %v6695_v49  ;;  %v6895_v11 = vor.u32 %v7021_v12, %v6892_v44  ;;  %v1600_v32 = vsel %vm1599_vm15, %v8884_v40, %v1598_v41  ;;  %v6113_v49 = vmul.f32 %v8669_v28, %v8669_v28 }
 0x264   : > { %v6115_v41 = vmul.f32 %v8700_v1, %v8700_v1  ;;  %v6119_v44 = vmul.f32 %v8774_v36, %v8774_v36 }
 0x265   : > { %2332 = vmatpush.bf16.msra.mxu2 %v6691_v60  ;;  %2430 = vmatpush.bf16.msra.mxu0 %v6699_v2  ;;  %v6863_v2 = vor.u32 %v7013_v42, %v6860_v24 }
 0x266   : > { %2473 = vmatpush.bf16.msra.mxu1 %v6895_v11  ;;  %v6118_v11 = vmul.f32 %v8764_v34, %v8764_v34 }
 0x267   : > { %2382 = vmatpush.bf16.msra.mxu3 %v6663_v29 }
 0x269   : > { %2333 = vmatpush.bf16.msra.mxu2 %v6659_v8 }
 0x26a   : > { %6169 = vrot.lane.b32.xlu2 %v6123_v17, %s8250_s15  ;;  %v6666_v17 = vld [vmem:[%s13659_s9 + $0x8] sm:$0xf]  ;;  %2474 = vmatpush.bf16.msra.mxu1 %v6863_v2 }
 0x26b   : > { %v6667_v35 = vor.u32 %v6969_v27, %v6666_v17 }
 0x26c   : > { %v1731_v58 = vpop.permute.xlu2 %1730 }
 0x26d   : > { %v1771_v45 = vadd.f32 %v1731_v58, %v8755_v14  ;;  %2431 = vmatpush.bf16.msra.mxu0 %v6667_v35  ;;  %v1603_v58 = vsel %vm1601_vm1, %v1602_v57, %v1600_v32 }
 0x26f   : > { %6647 = vmatmul.msk.f32.gmra.mxu1 %vm1786_vm0, %v1771_v45  ;;  %v6109_v45 = vmul.f32 %v8637_v63, %v8637_v63 }
 0x274   : > { %v1733_v39 = vpop.permute.xlu1 %1732  ;;  %v1665_v43 = vpop.permute.xlu2 %1664 }
 0x275   : > { %v1772_v51 = vadd.f32 %v1733_v39, %v8747_v7  ;;  %v1698_v52 = vmul.f32 %v1665_v43, %v1591_v61  ;;  %v7005_v39 = vld [vmem:[%s13659_s9 + $0x14c] sm:$0xf] }
 0x276   : > { %v6828_v61 = vld [vmem:[%s13659_s9 + $0x168] sm:$0xf0] }
 0x277   : > { %1744 = vrot.lane.b32.xlu0 %v1698_v52, %s14112_s27  ;;  %6648 = vmatmul.msk.f32.gmra.mxu1 %vm1786_vm0, %v1772_v51  ;;  %v6831_v12 = vor.u32 %v7005_v39, %v6828_v61 }
 0x279   : > { %2475 = vmatpush.bf16.msra.mxu1 %v6831_v12  ;;  %v6124_v12 = vmul.f32 %v8874_v30, %v8874_v30 }
 0x27c   : > { %v1667_v54 = vpop.permute.xlu1 %1666 }
 0x27d   : > { %v1699_v60 = vmul.f32 %v1667_v54, %v1603_v58  ;;  %v6122_v58 = vmul.f32 %v8807_v18, %v8807_v18 }
 0x27f   : > { %1746 = vrot.lane.b32.xlu1 %v1699_v60, %s14112_s27  ;;  %6145 = vrot.lane.b32.xlu0 %v6111_v59, %s8250_s15 }
 0x285   : > { %v1737_v27 = vpop.permute.xlu2 %1736 }
 0x286   : > { %v1774_v32 = vadd.f32 %v1737_v27, %v8774_v36  ;;  %v6989_v27 = vld [vmem:[%s13659_s9 + $0xcc] sm:$0xf] }
 0x287   : > { %6141 = vrot.lane.b32.xlu1 %v6109_v45, %s8250_s15  ;;  %v1852_v4 = vpop.f32.mrf.mxu1  ;;  %6149 = vrot.lane.b32.xlu0 %v6113_v49, %s8250_s15  ;;  %v6997_v45 = vld [vmem:[%s13659_s9 + $0x10c] sm:$0xf] }
 0x288   : > { %v1853_v23 = vadd.f32 %v9095_v9, %v1852_v4  ;;  %v6796_v49 = vld [vmem:[%s13659_s9 + $0x128] sm:$0xf0] }
 0x28a   : > { %v1900_v15 = vmax.f32 %v1853_v23, 0.0  ;;  %v6799_v23 = vor.u32 %v6997_v45, %v6796_v49  ;;  %v6668_v45 = vld [vmem:[%s13659_s9 + $0x28] sm:$0xf0] }
 0x28c   : > { %2476 = vmatpush.bf16.msra.mxu1 %v6799_v23 }
 0x28f   : > { %6147 = vrot.lane.b32.xlu1 %v6112_v19, %s8250_s15  ;;  %v1855_v47 = vpop.f32.mrf.mxu1  ;;  %6155 = vrot.lane.b32.xlu0 %v6116_v21, %s8250_s15  ;;  %v6121_v21 = vmul.f32 %v8795_v33, %v8795_v33 }
 0x290   : > { %v1856_v8 = vadd.f32 %v9095_v9, %v1855_v47 }
 0x292   : > { %v1901_v17 = vmax.f32 %v1856_v8, 0.0 }
 0x294   : > { %v9105_v29 = vpack.c.bf16 %v1901_v17, %v1900_v15  ;;  %v1735_v35 = vpop.permute.xlu0 %1734 }
 0x295   : > { %v1773_v43 = vadd.f32 %v1735_v35, %v8764_v34  ;;  %v6764_v35 = vld [vmem:[%s13659_s9 + $0xe8] sm:$0xf0] }
 0x296   : > { %2334 = vmatmul.bf16.vlgmr.msra.gmra.mxu2 %v9105_v29  ;;  %2383 = vmatmul.bf16.vlgmr.msra.gmra.mxu3 %v9105_v29  ;;  %v6767_v61 = vor.u32 %v6989_v27, %v6764_v35 }
 0x297   : > { %2432 = vmatmul.bf16.vlgmr.msra.gmra.mxu0 %v9105_v29  ;;  %6153 = vrot.lane.b32.xlu1 %v6115_v41, %s8250_s15  ;;  %v1858_v51 = vpop.f32.mrf.mxu1 }
 0x298   : > { %6161 = vrot.lane.b32.xlu0 %v6119_v44, %s8250_s15  ;;  %6649 = vmatmul.msk.f32.gmra.mxu1 %vm1786_vm0, %v1773_v43  ;;  %v1859_v57 = vadd.f32 %v9095_v9, %v1858_v51  ;;  %v6981_v43 = vld [vmem:[%s13659_s9 + $0x8c] sm:$0xf] }
 0x299   : > { %2477 = vmatpush.bf16.msra.mxu1 %v6767_v61 }
 0x29a   : > { %v1902_v59 = vmax.f32 %v1859_v57, 0.0 }
 0x29c   : > { %v1743_v52 = vpop.permute.xlu2 %1742  ;;  %v1739_v24 = vpop.permute.xlu0 %1738 }
 0x29d   : > { %v1775_v47 = vadd.f32 %v1739_v24, %v8777_v37 }
 0x29f   : > { %6159 = vrot.lane.b32.xlu1 %v6118_v11, %s8250_s15  ;;  %v1861_v54 = vpop.f32.mrf.mxu1 }
 0x2a0   : > { %6167 = vrot.lane.b32.xlu0 %v6122_v58, %s8250_s15  ;;  %v1862_v60 = vadd.f32 %v9095_v9, %v1861_v54  ;;  %6650 = vmatmul.msk.f32.gmra.mxu1 %vm1786_vm0, %v1774_v32 }
 0x2a2   : > { %v1903_v42 = vmax.f32 %v1862_v60, 0.0  ;;  %v1777_v60 = vadd.f32 %v1743_v52, %v8807_v18  ;;  %v6965_v52 = vld [vmem:[%s13659_s9 + $0xc] sm:$0xf] }
 0x2a3   : > { %v6671_v49 = vor.u32 %v6965_v52, %v6668_v45 }
 0x2a4   : > { %v9140_v2 = vpack.c.bf16 %v1903_v42, %v1902_v59  ;;  %v6144_v4 = vpop.permute.xlu2 %6143  ;;  %v6973_v59 = vld [vmem:[%s13659_s9 + $0x4c] sm:$0xf] }
 0x2a5   : > { %v6190_v19 = vadd.f32 %v8650_v5, %v6144_v4  ;;  %v6700_v42 = vld [vmem:[%s13659_s9 + $0x68] sm:$0xf0] }
 0x2a6   : > { %2339 = vmatmul.bf16.gmra.mxu2 %v9140_v2  ;;  %2388 = vmatmul.bf16.gmra.mxu3 %v9140_v2  ;;  %v6703_v24 = vor.u32 %v6973_v59, %v6700_v42 }
 0x2a7   : > { %v6913_v8 = vadd.f32 -1.0, %v6190_v19  ;;  %2437 = vmatmul.bf16.gmra.mxu0 %v9140_v2  ;;  %6165 = vrot.lane.b32.xlu1 %v6121_v21, %s8250_s15  ;;  %v1864_v15 = vpop.f32.mrf.mxu1 }
 0x2a8   : > { %6651 = vmatmul.msk.f32.gmra.mxu1 %vm1786_vm0, %v1775_v47  ;;  %v1865_v44 = vadd.f32 %v9095_v9, %v1864_v15 }
 0x2a9   : > { %v6222_v5 = vsub.f32 %v6913_v8, %v8641_v46  ;;  %v6732_v46 = vld [vmem:[%s13659_s9 + $0xa8] sm:$0xf0] }
 0x2aa   : > { %v6735_v51 = vor.u32 %v6981_v43, %v6732_v46  ;;  %v1904_v57 = vmax.f32 %v1865_v44, 0.0 }
 0x2ab   : > { %v6238_v17 = vmul.f32 0.5, %v6222_v5 }
 0x2ac   : > { %v1741_v39 = vpop.permute.xlu1 %1740  ;;  %2478 = vmatpush.bf16.msra.mxu1 %v6735_v51  ;;  %v6152_v47 = vpop.permute.xlu2 %6151 }
 0x2ad   : > { %v1776_v41 = vadd.f32 %v1741_v39, %v8795_v33  ;;  %6271 = vrot.lane.b32.xlu2 %v6238_v17, %s14112_s27  ;;  %v6194_v46 = vadd.f32 %v8702_v6, %v6152_v47 }
 0x2af   : > { %6171 = vrot.lane.b32.xlu1 %v6124_v12, %s8250_s15  ;;  %v1867_v11 = vpop.f32.mrf.mxu1  ;;  %v6917_v51 = vadd.f32 -1.0, %v6194_v46  ;;  %s6931_s15 = sshll.u32 %s15015_s19, 4 }
 0x2b0   : > { %v1868_v32 = vadd.f32 %v9095_v9, %v1867_v11  ;;  %6652 = vmatmul.msk.f32.gmra.mxu1 %vm1786_vm0, %v1776_v41  ;;  %s11344_s18 = scalar_lea.vmem %s13652_s2, %s6931_s15 }
 0x2b1   : > { %2479 = vmatpush.bf16.msra.mxu1 %v6703_v24  ;;  %v6226_v6 = vsub.f32 %v6917_v51, %v8684_v50 }
 0x2b2   : > { %v1905_v58 = vmax.f32 %v1868_v32, 0.0 }
 0x2b3   : > { %v6242_v52 = vmul.f32 0.5, %v6226_v6 }
 0x2b4   : > { %v9172_v54 = vpack.c.bf16 %v1905_v58, %v1904_v57  ;;  %v6158_v12 = vpop.permute.xlu2 %6157 }
 0x2b5   : > { %2480 = vmatpush.bf16.msra.mxu1 %v6671_v49 }
 0x2b6   : > { %2344 = vmatmul.bf16.gmra.mxu2 %v9172_v54  ;;  %2393 = vmatmul.bf16.gmra.mxu3 %v9172_v54 }
 0x2b7   : > { %2442 = vmatmul.bf16.gmra.mxu0 %v9172_v54  ;;  %v1870_v4 = vpop.f32.mrf.mxu1 }
 0x2b8   : > { %6653 = vmatmul.msk.f32.gmra.mxu1 %vm1786_vm0, %v1777_v60  ;;  %v1871_v23 = vadd.f32 %v9095_v9, %v1870_v4  ;;  %v6197_v60 = vadd.f32 %v8752_v10, %v6158_v12 }
 0x2ba   : > { %v1906_v5 = vmax.f32 %v1871_v23, 0.0  ;;  %v6920_v45 = vadd.f32 -1.0, %v6197_v60 }
 0x2bc   : > { %v6164_v49 = vpop.permute.xlu2 %6163 }
 0x2e9   : > { %v1745_v19 = vpop.permute.xlu0 %1744 }
 0x2ea   : > { %v1778_v21 = vadd.f32 %v1745_v19, %v8864_v20 }
 0x2ec   : > { %v1873_v8 = vpop.f32.mrf.mxu1  ;;  %6654 = vmatmul.msk.f32.gmra.mxu1 %vm1786_vm0, %v1778_v21 }
 0x2ed   : > { %v1874_v15 = vadd.f32 %v9095_v9, %v1873_v8 }
 0x2ef   : > { %v1907_v17 = vmax.f32 %v1874_v15, 0.0 }
 0x2f1   : > { %v9195_v27 = vpack.c.bf16 %v1907_v17, %v1906_v5  ;;  %v1747_v35 = vpop.permute.xlu1 %1746  ;;  %v6146_v39 = vpop.permute.xlu0 %6145 }
 0x2f2   : > { %v1779_v61 = vadd.f32 %v1747_v35, %v8874_v30  ;;  %v6191_v43 = vadd.f32 %v8658_v16, %v6146_v39 }
 0x2f3   : > { %2349 = vmatmul.bf16.gmra.mxu2 %v9195_v27  ;;  %2398 = vmatmul.bf16.gmra.mxu3 %v9195_v27 }
 0x2f4   : > { %v6914_v41 = vadd.f32 -1.0, %v6191_v43  ;;  %2447 = vmatmul.bf16.gmra.mxu0 %v9195_v27  ;;  %6655 = vmatmul.msk.f32.gmra.mxu1 %vm1786_vm0, %v1779_v61 }
 0x2f6   : > { %v6223_v44 = vsub.f32 %v6914_v41, %v8648_v3 }
 0x2f8   : > { %v6239_v11 = vmul.f32 0.5, %v6223_v44 }
 0x2f9   : > { %v6142_v32 = vpop.permute.xlu1 %6141  ;;  %v6150_v57 = vpop.permute.xlu0 %6149 }
 0x2fa   : > { %v6189_v16 = vadd.f32 %v8643_v0, %v6142_v32  ;;  %v6193_v58 = vadd.f32 %v8686_v53, %v6150_v57  ;;  %6273 = vrot.lane.b32.xlu1 %v6239_v11, %s14112_s27 }
 0x2fc   : > { %v6912_v59 = vadd.f32 -1.0, %v6189_v16  ;;  %v6916_v42 = vadd.f32 -1.0, %v6193_v58  ;;  %2481 = vmatmul.bf16.vlgmr.msra.gmra.mxu1 %v9105_v29 }
 0x2fe   : > { %v6221_v3 = vsub.f32 %v6912_v59, %v8637_v63  ;;  %v6225_v24 = vsub.f32 %v6916_v42, %v8669_v28  ;;  %v6229_v63 = vsub.f32 %v6920_v45, %v8747_v7  ;;  %v6200_v28 = vadd.f32 %v8792_v56, %v6164_v49 }
 0x300   : > { %v6237_v0 = vmul.f32 0.5, %v6221_v3  ;;  %v6241_v4 = vmul.f32 0.5, %v6225_v24  ;;  %v6245_v15 = vmul.f32 0.5, %v6229_v63  ;;  %v6898_v63 = vld [vmem:[%s13659_s9 + $0x1d0] sm:$0xf] }
 0x301   : > { %v6148_v53 = vpop.permute.xlu1 %6147  ;;  %v6156_v19 = vpop.permute.xlu0 %6155 }
 0x302   : > { %v6192_v21 = vadd.f32 %v8671_v31, %v6148_v53  ;;  %v6196_v50 = vadd.f32 %v8766_v22, %v6156_v19  ;;  %6269 = vrot.lane.b32.xlu0 %v6237_v0, %s14112_s27  ;;  %6279 = vrot.lane.b32.xlu1 %v6242_v52, %s14112_s27  ;;  %v6923_v31 = vadd.f32 -1.0, %v6200_v28  ;;  %v7026_v28 = vld [vmem:[%s13659_s9 + $0x1ec] sm:$0xf0] }
 0x303   : > { %6277 = vrot.lane.b32.xlu2 %v6241_v4, %s14112_s27 }
 0x304   : > { %v6915_v10 = vadd.f32 -1.0, %v6192_v21  ;;  %v6919_v23 = vadd.f32 -1.0, %v6196_v50 }
 0x306   : > { %v6224_v47 = vsub.f32 %v6915_v10, %v8656_v13  ;;  %v6228_v8 = vsub.f32 %v6919_v23, %v8755_v14  ;;  %v6232_v13 = vsub.f32 %v6923_v31, %v8777_v37  ;;  %v1876_v14 = vpop.f32.mrf.mxu1  ;;  %v7022_v10 = vld [vmem:[%s13659_s9 + $0x1d4] sm:$0xf]  ;;  %v6899_v23 = vor.u32 %v7026_v28, %v6898_v63 }
 0x307   : > { %v1877_v37 = vadd.f32 %v9095_v9, %v1876_v14  ;;  %v6868_v14 = vld [vmem:[%s13659_s9 + $0x1b0] sm:$0xf0] }
 0x308   : > { %v6240_v5 = vmul.f32 0.5, %v6224_v47  ;;  %v6244_v22 = vmul.f32 0.5, %v6228_v8  ;;  %v6248_v46 = vmul.f32 0.5, %v6232_v13  ;;  %v6900_v47 = vld [vmem:[%s13659_s9 + $0x1f0] sm:$0xf0]  ;;  %2522 = vmatpush.bf16.msrb.mxu2 %v6899_v23 }
 0x309   : > { %v6154_v17 = vpop.permute.xlu1 %6153  ;;  %v1908_v32 = vmax.f32 %v1877_v37, 0.0  ;;  %v6906_v8 = vld [vmem:[%s13659_s9 + $0x1d8] sm:$0xf]  ;;  %v6903_v31 = vor.u32 %v7022_v10, %v6900_v47  ;;  %v7014_v13 = vld [vmem:[%s13659_s9 + $0x194] sm:$0xf] }
 0x30a   : > { %v6195_v35 = vadd.f32 %v8715_v25, %v6154_v17  ;;  %v6162_v39 = vpop.permute.xlu0 %6161  ;;  %6275 = vrot.lane.b32.xlu0 %v6240_v5, %s14112_s27  ;;  %6285 = vrot.lane.b32.xlu1 %v6245_v15, %s14112_s27  ;;  %v7027_v15 = vld [vmem:[%s13659_s9 + $0x1f4] sm:$0xf0]  ;;  %v6908_v17 = vld [vmem:[%s13659_s9 + $0x1f8] sm:$0xf0] }
 0x30b   : > { %v6199_v7 = vadd.f32 %v8790_v26, %v6162_v39  ;;  %6283 = vrot.lane.b32.xlu2 %v6244_v22, %s14112_s27  ;;  %v6907_v5 = vor.u32 %v7027_v15, %v6906_v8  ;;  %v7023_v22 = vld [vmem:[%s13659_s9 + $0x1dc] sm:$0xf]  ;;  %2571 = vmatpush.bf16.msrb.mxu3 %v6903_v31  ;;  %v6866_v39 = vld [vmem:[%s13659_s9 + $0x190] sm:$0xf]  ;;  %v6990_v63 = vld [vmem:[%s13659_s9 + $0xd4] sm:$0xf] }
 0x30c   : > { %v6918_v56 = vadd.f32 -1.0, %v6195_v35  ;;  %2486 = vmatmul.bf16.gmra.mxu1 %v9140_v2  ;;  %v6911_v35 = vor.u32 %v7023_v22, %v6908_v17  ;;  %v7010_v37 = vld [vmem:[%s13659_s9 + $0x16c] sm:$0xf0]  ;;  %v6772_v23 = vld [vmem:[%s13659_s9 + $0xf0] sm:$0xf0] }
 0x30d   : > { %v6922_v61 = vadd.f32 -1.0, %v6199_v7  ;;  %2620 = vmatpush.bf16.msrb.mxu0 %v6907_v5  ;;  %v7018_v7 = vld [vmem:[%s13659_s9 + $0x1ac] sm:$0xf0]  ;;  %v6778_v47 = vld [vmem:[%s13659_s9 + $0xd8] sm:$0xf]  ;;  %v6775_v31 = vor.u32 %v6990_v63, %v6772_v23 }
 0x30e   : > { %v6227_v43 = vsub.f32 %v6918_v56, %v8700_v1  ;;  %v6867_v56 = vor.u32 %v7018_v7, %v6866_v39  ;;  %2669 = vmatpush.bf16.msrb.mxu1 %v6911_v35  ;;  %v6995_v8 = vld [vmem:[%s13659_s9 + $0xf4] sm:$0xf0]  ;;  %v6991_v22 = vld [vmem:[%s13659_s9 + $0xdc] sm:$0xf]  ;;  %v6738_v39 = vld [vmem:[%s13659_s9 + $0x90] sm:$0xf] }
 0x30f   : > { %v6231_v25 = vsub.f32 %v6922_v61, %v8774_v36  ;;  %v6874_v61 = vld [vmem:[%s13659_s9 + $0x198] sm:$0xf]  ;;  %v6779_v5 = vor.u32 %v6995_v8, %v6778_v47  ;;  %v6780_v17 = vld [vmem:[%s13659_s9 + $0xf8] sm:$0xf0]  ;;  %v6986_v7 = vld [vmem:[%s13659_s9 + $0xac] sm:$0xf0] }
 0x310   : > { %v6243_v41 = vmul.f32 0.5, %v6227_v43  ;;  %v7019_v43 = vld [vmem:[%s13659_s9 + $0x1b4] sm:$0xf0]  ;;  %2523 = vmatpush.bf16.msrb.mxu2 %v6867_v56  ;;  %v6783_v35 = vor.u32 %v6991_v22, %v6780_v17  ;;  %v6739_v56 = vor.u32 %v6986_v7, %v6738_v39  ;;  %v9465_v47 = vld [vmem:[%s13660_s10] sm:$0xff] }
 0x311   : > { %v6247_v12 = vmul.f32 0.5, %v6231_v25  ;;  %v6160_v44 = vpop.permute.xlu1 %6159  ;;  %v6871_v25 = vor.u32 %v7014_v13, %v6868_v14  ;;  %v6982_v13 = vld [vmem:[%s13659_s9 + $0x94] sm:$0xf] }
 0x312   : > { %v6198_v51 = vadd.f32 %v8780_v62, %v6160_v44  ;;  %6281 = vrot.lane.b32.xlu0 %v6243_v41, %s14112_s27  ;;  %6291 = vrot.lane.b32.xlu1 %v6248_v46, %s14112_s27  ;;  %v6875_v46 = vor.u32 %v7019_v43, %v6874_v61  ;;  %v7015_v41 = vld [vmem:[%s13659_s9 + $0x19c] sm:$0xf]  ;;  %v6740_v14 = vld [vmem:[%s13659_s9 + $0xb0] sm:$0xf0] }
 0x313   : > { %6289 = vrot.lane.b32.xlu2 %v6247_v12, %s14112_s27  ;;  %v6876_v12 = vld [vmem:[%s13659_s9 + $0x1b8] sm:$0xf0]  ;;  %2572 = vmatpush.bf16.msrb.mxu3 %v6871_v25  ;;  %v6746_v61 = vld [vmem:[%s13659_s9 + $0x98] sm:$0xf]  ;;  %v6743_v25 = vor.u32 %v6982_v13, %v6740_v14 }
 0x314   : > { %v6921_v26 = vadd.f32 -1.0, %v6198_v51  ;;  %v6879_v44 = vor.u32 %v7015_v41, %v6876_v12  ;;  %2621 = vmatpush.bf16.msrb.mxu0 %v6875_v46  ;;  %v6834_v51 = vld [vmem:[%s13659_s9 + $0x150] sm:$0xf]  ;;  %v6987_v43 = vld [vmem:[%s13659_s9 + $0xb4] sm:$0xf0] }
 0x315   : > { %v1879_v11 = vpop.f32.mrf.mxu1  ;;  %v6747_v46 = vor.u32 %v6987_v43, %v6746_v61  ;;  %v6983_v41 = vld [vmem:[%s13659_s9 + $0x9c] sm:$0xf] }
 0x316   : > { %v6230_v1 = vsub.f32 %v6921_v26, %v8764_v34  ;;  %v1880_v36 = vadd.f32 %v9095_v9, %v1879_v11  ;;  %v7006_v26 = vld [vmem:[%s13659_s9 + $0x154] sm:$0xf]  ;;  %v6835_v11 = vor.u32 %v7010_v37, %v6834_v51  ;;  %2670 = vmatpush.bf16.msrb.mxu1 %v6879_v44  ;;  %v6748_v12 = vld [vmem:[%s13659_s9 + $0xb8] sm:$0xf0]  ;;  %v2433_v51 = vpop.f32.mrf.mxu0  ;;  %v6706_v37 = vld [vmem:[%s13659_s9 + $0x50] sm:$0xf] }
 0x317   : > { %v6751_v44 = vor.u32 %v6983_v41, %v6748_v12 }
 0x318   : > { %v6246_v57 = vmul.f32 0.5, %v6230_v1  ;;  %v1909_v16 = vmax.f32 %v1880_v36, 0.0  ;;  %v6836_v1 = vld [vmem:[%s13659_s9 + $0x170] sm:$0xf0]  ;;  %v6842_v36 = vld [vmem:[%s13659_s9 + $0x158] sm:$0xf]  ;;  %2524 = vmatpush.bf16.msrb.mxu2 %v6835_v11 }
 0x319   : > { %v6166_v58 = vpop.permute.xlu1 %6165  ;;  %v9370_v28 = vpop.f32.mrf.mxu2  ;;  %v6974_v11 = vld [vmem:[%s13659_s9 + $0x54] sm:$0xf] }
 0x31a   : > { %v9238_v6 = vpack.c.bf16 %v1909_v16, %v1908_v32  ;;  %v6201_v62 = vadd.f32 %v8816_v48, %v6166_v58  ;;  %6287 = vrot.lane.b32.xlu0 %v6246_v57, %s14112_s27  ;;  %v7011_v32 = vld [vmem:[%s13659_s9 + $0x174] sm:$0xf0]  ;;  %v6839_v57 = vor.u32 %v7006_v26, %v6836_v1  ;;  %v7007_v58 = vld [vmem:[%s13659_s9 + $0x15c] sm:$0xf]  ;;  %v9381_v15 = vpop.f32.mrf.mxu3  ;;  %v6978_v26 = vld [vmem:[%s13659_s9 + $0x6c] sm:$0xf0] }
 0x31b   : > { %v6843_v16 = vor.u32 %v7011_v32, %v6842_v36  ;;  %v6707_v1 = vor.u32 %v6978_v26, %v6706_v37  ;;  %v6708_v36 = vld [vmem:[%s13659_s9 + $0x70] sm:$0xf0]  ;;  %v6714_v32 = vld [vmem:[%s13659_s9 + $0x58] sm:$0xf] }
 0x31c   : > { %v6924_v60 = vadd.f32 -1.0, %v6201_v62  ;;  %2354 = vmatmul.bf16.gmra.mxu2 %v9238_v6  ;;  %2403 = vmatmul.bf16.gmra.mxu3 %v9238_v6  ;;  %v6844_v62 = vld [vmem:[%s13659_s9 + $0x178] sm:$0xf0] }
 0x31d   : > { %2452 = vmatmul.bf16.gmra.mxu0 %v9238_v6  ;;  %v1882_v34 = vpop.f32.mrf.mxu1  ;;  %2491 = vmatmul.bf16.gmra.mxu1 %v9172_v54 }
 0x31e   : > { %v6233_v59 = vsub.f32 %v6924_v60, %v8795_v33  ;;  %v1883_v3 = vadd.f32 %v9095_v9, %v1882_v34  ;;  %v6847_v60 = vor.u32 %v7007_v58, %v6844_v62  ;;  %2573 = vmatpush.bf16.msrb.mxu3 %v6839_v57  ;;  %2622 = vmatpush.bf16.msrb.mxu0 %v6843_v16  ;;  %v6802_v34 = vld [vmem:[%s13659_s9 + $0x110] sm:$0xf]  ;;  %v6979_v57 = vld [vmem:[%s13659_s9 + $0x74] sm:$0xf0]  ;;  %v6975_v62 = vld [vmem:[%s13659_s9 + $0x5c] sm:$0xf]  ;;  %v2435_v23 = vpop.f32.mrf.mxu0 }
 0x31f   : > { %v6711_v16 = vor.u32 %v6974_v11, %v6708_v36  ;;  %v6715_v58 = vor.u32 %v6979_v57, %v6714_v32 }
 0x320   : > { %v6249_v42 = vmul.f32 0.5, %v6233_v59  ;;  %v1910_v52 = vmax.f32 %v1883_v3, 0.0  ;;  %v7002_v59 = vld [vmem:[%s13659_s9 + $0x12c] sm:$0xf0]  ;;  %2671 = vmatpush.bf16.msrb.mxu1 %v6847_v60  ;;  %v6716_v60 = vld [vmem:[%s13659_s9 + $0x78] sm:$0xf0] }
 0x321   : > { %v6803_v3 = vor.u32 %v7002_v59, %v6802_v34  ;;  %v2337_v34 = vpop.f32.mrf.mxu2  ;;  %v6719_v59 = vor.u32 %v6975_v62, %v6716_v60 }
 0x322   : > { %6293 = vrot.lane.b32.xlu0 %v6249_v42, %s14112_s27  ;;  %v6998_v42 = vld [vmem:[%s13659_s9 + $0x114] sm:$0xf] }
 0x323   : > { %2525 = vmatpush.bf16.msrb.mxu2 %v6803_v3  ;;  %v6674_v3 = vld [vmem:[%s13659_s9 + $0x10] sm:$0xf] }
 0x325   : > { %v1885_v48 = vpop.f32.mrf.mxu1 }
 0x326   : > { %v1886_v24 = vadd.f32 %v9095_v9, %v1885_v48  ;;  %v6804_v48 = vld [vmem:[%s13659_s9 + $0x130] sm:$0xf0]  ;;  %v2438_v14 = vpop.f32.mrf.mxu0 }
 0x328   : > { %v1911_v45 = vmax.f32 %v1886_v24, 0.0  ;;  %v6810_v24 = vld [vmem:[%s13659_s9 + $0x118] sm:$0xf] }
 0x329   : > { %v2340_v8 = vpop.f32.mrf.mxu2 }
 0x32a   : > { %v9250_v49 = vpack.c.bf16 %v1911_v45, %v1910_v52  ;;  %v7003_v52 = vld [vmem:[%s13659_s9 + $0x134] sm:$0xf0]  ;;  %v6807_v45 = vor.u32 %v6998_v42, %v6804_v48  ;;  %v2386_v42 = vpop.f32.mrf.mxu3  ;;  %v6970_v48 = vld [vmem:[%s13659_s9 + $0x2c] sm:$0xf0] }
 0x32c   : > { %2359 = vmatmul.bf16.gmra.mxu2 %v9250_v49  ;;  %2408 = vmatmul.bf16.gmra.mxu3 %v9250_v49 }
 0x32d   : > { %2457 = vmatmul.bf16.gmra.mxu0 %v9250_v49  ;;  %v1888_v0 = vpop.f32.mrf.mxu1  ;;  %2496 = vmatmul.bf16.gmra.mxu1 %v9195_v27 }
 0x32e   : > { %v1889_v33 = vadd.f32 %v9095_v9, %v1888_v0  ;;  %v6811_v0 = vor.u32 %v7003_v52, %v6810_v24  ;;  %2574 = vmatpush.bf16.msrb.mxu3 %v6807_v45  ;;  %v6966_v24 = vld [vmem:[%s13659_s9 + $0x14] sm:$0xf]  ;;  %v6675_v52 = vor.u32 %v6970_v48, %v6674_v3  ;;  %v2440_v36 = vpop.f32.mrf.mxu0 }
 0x32f   : > { %v6676_v45 = vld [vmem:[%s13659_s9 + $0x30] sm:$0xf0] }
 0x330   : > { %v1912_v19 = vmax.f32 %v1889_v33, 0.0  ;;  %v6999_v33 = vld [vmem:[%s13659_s9 + $0x11c] sm:$0xf]  ;;  %2623 = vmatpush.bf16.msrb.mxu0 %v6811_v0  ;;  %v6682_v0 = vld [vmem:[%s13659_s9 + $0x18] sm:$0xf] }
 0x331   : > { %v2342_v41 = vpop.f32.mrf.mxu2 }
 0x332   : > { %2575 = vmatpush.bf16.msrb.mxu3 %v6775_v31  ;;  %v9468_v31 = vperm.slane %v9465_v47, 0  ;;  %v2389_v22 = vpop.f32.mrf.mxu3 }
 0x334   : > { %2624 = vmatpush.bf16.msrb.mxu0 %v6779_v5  ;;  %v9471_v5 = vperm.slane %v9465_v47, 1  ;;  %v9476_v39 = vadd.f32 %v9370_v28, %v9468_v31  ;;  %v9491_v28 = vperm.slane %v9465_v47, 3 }
 0x335   : > { %v1891_v4 = vpop.f32.mrf.mxu1 }
 0x336   : > { %v1892_v53 = vadd.f32 %v9095_v9, %v1891_v4  ;;  %v6812_v4 = vld [vmem:[%s13659_s9 + $0x138] sm:$0xf0]  ;;  %2576 = vmatpush.bf16.msrb.mxu3 %v6743_v25  ;;  %v9480_v7 = vadd.f32 %v9381_v15, %v9471_v5  ;;  %v9504_v37 = vadd.f32 %v2386_v42, %v9471_v5  ;;  %v9520_v62 = vadd.f32 %v2389_v22, %v9471_v5 }
 0x338   : > { %v1913_v21 = vmax.f32 %v1892_v53, 0.0  ;;  %v6815_v53 = vor.u32 %v6999_v33, %v6812_v4  ;;  %2625 = vmatpush.bf16.msrb.mxu0 %v6747_v46  ;;  %v6971_v33 = vld [vmem:[%s13659_s9 + $0x34] sm:$0xf0]  ;;  %v6679_v4 = vor.u32 %v6966_v24, %v6676_v45  ;;  %v2718_v25 = vmax.f32 %v9476_v39, %v9480_v7  ;;  %v2443_v24 = vpop.f32.mrf.mxu0 }
 0x339   : > { %v2345_v57 = vpop.f32.mrf.mxu2  ;;  %v9537_v45 = vadd.f32 %v2342_v41, %v9468_v31 }
 0x33a   : > { %v9258_v50 = vpack.c.bf16 %v1913_v21, %v1912_v19  ;;  %v6770_v19 = vld [vmem:[%s13659_s9 + $0xd0] sm:$0xf]  ;;  %2672 = vmatpush.bf16.msrb.mxu1 %v6815_v53  ;;  %2577 = vmatpush.bf16.msrb.mxu3 %v6711_v16  ;;  %v6683_v53 = vor.u32 %v6971_v33, %v6682_v0  ;;  %v2391_v12 = vpop.f32.mrf.mxu3 }
 0x33b   : > { %v6994_v21 = vld [vmem:[%s13659_s9 + $0xec] sm:$0xf0]  ;;  %v9540_v0 = vadd.f32 %v2391_v12, %v9471_v5 }
 0x33c   : > { %2364 = vmatmul.bf16.gmra.mxu2 %v9258_v50  ;;  %2413 = vmatmul.bf16.gmra.mxu3 %v9258_v50  ;;  %v6771_v10 = vor.u32 %v6994_v21, %v6770_v19  ;;  %v6967_v19 = vld [vmem:[%s13659_s9 + $0x1c] sm:$0xf] }
 0x33d   : > { %2462 = vmatmul.bf16.gmra.mxu0 %v9258_v50  ;;  %2501 = vmatmul.bf16.gmra.mxu1 %v9238_v6  ;;  %v6684_v21 = vld [vmem:[%s13659_s9 + $0x38] sm:$0xf0] }
 0x33e   : > { %2526 = vmatpush.bf16.msrb.mxu2 %v6771_v10  ;;  %2673 = vmatpush.bf16.msrb.mxu1 %v6783_v35  ;;  %v6687_v63 = vor.u32 %v6967_v19, %v6684_v21 }
 0x33f   : > { %2626 = vmatpush.bf16.msrb.mxu0 %v6715_v58  ;;  %2578 = vmatpush.bf16.msrb.mxu3 %v6679_v4  ;;  %v9517_v58 = vadd.f32 %v2340_v8, %v9468_v31 }
 0x341   : > { %v2728_v3 = vmax.f32 %v9517_v58, %v9520_v62 }
 0x342   : > { %2527 = vmatpush.bf16.msrb.mxu2 %v6739_v56  ;;  %2674 = vmatpush.bf16.msrb.mxu1 %v6751_v44  ;;  %v9484_v56 = vperm.slane %v9465_v47, 2  ;;  %v9501_v44 = vadd.f32 %v2337_v34, %v9468_v31  ;;  %v2394_v60 = vpop.f32.mrf.mxu3 }
 0x343   : > { %2627 = vmatpush.bf16.msrb.mxu0 %v6683_v53  ;;  %v2347_v53 = vpop.f32.mrf.mxu2 }
 0x344   : > { %v9494_v15 = vadd.f32 %v2433_v51, %v9484_v56  ;;  %v9514_v32 = vadd.f32 %v2435_v23, %v9484_v56  ;;  %v9530_v48 = vadd.f32 %v2438_v14, %v9484_v56  ;;  %v2445_v23 = vpop.f32.mrf.mxu0 }
 0x346   : > { %2528 = vmatpush.bf16.msrb.mxu2 %v6707_v1  ;;  %2675 = vmatpush.bf16.msrb.mxu1 %v6719_v59  ;;  %v2719_v51 = vmax.f32 %v2718_v25, %v9494_v15  ;;  %v2723_v1 = vmax.f32 %v9501_v44, %v9504_v37  ;;  %v2729_v4 = vmax.f32 %v2728_v3, %v9530_v48 }
 0x347   : > { %v9568_v25 = vadd.f32 %v2443_v24, %v9484_v56 }
 0x348   : > { %v2724_v59 = vmax.f32 %v2723_v1, %v9514_v32 }
 0x34a   : > { %2529 = vmatpush.bf16.msrb.mxu2 %v6675_v52  ;;  %2676 = vmatpush.bf16.msrb.mxu1 %v6687_v63  ;;  %v2396_v19 = vpop.f32.mrf.mxu3  ;;  %v2733_v63 = vmax.f32 %v9537_v45, %v9540_v0 }
 0x34d   : > { %2506 = vmatmul.bf16.gmra.mxu1 %v9250_v49 }
 0x35d   : > { %2511 = vmatmul.bf16.gmra.mxu1 %v9258_v50 }
 0x369   : > { %v1894_v10 = vpop.f32.mrf.mxu1 }
 0x36a   : > { %v1895_v17 = vadd.f32 %v9095_v9, %v1894_v10 }
 0x36c   : > { %v1914_v61 = vmax.f32 %v1895_v17, 0.0  ;;  %v9557_v17 = vadd.f32 %v2345_v57, %v9468_v31 }
 0x371   : > { %v1897_v35 = vpop.f32.mrf.mxu1  ;;  %v2448_v41 = vpop.f32.mrf.mxu0 }
 0x372   : > { %v1898_v13 = vadd.f32 %v9095_v9, %v1897_v35  ;;  %v9560_v35 = vadd.f32 %v2394_v60, %v9471_v5  ;;  %v9586_v60 = vadd.f32 %v2445_v23, %v9484_v56 }
 0x374   : > { %v1915_v43 = vmax.f32 %v1898_v13, 0.0 }
 0x376   : > { %v9488_v46 = vpack.c.bf16 %v1915_v43, %v1914_v61  ;;  %v2350_v13 = vpop.f32.mrf.mxu2  ;;  %v2399_v14 = vpop.f32.mrf.mxu3  ;;  %v2738_v43 = vmax.f32 %v9557_v17, %v9560_v35 }
 0x377   : > { %v9592_v3 = vadd.f32 %v2399_v14, %v9471_v5 }
 0x378   : > { %2369 = vmatmul.bf16.gmra.mxu2 %v9488_v46  ;;  %2418 = vmatmul.bf16.gmra.mxu3 %v9488_v46  ;;  %v2739_v1 = vmax.f32 %v2738_v43, %v9568_v25 }
 0x379   : > { %2467 = vmatmul.bf16.gmra.mxu0 %v9488_v46  ;;  %2516 = vmatmul.bf16.gmra.mxu1 %v9488_v46  ;;  %v2482_v9 = vpop.f32.mrf.mxu1 }
 0x37a   : > { %v9507_v26 = vadd.f32 %v2482_v9, %v9491_v28  ;;  %v9573_v9 = vadd.f32 %v2347_v53, %v9468_v31 }
 0x37c   : > { %v2720_v11 = vmax.f32 %v2719_v51, %v9507_v26  ;;  %v9576_v51 = vadd.f32 %v2396_v19, %v9471_v5 }
 0x37e   : > { %2721 = vmax.xlane.f32.xlu2 %v2720_v11 }
 0x381   : > { %v2484_v16 = vpop.f32.mrf.mxu1 }
 0x382   : > { %v9523_v34 = vadd.f32 %v2484_v16, %v9491_v28  ;;  %v2401_v16 = vpop.f32.mrf.mxu3 }
 0x384   : > { %v2725_v42 = vmax.f32 %v2724_v59, %v9523_v34 }
 0x386   : > { %2726 = vmax.xlane.f32.xlu0 %v2725_v42  ;;  %v9589_v42 = vadd.f32 %v2350_v13, %v9468_v31  ;;  %v9612_v13 = vadd.f32 %v2401_v16, %v9471_v5 }
 0x388   : > { %2530 = vmatmul.bf16.vlgmr.msrb.gmra.mxu2 %v9105_v29  ;;  %2579 = vmatmul.bf16.vlgmr.msrb.gmra.mxu3 %v9105_v29 }
 0x389   : > { %2628 = vmatmul.bf16.vlgmr.msrb.gmra.mxu0 %v9105_v29  ;;  %2677 = vmatmul.bf16.vlgmr.msrb.gmra.mxu1 %v9105_v29  ;;  %v2487_v52 = vpop.f32.mrf.mxu1  ;;  %v9550_v29 = vadd.f32 %v2440_v36, %v9484_v56  ;;  %v2352_v36 = vpop.f32.mrf.mxu2 }
 0x38a   : > { %v9543_v33 = vadd.f32 %v2487_v52, %v9491_v28 }
 0x38b   : > { %v2734_v22 = vmax.f32 %v2733_v63, %v9550_v29  ;;  %v2748_v63 = vmax.f32 %v9589_v42, %v9592_v3 }
 0x38c   : > { %v2730_v21 = vmax.f32 %v2729_v4, %v9543_v33  ;;  %v2450_v4 = vpop.f32.mrf.mxu0 }
 0x38e   : > { %2731 = vmax.xlane.f32.xlu1 %v2730_v21 }
 0x391   : > { %v2489_v10 = vpop.f32.mrf.mxu1 }
 0x392   : > { %v9553_v8 = vadd.f32 %v2489_v10, %v9491_v28  ;;  %v9604_v10 = vadd.f32 %v2448_v41, %v9484_v56 }
 0x394   : > { %v2735_v61 = vmax.f32 %v2734_v22, %v9553_v8  ;;  %v9609_v22 = vadd.f32 %v2352_v36, %v9468_v31  ;;  %v9622_v36 = vadd.f32 %v2450_v4, %v9484_v56 }
 0x396   : > { %2736 = vmax.xlane.f32.xlu2 %v2735_v61  ;;  %v2749_v61 = vmax.f32 %v2748_v63, %v9604_v10 }
 0x398   : > { %2535 = vmatmul.bf16.gmra.mxu2 %v9140_v2  ;;  %2584 = vmatmul.bf16.gmra.mxu3 %v9140_v2 }
 0x399   : > { %2633 = vmatmul.bf16.gmra.mxu0 %v9140_v2  ;;  %2682 = vmatmul.bf16.gmra.mxu1 %v9140_v2  ;;  %v2743_v2 = vmax.f32 %v9573_v9, %v9576_v51 }
 0x39a   : > { %v2492_v12 = vpop.f32.mrf.mxu1  ;;  %v2453_v43 = vpop.f32.mrf.mxu0 }
 0x39b   : > { %v9579_v11 = vadd.f32 %v2492_v12, %v9491_v28  ;;  %v2744_v52 = vmax.f32 %v2743_v2, %v9586_v60  ;;  %v2753_v12 = vmax.f32 %v9609_v22, %v9612_v13  ;;  %v9640_v4 = vadd.f32 %v2453_v43, %v9484_v56 }
 0x39d   : > { %v2740_v57 = vmax.f32 %v2739_v1, %v9579_v11  ;;  %14115 = vst [vmem:[#allocation4_spill] sm:$0xff] %v9640_v4 }
 0x39f   : > { %2741 = vmax.xlane.f32.xlu2 %v2740_v57  ;;  %v2355_v53 = vpop.f32.mrf.mxu2  ;;  %v2404_v21 = vpop.f32.mrf.mxu3 }
 0x3a0   : > { %v9625_v16 = vadd.f32 %v2355_v53, %v9468_v31  ;;  %v9628_v2 = vadd.f32 %v2404_v21, %v9471_v5 }
 0x3a2   : > { %v2494_v59 = vpop.f32.mrf.mxu1  ;;  %14113 = vst [vmem:[#allocation2_spill] sm:$0xff] %v9625_v16  ;;  %v2455_v63 = vpop.f32.mrf.mxu0 }
 0x3a3   : > { %v9595_v24 = vadd.f32 %v2494_v59, %v9491_v28  ;;  %14114 = vst [vmem:[#allocation3_spill] sm:$0xff] %v9628_v2 }
 0x3a5   : > { %v2745_v19 = vmax.f32 %v2744_v52, %v9595_v24  ;;  %v2754_v52 = vmax.f32 %v2753_v12, %v9622_v36 }
 0x3a7   : > { %2746 = vmax.xlane.f32.xlu0 %v2745_v19  ;;  %v2357_v1 = vpop.f32.mrf.mxu2 }
 0x3a8   : > { %2540 = vmatmul.bf16.gmra.mxu2 %v9172_v54  ;;  %2589 = vmatmul.bf16.gmra.mxu3 %v9172_v54 }
 0x3a9   : > { %2638 = vmatmul.bf16.gmra.mxu0 %v9172_v54  ;;  %2687 = vmatmul.bf16.gmra.mxu1 %v9172_v54  ;;  %v2406_v54 = vpop.f32.mrf.mxu3 }
 0x3aa   : > { %v2497_v23 = vpop.f32.mrf.mxu1  ;;  %v9648_v12 = vadd.f32 %v2406_v54, %v9471_v5 }
 0x3ab   : > { %v9615_v14 = vadd.f32 %v2497_v23, %v9491_v28  ;;  %v2758_v23 = vmax.f32 %v9625_v16, %v9628_v2  ;;  %v9657_v2 = vpop.permute.xlu0 %6167 }
 0x3ac   : > { %14117 = vst [vmem:[#allocation6_spill] sm:$0xff] %v9648_v12 }
 0x3ad   : > { %v2750_v41 = vmax.f32 %v2749_v61, %v9615_v14 }
 0x3af   : > { %2751 = vmax.xlane.f32.xlu1 %v2750_v41  ;;  %v2360_v53 = vpop.f32.mrf.mxu2  ;;  %v9645_v41 = vadd.f32 %v2357_v1, %v9468_v31  ;;  %v9660_v1 = vadd.f32 %v2455_v63, %v9484_v56 }
 0x3b0   : > { %v9663_v54 = vadd.f32 %v2360_v53, %v9468_v31 }
 0x3b1   : > { %v2409_v21 = vpop.f32.mrf.mxu3  ;;  %14116 = vst [vmem:[#allocation5_spill] sm:$0xff] %v9645_v41 }
 0x3b2   : > { %v2499_v57 = vpop.f32.mrf.mxu1  ;;  %14119 = vst [vmem:[#allocation8_spill] sm:$0xff] %v9660_v1 }
 0x3b3   : > { %v9631_v59 = vadd.f32 %v2499_v57, %v9491_v28  ;;  %14120 = vst [vmem:[#allocation9_spill] sm:$0xff] %v9663_v54  ;;  %v9679_v53 = vpop.permute.xlu0 %6269 }
 0x3b4   : > { %14123 = vst [vmem:[#allocation12_spill] sm:$0xff] %v9679_v53 }
 0x3b5   : > { %v2755_v19 = vmax.f32 %v2754_v52, %v9631_v59  ;;  %v2759_v52 = vmax.f32 %v2758_v23, %v9640_v4  ;;  %v9704_v4 = vpop.permute.xlu1 %6171 }
 0x3b7   : > { %2756 = vmax.xlane.f32.xlu2 %v2755_v19  ;;  %v2763_v19 = vmax.f32 %v9645_v41, %v9648_v12  ;;  %v2362_v12 = vpop.f32.mrf.mxu2  ;;  %v9672_v41 = vpop.permute.xlu2 %6169 }
 0x3b8   : > { %2545 = vmatmul.bf16.gmra.mxu2 %v9195_v27  ;;  %2594 = vmatmul.bf16.gmra.mxu3 %v9195_v27 }
 0x3b9   : > { %2643 = vmatmul.bf16.gmra.mxu0 %v9195_v27  ;;  %2692 = vmatmul.bf16.gmra.mxu1 %v9195_v27  ;;  %v2458_v27 = vpop.f32.mrf.mxu0 }
 0x3ba   : > { %v2502_v61 = vpop.f32.mrf.mxu1 }
 0x3bb   : > { %v9651_v57 = vadd.f32 %v2502_v61, %v9491_v28  ;;  %v9666_v61 = vadd.f32 %v2409_v21, %v9471_v5 }
 0x3bd   : > { %14118 = vst [vmem:[#allocation7_spill] sm:$0xff] %v9651_v57  ;;  %v2760_v43 = vmax.f32 %v2759_v52, %v9651_v57  ;;  %v2764_v52 = vmax.f32 %v2763_v19, %v9660_v1  ;;  %v2768_v63 = vmax.f32 %v9663_v54, %v9666_v61 }
 0x3be   : > { %14121 = vst [vmem:[#allocation10_spill] sm:$0xff] %v9666_v61 }
 0x3bf   : > { %2761 = vmax.xlane.f32.xlu0 %v2760_v43  ;;  %v2411_v43 = vpop.f32.mrf.mxu3  ;;  %v9696_v54 = vpop.permute.xlu2 %6271 }
 0x3c1   : > { %v2460_v21 = vpop.f32.mrf.mxu0 }
 0x3c2   : > { %v2504_v16 = vpop.f32.mrf.mxu1 }
 0x3c3   : > { %v9669_v23 = vadd.f32 %v2504_v16, %v9491_v28  ;;  %v9682_v16 = vadd.f32 %v2458_v27, %v9484_v56 }
 0x3c5   : > { %14122 = vst [vmem:[#allocation11_spill] sm:$0xff] %v9669_v23  ;;  %v2765_v57 = vmax.f32 %v2764_v52, %v9669_v23  ;;  %v9687_v52 = vadd.f32 %v2362_v12, %v9468_v31  ;;  %v2769_v53 = vmax.f32 %v2768_v63, %v9682_v16  ;;  %v2365_v23 = vpop.f32.mrf.mxu2  ;;  %v9702_v12 = vadd.f32 %v2460_v21, %v9484_v56 }
 0x3c6   : > { %14124 = vst [vmem:[#allocation13_spill] sm:$0xff] %v9682_v16  ;;  %v9709_v63 = vadd.f32 %v2365_v23, %v9468_v31 }
 0x3c7   : > { %2766 = vmax.xlane.f32.xlu1 %v2765_v57  ;;  %14125 = vst [vmem:[#allocation14_spill] sm:$0xff] %v9687_v52  ;;  %v9690_v57 = vadd.f32 %v2411_v43, %v9471_v5  ;;  %v2414_v1 = vpop.f32.mrf.mxu3 }
 0x3c8   : > { %2550 = vmatmul.bf16.gmra.mxu2 %v9238_v6  ;;  %2599 = vmatmul.bf16.gmra.mxu3 %v9238_v6  ;;  %14128 = vst [vmem:[#allocation17_spill] sm:$0xff] %v9702_v12  ;;  %v9712_v16 = vadd.f32 %v2414_v1, %v9471_v5 }
 0x3c9   : > { %2648 = vmatmul.bf16.gmra.mxu0 %v9238_v6  ;;  %2697 = vmatmul.bf16.gmra.mxu1 %v9238_v6  ;;  %14126 = vst [vmem:[#allocation15_spill] sm:$0xff] %v9690_v57  ;;  %v2773_v6 = vmax.f32 %v9687_v52, %v9690_v57  ;;  %v9718_v52 = vpop.permute.xlu2 %6277 }
 0x3ca   : > { %v2507_v19 = vpop.f32.mrf.mxu1  ;;  %14130 = vst [vmem:[#allocation19_spill] sm:$0xff] %v9709_v63 }
 0x3cb   : > { %v9693_v61 = vadd.f32 %v2507_v19, %v9491_v28  ;;  %v9706_v19 = vpop.permute.xlu0 %6275  ;;  %14131 = vst [vmem:[#allocation20_spill] sm:$0xff] %v9712_v16  ;;  %v2774_v57 = vmax.f32 %v2773_v6, %v9702_v12 }
 0x3cc   : > { %14129 = vst [vmem:[#allocation18_spill] sm:$0xff] %v9706_v19 }
 0x3cd   : > { %14127 = vst [vmem:[#allocation16_spill] sm:$0xff] %v9693_v61  ;;  %v2770_v27 = vmax.f32 %v2769_v53, %v9693_v61  ;;  %v2778_v61 = vmax.f32 %v9709_v63, %v9712_v16  ;;  %v2367_v19 = vpop.f32.mrf.mxu2 }
 0x3ce   : > { %14133 = vst [vmem:[#allocation22_spill] sm:$0xff] %v9718_v52 }
 0x3cf   : > { %2771 = vmax.xlane.f32.xlu2 %v2770_v27  ;;  %v2463_v27 = vpop.f32.mrf.mxu0  ;;  %v2416_v23 = vpop.f32.mrf.mxu3 }
 0x3d0   : > { %v9726_v1 = vadd.f32 %v2463_v27, %v9484_v56 }
 0x3d2   : > { %v2509_v43 = vpop.f32.mrf.mxu1  ;;  %14134 = vst [vmem:[#allocation23_spill] sm:$0xff] %v9726_v1  ;;  %v2779_v16 = vmax.f32 %v2778_v61, %v9726_v1 }
 0x3d3   : > { %v9715_v53 = vadd.f32 %v2509_v43, %v9491_v28  ;;  %v9730_v43 = vpop.permute.xlu1 %6273  ;;  %v9742_v27 = vpop.permute.xlu0 %6281 }
 0x3d4   : > { %14138 = vst [vmem:[#allocation27_spill] sm:$0xff] %v9742_v27 }
 0x3d5   : > { %14132 = vst [vmem:[#allocation21_spill] sm:$0xff] %v9715_v53  ;;  %v2775_v21 = vmax.f32 %v2774_v57, %v9715_v53  ;;  %v9733_v57 = vadd.f32 %v2367_v19, %v9468_v31 }
 0x3d7   : > { %2776 = vmax.xlane.f32.xlu0 %v2775_v21  ;;  %14135 = vst [vmem:[#allocation24_spill] sm:$0xff] %v9733_v57  ;;  %v9736_v21 = vadd.f32 %v2416_v23, %v9471_v5  ;;  %v2465_v53 = vpop.f32.mrf.mxu0 }
 0x3d8   : > { %2555 = vmatmul.bf16.gmra.mxu2 %v9250_v49  ;;  %2604 = vmatmul.bf16.gmra.mxu3 %v9250_v49  ;;  %v9750_v19 = vadd.f32 %v2465_v53, %v9484_v56 }
 0x3d9   : > { %2653 = vmatmul.bf16.gmra.mxu0 %v9250_v49  ;;  %2702 = vmatmul.bf16.gmra.mxu1 %v9250_v49  ;;  %14136 = vst [vmem:[#allocation25_spill] sm:$0xff] %v9736_v21  ;;  %v9745_v49 = vpop.permute.xlu2 %6283  ;;  %v2783_v12 = vmax.f32 %v9733_v57, %v9736_v21 }
 0x3da   : > { %v2512_v6 = vpop.f32.mrf.mxu1  ;;  %14139 = vst [vmem:[#allocation28_spill] sm:$0xff] %v9745_v49 }
 0x3db   : > { %v9739_v52 = vadd.f32 %v2512_v6, %v9491_v28  ;;  %14140 = vst [vmem:[#allocation29_spill] sm:$0xff] %v9750_v19  ;;  %v2784_v61 = vmax.f32 %v2783_v12, %v9750_v19  ;;  %v9756_v1 = vpop.permute.xlu1 %6279  ;;  %v9759_v27 = vpop.permute.xlu0 %6287 }
 0x3dc   : > { %14142 = vst [vmem:[#allocation31_spill] sm:$0xff] %v9759_v27 }
 0x3dd   : > { %14137 = vst [vmem:[#allocation26_spill] sm:$0xff] %v9739_v52  ;;  %v2780_v63 = vmax.f32 %v2779_v16, %v9739_v52 }
 0x3df   : > { %2781 = vmax.xlane.f32.xlu1 %v2780_v63 }
 0x3e1   : > { %v9763_v63 = vpop.permute.xlu2 %6289 }
 0x3e2   : > { %v2514_v23 = vpop.f32.mrf.mxu1  ;;  %14143 = vst [vmem:[#allocation32_spill] sm:$0xff] %v9763_v63 }
 0x3e3   : > { %v9753_v6 = vadd.f32 %v2514_v23, %v9491_v28  ;;  %v9767_v53 = vpop.permute.xlu1 %6285  ;;  %v9769_v12 = vpop.permute.xlu0 %6293 }
 0x3e4   : > { %14144 = vst [vmem:[#allocation33_spill] sm:$0xff] %v9769_v12 }
 0x3e5   : > { %14141 = vst [vmem:[#allocation30_spill] sm:$0xff] %v9753_v6  ;;  %v2785_v16 = vmax.f32 %v2784_v61, %v9753_v6 }
 0x3e7   : > { %2786 = vmax.xlane.f32.xlu2 %v2785_v16 }
 0x3e8   : > { %2560 = vmatmul.bf16.gmra.mxu2 %v9258_v50  ;;  %2609 = vmatmul.bf16.gmra.mxu3 %v9258_v50 }
 0x3e9   : > { %2658 = vmatmul.bf16.gmra.mxu0 %v9258_v50  ;;  %2707 = vmatmul.bf16.gmra.mxu1 %v9258_v50 }
 0x3eb   : > { %v9777_v12 = vpop.permute.xlu1 %6291 }
 0x3f1   : > { %v2722_v23 = vpop.xlane.xlu2 %2721 }
 0x3f2   : > { %v2798_v61 = vsub.f32 %v9476_v39, %v2722_v23  ;;  %v2799_v27 = vsub.f32 %v9480_v7, %v2722_v23  ;;  %v2800_v16 = vsub.f32 %v9494_v15, %v2722_v23  ;;  %v2801_v49 = vsub.f32 %v9507_v26, %v2722_v23 }
 0x3f4   : > { %v2862_v6 = vmul.f32 1.442695, %v2798_v61  ;;  %v2864_v19 = vmul.f32 1.442695, %v2799_v27  ;;  %v2866_v63 = vmul.f32 1.442695, %v2800_v16 }
 0x3f5   : > { %v2868_v50 = vmul.f32 1.442695, %v2801_v49 }
 0x3f6   : > { %7249 = vpow2.f32 %v2862_v6  ;;  %v2468_v21 = vpop.f32.mrf.mxu0  ;;  %v2517_v57 = vpop.f32.mrf.mxu1 }
 0x3f7   : > { %7251 = vpow2.f32 %v2864_v19 }
 0x3f8   : > { %2565 = vmatmul.bf16.gmra.mxu2 %v9488_v46  ;;  %2614 = vmatmul.bf16.gmra.mxu3 %v9488_v46  ;;  %7253 = vpow2.f32 %v2866_v63 }
 0x3f9   : > { %2663 = vmatmul.bf16.gmra.mxu0 %v9488_v46  ;;  %2712 = vmatmul.bf16.gmra.mxu1 %v9488_v46  ;;  %v2727_v39 = vpop.xlane.xlu0 %2726  ;;  %7255 = vpow2.f32 %v2868_v50 }
 0x3fa   : > { %v2802_v7 = vsub.f32 %v9501_v44, %v2727_v39  ;;  %v2803_v15 = vsub.f32 %v9504_v37, %v2727_v39  ;;  %v2804_v26 = vsub.f32 %v9514_v32, %v2727_v39  ;;  %v9795_v44 = vadd.f32 %v2468_v21, %v9484_v56 }
 0x3fb   : > { %v2370_v27 = vpop.f32.mrf.mxu2  ;;  %v2419_v49 = vpop.f32.mrf.mxu3  ;;  %v2805_v16 = vsub.f32 %v9523_v34, %v2727_v39 }
 0x3fc   : > { %v9784_v19 = vpop.eup %7249  ;;  %v2870_v6 = vmul.f32 1.442695, %v2802_v7  ;;  %v2872_v23 = vmul.f32 1.442695, %v2803_v15  ;;  %v9787_v63 = vadd.f32 %v2370_v27, %v9468_v31  ;;  %v9792_v46 = vadd.f32 %v2419_v49, %v9471_v5 }
 0x3fd   : > { %14145 = vst [vmem:[#allocation34_spill] sm:$0xff] %v9784_v19  ;;  %v9789_v61 = vpop.eup %7251  ;;  %v2874_v50 = vmul.f32 1.442695, %v2804_v26  ;;  %v9806_v27 = vadd.f32 %v2517_v57, %v9491_v28 }
 0x3fe   : > { %14146 = vst [vmem:[#allocation35_spill] sm:$0xff] %v9789_v61  ;;  %7257 = vpow2.f32 %v2870_v6  ;;  %v2990_v37 = vadd.f32 %v9789_v61, %v9784_v19  ;;  %v9799_v32 = vpop.eup %7253  ;;  %v2788_v7 = vmax.f32 %v9787_v63, %v9792_v46  ;;  %v2470_v21 = vpop.f32.mrf.mxu0  ;;  %v2876_v19 = vmul.f32 1.442695, %v2805_v16 }
 0x3ff   : > { %14147 = vst [vmem:[#allocation36_spill] sm:$0xff] %v9792_v46  ;;  %7259 = vpow2.f32 %v2872_v23  ;;  %v9809_v52 = vpop.eup %7255  ;;  %v2519_v61 = vpop.f32.mrf.mxu1 }
 0x400   : > { %14148 = vst [vmem:[#allocation37_spill] sm:$0xff] %v9799_v32  ;;  %v2991_v15 = vadd.f32 %v9799_v32, %v2990_v37  ;;  %v2789_v6 = vmax.f32 %v2788_v7, %v9795_v44  ;;  %7261 = vpow2.f32 %v2874_v50 }
 0x401   : > { %v2732_v49 = vpop.xlane.xlu1 %2731  ;;  %14149 = vst [vmem:[#allocation38_spill] sm:$0xff] %v9809_v52  ;;  %7263 = vpow2.f32 %v2876_v19 }
 0x402   : > { %v2992_v26 = vadd.f32 %v9809_v52, %v2991_v15  ;;  %v2790_v23 = vmax.f32 %v2789_v6, %v9806_v27  ;;  %v2806_v57 = vsub.f32 %v9517_v58, %v2732_v49  ;;  %v2807_v7 = vsub.f32 %v9520_v62, %v2732_v49 }
 0x403   : > { %v2372_v34 = vpop.f32.mrf.mxu2  ;;  %v2421_v39 = vpop.f32.mrf.mxu3  ;;  %v9830_v58 = vadd.f32 %v2470_v21, %v9484_v56  ;;  %v9835_v62 = vperm.slane %v9465_v47, 6  ;;  %v9844_v56 = vperm.slane %v9465_v47, 7 }
 0x404   : > { %v9813_v46 = vpop.eup %7257  ;;  %v9817_v37 = vadd.f32 %v2372_v34, %v9468_v31  ;;  %v9823_v50 = vadd.f32 %v2421_v39, %v9471_v5  ;;  %2993 = vadd.xlane.f32.xlu2 %v2992_v26  ;;  %2791 = vmax.xlane.f32.xlu0 %v2790_v23  ;;  %v2878_v31 = vmul.f32 1.442695, %v2806_v57  ;;  %v2880_v34 = vmul.f32 1.442695, %v2807_v7 }
 0x405   : > { %14150 = vst [vmem:[#allocation39_spill] sm:$0xff] %v9813_v46  ;;  %v9819_v32 = vpop.eup %7259  ;;  %v2808_v26 = vsub.f32 %v9530_v48, %v2732_v49  ;;  %v9841_v23 = vadd.f32 %v2519_v61, %v9491_v28  ;;  %v2809_v57 = vsub.f32 %v9543_v33, %v2732_v49  ;;  %v9854_v61 = vperm.slane %v9465_v47, 4 }
 0x406   : > { %14151 = vst [vmem:[#allocation40_spill] sm:$0xff] %v9817_v37  ;;  %v2995_v16 = vadd.f32 %v9819_v32, %v9813_v46  ;;  %v2793_v15 = vmax.f32 %v9817_v37, %v9823_v50  ;;  %v9832_v6 = vpop.eup %7261  ;;  %v2629_v19 = vpop.f32.mrf.mxu0  ;;  %7265 = vpow2.f32 %v2878_v31  ;;  %v9857_v33 = vperm.slane %v9465_v47, 5 }
 0x407   : > { %14152 = vst [vmem:[#allocation41_spill] sm:$0xff] %v9819_v32  ;;  %v9846_v21 = vpop.eup %7263  ;;  %7267 = vpow2.f32 %v2880_v34  ;;  %v2678_v7 = vpop.f32.mrf.mxu1  ;;  %v2884_v31 = vmul.f32 1.442695, %v2809_v57 }
 0x408   : > { %14153 = vst [vmem:[#allocation42_spill] sm:$0xff] %v9823_v50  ;;  %v2794_v5 = vmax.f32 %v2793_v15, %v9830_v58  ;;  %v2996_v39 = vadd.f32 %v9832_v6, %v2995_v16  ;;  %v2630_v15 = vadd.f32 %v2629_v19, %v9835_v62  ;;  %v2679_v28 = vadd.f32 %v2678_v7, %v9844_v56 }
 0x409   : > { %14154 = vst [vmem:[#allocation43_spill] sm:$0xff] %v9830_v58 }
 0x40a   : > { %14155 = vst [vmem:[#allocation44_spill] sm:$0xff] %v9832_v6  ;;  %v2795_v16 = vmax.f32 %v2794_v5, %v9841_v23  ;;  %v2997_v48 = vadd.f32 %v9846_v21, %v2996_v39  ;;  %v2882_v6 = vmul.f32 1.442695, %v2808_v26  ;;  %v9861_v34 = vsub.f32 0.0, %v2630_v15  ;;  %v2737_v26 = vpop.xlane.xlu2 %2736 }
 0x40b   : > { %14156 = vst [vmem:[#allocation45_spill] sm:$0xff] %v9841_v23  ;;  %v2531_v32 = vpop.f32.mrf.mxu2  ;;  %v2580_v5 = vpop.f32.mrf.mxu3  ;;  %v9865_v39 = vsub.f32 0.0, %v2679_v28  ;;  %v2810_v15 = vsub.f32 %v9537_v45, %v2737_v26  ;;  %v2811_v28 = vsub.f32 %v9540_v0, %v2737_v26 }
 0x40c   : > { %14157 = vst [vmem:[#allocation46_spill] sm:$0xff] %v9846_v21  ;;  %2796 = vmax.xlane.f32.xlu1 %v2795_v16  ;;  %2998 = vadd.xlane.f32.xlu0 %v2997_v48  ;;  %v9859_v49 = vpop.eup %7265  ;;  %7269 = vpow2.f32 %v2882_v6  ;;  %v2532_v7 = vadd.f32 %v2531_v32, %v9854_v61  ;;  %v2581_v57 = vadd.f32 %v2580_v5, %v9857_v33  ;;  %v3836_v16 = vand.u32 2147483647, %v9861_v34 }
 0x40d   : > { %14158 = vst [vmem:[#allocation47_spill] sm:$0xff] %v9859_v49  ;;  %v9863_v19 = vpop.eup %7267  ;;  %7271 = vpow2.f32 %v2884_v31  ;;  %v3837_v48 = vand.u32 2147483647, %v9865_v39  ;;  %v2886_v45 = vmul.f32 1.442695, %v2810_v15  ;;  %v2813_v15 = vsub.f32 %v9553_v8, %v2737_v26 }
 0x40e   : > { %14159 = vst [vmem:[#allocation48_spill] sm:$0xff] %v9861_v34  ;;  %v3000_v47 = vadd.f32 %v9863_v19, %v9859_v49  ;;  %v9874_v21 = vsub.f32 0.0, %v2532_v7  ;;  %v9879_v46 = vsub.f32 0.0, %v2581_v57  ;;  %v2631_v32 = vpop.f32.mrf.mxu0  ;;  %v3900_v31 = vsub.f32 0.0, %v3836_v16 }
 0x40f   : > { %14160 = vst [vmem:[#allocation49_spill] sm:$0xff] %v9863_v19  ;;  %v2680_v5 = vpop.f32.mrf.mxu1  ;;  %v2812_v19 = vsub.f32 %v9550_v29, %v2737_v26  ;;  %v3901_v49 = vsub.f32 0.0, %v3837_v48  ;;  %v2632_v58 = vadd.f32 %v2631_v32, %v9835_v62  ;;  %v2888_v0 = vmul.f32 1.442695, %v2811_v28 }
 0x410   : > { %14161 = vst [vmem:[#allocation50_spill] sm:$0xff] %v9865_v39  ;;  %v3834_v7 = vand.u32 2147483647, %v9874_v21  ;;  %v3835_v57 = vand.u32 2147483647, %v9879_v46  ;;  %v2681_v16 = vadd.f32 %v2680_v5, %v9844_v56  ;;  %v6202_v29 = vadd.f32 %v8824_v55, %v9657_v2 }
 0x411   : > { %14162 = vst [vmem:[#allocation51_spill] sm:$0xff] %v9874_v21  ;;  %v3966_v37 = vmul.f32 1.442695, %v3900_v31  ;;  %v2890_v48 = vmul.f32 1.442695, %v2812_v19  ;;  %7273 = vpow2.f32 %v2886_v45 }
 0x412   : > { %v9876_v6 = vpop.eup %7269  ;;  %14164 = vst [vmem:[#allocation53_spill] sm:$0xff] %v9879_v46  ;;  %v3898_v32 = vsub.f32 0.0, %v3834_v7  ;;  %7275 = vpow2.f32 %v2888_v0  ;;  %v3899_v28 = vsub.f32 0.0, %v3835_v57  ;;  %v6925_v8 = vadd.f32 -1.0, %v6202_v29 }
 0x413   : > { %14163 = vst [vmem:[#allocation52_spill] sm:$0xff] %v9876_v6  ;;  %v3001_v23 = vadd.f32 %v9876_v6, %v3000_v47  ;;  %v9882_v52 = vpop.eup %7271  ;;  %v6203_v47 = vadd.f32 %v8878_v38, %v9672_v41  ;;  %v3968_v6 = vmul.f32 1.442695, %v3901_v49  ;;  %v2533_v31 = vpop.f32.mrf.mxu2  ;;  %7277 = vpow2.f32 %v3966_v37 }
 0x414   : > { %14165 = vst [vmem:[#allocation54_spill] sm:$0xff] %v9882_v52  ;;  %v9901_v38 = vpop.xlane.xlu2 %2741  ;;  %v2582_v55 = vpop.f32.mrf.mxu3  ;;  %7279 = vpow2.f32 %v2890_v48  ;;  %v2892_v41 = vmul.f32 1.442695, %v2813_v15  ;;  %v3962_v49 = vmul.f32 1.442695, %v3898_v32  ;;  %v2534_v19 = vadd.f32 %v2533_v31, %v9854_v61 }
 0x415   : > { %v3002_v50 = vadd.f32 %v9882_v52, %v3001_v23  ;;  %v9895_v23 = vsub.f32 0.0, %v2632_v58  ;;  %v9897_v52 = vsub.f32 0.0, %v2681_v16  ;;  %v6926_v2 = vadd.f32 -1.0, %v6203_v47 }
 0x416   : > { %7281 = vpow2.f32 %v3968_v6  ;;  %v3964_v26 = vmul.f32 1.442695, %v3899_v28  ;;  %v2815_v7 = vsub.f32 %v9560_v35, %v9901_v38  ;;  %v6234_v16 = vsub.f32 %v6925_v8, %v8807_v18 }
 0x417   : > { %3003 = vadd.xlane.f32.xlu1 %v3002_v50  ;;  %14166 = vst [vmem:[#allocation55_spill] sm:$0xff] %v9895_v23  ;;  %v6204_v50 = vadd.f32 %v8884_v40, %v9704_v4  ;;  %v3840_v58 = vand.u32 2147483647, %v9895_v23  ;;  %v3841_v5 = vand.u32 2147483647, %v9897_v52  ;;  %v2814_v40 = vsub.f32 %v9557_v17, %v9901_v38  ;;  %v9909_v37 = vpop.eup %7273  ;;  %v2634_v17 = vpop.f32.mrf.mxu0 }
 0x418   : > { %14167 = vst [vmem:[#allocation56_spill] sm:$0xff] %v9897_v52  ;;  %v2583_v4 = vadd.f32 %v2582_v55, %v9857_v33  ;;  %v9913_v6 = vpop.eup %7275  ;;  %v6235_v0 = vsub.f32 %v6926_v2, %v8864_v20  ;;  %7283 = vpow2.f32 %v2892_v41  ;;  %v9917_v29 = vsub.f32 0.0, %v2534_v19  ;;  %v2683_v8 = vpop.f32.mrf.mxu1 }
 0x419   : > { %v6927_v45 = vadd.f32 -1.0, %v6204_v50  ;;  %14168 = vst [vmem:[#allocation57_spill] sm:$0xff] %v9913_v6  ;;  %v7278_v57 = vpop.eup %7277  ;;  %7285 = vpow2.f32 %v3962_v49  ;;  %v3904_v47 = vsub.f32 0.0, %v3840_v58  ;;  %v3905_v48 = vsub.f32 0.0, %v3841_v5 }
 0x41a   : > { %14169 = vst [vmem:[#allocation58_spill] sm:$0xff] %v9917_v29  ;;  %v9919_v15 = vpop.eup %7279  ;;  %7287 = vpow2.f32 %v3964_v26  ;;  %v2894_v32 = vmul.f32 1.442695, %v2814_v40  ;;  %v9921_v28 = vsub.f32 0.0, %v2583_v4  ;;  %v2896_v20 = vmul.f32 1.442695, %v2815_v7 }
 0x41b   : > { %14170 = vst [vmem:[#allocation59_spill] sm:$0xff] %v9919_v15  ;;  %v6236_v31 = vsub.f32 %v6927_v45, %v8874_v30  ;;  %v3005_v50 = vadd.f32 %v9913_v6, %v9909_v37  ;;  %v9926_v18 = vmul.f32 0.5, %v6235_v0  ;;  %v4092_v55 = vadd.f32 1.0, %v7278_v57 }
 0x41c   : > { %14171 = vst [vmem:[#allocation60_spill] sm:$0xff] %v9921_v28  ;;  %v7282_v35 = vpop.eup %7281  ;;  %v2635_v2 = vadd.f32 %v2634_v17, %v9835_v62  ;;  %v3974_v41 = vmul.f32 1.442695, %v3904_v47  ;;  %v2816_v49 = vsub.f32 %v9568_v25, %v9901_v38  ;;  %v3838_v58 = vand.u32 2147483647, %v9917_v29 }
 0x41d   : > { %14172 = vst [vmem:[#allocation61_spill] sm:$0xff] %v9926_v18  ;;  %v3006_v19 = vadd.f32 %v9919_v15, %v3005_v50  ;;  %v9935_v30 = vmul.f32 0.5, %v6234_v16  ;;  %v3976_v5 = vmul.f32 1.442695, %v3905_v48  ;;  %7289 = vpow2.f32 %v2894_v32 }
 0x41e   : > { %v9933_v26 = vpop.eup %7283  ;;  %v3839_v40 = vand.u32 2147483647, %v9921_v28  ;;  %v9938_v45 = vmul.f32 0.5, %v6236_v31  ;;  %v4093_v7 = vadd.f32 1.0, %v7282_v35  ;;  %7291 = vpow2.f32 %v2896_v20  ;;  %v2536_v20 = vpop.f32.mrf.mxu2 }
 0x41f   : > { %14173 = vst [vmem:[#allocation62_spill] sm:$0xff] %v9933_v26  ;;  %v7286_v4 = vpop.eup %7285  ;;  %v2684_v0 = vadd.f32 %v2683_v8, %v9844_v56  ;;  %7293 = vlog2.f32 %v4092_v55  ;;  %v2817_v57 = vsub.f32 %v9579_v11, %v9901_v38  ;;  %v9943_v47 = vsub.f32 0.0, %v2635_v2  ;;  %v2585_v55 = vpop.f32.mrf.mxu3 }
 0x420   : > { %14174 = vst [vmem:[#allocation63_spill] sm:$0xff] %v9935_v30  ;;  %v7288_v25 = vpop.eup %7287  ;;  %v3007_v16 = vadd.f32 %v9933_v26, %v3006_v19  ;;  %7295 = vpow2.f32 %v3974_v41  ;;  %v2898_v17 = vmul.f32 1.442695, %v2816_v49  ;;  %v3902_v48 = vsub.f32 0.0, %v3838_v58 }
 0x421   : > { %14175 = vst [vmem:[#allocation64_spill] sm:$0xff] %v9943_v47  ;;  %v9948_v32 = vsel %vm1786_vm0, %v9696_v54, 0.0  ;;  %v4090_v35 = vadd.f32 1.0, %v7286_v4  ;;  %7297 = vpow2.f32 %v3976_v5  ;;  %v3903_v31 = vsub.f32 0.0, %v3839_v40 }
 0x422   : > { %14176 = vst [vmem:[#allocation65_spill] sm:$0xff] %v9948_v32  ;;  %3008 = vadd.xlane.f32.xlu2 %v3007_v16  ;;  %v9952_v50 = vsel %vm1786_vm0, %v9730_v43, 0.0  ;;  %7299 = vlog2.f32 %v4093_v7  ;;  %v4091_v11 = vadd.f32 1.0, %v7288_v25  ;;  %v9954_v38 = vsub.f32 0.0, %v2684_v0  ;;  %v9976_v0 = vpop.xlane.xlu0 %2746 }
 0x423   : > { %v9958_v2 = vsel %vm1786_vm0, %v9756_v1, 0.0  ;;  %v9960_v54 = vpop.eup %7289  ;;  %v2900_v8 = vmul.f32 1.442695, %v2817_v57  ;;  %v3844_v41 = vand.u32 2147483647, %v9943_v47  ;;  %v9965_v49 = vsel %vm1786_vm0, %v9767_v53, 0.0 }
 0x424   : > { %14177 = vst [vmem:[#allocation66_spill] sm:$0xff] %v9954_v38  ;;  %v9969_v43 = vsel %vm1786_vm0, %v9777_v12, 0.0  ;;  %v9971_v58 = vpop.eup %7291  ;;  %7301 = vpow2.f32 %v2898_v17  ;;  %v3970_v1 = vmul.f32 1.442695, %v3902_v48  ;;  %v2537_v5 = vadd.f32 %v2536_v20, %v9854_v61  ;;  %v2685_v20 = vpop.f32.mrf.mxu1 }
 0x425   : > { %14178 = vst [vmem:[#allocation67_spill] sm:$0xff] %v9960_v54  ;;  %v7294_v40 = vpop.eup %7293  ;;  %7303 = vlog2.f32 %v4090_v35  ;;  %v3972_v7 = vmul.f32 1.442695, %v3903_v31  ;;  %v2586_v53 = vadd.f32 %v2585_v55, %v9857_v33  ;;  %v3845_v16 = vand.u32 2147483647, %v9954_v38  ;;  %v2636_v31 = vpop.f32.mrf.mxu0 }
 0x426   : > { %14179 = vst [vmem:[#allocation68_spill] sm:$0xff] %v9971_v58  ;;  %v7296_v25 = vpop.eup %7295  ;;  %7305 = vlog2.f32 %v4091_v11  ;;  %v3908_v35 = vsub.f32 0.0, %v3844_v41  ;;  %v2818_v55 = vsub.f32 %v9573_v9, %v9976_v0  ;;  %v9987_v12 = vsub.f32 0.0, %v2537_v5 }
 0x427   : > { %v7298_v17 = vpop.eup %7297  ;;  %7307 = vpow2.f32 %v2900_v8  ;;  %v4096_v11 = vadd.f32 1.0, %v7296_v25  ;;  %v2819_v57 = vsub.f32 %v9576_v51, %v9976_v0  ;;  %v9991_v48 = vsub.f32 0.0, %v2586_v53 }
 0x428   : > { %v7300_v4 = vpop.eup %7299  ;;  %7309 = vpow2.f32 %v3970_v1  ;;  %14180 = vst [vmem:[#allocation69_spill] sm:$0xff] %v9987_v12  ;;  %v4097_v41 = vadd.f32 1.0, %v7298_v17  ;;  %v3909_v19 = vsub.f32 0.0, %v3845_v16  ;;  %v2637_v1 = vadd.f32 %v2636_v31, %v9835_v62 }
 0x429   : > { %7311 = vpow2.f32 %v3972_v7  ;;  %14181 = vst [vmem:[#allocation70_spill] sm:$0xff] %v9991_v48  ;;  %v4159_v9 = vmul.f32 0.6931472, %v7294_v40  ;;  %v4161_v5 = vmul.f32 0.6931472, %v7300_v4  ;;  %v3010_v7 = vadd.f32 %v9971_v58, %v9960_v54 }
 0x42a   : > { %v9993_v8 = vpop.eup %7301  ;;  %v3982_v18 = vmul.f32 1.442695, %v3908_v35  ;;  %v2820_v51 = vsub.f32 %v9586_v60, %v9976_v0  ;;  %v2902_v53 = vmul.f32 1.442695, %v2818_v55  ;;  %v3842_v26 = vand.u32 2147483647, %v9987_v12 }
 0x42b   : > { %14182 = vst [vmem:[#allocation71_spill] sm:$0xff] %v9993_v8  ;;  %v7304_v30 = vpop.eup %7303  ;;  %v2686_v17 = vadd.f32 %v2685_v20, %v9844_v56  ;;  %7313 = vlog2.f32 %v4096_v11  ;;  %v2904_v16 = vmul.f32 1.442695, %v2819_v57  ;;  %v3843_v40 = vand.u32 2147483647, %v9991_v48 }
 0x42c   : > { %v7306_v25 = vpop.eup %7305  ;;  %v3011_v4 = vadd.f32 %v9993_v8, %v3010_v7  ;;  %7315 = vlog2.f32 %v4097_v41  ;;  %v3984_v31 = vmul.f32 1.442695, %v3909_v19  ;;  %v2821_v58 = vsub.f32 %v9595_v24, %v9976_v0  ;;  %v2538_v8 = vpop.f32.mrf.mxu2 }
 0x42d   : > { %v10003_v32 = vpop.eup %7307  ;;  %v10009_v60 = vsub.f32 0.0, %v2637_v1  ;;  %v4155_v54 = vmul.f32 0.6931472, %v7304_v30  ;;  %v4157_v15 = vmul.f32 0.6931472, %v7306_v25  ;;  %7317 = vpow2.f32 %v3982_v18  ;;  %v2587_v1 = vpop.f32.mrf.mxu3 }
 0x42e   : > { %14183 = vst [vmem:[#allocation72_spill] sm:$0xff] %v10003_v32  ;;  %v7310_v35 = vpop.eup %7309  ;;  %v3012_v20 = vadd.f32 %v10003_v32, %v3011_v4  ;;  %7319 = vpow2.f32 %v2902_v53  ;;  %v2906_v57 = vmul.f32 1.442695, %v2820_v51  ;;  %v3906_v11 = vsub.f32 0.0, %v3842_v26  ;;  %v2639_v4 = vpop.f32.mrf.mxu0 }
 0x42f   : > { %14184 = vst [vmem:[#allocation73_spill] sm:$0xff] %v10009_v60  ;;  %v7312_v55 = vpop.eup %7311  ;;  %v10012_v6 = vsub.f32 0.0, %v2686_v17  ;;  %v4094_v7 = vadd.f32 1.0, %v7310_v35  ;;  %7321 = vpow2.f32 %v2904_v16  ;;  %v3907_v19 = vsub.f32 0.0, %v3843_v40 }
 0x430   : > { %3013 = vadd.xlane.f32.xlu0 %v3012_v20  ;;  %v14186_v24 = vmax.f32 %v9861_v34, 0.0  ;;  %v4095_v30 = vadd.f32 1.0, %v7312_v55  ;;  %7323 = vpow2.f32 %v3984_v31  ;;  %v3848_v18 = vand.u32 2147483647, %v10009_v60 }
 0x431   : > { %14185 = vst [vmem:[#allocation74_spill] sm:$0xff] %v10012_v6  ;;  %v7314_v25 = vpop.eup %7313  ;;  %v14188_v26 = vmax.f32 %v9865_v39, 0.0  ;;  %v14190_v53 = vmax.f32 %v9874_v21, 0.0  ;;  %v14192_v16 = vmax.f32 %v9879_v46, 0.0  ;;  %7325 = vpow2.f32 %v2906_v57 }
 0x432   : > { %v10017_v0 = vadd.f32 %v4159_v9, %v14186_v24  ;;  %v2908_v9 = vmul.f32 1.442695, %v2821_v58  ;;  %v7316_v35 = vpop.eup %7315  ;;  %v3978_v31 = vmul.f32 1.442695, %v3906_v11  ;;  %v3849_v55 = vand.u32 2147483647, %v10012_v6 }
 0x433   : > { %v10022_v51 = vadd.f32 %v4161_v5, %v14188_v26  ;;  %v10026_v17 = vadd.f32 %v4155_v54, %v14190_v53  ;;  %v10030_v40 = vadd.f32 %v4157_v15, %v14192_v16  ;;  %v2539_v20 = vadd.f32 %v2538_v8, %v9854_v61  ;;  %v7318_v24 = vpop.eup %7317 }
 0x434   : > { %14187 = vst [vmem:[#allocation75_spill] sm:$0xff] %v10017_v0  ;;  %7327 = vlog2.f32 %v4094_v7  ;;  %v3980_v26 = vmul.f32 1.442695, %v3907_v19  ;;  %v2588_v54 = vadd.f32 %v2587_v1, %v9857_v33  ;;  %v10036_v53 = vpop.eup %7319  ;;  %v3912_v58 = vsub.f32 0.0, %v3848_v18  ;;  %v2752_v19 = vpop.xlane.xlu1 %2751 }
 0x435   : > { %14189 = vst [vmem:[#allocation76_spill] sm:$0xff] %v10022_v51  ;;  %7329 = vlog2.f32 %v4095_v30  ;;  %v2640_v57 = vadd.f32 %v2639_v4, %v9835_v62  ;;  %v10040_v11 = vpop.eup %7321  ;;  %v4167_v1 = vmul.f32 0.6931472, %v7314_v25  ;;  %v3913_v41 = vsub.f32 0.0, %v3849_v55  ;;  %v2688_v30 = vpop.f32.mrf.mxu1 }
 0x436   : > { %14191 = vst [vmem:[#allocation77_spill] sm:$0xff] %v10026_v17  ;;  %7331 = vpow2.f32 %v2908_v9  ;;  %v7324_v5 = vpop.eup %7323  ;;  %v10045_v39 = vsub.f32 0.0, %v2539_v20  ;;  %v4169_v18 = vmul.f32 0.6931472, %v7316_v35  ;;  %v4100_v15 = vadd.f32 1.0, %v7318_v24  ;;  %v2541_v46 = vpop.f32.mrf.mxu2 }
 0x437   : > { %14193 = vst [vmem:[#allocation78_spill] sm:$0xff] %v10030_v40  ;;  %7333 = vpow2.f32 %v3978_v31  ;;  %v10047_v4 = vsub.f32 0.0, %v2588_v54  ;;  %v10049_v0 = vpop.eup %7325  ;;  %v3990_v16 = vmul.f32 1.442695, %v3912_v58  ;;  %v2822_v8 = vsub.f32 %v9589_v42, %v2752_v19 }
 0x438   : > { %14194 = vst [vmem:[#allocation79_spill] sm:$0xff] %v10045_v39  ;;  %7335 = vpow2.f32 %v3980_v26  ;;  %v10052_v7 = vsub.f32 0.0, %v2640_v57  ;;  %v3015_v25 = vadd.f32 %v10040_v11, %v10036_v53  ;;  %v4101_v31 = vadd.f32 1.0, %v7324_v5 }
 0x439   : > { %14195 = vst [vmem:[#allocation80_spill] sm:$0xff] %v10047_v4  ;;  %v2823_v35 = vsub.f32 %v9592_v3, %v2752_v19  ;;  %v2689_v20 = vadd.f32 %v2688_v30, %v9844_v56  ;;  %v14198_v26 = vmax.f32 %v9895_v23, 0.0  ;;  %v3992_v58 = vmul.f32 1.442695, %v3913_v41 }
 0x43a   : > { %14196 = vst [vmem:[#allocation81_spill] sm:$0xff] %v10049_v0  ;;  %v7328_v9 = vpop.eup %7327  ;;  %v2824_v42 = vsub.f32 %v9604_v10, %v2752_v19  ;;  %v3846_v57 = vand.u32 2147483647, %v10045_v39  ;;  %v14201_v5 = vmax.f32 %v9897_v52, 0.0  ;;  %7337 = vlog2.f32 %v4100_v15 }
 0x43b   : > { %14197 = vst [vmem:[#allocation82_spill] sm:$0xff] %v10052_v7  ;;  %v7330_v24 = vpop.eup %7329  ;;  %v10061_v54 = vadd.f32 %v4167_v1, %v14198_v26  ;;  %v3847_v30 = vand.u32 2147483647, %v10047_v4  ;;  %7339 = vpow2.f32 %v3990_v16  ;;  %v2910_v1 = vmul.f32 1.442695, %v2822_v8 }
 0x43c   : > { %v10065_v51 = vpop.eup %7331  ;;  %v10069_v40 = vadd.f32 %v4169_v18, %v14201_v5  ;;  %v3852_v41 = vand.u32 2147483647, %v10052_v7  ;;  %v3016_v10 = vadd.f32 %v10049_v0, %v3015_v25  ;;  %7341 = vlog2.f32 %v4101_v31 }
 0x43d   : > { %14199 = vst [vmem:[#allocation83_spill] sm:$0xff] %v10061_v54  ;;  %v7334_v55 = vpop.eup %7333  ;;  %v2825_v23 = vsub.f32 %v9615_v14, %v2752_v19  ;;  %v2912_v17 = vmul.f32 1.442695, %v2823_v35  ;;  %v10076_v52 = vsub.f32 0.0, %v2689_v20  ;;  %7343 = vpow2.f32 %v3992_v58  ;;  %v2590_v14 = vpop.f32.mrf.mxu3 }
 0x43e   : > { %14200 = vst [vmem:[#allocation84_spill] sm:$0xff] %v10065_v51  ;;  %v7336_v26 = vpop.eup %7335  ;;  %v2914_v15 = vmul.f32 1.442695, %v2824_v42  ;;  %v3910_v18 = vsub.f32 0.0, %v3846_v57  ;;  %v3017_v5 = vadd.f32 %v10065_v51, %v3016_v10  ;;  %v4163_v16 = vmul.f32 0.6931472, %v7328_v9  ;;  %v10082_v42 = vpop.xlane.xlu2 %2756 }
 0x43f   : > { %14202 = vst [vmem:[#allocation85_spill] sm:$0xff] %v10069_v40  ;;  %v4098_v8 = vadd.f32 1.0, %v7334_v55  ;;  %v3911_v34 = vsub.f32 0.0, %v3847_v30  ;;  %v4099_v21 = vadd.f32 1.0, %v7336_v26  ;;  %7345 = vpow2.f32 %v2910_v1  ;;  %v2543_v40 = vpop.f32.mrf.mxu2 }
 0x440   : > { %14203 = vst [vmem:[#allocation86_spill] sm:$0xff] %v10076_v52  ;;  %v3916_v31 = vsub.f32 0.0, %v3852_v41  ;;  %3018 = vadd.xlane.f32.xlu1 %v3017_v5  ;;  %v7338_v19 = vpop.eup %7337  ;;  %v4165_v35 = vmul.f32 0.6931472, %v7330_v24  ;;  %7347 = vpow2.f32 %v2912_v17  ;;  %v2916_v20 = vmul.f32 1.442695, %v2825_v23 }
 0x441   : > { %v3853_v58 = vand.u32 2147483647, %v10076_v52  ;;  %v7340_v57 = vpop.eup %7339  ;;  %7349 = vpow2.f32 %v2914_v15  ;;  %v3986_v55 = vmul.f32 1.442695, %v3910_v18  ;;  %v2542_v30 = vadd.f32 %v2541_v46, %v9854_v61 }
 0x442   : > { %v7342_v10 = vpop.eup %7341  ;;  %v14204_v1 = vmax.f32 %v9917_v29, 0.0  ;;  %7351 = vlog2.f32 %v4098_v8  ;;  %v3988_v24 = vmul.f32 1.442695, %v3911_v34  ;;  %v2591_v23 = vadd.f32 %v2590_v14, %v9857_v33 }
 0x443   : > { %v7344_v17 = vpop.eup %7343  ;;  %v4175_v26 = vmul.f32 0.6931472, %v7338_v19  ;;  %7353 = vlog2.f32 %v4099_v21  ;;  %v3998_v5 = vmul.f32 1.442695, %v3916_v31  ;;  %v2826_v25 = vsub.f32 %v9609_v22, %v10082_v42  ;;  %v2641_v31 = vpop.f32.mrf.mxu0 }
 0x444   : > { %v10088_v41 = vadd.f32 %v4163_v16, %v14204_v1  ;;  %v4104_v15 = vadd.f32 1.0, %v7340_v57  ;;  %7355 = vpow2.f32 %v2916_v20  ;;  %v3917_v46 = vsub.f32 0.0, %v3853_v58 }
 0x445   : > { %v10094_v3 = vpop.eup %7345  ;;  %v14207_v16 = vmax.f32 %v9921_v28, 0.0  ;;  %7357 = vpow2.f32 %v3986_v55  ;;  %v2827_v34 = vsub.f32 %v9612_v13, %v10082_v42  ;;  %v10102_v21 = vsub.f32 0.0, %v2542_v30  ;;  %v2690_v30 = vpop.f32.mrf.mxu1 }
 0x446   : > { %14205 = vst [vmem:[#allocation87_spill] sm:$0xff] %v10088_v41  ;;  %v10104_v14 = vpop.eup %7347  ;;  %v4177_v22 = vmul.f32 0.6931472, %v7342_v10  ;;  %v4105_v19 = vadd.f32 1.0, %v7344_v17  ;;  %7359 = vpow2.f32 %v3988_v24  ;;  %v10106_v20 = vsub.f32 0.0, %v2591_v23 }
 0x447   : > { %14206 = vst [vmem:[#allocation88_spill] sm:$0xff] %v10094_v3  ;;  %v10098_v8 = vadd.f32 %v4165_v35, %v14207_v16  ;;  %v10108_v58 = vpop.eup %7349  ;;  %v14213_v35 = vmax.f32 %v9943_v47, 0.0  ;;  %7361 = vpow2.f32 %v3998_v5  ;;  %v2918_v13 = vmul.f32 1.442695, %v2826_v25 }
 0x448   : > { %14209 = vst [vmem:[#allocation90_spill] sm:$0xff] %v10102_v21  ;;  %v7352_v1 = vpop.eup %7351  ;;  %7363 = vlog2.f32 %v4104_v15  ;;  %v4000_v16 = vmul.f32 1.442695, %v3917_v46  ;;  %v2828_v10 = vsub.f32 %v9622_v36, %v10082_v42  ;;  %v2642_v24 = vadd.f32 %v2641_v31, %v9835_v62 }
 0x449   : > { %14208 = vst [vmem:[#allocation89_spill] sm:$0xff] %v10098_v8  ;;  %v10113_v55 = vadd.f32 %v4175_v26, %v14213_v35  ;;  %v7354_v23 = vpop.eup %7353  ;;  %v2829_v17 = vsub.f32 %v9631_v59, %v10082_v42  ;;  %v2920_v57 = vmul.f32 1.442695, %v2827_v34  ;;  %v3850_v18 = vand.u32 2147483647, %v10102_v21 }
 0x44a   : > { %14210 = vst [vmem:[#allocation91_spill] sm:$0xff] %v10104_v14  ;;  %v3020_v26 = vadd.f32 %v10104_v14, %v10094_v3  ;;  %v10123_v25 = vpop.eup %7355  ;;  %v14216_v5 = vmax.f32 %v9954_v38, 0.0  ;;  %7365 = vlog2.f32 %v4105_v19  ;;  %v3851_v36 = vand.u32 2147483647, %v10106_v20 }
 0x44b   : > { %14211 = vst [vmem:[#allocation92_spill] sm:$0xff] %v10106_v20  ;;  %v2691_v46 = vadd.f32 %v2690_v30, %v9844_v56  ;;  %v7358_v31 = vpop.eup %7357  ;;  %v4171_v42 = vmul.f32 0.6931472, %v7352_v1  ;;  %7367 = vpow2.f32 %v2918_v13  ;;  %v2922_v47 = vmul.f32 1.442695, %v2828_v10 }
 0x44c   : > { %14212 = vst [vmem:[#allocation93_spill] sm:$0xff] %v10108_v58  ;;  %v10127_v15 = vadd.f32 %v4177_v22, %v14216_v5  ;;  %v3021_v34 = vadd.f32 %v10108_v58, %v3020_v26  ;;  %v7360_v35 = vpop.eup %7359  ;;  %7369 = vpow2.f32 %v4000_v16  ;;  %v10134_v38 = vsub.f32 0.0, %v2642_v24 }
 0x44d   : > { %14214 = vst [vmem:[#allocation94_spill] sm:$0xff] %v10113_v55  ;;  %v7362_v22 = vpop.eup %7361  ;;  %7371 = vpow2.f32 %v2920_v57  ;;  %v2924_v19 = vmul.f32 1.442695, %v2829_v17  ;;  %v3914_v5 = vsub.f32 0.0, %v3850_v18  ;;  %v4102_v13 = vadd.f32 1.0, %v7358_v31 }
 0x44e   : > { %14215 = vst [vmem:[#allocation95_spill] sm:$0xff] %v10123_v25  ;;  %v3022_v30 = vadd.f32 %v10123_v25, %v3021_v34  ;;  %v7364_v54 = vpop.eup %7363  ;;  %v3915_v59 = vsub.f32 0.0, %v3851_v36  ;;  %v10138_v26 = vsub.f32 0.0, %v2691_v46  ;;  %v14220_v9 = vmax.f32 %v9987_v12, 0.0  ;;  %v14227_v12 = vld [vmem:[#allocation2_spill] sm:$0xff] }
 0x44f   : > { %14217 = vst [vmem:[#allocation96_spill] sm:$0xff] %v10127_v15  ;;  %v4173_v10 = vmul.f32 0.6931472, %v7354_v23  ;;  %v4103_v57 = vadd.f32 1.0, %v7360_v35  ;;  %v4108_v17 = vadd.f32 1.0, %v7362_v22  ;;  %7373 = vpow2.f32 %v2922_v47  ;;  %v2592_v23 = vpop.f32.mrf.mxu3  ;;  %v10153_v22 = vpop.xlane.xlu0 %2761 }
 0x450   : > { %14218 = vst [vmem:[#allocation97_spill] sm:$0xff] %v10134_v38  ;;  %v10142_v16 = vadd.f32 %v4171_v42, %v14220_v9  ;;  %3023 = vadd.xlane.f32.xlu2 %v3022_v30  ;;  %v7366_v18 = vpop.eup %7365  ;;  %v3856_v34 = vand.u32 2147483647, %v10134_v38  ;;  %v2544_v1 = vadd.f32 %v2543_v40, %v9854_v61  ;;  %7375 = vpow2.f32 %v2924_v19  ;;  %v2693_v40 = vpop.f32.mrf.mxu1 }
 0x451   : > { %14219 = vst [vmem:[#allocation98_spill] sm:$0xff] %v10138_v26  ;;  %v10147_v31 = vpop.eup %7367  ;;  %v3994_v9 = vmul.f32 1.442695, %v3914_v5  ;;  %7377 = vlog2.f32 %v4102_v13  ;;  %v3996_v30 = vmul.f32 1.442695, %v3915_v59  ;;  %v14224_v36 = vmax.f32 %v9991_v48, 0.0  ;;  %v2644_v5 = vpop.f32.mrf.mxu0 }
 0x452   : > { %14221 = vst [vmem:[#allocation99_spill] sm:$0xff] %v10142_v16  ;;  %v7370_v42 = vpop.eup %7369  ;;  %v3857_v47 = vand.u32 2147483647, %v10138_v26  ;;  %v4183_v19 = vmul.f32 0.6931472, %v7364_v54  ;;  %7379 = vlog2.f32 %v4103_v57  ;;  %v3920_v13 = vsub.f32 0.0, %v3856_v34 }
 0x453   : > { %14222 = vst [vmem:[#allocation100_spill] sm:$0xff] %v10147_v31  ;;  %v10155_v24 = vpop.eup %7371  ;;  %v10160_v15 = vadd.f32 %v4173_v10, %v14224_v36  ;;  %7381 = vlog2.f32 %v4108_v17  ;;  %v10162_v46 = vsub.f32 0.0, %v2544_v1  ;;  %v2593_v59 = vadd.f32 %v2592_v23, %v9857_v33  ;;  %v14232_v36 = vld [vmem:[#allocation3_spill] sm:$0xff] }
 0x454   : > { %14223 = vst [vmem:[#allocation101_spill] sm:$0xff] %v10155_v24  ;;  %v4185_v35 = vmul.f32 0.6931472, %v7366_v18  ;;  %v4109_v55 = vadd.f32 1.0, %v7370_v42  ;;  %7383 = vpow2.f32 %v3994_v9  ;;  %v2830_v8 = vsub.f32 %v14227_v12, %v10153_v22 }
 0x455   : > { %14225 = vst [vmem:[#allocation102_spill] sm:$0xff] %v10160_v15  ;;  %v10167_v16 = vpop.eup %7373  ;;  %7385 = vpow2.f32 %v3996_v30  ;;  %v3921_v10 = vsub.f32 0.0, %v3857_v47  ;;  %v2645_v54 = vadd.f32 %v2644_v5, %v9835_v62  ;;  %v3025_v57 = vadd.f32 %v10155_v24, %v10147_v31 }
 0x456   : > { %14226 = vst [vmem:[#allocation103_spill] sm:$0xff] %v10162_v46  ;;  %v10172_v1 = vpop.eup %7375  ;;  %v14230_v18 = vmax.f32 %v10009_v60, 0.0  ;;  %v2831_v9 = vsub.f32 %v14232_v36, %v10153_v22  ;;  %v4006_v42 = vmul.f32 1.442695, %v3920_v13  ;;  %v3854_v30 = vand.u32 2147483647, %v10162_v46 }
 0x457   : > { %14228 = vst [vmem:[#allocation2_spill] sm:$0xff] %v10167_v16  ;;  %v7378_v23 = vpop.eup %7377  ;;  %v10183_v47 = vsub.f32 0.0, %v2593_v59  ;;  %v2694_v5 = vadd.f32 %v2693_v40, %v9844_v56  ;;  %v14234_v17 = vmax.f32 %v10012_v6, 0.0  ;;  %v2926_v12 = vmul.f32 1.442695, %v2830_v8 }
 0x458   : > { %14229 = vst [vmem:[#allocation104_spill] sm:$0xff] %v10172_v1  ;;  %v10177_v34 = vadd.f32 %v4183_v19, %v14230_v18  ;;  %v7380_v48 = vpop.eup %7379  ;;  %v14236_v19 = vld [vmem:[#allocation4_spill] sm:$0xff]  ;;  %v3026_v41 = vadd.f32 %v10167_v16, %v3025_v57  ;;  %7387 = vlog2.f32 %v4109_v55  ;;  %v4008_v28 = vmul.f32 1.442695, %v3921_v10  ;;  %v2595_v55 = vpop.f32.mrf.mxu3 }
 0x459   : > { %14233 = vst [vmem:[#allocation3_spill] sm:$0xff] %v10183_v47  ;;  %v10188_v15 = vadd.f32 %v4185_v35, %v14234_v17  ;;  %v2832_v18 = vsub.f32 %v14236_v19, %v10153_v22  ;;  %v7382_v36 = vpop.eup %7381  ;;  %v10194_v59 = vsub.f32 0.0, %v2645_v54  ;;  %v4179_v60 = vmul.f32 0.6931472, %v7378_v23  ;;  %v2546_v54 = vpop.f32.mrf.mxu2 }
 0x45a   : > { %14231 = vst [vmem:[#allocation105_spill] sm:$0xff] %v10177_v34  ;;  %v7384_v29 = vpop.eup %7383  ;;  %v2928_v6 = vmul.f32 1.442695, %v2831_v9  ;;  %v3027_v35 = vadd.f32 %v10172_v1, %v3026_v41  ;;  %7389 = vpow2.f32 %v4006_v42  ;;  %v3918_v19 = vsub.f32 0.0, %v3854_v30  ;;  %v14239_v9 = vld [vmem:[#allocation7_spill] sm:$0xff] }
 0x45b   : > { %14235 = vst [vmem:[#allocation106_spill] sm:$0xff] %v10188_v15  ;;  %v7386_v17 = vpop.eup %7385  ;;  %v3855_v8 = vand.u32 2147483647, %v10183_v47  ;;  %v10199_v57 = vsub.f32 0.0, %v2694_v5  ;;  %v4181_v13 = vmul.f32 0.6931472, %v7380_v48  ;;  %7391 = vpow2.f32 %v2926_v12 }
 0x45c   : > { %14237 = vst [vmem:[#allocation4_spill] sm:$0xff] %v10194_v59  ;;  %v2930_v10 = vmul.f32 1.442695, %v2832_v18  ;;  %3028 = vadd.xlane.f32.xlu0 %v3027_v35  ;;  %v4106_v16 = vadd.f32 1.0, %v7384_v29  ;;  %7393 = vpow2.f32 %v4008_v28  ;;  %v2833_v23 = vsub.f32 %v14239_v9, %v10153_v22 }
 0x45d   : > { %14238 = vst [vmem:[#allocation107_spill] sm:$0xff] %v10199_v57  ;;  %v3860_v41 = vand.u32 2147483647, %v10194_v59  ;;  %v14240_v42 = vmax.f32 %v10045_v39, 0.0  ;;  %v4191_v5 = vmul.f32 0.6931472, %v7382_v36  ;;  %7395 = vpow2.f32 %v2928_v6 }
 0x45e   : > { %v4107_v40 = vadd.f32 1.0, %v7386_v17  ;;  %v7388_v48 = vpop.eup %7387  ;;  %v4002_v12 = vmul.f32 1.442695, %v3918_v19  ;;  %v3919_v18 = vsub.f32 0.0, %v3855_v8  ;;  %v3861_v35 = vand.u32 2147483647, %v10199_v57  ;;  %v2646_v8 = vpop.f32.mrf.mxu0 }
 0x45f   : > { %v10207_v30 = vadd.f32 %v4179_v60, %v14240_v42  ;;  %v2547_v29 = vadd.f32 %v2546_v54, %v9854_v61  ;;  %v14242_v28 = vmax.f32 %v10047_v4, 0.0  ;;  %7397 = vpow2.f32 %v2930_v10  ;;  %v10217_v42 = vpop.xlane.xlu1 %2766  ;;  %v14249_v4 = vld [vmem:[#allocation5_spill] sm:$0xff] }
 0x460   : > { %v7390_v36 = vpop.eup %7389  ;;  %7399 = vlog2.f32 %v4106_v16  ;;  %v2932_v6 = vmul.f32 1.442695, %v2833_v23  ;;  %v3924_v17 = vsub.f32 0.0, %v3860_v41  ;;  %v2596_v19 = vadd.f32 %v2595_v55, %v9857_v33  ;;  %v2695_v55 = vpop.f32.mrf.mxu1 }
 0x461   : > { %14241 = vst [vmem:[#allocation7_spill] sm:$0xff] %v10207_v30  ;;  %v10213_v22 = vadd.f32 %v4181_v13, %v14242_v28  ;;  %v10220_v15 = vpop.eup %7391  ;;  %v14245_v13 = vmax.f32 %v10052_v7, 0.0  ;;  %v4193_v9 = vmul.f32 0.6931472, %v7388_v48  ;;  %7401 = vlog2.f32 %v4107_v40  ;;  %v14250_v40 = vld [vmem:[#allocation6_spill] sm:$0xff]  ;;  %v2548_v30 = vpop.f32.mrf.mxu2 }
 0x462   : > { %14244 = vst [vmem:[#allocation109_spill] sm:$0xff] %v10220_v15  ;;  %v7394_v10 = vpop.eup %7393  ;;  %7403 = vpow2.f32 %v4002_v12  ;;  %v4004_v16 = vmul.f32 1.442695, %v3919_v18  ;;  %v3925_v23 = vsub.f32 0.0, %v3861_v35  ;;  %v10227_v41 = vsub.f32 0.0, %v2547_v29 }
 0x463   : > { %14243 = vst [vmem:[#allocation108_spill] sm:$0xff] %v10213_v22  ;;  %v10225_v28 = vadd.f32 %v4191_v5, %v14245_v13  ;;  %v10229_v60 = vpop.eup %7395  ;;  %v4112_v34 = vadd.f32 1.0, %v7390_v36  ;;  %v2834_v54 = vsub.f32 %v14249_v4, %v10217_v42  ;;  %v2647_v7 = vadd.f32 %v2646_v8, %v9835_v62 }
 0x464   : > { %14247 = vst [vmem:[#allocation111_spill] sm:$0xff] %v10227_v41  ;;  %7405 = vpow2.f32 %v2932_v6  ;;  %v4014_v5 = vmul.f32 1.442695, %v3924_v17  ;;  %v2835_v48 = vsub.f32 %v14250_v40, %v10217_v42  ;;  %v10237_v12 = vsub.f32 0.0, %v2596_v19  ;;  %v14255_v17 = vld [vmem:[#allocation8_spill] sm:$0xff] }
 0x465   : > { %14246 = vst [vmem:[#allocation110_spill] sm:$0xff] %v10225_v28  ;;  %v10239_v18 = vpop.eup %7397  ;;  %v14253_v29 = vmax.f32 %v10076_v52, 0.0  ;;  %v4113_v36 = vadd.f32 1.0, %v7394_v10  ;;  %7407 = vpow2.f32 %v4004_v16  ;;  %v4016_v6 = vmul.f32 1.442695, %v3925_v23 }
 0x466   : > { %14248 = vst [vmem:[#allocation112_spill] sm:$0xff] %v10229_v60  ;;  %v7400_v8 = vpop.eup %7399  ;;  %v2836_v40 = vsub.f32 %v14255_v17, %v10217_v42  ;;  %v3858_v19 = vand.u32 2147483647, %v10227_v41  ;;  %7409 = vlog2.f32 %v4112_v34  ;;  %v2934_v28 = vmul.f32 1.442695, %v2834_v54  ;;  %v14257_v17 = vld [vmem:[#allocation11_spill] sm:$0xff] }
 0x467   : > { %14251 = vst [vmem:[#allocation5_spill] sm:$0xff] %v10237_v12  ;;  %v10244_v13 = vadd.f32 %v4193_v9, %v14253_v29  ;;  %v7402_v22 = vpop.eup %7401  ;;  %v10251_v52 = vsub.f32 0.0, %v2647_v7  ;;  %7411 = vpow2.f32 %v4014_v5  ;;  %v2936_v10 = vmul.f32 1.442695, %v2835_v48 }
 0x468   : > { %14252 = vst [vmem:[#allocation6_spill] sm:$0xff] %v10239_v18  ;;  %v7404_v9 = vpop.eup %7403  ;;  %v3859_v29 = vand.u32 2147483647, %v10237_v12  ;;  %v2696_v16 = vadd.f32 %v2695_v55, %v9844_v56  ;;  %v4187_v23 = vmul.f32 0.6931472, %v7400_v8  ;;  %7413 = vlog2.f32 %v4113_v36  ;;  %v2597_v55 = vpop.f32.mrf.mxu3 }
 0x469   : > { %14254 = vst [vmem:[#allocation113_spill] sm:$0xff] %v10244_v13  ;;  %v2837_v4 = vsub.f32 %v14257_v17, %v10217_v42  ;;  %v3030_v34 = vadd.f32 %v10229_v60, %v10220_v15  ;;  %v4189_v7 = vmul.f32 0.6931472, %v7402_v22  ;;  %7415 = vpow2.f32 %v4016_v6 }
 0x46a   : > { %14256 = vst [vmem:[#allocation8_spill] sm:$0xff] %v10251_v52  ;;  %v10259_v35 = vpop.eup %7405  ;;  %v2938_v54 = vmul.f32 1.442695, %v2836_v40  ;;  %v3922_v5 = vsub.f32 0.0, %v3858_v19  ;;  %v4110_v48 = vadd.f32 1.0, %v7404_v9  ;;  %7417 = vpow2.f32 %v2934_v28 }
 0x46b   : > { %14258 = vst [vmem:[#allocation11_spill] sm:$0xff] %v10259_v35  ;;  %v3864_v39 = vand.u32 2147483647, %v10251_v52  ;;  %v3031_v36 = vadd.f32 %v10239_v18, %v3030_v34  ;;  %v7408_v8 = vpop.eup %7407  ;;  %7419 = vpow2.f32 %v2936_v10  ;;  %v3923_v42 = vsub.f32 0.0, %v3859_v29  ;;  %v2649_v10 = vpop.f32.mrf.mxu0 }
 0x46c   : > { %v10263_v17 = vsub.f32 0.0, %v2696_v16  ;;  %v2549_v60 = vadd.f32 %v2548_v30, %v9854_v61  ;;  %v7410_v15 = vpop.eup %7409  ;;  %v14260_v6 = vmax.f32 %v10102_v21, 0.0  ;;  %v2940_v28 = vmul.f32 1.442695, %v2837_v4 }
 0x46d   : > { %v3032_v19 = vadd.f32 %v10259_v35, %v3031_v36  ;;  %v7412_v9 = vpop.eup %7411  ;;  %v14262_v34 = vmax.f32 %v10106_v20, 0.0  ;;  %v4010_v29 = vmul.f32 1.442695, %v3922_v5  ;;  %v2598_v30 = vadd.f32 %v2597_v55, %v9857_v33  ;;  %v14269_v20 = vld [vmem:[#allocation10_spill] sm:$0xff] }
 0x46e   : > { %14259 = vst [vmem:[#allocation114_spill] sm:$0xff] %v10263_v17  ;;  %v10269_v40 = vadd.f32 %v4187_v23, %v14260_v6  ;;  %v7414_v16 = vpop.eup %7413  ;;  %7421 = vlog2.f32 %v4110_v48  ;;  %v4111_v22 = vadd.f32 1.0, %v7408_v8  ;;  %v3928_v23 = vsub.f32 0.0, %v3864_v39  ;;  %v10279_v6 = vpop.xlane.xlu2 %2771 }
 0x46f   : > { %v10274_v18 = vadd.f32 %v4189_v7, %v14262_v34  ;;  %3033 = vadd.xlane.f32.xlu1 %v3032_v19  ;;  %v7416_v4 = vpop.eup %7415  ;;  %7423 = vpow2.f32 %v2938_v54  ;;  %v4012_v36 = vmul.f32 1.442695, %v3923_v42  ;;  %v3865_v7 = vand.u32 2147483647, %v10263_v17  ;;  %v14267_v54 = vld [vmem:[#allocation9_spill] sm:$0xff] }
 0x470   : > { %14261 = vst [vmem:[#allocation115_spill] sm:$0xff] %v10269_v40  ;;  %v10282_v34 = vsub.f32 0.0, %v2549_v60  ;;  %v10284_v5 = vpop.eup %7417  ;;  %v4199_v48 = vmul.f32 0.6931472, %v7410_v15  ;;  %v4116_v8 = vadd.f32 1.0, %v7412_v9  ;;  %7425 = vpow2.f32 %v2940_v28 }
 0x471   : > { %14263 = vst [vmem:[#allocation116_spill] sm:$0xff] %v10274_v18  ;;  %v10287_v13 = vpop.eup %7419  ;;  %7427 = vpow2.f32 %v4010_v29  ;;  %v2838_v42 = vsub.f32 %v14267_v54, %v10279_v6  ;;  %v10292_v19 = vsub.f32 0.0, %v2598_v30  ;;  %v4022_v60 = vmul.f32 1.442695, %v3928_v23  ;;  %v2698_v30 = vpop.f32.mrf.mxu1 }
 0x472   : > { %14264 = vst [vmem:[#allocation117_spill] sm:$0xff] %v10282_v34  ;;  %7429 = vlog2.f32 %v4111_v22  ;;  %v2839_v21 = vsub.f32 %v14269_v20, %v10279_v6  ;;  %v2650_v55 = vadd.f32 %v2649_v10, %v9835_v62  ;;  %v4117_v15 = vadd.f32 1.0, %v7416_v4  ;;  %v14273_v10 = vld [vmem:[#allocation13_spill] sm:$0xff] }
 0x473   : > { %14265 = vst [vmem:[#allocation118_spill] sm:$0xff] %v10284_v5  ;;  %7431 = vpow2.f32 %v4012_v36  ;;  %v3929_v28 = vsub.f32 0.0, %v3865_v7  ;;  %v3862_v9 = vand.u32 2147483647, %v10282_v34  ;;  %v14270_v29 = vmax.f32 %v10134_v38, 0.0 }
 0x474   : > { %14266 = vst [vmem:[#allocation119_spill] sm:$0xff] %v10287_v13  ;;  %v7422_v40 = vpop.eup %7421  ;;  %v4201_v54 = vmul.f32 0.6931472, %v7414_v16  ;;  %7433 = vlog2.f32 %v4116_v8  ;;  %v3035_v22 = vadd.f32 %v10287_v13, %v10284_v5  ;;  %v2840_v4 = vsub.f32 %v14273_v10, %v10279_v6 }
 0x475   : > { %14268 = vst [vmem:[#allocation9_spill] sm:$0xff] %v10292_v19  ;;  %v10300_v39 = vadd.f32 %v4199_v48, %v14270_v29  ;;  %v10304_v23 = vpop.eup %7423  ;;  %v2942_v36 = vmul.f32 1.442695, %v2838_v42  ;;  %v3863_v7 = vand.u32 2147483647, %v10292_v19  ;;  %7435 = vpow2.f32 %v4022_v60 }
 0x476   : > { %14272 = vst [vmem:[#allocation120_spill] sm:$0xff] %v10304_v23  ;;  %v10310_v18 = vpop.eup %7425  ;;  %v2944_v48 = vmul.f32 1.442695, %v2839_v21  ;;  %v10312_v16 = vsub.f32 0.0, %v2650_v55  ;;  %v3036_v8 = vadd.f32 %v10304_v23, %v3035_v22  ;;  %7437 = vlog2.f32 %v4117_v15  ;;  %v2551_v21 = vpop.f32.mrf.mxu2 }
 0x477   : > { %14271 = vst [vmem:[#allocation10_spill] sm:$0xff] %v10300_v39  ;;  %v7428_v29 = vpop.eup %7427  ;;  %v4024_v38 = vmul.f32 1.442695, %v3929_v28  ;;  %v3926_v13 = vsub.f32 0.0, %v3862_v9  ;;  %v2699_v20 = vadd.f32 %v2698_v30, %v9844_v56  ;;  %v14276_v42 = vmax.f32 %v10138_v26, 0.0  ;;  %v14278_v30 = vld [vmem:[#allocation16_spill] sm:$0xff]  ;;  %v10336_v39 = vpop.xlane.xlu0 %2776 }
 0x478   : > { %14274 = vst [vmem:[#allocation13_spill] sm:$0xff] %v10310_v18  ;;  %v7430_v5 = vpop.eup %7429  ;;  %v3037_v55 = vadd.f32 %v10310_v18, %v3036_v8  ;;  %v4195_v22 = vmul.f32 0.6931472, %v7422_v40  ;;  %7439 = vpow2.f32 %v2942_v36  ;;  %v2946_v15 = vmul.f32 1.442695, %v2840_v4 }
 0x479   : > { %14275 = vst [vmem:[#allocation121_spill] sm:$0xff] %v10312_v16  ;;  %v10319_v35 = vadd.f32 %v4201_v54, %v14276_v42  ;;  %v7432_v1 = vpop.eup %7431  ;;  %v3927_v28 = vsub.f32 0.0, %v3863_v7  ;;  %v4114_v23 = vadd.f32 1.0, %v7428_v29  ;;  %v2841_v24 = vsub.f32 %v14278_v30, %v10279_v6 }
 0x47a   : > { %v7434_v9 = vpop.eup %7433  ;;  %7441 = vpow2.f32 %v2944_v48  ;;  %v3868_v10 = vand.u32 2147483647, %v10312_v16  ;;  %3038 = vadd.xlane.f32.xlu2 %v3037_v55  ;;  %v4018_v54 = vmul.f32 1.442695, %v3926_v13  ;;  %v10326_v42 = vsub.f32 0.0, %v2699_v20  ;;  %v2600_v13 = vpop.f32.mrf.mxu3 }
 0x47b   : > { %14277 = vst [vmem:[#allocation122_spill] sm:$0xff] %v10319_v35  ;;  %7443 = vpow2.f32 %v4024_v38  ;;  %v2552_v8 = vadd.f32 %v2551_v21, %v9854_v61  ;;  %v7436_v60 = vpop.eup %7435  ;;  %v4197_v4 = vmul.f32 0.6931472, %v7430_v5  ;;  %v4115_v36 = vadd.f32 1.0, %v7432_v1  ;;  %v2651_v5 = vpop.f32.mrf.mxu0 }
 0x47c   : > { %14279 = vst [vmem:[#allocation16_spill] sm:$0xff] %v10326_v42  ;;  %v7438_v29 = vpop.eup %7437  ;;  %v14280_v6 = vmax.f32 %v10162_v46, 0.0  ;;  %v4207_v30 = vmul.f32 0.6931472, %v7434_v9  ;;  %7445 = vpow2.f32 %v2946_v15  ;;  %v4020_v38 = vmul.f32 1.442695, %v3927_v28 }
 0x47d   : > { %7447 = vlog2.f32 %v4114_v23  ;;  %v2948_v21 = vmul.f32 1.442695, %v2841_v24  ;;  %v3932_v55 = vsub.f32 0.0, %v3868_v10  ;;  %v4120_v40 = vadd.f32 1.0, %v7436_v60  ;;  %v14289_v60 = vld [vmem:[#allocation14_spill] sm:$0xff] }
 0x47e   : > { %v10333_v48 = vadd.f32 %v4195_v22, %v14280_v6  ;;  %v10338_v1 = vpop.eup %7439  ;;  %7449 = vpow2.f32 %v4018_v54  ;;  %v3869_v7 = vand.u32 2147483647, %v10326_v42  ;;  %v10341_v22 = vsub.f32 0.0, %v2552_v8 }
 0x47f   : > { %14282 = vst [vmem:[#allocation124_spill] sm:$0xff] %v10338_v1  ;;  %v14285_v15 = vmax.f32 %v10183_v47, 0.0  ;;  %v4209_v28 = vmul.f32 0.6931472, %v7438_v29  ;;  %7451 = vlog2.f32 %v4115_v36  ;;  %v2601_v24 = vadd.f32 %v2600_v13, %v9857_v33  ;;  %v14290_v29 = vld [vmem:[#allocation15_spill] sm:$0xff] }
 0x480   : > { %14281 = vst [vmem:[#allocation123_spill] sm:$0xff] %v10333_v48  ;;  %v10343_v9 = vpop.eup %7441  ;;  %v14287_v6 = vmax.f32 %v10194_v59, 0.0  ;;  %7453 = vpow2.f32 %v4020_v38  ;;  %v2842_v54 = vsub.f32 %v14289_v60, %v10336_v39  ;;  %v2652_v8 = vadd.f32 %v2651_v5, %v9835_v62 }
 0x481   : > { %14283 = vst [vmem:[#allocation125_spill] sm:$0xff] %v10341_v22  ;;  %v10347_v23 = vadd.f32 %v4197_v4, %v14285_v15  ;;  %v7444_v10 = vpop.eup %7443  ;;  %7455 = vpow2.f32 %v2948_v21  ;;  %v4030_v4 = vmul.f32 1.442695, %v3932_v55  ;;  %v2843_v36 = vsub.f32 %v14290_v29, %v10336_v39 }
 0x482   : > { %14284 = vst [vmem:[#allocation126_spill] sm:$0xff] %v10343_v9  ;;  %v10352_v20 = vadd.f32 %v4207_v30, %v14287_v6  ;;  %v10360_v15 = vpop.eup %7445  ;;  %7457 = vlog2.f32 %v4120_v40  ;;  %v3933_v13 = vsub.f32 0.0, %v3869_v7  ;;  %v3866_v30 = vand.u32 2147483647, %v10341_v22  ;;  %v2700_v6 = vpop.f32.mrf.mxu1 }
 0x483   : > { %14286 = vst [vmem:[#allocation127_spill] sm:$0xff] %v10347_v23  ;;  %v3040_v38 = vadd.f32 %v10343_v9, %v10338_v1  ;;  %v7448_v60 = vpop.eup %7447  ;;  %v14292_v35 = vmax.f32 %v10199_v57, 0.0  ;;  %v4121_v55 = vadd.f32 1.0, %v7444_v10  ;;  %v10370_v48 = vsub.f32 0.0, %v2601_v24  ;;  %v14296_v24 = vld [vmem:[#allocation17_spill] sm:$0xff] }
 0x484   : > { %14288 = vst [vmem:[#allocation128_spill] sm:$0xff] %v10352_v20  ;;  %v7450_v29 = vpop.eup %7449  ;;  %v2950_v26 = vmul.f32 1.442695, %v2842_v54  ;;  %v10374_v47 = vsub.f32 0.0, %v2652_v8  ;;  %7459 = vpow2.f32 %v4030_v4  ;;  %v2952_v59 = vmul.f32 1.442695, %v2843_v36 }
 0x485   : > { %14291 = vst [vmem:[#allocation14_spill] sm:$0xff] %v10360_v15  ;;  %v10368_v21 = vadd.f32 %v4209_v28, %v14292_v35  ;;  %v7452_v46 = vpop.eup %7451  ;;  %v2701_v5 = vadd.f32 %v2700_v6, %v9844_v56  ;;  %v3041_v23 = vadd.f32 %v10360_v15, %v3040_v38  ;;  %v4203_v28 = vmul.f32 0.6931472, %v7448_v60  ;;  %v14298_v8 = vld [vmem:[#allocation21_spill] sm:$0xff] }
 0x486   : > { %14294 = vst [vmem:[#allocation129_spill] sm:$0xff] %v10370_v48  ;;  %v7454_v35 = vpop.eup %7453  ;;  %v4032_v10 = vmul.f32 1.442695, %v3933_v13  ;;  %v2844_v57 = vsub.f32 %v14296_v24, %v10336_v39  ;;  %v3930_v9 = vsub.f32 0.0, %v3866_v30  ;;  %7461 = vlog2.f32 %v4121_v55  ;;  %v2553_v55 = vpop.f32.mrf.mxu2 }
 0x487   : > { %14293 = vst [vmem:[#allocation15_spill] sm:$0xff] %v10368_v21  ;;  %v10380_v40 = vpop.eup %7455  ;;  %v4118_v54 = vadd.f32 1.0, %v7450_v29  ;;  %v2845_v7 = vsub.f32 %v14298_v8, %v10336_v39  ;;  %v3867_v4 = vand.u32 2147483647, %v10370_v48  ;;  %v4205_v6 = vmul.f32 0.6931472, %v7452_v46 }
 0x488   : > { %14295 = vst [vmem:[#allocation130_spill] sm:$0xff] %v10374_v47  ;;  %v7458_v36 = vpop.eup %7457  ;;  %7463 = vpow2.f32 %v2950_v26  ;;  %v3872_v38 = vand.u32 2147483647, %v10374_v47  ;;  %v3042_v13 = vadd.f32 %v10380_v40, %v3041_v23  ;;  %v4119_v24 = vadd.f32 1.0, %v7454_v35  ;;  %v10395_v26 = vpop.xlane.xlu1 %2781 }
 0x489   : > { %14297 = vst [vmem:[#allocation17_spill] sm:$0xff] %v10380_v40  ;;  %7465 = vpow2.f32 %v2952_v59  ;;  %v10388_v30 = vsub.f32 0.0, %v2701_v5  ;;  %v14300_v29 = vmax.f32 %v10227_v41, 0.0  ;;  %v4026_v46 = vmul.f32 1.442695, %v3930_v9  ;;  %v2602_v41 = vpop.f32.mrf.mxu3 }
 0x48a   : > { %7467 = vpow2.f32 %v4032_v10  ;;  %3043 = vadd.xlane.f32.xlu0 %v3042_v13  ;;  %v7460_v8 = vpop.eup %7459  ;;  %v4215_v23 = vmul.f32 0.6931472, %v7458_v36  ;;  %v2954_v60 = vmul.f32 1.442695, %v2844_v57  ;;  %v3931_v35 = vsub.f32 0.0, %v3867_v4  ;;  %v14304_v36 = vld [vmem:[#allocation19_spill] sm:$0xff] }
 0x48b   : > { %14299 = vst [vmem:[#allocation21_spill] sm:$0xff] %v10388_v30  ;;  %v10392_v20 = vadd.f32 %v4203_v28, %v14300_v29  ;;  %7469 = vlog2.f32 %v4118_v54  ;;  %v14302_v59 = vmax.f32 %v10237_v12, 0.0  ;;  %v2956_v28 = vmul.f32 1.442695, %v2845_v7 }
 0x48c   : > { %v3936_v29 = vsub.f32 0.0, %v3872_v38  ;;  %v7462_v39 = vpop.eup %7461  ;;  %7471 = vlog2.f32 %v4119_v24  ;;  %v3873_v10 = vand.u32 2147483647, %v10388_v30  ;;  %v2846_v54 = vsub.f32 %v14304_v36, %v10395_v26  ;;  %v2654_v38 = vpop.f32.mrf.mxu0 }
 0x48d   : > { %14301 = vst [vmem:[#allocation131_spill] sm:$0xff] %v10392_v20  ;;  %v10399_v5 = vadd.f32 %v4205_v6, %v14302_v59  ;;  %v4124_v4 = vadd.f32 1.0, %v7460_v8  ;;  %7473 = vpow2.f32 %v4026_v46  ;;  %v14306_v6 = vld [vmem:[#allocation20_spill] sm:$0xff]  ;;  %v2554_v7 = vadd.f32 %v2553_v55, %v9854_v61  ;;  %v14310_v55 = vld [vmem:[#allocation23_spill] sm:$0xff]  ;;  %v10434_v8 = vpop.xlane.xlu2 %2786 }
 0x48e   : > { %v10406_v57 = vpop.eup %7463  ;;  %v2847_v13 = vsub.f32 %v14306_v6, %v10395_v26  ;;  %v14308_v9 = vmax.f32 %v10251_v52, 0.0  ;;  %7475 = vpow2.f32 %v2954_v60  ;;  %v4028_v36 = vmul.f32 1.442695, %v3931_v35  ;;  %v2703_v35 = vpop.f32.mrf.mxu1 }
 0x48f   : > { %14303 = vst [vmem:[#allocation132_spill] sm:$0xff] %v10399_v5  ;;  %v10411_v59 = vpop.eup %7465  ;;  %v4217_v46 = vmul.f32 0.6931472, %v7462_v39  ;;  %7477 = vpow2.f32 %v2956_v28  ;;  %v4038_v40 = vmul.f32 1.442695, %v3936_v29  ;;  %v3937_v15 = vsub.f32 0.0, %v3873_v10  ;;  %v2556_v29 = vpop.f32.mrf.mxu2 }
 0x490   : > { %14305 = vst [vmem:[#allocation19_spill] sm:$0xff] %v10406_v57  ;;  %v10416_v21 = vadd.f32 %v4215_v23, %v14308_v9  ;;  %v7468_v12 = vpop.eup %7467  ;;  %v2848_v1 = vsub.f32 %v14310_v55, %v10395_v26  ;;  %v2958_v18 = vmul.f32 1.442695, %v2846_v54  ;;  %v2603_v24 = vadd.f32 %v2602_v41, %v9857_v33 }
 0x491   : > { %14307 = vst [vmem:[#allocation20_spill] sm:$0xff] %v10411_v59  ;;  %v7470_v6 = vpop.eup %7469  ;;  %7479 = vlog2.f32 %v4124_v4  ;;  %v2960_v9 = vmul.f32 1.442695, %v2847_v13  ;;  %v10423_v60 = vsub.f32 0.0, %v2554_v7  ;;  %v4125_v28 = vadd.f32 1.0, %v7468_v12  ;;  %v14314_v13 = vld [vmem:[#allocation26_spill] sm:$0xff] }
 0x492   : > { %14309 = vst [vmem:[#allocation133_spill] sm:$0xff] %v10416_v21  ;;  %v7472_v52 = vpop.eup %7471  ;;  %7481 = vpow2.f32 %v4028_v36  ;;  %v3045_v10 = vadd.f32 %v10411_v59, %v10406_v57  ;;  %v14312_v54 = vmax.f32 %v10263_v17, 0.0  ;;  %v4211_v4 = vmul.f32 0.6931472, %v7470_v6  ;;  %v14318_v17 = vld [vmem:[#allocation24_spill] sm:$0xff] }
 0x493   : > { %14311 = vst [vmem:[#allocation23_spill] sm:$0xff] %v10423_v60  ;;  %v7474_v55 = vpop.eup %7473  ;;  %7483 = vpow2.f32 %v4038_v40  ;;  %v2849_v7 = vsub.f32 %v14314_v13, %v10395_v26  ;;  %v4040_v12 = vmul.f32 1.442695, %v3937_v15  ;;  %v2962_v36 = vmul.f32 1.442695, %v2848_v1  ;;  %v2605_v40 = vpop.f32.mrf.mxu3 }
 0x494   : > { %v10430_v41 = vadd.f32 %v4217_v46, %v14312_v54  ;;  %v10436_v23 = vpop.eup %7475  ;;  %7485 = vpow2.f32 %v2958_v18  ;;  %v10438_v39 = vsub.f32 0.0, %v2603_v24  ;;  %v3870_v46 = vand.u32 2147483647, %v10423_v60 }
 0x495   : > { %14315 = vst [vmem:[#allocation26_spill] sm:$0xff] %v10436_v23  ;;  %v10440_v21 = vpop.eup %7477  ;;  %7487 = vpow2.f32 %v2960_v9  ;;  %v2655_v6 = vadd.f32 %v2654_v38, %v9835_v62  ;;  %v3046_v54 = vadd.f32 %v10436_v23, %v3045_v10  ;;  %v4213_v26 = vmul.f32 0.6931472, %v7472_v52  ;;  %v14319_v9 = vld [vmem:[#allocation25_spill] sm:$0xff]  ;;  %v2656_v38 = vpop.f32.mrf.mxu0 }
 0x496   : > { %14313 = vst [vmem:[#allocation134_spill] sm:$0xff] %v10430_v41  ;;  %7489 = vlog2.f32 %v4125_v28  ;;  %v4122_v13 = vadd.f32 1.0, %v7474_v55  ;;  %v2850_v15 = vsub.f32 %v14318_v17, %v10434_v8  ;;  %v2964_v1 = vmul.f32 1.442695, %v2849_v7 }
 0x497   : > { %14316 = vst [vmem:[#allocation135_spill] sm:$0xff] %v10438_v39  ;;  %v10447_v18 = vpop.eup %7479  ;;  %v2704_v24 = vadd.f32 %v2703_v35, %v9844_v56  ;;  %v2851_v5 = vsub.f32 %v14319_v9, %v10434_v8  ;;  %v3047_v20 = vadd.f32 %v10440_v21, %v3046_v54  ;;  %7491 = vpow2.f32 %v4040_v12 }
 0x498   : > { %14317 = vst [vmem:[#allocation136_spill] sm:$0xff] %v10440_v21  ;;  %v7482_v59 = vpop.eup %7481  ;;  %v3871_v28 = vand.u32 2147483647, %v10438_v39  ;;  %7493 = vpow2.f32 %v2962_v36  ;;  %v3934_v7 = vsub.f32 0.0, %v3870_v46  ;;  %v10457_v35 = vsub.f32 0.0, %v2655_v6  ;;  %v2705_v46 = vpop.f32.mrf.mxu1 }
 0x499   : > { %v7484_v17 = vpop.eup %7483  ;;  %3048 = vadd.xlane.f32.xlu1 %v3047_v20  ;;  %v14322_v54 = vmax.f32 %v10282_v34, 0.0  ;;  %7495 = vlog2.f32 %v4122_v13  ;;  %v2966_v10 = vmul.f32 1.442695, %v2850_v15  ;;  %v2557_v12 = vadd.f32 %v2556_v29, %v9854_v61  ;;  %v2558_v15 = vpop.f32.mrf.mxu2 }
 0x49a   : > { %14320 = vst [vmem:[#allocation24_spill] sm:$0xff] %v10457_v35  ;;  %v10459_v9 = vpop.eup %7485  ;;  %v14325_v41 = vmax.f32 %v10292_v19, 0.0  ;;  %7497 = vpow2.f32 %v2964_v1  ;;  %v10472_v36 = vsub.f32 0.0, %v2704_v24  ;;  %v2968_v20 = vmul.f32 1.442695, %v2851_v5  ;;  %v14328_v19 = vld [vmem:[#allocation29_spill] sm:$0xff] }
 0x49b   : > { %14321 = vst [vmem:[#allocation25_spill] sm:$0xff] %v10459_v9  ;;  %v10463_v21 = vadd.f32 %v4211_v4, %v14322_v54  ;;  %v10466_v52 = vpop.eup %7487  ;;  %v4123_v34 = vadd.f32 1.0, %v7482_v59  ;;  %v4128_v4 = vadd.f32 1.0, %v7484_v17  ;;  %v3935_v54 = vsub.f32 0.0, %v3871_v28  ;;  %v14331_v17 = vld [vmem:[#allocation30_spill] sm:$0xff] }
 0x49c   : > { %14324 = vst [vmem:[#allocation138_spill] sm:$0xff] %v10466_v52  ;;  %v10470_v55 = vadd.f32 %v4213_v26, %v14325_v41  ;;  %v10474_v6 = vpop.eup %7489  ;;  %v2606_v13 = vadd.f32 %v2605_v40, %v9857_v33  ;;  %v4034_v29 = vmul.f32 1.442695, %v3934_v7  ;;  %v3876_v23 = vand.u32 2147483647, %v10457_v35 }
 0x49d   : > { %14323 = vst [vmem:[#allocation137_spill] sm:$0xff] %v10463_v21  ;;  %v2852_v41 = vsub.f32 %v14328_v19, %v10434_v8  ;;  %v2657_v26 = vadd.f32 %v2656_v38, %v9835_v62  ;;  %v7492_v1 = vpop.eup %7491  ;;  %7499 = vpow2.f32 %v2966_v10  ;;  %v10481_v5 = vsub.f32 0.0, %v2557_v12  ;;  %v2607_v38 = vpop.f32.mrf.mxu3 }
 0x49e   : > { %14326 = vst [vmem:[#allocation139_spill] sm:$0xff] %v10470_v55  ;;  %v2706_v24 = vadd.f32 %v2705_v46, %v9844_v56  ;;  %v3050_v59 = vadd.f32 %v10466_v52, %v10459_v9  ;;  %v10486_v28 = vpop.eup %7493  ;;  %v3877_v40 = vand.u32 2147483647, %v10472_v36  ;;  %v2853_v7 = vsub.f32 %v14331_v17, %v10434_v8  ;;  %v2659_v8 = vpop.f32.mrf.mxu0 }
 0x49f   : > { %14327 = vst [vmem:[#allocation140_spill] sm:$0xff] %v10472_v36  ;;  %7501 = vpow2.f32 %v2968_v20  ;;  %v2559_v19 = vadd.f32 %v2558_v15, %v9854_v61  ;;  %v10492_v57 = vpop.eup %7495  ;;  %v4036_v10 = vmul.f32 1.442695, %v3935_v54  ;;  %v10494_v12 = vsub.f32 0.0, %v2606_v13 }
 0x4a0   : > { %14329 = vst [vmem:[#allocation29_spill] sm:$0xff] %v10481_v5  ;;  %7503 = vlog2.f32 %v4123_v34  ;;  %v3051_v46 = vadd.f32 %v10486_v28, %v3050_v59  ;;  %v10497_v52 = vpop.eup %7497  ;;  %v3940_v9 = vsub.f32 0.0, %v3876_v23  ;;  %v2970_v31 = vmul.f32 1.442695, %v2852_v41 }
 0x4a1   : > { %14330 = vst [vmem:[#allocation141_spill] sm:$0xff] %v10486_v28  ;;  %7505 = vpow2.f32 %v4034_v29  ;;  %v10499_v25 = vsub.f32 0.0, %v2657_v26  ;;  %v3874_v20 = vand.u32 2147483647, %v10481_v5  ;;  %v10502_v15 = vsub.f32 0.0, %v2706_v24 }
 0x4a2   : > { %14332 = vst [vmem:[#allocation30_spill] sm:$0xff] %v10494_v12  ;;  %v2608_v17 = vadd.f32 %v2607_v38, %v9857_v33  ;;  %v3052_v34 = vadd.f32 %v10497_v52, %v3051_v46  ;;  %7507 = vlog2.f32 %v4128_v4  ;;  %v3941_v54 = vsub.f32 0.0, %v3877_v40 }
 0x4a3   : > { %14333 = vst [vmem:[#allocation142_spill] sm:$0xff] %v10497_v52  ;;  %v2972_v13 = vmul.f32 1.442695, %v2853_v7  ;;  %v10506_v59 = vsub.f32 0.0, %v2559_v19  ;;  %v10508_v28 = vpop.eup %7499  ;;  %7509 = vpow2.f32 %v4036_v10  ;;  %v3875_v29 = vand.u32 2147483647, %v10494_v12  ;;  %v2708_v7 = vpop.f32.mrf.mxu1 }
 0x4a4   : > { %14334 = vst [vmem:[#allocation143_spill] sm:$0xff] %v10499_v25  ;;  %3053 = vadd.xlane.f32.xlu2 %v3052_v34  ;;  %v2660_v41 = vadd.f32 %v2659_v8, %v9835_v62  ;;  %7511 = vpow2.f32 %v2970_v31  ;;  %v3880_v40 = vand.u32 2147483647, %v10499_v25  ;;  %v4046_v38 = vmul.f32 1.442695, %v3940_v9 }
 0x4a5   : > { %14335 = vst [vmem:[#allocation144_spill] sm:$0xff] %v10502_v15  ;;  %v10513_v26 = vpop.eup %7501  ;;  %v3938_v46 = vsub.f32 0.0, %v3874_v20  ;;  %v3881_v10 = vand.u32 2147483647, %v10502_v15  ;;  %v10519_v23 = vsub.f32 0.0, %v2608_v17  ;;  %7513 = vpow2.f32 %v2972_v13 }
 0x4a6   : > { %14336 = vst [vmem:[#allocation145_spill] sm:$0xff] %v10506_v59  ;;  %v7504_v19 = vpop.eup %7503  ;;  %v4223_v8 = vmul.f32 0.6931472, %v10447_v18  ;;  %v4048_v52 = vmul.f32 1.442695, %v3941_v54  ;;  %v3939_v21 = vsub.f32 0.0, %v3875_v29  ;;  %v2709_v31 = vadd.f32 %v2708_v7, %v9844_v56 }
 0x4a7   : > { %14337 = vst [vmem:[#allocation146_spill] sm:$0xff] %v10508_v28  ;;  %v7506_v34 = vpop.eup %7505  ;;  %v3878_v24 = vand.u32 2147483647, %v10506_v59  ;;  %v10523_v4 = vsub.f32 0.0, %v2660_v41  ;;  %v3055_v9 = vadd.f32 %v10513_v26, %v10508_v28  ;;  %v4225_v55 = vmul.f32 0.6931472, %v10474_v6  ;;  %v2561_v41 = vpop.f32.mrf.mxu2 }
 0x4a8   : > { %14338 = vst [vmem:[#allocation147_spill] sm:$0xff] %v10513_v26  ;;  %v7508_v20 = vpop.eup %7507  ;;  %v4129_v17 = vadd.f32 1.0, %v7492_v1  ;;  %v3944_v14 = vsub.f32 0.0, %v3880_v40  ;;  %7515 = vpow2.f32 %v4046_v38  ;;  %v4042_v54 = vmul.f32 1.442695, %v3938_v46 }
 0x4a9   : > { %14339 = vst [vmem:[#allocation148_spill] sm:$0xff] %v10519_v23  ;;  %v7510_v18 = vpop.eup %7509  ;;  %v3945_v13 = vsub.f32 0.0, %v3881_v10  ;;  %v3879_v29 = vand.u32 2147483647, %v10519_v23  ;;  %v14342_v7 = vmax.f32 %v10312_v16, 0.0  ;;  %v4126_v26 = vadd.f32 1.0, %v7506_v34 }
 0x4aa   : > { %14340 = vst [vmem:[#allocation149_spill] sm:$0xff] %v10523_v4  ;;  %v10531_v3 = vpop.eup %7511  ;;  %7517 = vpow2.f32 %v4048_v52  ;;  %v3942_v6 = vsub.f32 0.0, %v3878_v24  ;;  %v4044_v1 = vmul.f32 1.442695, %v3939_v21  ;;  %v3884_v58 = vand.u32 2147483647, %v10523_v4 }
 0x4ab   : > { %14341 = vst [vmem:[#allocation150_spill] sm:$0xff] %v10531_v3  ;;  %v10535_v51 = vadd.f32 %v4223_v8, %v14342_v7  ;;  %v10538_v40 = vsub.f32 0.0, %v2709_v31  ;;  %v3056_v38 = vadd.f32 %v10531_v3, %v3055_v9  ;;  %v10541_v46 = vpop.eup %7513  ;;  %v4219_v10 = vmul.f32 0.6931472, %v10492_v57  ;;  %v2610_v7 = vpop.f32.mrf.mxu3 }
 0x4ac   : > { %14345 = vst [vmem:[#allocation153_spill] sm:$0xff] %v10541_v46  ;;  %7519 = vlog2.f32 %v4129_v17  ;;  %v4054_v28 = vmul.f32 1.442695, %v3944_v14  ;;  %v2562_v16 = vadd.f32 %v2561_v41, %v9854_v61  ;;  %v4056_v8 = vmul.f32 1.442695, %v3945_v13 }
 0x4ad   : > { %14343 = vst [vmem:[#allocation151_spill] sm:$0xff] %v10535_v51  ;;  %7521 = vpow2.f32 %v4042_v54  ;;  %v3943_v34 = vsub.f32 0.0, %v3879_v29  ;;  %v3057_v52 = vadd.f32 %v10541_v46, %v3056_v38  ;;  %v4221_v21 = vmul.f32 0.6931472, %v7504_v19 }
 0x4ae   : > { %14344 = vst [vmem:[#allocation152_spill] sm:$0xff] %v10538_v40  ;;  %v4231_v24 = vmul.f32 0.6931472, %v7508_v20  ;;  %7523 = vlog2.f32 %v4126_v26  ;;  %v4050_v31 = vmul.f32 1.442695, %v3942_v6  ;;  %v7516_v0 = vpop.eup %7515  ;;  %v4127_v9 = vadd.f32 1.0, %v7510_v18 }
 0x4af   : > { %7525 = vpow2.f32 %v4044_v1  ;;  %v3948_v3 = vsub.f32 0.0, %v3884_v58  ;;  %v3885_v57 = vand.u32 2147483647, %v10538_v40  ;;  %3058 = vadd.xlane.f32.xlu0 %v3057_v52  ;;  %v14346_v54 = vmax.f32 %v10326_v42, 0.0 }
 0x4b0   : > { %v7518_v14 = vpop.eup %7517  ;;  %7527 = vpow2.f32 %v4054_v28  ;;  %v10552_v19 = vsub.f32 0.0, %v2562_v16  ;;  %v14349_v26 = vmax.f32 %v10341_v22, 0.0  ;;  %v4052_v58 = vmul.f32 1.442695, %v3943_v34 }
 0x4b1   : > { %v10550_v13 = vadd.f32 %v4225_v55, %v14346_v54  ;;  %7529 = vpow2.f32 %v4056_v8  ;;  %v14351_v41 = vmax.f32 %v10370_v48, 0.0  ;;  %v4132_v1 = vadd.f32 1.0, %v7516_v0  ;;  %v2661_v0 = vpop.f32.mrf.mxu0 }
 0x4b2   : > { %14348 = vst [vmem:[#allocation155_spill] sm:$0xff] %v10552_v19  ;;  %v10556_v20 = vadd.f32 %v4219_v10, %v14349_v26  ;;  %v7520_v29 = vpop.eup %7519  ;;  %7531 = vpow2.f32 %v4050_v31  ;;  %v2611_v55 = vadd.f32 %v2610_v7, %v9857_v33  ;;  %v14353_v16 = vmax.f32 %v10374_v47, 0.0  ;;  %v2563_v7 = vpop.f32.mrf.mxu2 }
 0x4b3   : > { %14347 = vst [vmem:[#allocation154_spill] sm:$0xff] %v10550_v13  ;;  %v10561_v6 = vadd.f32 %v4221_v21, %v14351_v41  ;;  %v7522_v28 = vpop.eup %7521  ;;  %7533 = vlog2.f32 %v4127_v9  ;;  %v4062_v10 = vmul.f32 1.442695, %v3948_v3  ;;  %v3949_v52 = vsub.f32 0.0, %v3885_v57  ;;  %v2612_v51 = vpop.f32.mrf.mxu3 }
 0x4b4   : > { %14350 = vst [vmem:[#allocation156_spill] sm:$0xff] %v10556_v20  ;;  %v10566_v38 = vadd.f32 %v4231_v24, %v14353_v16  ;;  %v7524_v54 = vpop.eup %7523  ;;  %v4133_v26 = vadd.f32 1.0, %v7518_v14  ;;  %v3882_v21 = vand.u32 2147483647, %v10552_v19  ;;  %v4233_v41 = vmul.f32 0.6931472, %v7520_v29  ;;  %v2710_v24 = vpop.f32.mrf.mxu1 }
 0x4b5   : > { %14352 = vst [vmem:[#allocation157_spill] sm:$0xff] %v10561_v6  ;;  %v7526_v31 = vpop.eup %7525  ;;  %7535 = vpow2.f32 %v4052_v58  ;;  %v4130_v57 = vadd.f32 1.0, %v7522_v28  ;;  %v10574_v16 = vsub.f32 0.0, %v2611_v55  ;;  %v4064_v34 = vmul.f32 1.442695, %v3949_v52 }
 0x4b6   : > { %14354 = vst [vmem:[#allocation158_spill] sm:$0xff] %v10566_v38  ;;  %v7528_v9 = vpop.eup %7527  ;;  %7537 = vlog2.f32 %v4132_v1  ;;  %v2662_v18 = vadd.f32 %v2661_v0, %v9835_v62  ;;  %v4131_v17 = vadd.f32 1.0, %v7526_v31  ;;  %v3946_v58 = vsub.f32 0.0, %v3882_v21 }
 0x4b7   : > { %14355 = vst [vmem:[#allocation159_spill] sm:$0xff] %v10574_v16  ;;  %v7530_v8 = vpop.eup %7529  ;;  %7539 = vpow2.f32 %v4062_v10  ;;  %v2711_v13 = vadd.f32 %v2710_v24, %v9844_v56  ;;  %v14356_v1 = vmax.f32 %v10388_v30, 0.0  ;;  %v4227_v28 = vmul.f32 0.6931472, %v7524_v54 }
 0x4b8   : > { %v7532_v29 = vpop.eup %7531  ;;  %7541 = vlog2.f32 %v4133_v26  ;;  %v4136_v10 = vadd.f32 1.0, %v7528_v9  ;;  %v4137_v52 = vadd.f32 1.0, %v7530_v8  ;;  %v3883_v0 = vand.u32 2147483647, %v10574_v16 }
 0x4b9   : > { %v7534_v3 = vpop.eup %7533  ;;  %v10581_v55 = vadd.f32 %v4233_v41, %v14356_v1  ;;  %7543 = vlog2.f32 %v4130_v57  ;;  %v2564_v26 = vadd.f32 %v2563_v7, %v9854_v61  ;;  %v4134_v21 = vadd.f32 1.0, %v7532_v29 }
 0x4ba   : > { %7545 = vpow2.f32 %v4064_v34  ;;  %v10586_v24 = vsub.f32 0.0, %v2662_v18  ;;  %v2613_v6 = vadd.f32 %v2612_v51, %v9857_v33  ;;  %v4229_v41 = vmul.f32 0.6931472, %v7534_v3 }
 0x4bb   : > { %14357 = vst [vmem:[#allocation160_spill] sm:$0xff] %v10581_v55  ;;  %v7536_v31 = vpop.eup %7535  ;;  %7547 = vlog2.f32 %v4131_v17  ;;  %v4058_v54 = vmul.f32 1.442695, %v3946_v58  ;;  %v10589_v1 = vsub.f32 0.0, %v2711_v13  ;;  %v14360_v57 = vmax.f32 %v10423_v60, 0.0  ;;  %v2664_v58 = vpop.f32.mrf.mxu0 }
 0x4bc   : > { %14358 = vst [vmem:[#allocation161_spill] sm:$0xff] %v10586_v24  ;;  %v7538_v20 = vpop.eup %7537  ;;  %7549 = vlog2.f32 %v4136_v10  ;;  %v4135_v34 = vadd.f32 1.0, %v7536_v31  ;;  %v3947_v51 = vsub.f32 0.0, %v3883_v0  ;;  %v10597_v29 = vsub.f32 0.0, %v2564_v26 }
 0x4bd   : > { %14359 = vst [vmem:[#allocation162_spill] sm:$0xff] %v10589_v1  ;;  %v7540_v9 = vpop.eup %7539  ;;  %v10594_v14 = vadd.f32 %v4227_v28, %v14360_v57  ;;  %7551 = vlog2.f32 %v4137_v52  ;;  %v4239_v17 = vmul.f32 0.6931472, %v7538_v20  ;;  %v3888_v13 = vand.u32 2147483647, %v10586_v24 }
 0x4be   : > { %v7542_v18 = vpop.eup %7541  ;;  %14362 = vst [vmem:[#allocation164_spill] sm:$0xff] %v10597_v29  ;;  %7553 = vlog2.f32 %v4134_v21  ;;  %v10600_v3 = vsub.f32 0.0, %v2613_v6  ;;  %v14364_v28 = vmax.f32 %v10438_v39, 0.0  ;;  %v4140_v7 = vadd.f32 1.0, %v7540_v9 }
 0x4bf   : > { %14361 = vst [vmem:[#allocation163_spill] sm:$0xff] %v10594_v14  ;;  %v7544_v8 = vpop.eup %7543  ;;  %7555 = vpow2.f32 %v4058_v54  ;;  %v3889_v10 = vand.u32 2147483647, %v10589_v1  ;;  %v4241_v0 = vmul.f32 0.6931472, %v7542_v18  ;;  %v3816_v26 = vmax.f32 %v10499_v25, 0.0 }
 0x4c0   : > { %14363 = vst [vmem:[#allocation165_spill] sm:$0xff] %v10600_v3  ;;  %v10604_v57 = vadd.f32 %v4229_v41, %v14364_v28  ;;  %v7546_v52 = vpop.eup %7545  ;;  %v3817_v20 = vmax.f32 %v10502_v15, 0.0  ;;  %v3814_v31 = vmax.f32 %v10506_v59, 0.0  ;;  %7557 = vlog2.f32 %v4135_v34  ;;  %v2713_v15 = vpop.f32.mrf.mxu1 }
 0x4c1   : > { %v7548_v6 = vpop.eup %7547  ;;  %v4060_v21 = vmul.f32 1.442695, %v3947_v51  ;;  %v3886_v42 = vand.u32 2147483647, %v10597_v29  ;;  %v2665_v41 = vadd.f32 %v2664_v58, %v9835_v62  ;;  %v14366_v9 = vmax.f32 %v10457_v35, 0.0 }
 0x4c2   : > { %14365 = vst [vmem:[#allocation166_spill] sm:$0xff] %v10604_v57  ;;  %v7550_v28 = vpop.eup %7549  ;;  %v3952_v18 = vsub.f32 0.0, %v3888_v13  ;;  %v3887_v25 = vand.u32 2147483647, %v10600_v3  ;;  %7559 = vlog2.f32 %v4140_v7  ;;  %v4141_v59 = vadd.f32 1.0, %v7546_v52 }
 0x4c3   : > { %v10615_v48 = vadd.f32 %v4239_v17, %v14366_v9  ;;  %6299 = vrot.lane.b32.xlu0 %v9938_v45, %s14112_s27  ;;  %v7552_v34 = vpop.eup %7551  ;;  %v3953_v58 = vsub.f32 0.0, %v3889_v10  ;;  %v14368_v54 = vmax.f32 %v10472_v36, 0.0  ;;  %v4235_v17 = vmul.f32 0.6931472, %v7544_v8 }
 0x4c4   : > { %v7554_v22 = vpop.eup %7553  ;;  %v3815_v13 = vmax.f32 %v10519_v23, 0.0  ;;  %v3820_v9 = vmax.f32 %v10523_v4, 0.0  ;;  %7561 = vpow2.f32 %v4060_v21  ;;  %v3950_v55 = vsub.f32 0.0, %v3886_v42 }
 0x4c5   : > { %14367 = vst [vmem:[#allocation167_spill] sm:$0xff] %v10615_v48  ;;  %v10623_v46 = vadd.f32 %v4241_v0, %v14368_v54  ;;  %v7556_v35 = vpop.eup %7555  ;;  %v10627_v45 = vsub.f32 0.0, %v2665_v41  ;;  %v2714_v51 = vadd.f32 %v2713_v15, %v9844_v56  ;;  %v4237_v10 = vmul.f32 0.6931472, %v7548_v6 }
 0x4c6   : > { %v4070_v52 = vmul.f32 1.442695, %v3952_v18  ;;  %v3951_v38 = vsub.f32 0.0, %v3887_v25  ;;  %v7558_v36 = vpop.eup %7557  ;;  %v4247_v0 = vmul.f32 0.6931472, %v7550_v28  ;;  %v3821_v8 = vmax.f32 %v10538_v40, 0.0 }
 0x4c7   : > { %14369 = vst [vmem:[#allocation168_spill] sm:$0xff] %v10623_v46  ;;  %7563 = vlog2.f32 %v4141_v59  ;;  %v4072_v54 = vmul.f32 1.442695, %v3953_v58  ;;  %v14371_v23 = vmax.f32 %v10481_v5, 0.0  ;;  %v4249_v42 = vmul.f32 0.6931472, %v7552_v34 }
 0x4c8   : > { %14370 = vst [vmem:[#allocation169_spill] sm:$0xff] %v10627_v45  ;;  %v4243_v21 = vmul.f32 0.6931472, %v7554_v22  ;;  %v4138_v41 = vadd.f32 1.0, %v7556_v35  ;;  %v7560_v57 = vpop.eup %7559  ;;  %v4066_v7 = vmul.f32 1.442695, %v3950_v55  ;;  %7565 = vpow2.f32 %v4070_v52  ;;  %v2615_v55 = vpop.f32.mrf.mxu3 }
 0x4c9   : > { %v10634_v4 = vadd.f32 %v4235_v17, %v14371_v23  ;;  %v3892_v6 = vand.u32 2147483647, %v10627_v45  ;;  %v10638_v25 = vsub.f32 0.0, %v2714_v51  ;;  %v14374_v28 = vmax.f32 %v10494_v12, 0.0  ;;  %v10689_v22 = vpop.xlane.xlu0 %2791 }
 0x4ca   : > { %v4245_v59 = vmul.f32 0.6931472, %v7558_v36  ;;  %v4068_v58 = vmul.f32 1.442695, %v3951_v38  ;;  %v7562_v23 = vpop.eup %7561  ;;  %v10644_v17 = vadd.f32 %v4247_v0, %v3816_v26  ;;  %7567 = vpow2.f32 %v4072_v54  ;;  %v3102_v36 = vld [vmem:[%s13661_s11] sm:$0xf] }
 0x4cb   : > { %14372 = vst [vmem:[#allocation170_spill] sm:$0xff] %v10634_v4  ;;  %v10642_v18 = vadd.f32 %v4237_v10, %v14374_v28  ;;  %v10649_v34 = vadd.f32 %v4249_v42, %v3817_v20  ;;  %v4255_v51 = vmul.f32 0.6931472, %v7560_v57  ;;  %7569 = vlog2.f32 %v4138_v41  ;;  %v2566_v10 = vpop.f32.mrf.mxu2  ;;  %v2666_v42 = vpop.f32.mrf.mxu0 }
 0x4cc   : > { %14373 = vst [vmem:[#allocation171_spill] sm:$0xff] %v10638_v25  ;;  %v10654_v52 = vadd.f32 %v4243_v21, %v3814_v31  ;;  %7571 = vpow2.f32 %v4066_v7  ;;  %v3956_v26 = vsub.f32 0.0, %v3892_v6  ;;  %v3893_v0 = vand.u32 2147483647, %v10638_v25  ;;  %v10671_v7 = vpop.xlane.xlu2 %2993 }
 0x4cd   : > { %14375 = vst [vmem:[#allocation172_spill] sm:$0xff] %v10642_v18  ;;  %v7564_v38 = vpop.eup %7563  ;;  %v10658_v28 = vadd.f32 %v4245_v59, %v3815_v13  ;;  %v4139_v20 = vadd.f32 1.0, %v7562_v23  ;;  %7573 = vpow2.f32 %v4068_v58  ;;  %v3376_v41 = vadd.f32 1e-08, %v3102_v36 }
 0x4ce   : > { %14376 = vst [vmem:[#allocation173_spill] sm:$0xff] %v10644_v17  ;;  %v2567_v15 = vadd.f32 %v2566_v10, %v9854_v61  ;;  %v7566_v31 = vpop.eup %7565  ;;  %v10664_v21 = vadd.f32 %v4255_v51, %v3820_v9  ;;  %v4257_v6 = vmul.f32 0.6931472, %v7564_v38  ;;  %v4078_v23 = vmul.f32 1.442695, %v3956_v26 }
 0x4cf   : > { %14377 = vst [vmem:[#allocation174_spill] sm:$0xff] %v10649_v34  ;;  %v3957_v57 = vsub.f32 0.0, %v3893_v0  ;;  %7575 = vlog2.f32 %v4139_v20  ;;  %v2616_v9 = vadd.f32 %v2615_v55, %v9857_v33  ;;  %v4144_v38 = vadd.f32 1.0, %v7566_v31 }
 0x4d0   : > { %14378 = vst [vmem:[#allocation175_spill] sm:$0xff] %v10654_v52  ;;  %v7568_v13 = vpop.eup %7567  ;;  %v10675_v59 = vperm.slane %v3376_v41, 0  ;;  %v10677_v58 = vsub.f32 0.0, %v2567_v15  ;;  %v10682_v20 = vadd.f32 %v4257_v6, %v3821_v8  ;;  %v2667_v35 = vadd.f32 %v2666_v42, %v9835_v62  ;;  %v2715_v8 = vpop.f32.mrf.mxu1 }
 0x4d1   : > { %14379 = vst [vmem:[#allocation176_spill] sm:$0xff] %v10658_v28  ;;  %v7570_v36 = vpop.eup %7569  ;;  %v4145_v10 = vadd.f32 1.0, %v7568_v13  ;;  %7577 = vpow2.f32 %v4078_v23  ;;  %v4080_v31 = vmul.f32 1.442695, %v3957_v57  ;;  %v10687_v54 = vmul.f32 1e-08, %v10671_v7 }
 0x4d2   : > { %14380 = vst [vmem:[#allocation177_spill] sm:$0xff] %v10664_v21  ;;  %v7572_v51 = vpop.eup %7571  ;;  %v4251_v15 = vmul.f32 0.6931472, %v7570_v36  ;;  %v10691_v17 = vperm.slane %v3376_v41, 1  ;;  %v10693_v0 = vsub.f32 0.0, %v2616_v9  ;;  %7579 = vlog2.f32 %v4144_v38  ;;  %v14387_v9 = vld [vmem:[#allocation34_spill] sm:$0xff] }
 0x4d3   : > { %14381 = vst [vmem:[#allocation178_spill] sm:$0xff] %v10675_v59  ;;  %v7574_v26 = vpop.eup %7573  ;;  %v4142_v34 = vadd.f32 1.0, %v7572_v51  ;;  %v3386_v62 = vmul.f32 %v10675_v59, %v10671_v7  ;;  %v3890_v42 = vand.u32 2147483647, %v10677_v58  ;;  %7581 = vlog2.f32 %v4145_v10  ;;  %v14388_v38 = vld [vmem:[#allocation36_spill] sm:$0xff]  ;;  %v14390_v13 = vld [vmem:[#allocation35_spill] sm:$0xff] }
 0x4d4   : > { %14382 = vst [vmem:[#allocation179_spill] sm:$0xff] %v10677_v58  ;;  %v4143_v6 = vadd.f32 1.0, %v7574_v26  ;;  %v2854_v23 = vsub.f32 %v9787_v63, %v10689_v22  ;;  %v10701_v36 = vsub.f32 0.0, %v2667_v35  ;;  %7583 = vpow2.f32 %v4080_v31  ;;  %v10723_v21 = vld [vmem:[%s13662_s12] sm:$0xf] }
 0x4d5   : > { %14383 = vst [vmem:[#allocation180_spill] sm:$0xff] %v10682_v20  ;;  %v7576_v57 = vpop.eup %7575  ;;  %v3120_v51 = vadd.f32 %v14387_v9, %v10687_v54  ;;  %v2855_v26 = vsub.f32 %v14388_v38, %v10689_v22  ;;  %v2716_v55 = vadd.f32 %v2715_v8, %v9844_v56  ;;  %7585 = vlog2.f32 %v4142_v34 }
 0x4d6   : > { %14384 = vst [vmem:[#allocation181_spill] sm:$0xff] %v10691_v17  ;;  %v10708_v28 = vperm.slane %v3376_v41, 2  ;;  %v3121_v10 = vadd.f32 %v14390_v13, %v10687_v54  ;;  %v3891_v52 = vand.u32 2147483647, %v10693_v0  ;;  %7587 = vlog2.f32 %v4143_v6 }
 0x4d7   : > { %14385 = vst [vmem:[#allocation182_spill] sm:$0xff] %v10693_v0  ;;  %v7578_v63 = vpop.eup %7577  ;;  %v10713_v35 = vperm.slane %v3376_v41, 3  ;;  %v3450_v31 = vadd.f32 %v14387_v9, %v3386_v62  ;;  %v3954_v20 = vsub.f32 0.0, %v3890_v42  ;;  %7589 = vlog2.f32 %v10671_v7 }
 0x4d8   : > { %14386 = vst [vmem:[#allocation183_spill] sm:$0xff] %v10701_v36  ;;  %v3387_v56 = vmul.f32 %v10691_v17, %v10671_v7  ;;  %v2974_v34 = vmul.f32 1.442695, %v2854_v23  ;;  %v3896_v8 = vand.u32 2147483647, %v10701_v36  ;;  %v7580_v38 = vpop.eup %7579  ;;  %7591 = vlog2.f32 %v3120_v51 }
 0x4d9   : > { %14389 = vst [vmem:[#allocation34_spill] sm:$0xff] %v10708_v28  ;;  %v2856_v41 = vsub.f32 %v9795_v44, %v10689_v22  ;;  %v2976_v6 = vmul.f32 1.442695, %v2855_v26  ;;  %v10727_v62 = vsub.f32 0.0, %v2716_v55  ;;  %v10729_v42 = vpop.eup %7581  ;;  %v4253_v9 = vmul.f32 0.6931472, %v7576_v57 }
 0x4da   : > { %14391 = vst [vmem:[#allocation36_spill] sm:$0xff] %v10713_v35  ;;  %v4148_v40 = vadd.f32 1.0, %v7578_v63  ;;  %7593 = vlog2.f32 %v3121_v10  ;;  %v3955_v23 = vsub.f32 0.0, %v3891_v52  ;;  %v7584_v46 = vpop.eup %7583  ;;  %v14393_v48 = vmax.f32 %v10552_v19, 0.0  ;;  %v10741_v10 = vpop.xlane.xlu1 %2796 }
 0x4db   : > { %14392 = vst [vmem:[#allocation35_spill] sm:$0xff] %v10727_v62  ;;  %7595 = vlog2.f32 %v3450_v31  ;;  %v2857_v51 = vsub.f32 %v9806_v27, %v10689_v22  ;;  %v4074_v4 = vmul.f32 1.442695, %v3954_v20  ;;  %v7586_v44 = vpop.eup %7585  ;;  %v10738_v55 = vperm.slane %v10723_v21, 0  ;;  %v2568_v27 = vpop.f32.mrf.mxu2 }
 0x4dc   : > { %v10733_v18 = vadd.f32 %v4251_v15, %v14393_v48  ;;  %v3451_v26 = vadd.f32 %v14390_v13, %v3387_v56  ;;  %7597 = vpow2.f32 %v2974_v34  ;;  %v3960_v57 = vsub.f32 0.0, %v3896_v8  ;;  %v7588_v52 = vpop.eup %7587  ;;  %v2617_v34 = vpop.f32.mrf.mxu3 }
 0x4dd   : > { %v10744_v63 = vperm.slane %v10723_v21, 1  ;;  %7599 = vpow2.f32 %v2976_v6  ;;  %v2978_v48 = vmul.f32 1.442695, %v2856_v41  ;;  %v3897_v15 = vand.u32 2147483647, %v10727_v62  ;;  %v10747_v22 = vpop.eup %7589  ;;  %v14397_v62 = vld [vmem:[#allocation40_spill] sm:$0xff] }
 0x4de   : > { %14394 = vst [vmem:[#allocation184_spill] sm:$0xff] %v10733_v18  ;;  %v14395_v20 = vmax.f32 %v10574_v16, 0.0  ;;  %7601 = vlog2.f32 %v4148_v40  ;;  %v3388_v13 = vmul.f32 %v10708_v28, %v10671_v7  ;;  %v4076_v56 = vmul.f32 1.442695, %v3955_v23  ;;  %v10755_v8 = vpop.eup %7591  ;;  %v14398_v40 = vld [vmem:[#allocation42_spill] sm:$0xff] }
 0x4df   : > { %v3389_v41 = vmul.f32 %v10713_v35, %v10671_v7  ;;  %v2980_v6 = vmul.f32 1.442695, %v2857_v51  ;;  %7603 = vpow2.f32 %v4074_v4  ;;  %v2858_v19 = vsub.f32 %v14397_v62, %v10741_v10  ;;  %v10781_v62 = vpop.xlane.xlu0 %2998 }
 0x4e0   : > { %v10751_v31 = vadd.f32 %v4253_v9, %v14395_v20  ;;  %v10761_v12 = vpop.eup %7593  ;;  %7605 = vlog2.f32 %v3451_v26  ;;  %v4086_v9 = vmul.f32 1.442695, %v3960_v57  ;;  %v2859_v20 = vsub.f32 %v14398_v40, %v10741_v10  ;;  %v14400_v26 = vld [vmem:[#allocation37_spill] sm:$0xff] }
 0x4e1   : > { %v2569_v23 = vadd.f32 %v2568_v27, %v9854_v61  ;;  %v10766_v16 = vpop.eup %7595  ;;  %v4149_v5 = vadd.f32 1.0, %v7584_v46  ;;  %7607 = vpow2.f32 %v2978_v48  ;;  %v3961_v14 = vsub.f32 0.0, %v3897_v15  ;;  %v14402_v61 = vld [vmem:[#allocation43_spill] sm:$0xff] }
 0x4e2   : > { %14396 = vst [vmem:[#allocation185_spill] sm:$0xff] %v10751_v31  ;;  %v2618_v7 = vadd.f32 %v2617_v34, %v9857_v33  ;;  %v10769_v4 = vpop.eup %7597  ;;  %v3452_v57 = vadd.f32 %v14400_v26, %v3388_v13  ;;  %7609 = vpow2.f32 %v4076_v56  ;;  %v4263_v40 = vmul.f32 0.6931472, %v7580_v38  ;;  %v14403_v33 = vld [vmem:[#allocation38_spill] sm:$0xff]  ;;  %v14405_v38 = vld [vmem:[#allocation45_spill] sm:$0xff] }
 0x4e3   : > { %14399 = vst [vmem:[#allocation40_spill] sm:$0xff] %v10769_v4  ;;  %v10774_v30 = vpop.eup %7599  ;;  %7611 = vpow2.f32 %v2980_v6  ;;  %v2860_v46 = vsub.f32 %v14402_v61, %v10741_v10  ;;  %v2982_v48 = vmul.f32 1.442695, %v2858_v19  ;;  %v3453_v27 = vadd.f32 %v14403_v33, %v3389_v41 }
 0x4e4   : > { %14401 = vst [vmem:[#allocation42_spill] sm:$0xff] %v10774_v30  ;;  %v10778_v15 = vpop.eup %7601  ;;  %7613 = vpow2.f32 %v4086_v9  ;;  %v2984_v34 = vmul.f32 1.442695, %v2859_v20  ;;  %v10783_v51 = vsub.f32 0.0, %v2569_v23  ;;  %v4088_v56 = vmul.f32 1.442695, %v3961_v14 }
 0x4e5   : > { %v7604_v13 = vpop.eup %7603  ;;  %7615 = vlog2.f32 %v4149_v5  ;;  %v2861_v6 = vsub.f32 %v14405_v38, %v10741_v10  ;;  %v10787_v31 = vsub.f32 0.0, %v2618_v7  ;;  %v4265_v19 = vmul.f32 0.6931472, %v10729_v42 }
 0x4e6   : > { %14404 = vst [vmem:[#allocation37_spill] sm:$0xff] %v10783_v51  ;;  %v10789_v61 = vpop.eup %7605  ;;  %v4259_v18 = vmul.f32 0.6931472, %v7586_v44  ;;  %7617 = vlog2.f32 %v3452_v57  ;;  %v3060_v41 = vadd.f32 %v10774_v30, %v10769_v4  ;;  %v4261_v20 = vmul.f32 0.6931472, %v7588_v52 }
 0x4e7   : > { %14406 = vst [vmem:[#allocation43_spill] sm:$0xff] %v10787_v31  ;;  %v10794_v9 = vpop.eup %7607  ;;  %7619 = vpow2.f32 %v2982_v48  ;;  %v2986_v5 = vmul.f32 1.442695, %v2860_v46  ;;  %v10797_v14 = vmul.f32 1e-08, %v10781_v62  ;;  %v4146_v23 = vadd.f32 1.0, %v7604_v13 }
 0x4e8   : > { %14407 = vst [vmem:[#allocation38_spill] sm:$0xff] %v10794_v9  ;;  %v7610_v10 = vpop.eup %7609  ;;  %7621 = vpow2.f32 %v2984_v34  ;;  %v3894_v7 = vand.u32 2147483647, %v10783_v51  ;;  %v3061_v42 = vadd.f32 %v10794_v9, %v3060_v41  ;;  %v14410_v57 = vmax.f32 %v10586_v24, 0.0 }
 0x4e9   : > { %14408 = vst [vmem:[#allocation45_spill] sm:$0xff] %v10797_v14  ;;  %v10802_v44 = vpop.eup %7611  ;;  %7623 = vpow2.f32 %v4088_v56  ;;  %v2988_v52 = vmul.f32 1.442695, %v2861_v6  ;;  %v3895_v46 = vand.u32 2147483647, %v10787_v31  ;;  %v14412_v13 = vmax.f32 %v10589_v1, 0.0 }
 0x4ea   : > { %14409 = vst [vmem:[#allocation186_spill] sm:$0xff] %v10802_v44  ;;  %v10806_v38 = vadd.f32 %v4263_v40, %v14410_v57  ;;  %v7614_v48 = vpop.eup %7613  ;;  %v14414_v51 = vmax.f32 %v10597_v29, 0.0  ;;  %7625 = vlog2.f32 %v3453_v27  ;;  %v4147_v56 = vadd.f32 1.0, %v7610_v10  ;;  %v14426_v29 = vld [vmem:[#allocation46_spill] sm:$0xff] }
 0x4eb   : > { %v10811_v34 = vadd.f32 %v4265_v19, %v14412_v13  ;;  %v10821_v40 = vpop.eup %7615  ;;  %7627 = vpow2.f32 %v2986_v5  ;;  %v3390_v6 = vmul.f32 %v10675_v59, %v10781_v62  ;;  %v3062_v57 = vadd.f32 %v10802_v44, %v3061_v42  ;;  %v3004_v5 = vpop.xlane.xlu1 %3003  ;;  %v14437_v44 = vld [vmem:[#allocation54_spill] sm:$0xff] }
 0x4ec   : > { %14411 = vst [vmem:[#allocation187_spill] sm:$0xff] %v10806_v38  ;;  %v10815_v41 = vadd.f32 %v4259_v18, %v14414_v51  ;;  %v10826_v19 = vpop.eup %7617  ;;  %v14416_v13 = vmax.f32 %v10600_v3, 0.0  ;;  %7629 = vlog2.f32 %v4146_v23  ;;  %v14418_v51 = vld [vmem:[#allocation39_spill] sm:$0xff]  ;;  %v3958_v27 = vsub.f32 0.0, %v3894_v7  ;;  %v14421_v23 = vld [vmem:[#allocation41_spill] sm:$0xff] }
 0x4ed   : > { %6324 = vadd.xlane.f32.xlu0 %v9952_v50  ;;  %14413 = vst [vmem:[#allocation188_spill] sm:$0xff] %v10811_v34  ;;  %v10819_v50 = vadd.f32 %v14400_v26, %v10687_v54  ;;  %v3124_v26 = vadd.f32 %v14418_v51, %v10797_v14  ;;  %v10834_v31 = vpop.eup %7619  ;;  %v4152_v10 = vadd.f32 1.0, %v7614_v48  ;;  %7631 = vpow2.f32 %v2988_v52  ;;  %3063 = vadd.xlane.f32.xlu1 %v3062_v57 }
 0x4ee   : > { %14415 = vst [vmem:[#allocation189_spill] sm:$0xff] %v10815_v41  ;;  %v10830_v18 = vadd.f32 %v4261_v20, %v14416_v13  ;;  %v3959_v1 = vsub.f32 0.0, %v3895_v46  ;;  %v10837_v42 = vpop.eup %7621  ;;  %v10841_v20 = vmul.f32 0.6931472, %v10747_v22  ;;  %7633 = vlog2.f32 %v10781_v62 }
 0x4ef   : > { %14419 = vst [vmem:[#allocation39_spill] sm:$0xff] %v10834_v31  ;;  %v3125_v7 = vadd.f32 %v14421_v23, %v10797_v14  ;;  %v7624_v13 = vpop.eup %7623  ;;  %7635 = vlog2.f32 %v4147_v56  ;;  %v3391_v52 = vmul.f32 %v10691_v17, %v10781_v62  ;;  %v3454_v46 = vadd.f32 %v14418_v51, %v3390_v6 }
 0x4f0   : > { %14417 = vst [vmem:[#allocation190_spill] sm:$0xff] %v10830_v18  ;;  %v7626_v48 = vpop.eup %7625  ;;  %7637 = vlog2.f32 %v3124_v26  ;;  %v3392_v22 = vmul.f32 %v10708_v28, %v10781_v62  ;;  %v4082_v24 = vmul.f32 1.442695, %v3958_v27  ;;  %v3515_v56 = vmul.f32 0.6931472, %v10766_v16 }
 0x4f1   : > { %14420 = vst [vmem:[#allocation191_spill] sm:$0xff] %v10837_v42  ;;  %v10854_v34 = vpop.eup %7627  ;;  %7639 = vlog2.f32 %v4152_v10  ;;  %v3393_v3 = vmul.f32 %v10713_v35, %v10781_v62  ;;  %v4084_v6 = vmul.f32 1.442695, %v3959_v1  ;;  %v4271_v57 = vmul.f32 0.6931472, %v10778_v15  ;;  %v14425_v62 = vld [vmem:[#allocation44_spill] sm:$0xff] }
 0x4f2   : > { %14422 = vst [vmem:[#allocation41_spill] sm:$0xff] %v10854_v34  ;;  %v7630_v51 = vpop.eup %7629  ;;  %v4153_v26 = vadd.f32 1.0, %v7624_v13  ;;  %7641 = vlog2.f32 %v3125_v7  ;;  %v3065_v27 = vadd.f32 %v10837_v42, %v10834_v31  ;;  %v3455_v18 = vadd.f32 %v14421_v23, %v3391_v52 }
 0x4f3   : > { %v10862_v38 = vpop.eup %7631  ;;  %7643 = vlog2.f32 %v3454_v46  ;;  %v10866_v16 = vmul.f32 1e-08, %v3004_v5  ;;  %v3517_v1 = vmul.f32 0.6931472, %v10789_v61  ;;  %v3456_v15 = vadd.f32 %v14425_v62, %v3392_v22 }
 0x4f4   : > { %14423 = vst [vmem:[#allocation192_spill] sm:$0xff] %v10862_v38  ;;  %v10868_v10 = vpop.eup %7633  ;;  %7645 = vpow2.f32 %v4082_v24  ;;  %v3066_v7 = vadd.f32 %v10854_v34, %v3065_v27  ;;  %v10874_v41 = vsub.f32 %v3515_v56, %v10841_v20  ;;  %v3394_v23 = vmul.f32 %v10675_v59, %v3004_v5 }
 0x4f5   : > { %6333 = vadd.xlane.f32.xlu0 %v9958_v2  ;;  %14424 = vst [vmem:[#allocation193_spill] sm:$0xff] %v10866_v16  ;;  %v7636_v13 = vpop.eup %7635  ;;  %v3457_v2 = vadd.f32 %v14426_v29, %v3393_v3  ;;  %7647 = vpow2.f32 %v4084_v6  ;;  %v14428_v46 = vmax.f32 %v10627_v45, 0.0  ;;  %v3395_v24 = vmul.f32 %v10691_v17, %v3004_v5  ;;  %v14430_v3 = vld [vmem:[#allocation47_spill] sm:$0xff] }
 0x4f6   : > { %v10878_v52 = vpop.eup %7637  ;;  %7649 = vlog2.f32 %v4153_v26  ;;  %v3067_v61 = vadd.f32 %v10862_v38, %v3066_v7  ;;  %v4273_v56 = vmul.f32 0.6931472, %v10821_v40  ;;  %v3128_v6 = vadd.f32 %v14430_v3, %v10866_v16  ;;  %v14432_v26 = vld [vmem:[#allocation49_spill] sm:$0xff] }
 0x4f7   : > { %14427 = vst [vmem:[#allocation44_spill] sm:$0xff] %v10878_v52  ;;  %v10882_v42 = vadd.f32 %v4271_v57, %v14428_v46  ;;  %v10886_v22 = vpop.eup %7639  ;;  %7651 = vlog2.f32 %v3455_v18  ;;  %v3396_v27 = vmul.f32 %v10708_v28, %v3004_v5  ;;  %v10895_v57 = vsub.f32 %v3517_v1, %v10841_v20  ;;  %v3009_v1 = vpop.xlane.xlu2 %3008 }
 0x4f8   : > { %v10892_v34 = vpop.eup %7641  ;;  %7653 = vlog2.f32 %v3456_v15  ;;  %v3129_v46 = vadd.f32 %v14432_v26, %v10866_v16  ;;  %v3397_v7 = vmul.f32 %v10713_v35, %v3004_v5  ;;  %3068 = vadd.xlane.f32.xlu2 %v3067_v61  ;;  %v10902_v18 = vmul.f32 0.6931472, %v10826_v19 }
 0x4f9   : > { %14429 = vst [vmem:[#allocation194_spill] sm:$0xff] %v10882_v42  ;;  %v7644_v40 = vpop.eup %7643  ;;  %v3827_v45 = vmax.f32 %v10693_v0, 0.0  ;;  %7655 = vlog2.f32 %v3457_v2  ;;  %v3458_v38 = vadd.f32 %v14430_v3, %v3394_v23  ;;  %v3459_v61 = vadd.f32 %v14432_v26, %v3395_v24  ;;  %v14435_v2 = vld [vmem:[#allocation52_spill] sm:$0xff] }
 0x4fa   : > { %14431 = vst [vmem:[#allocation47_spill] sm:$0xff] %v10892_v34  ;;  %v7646_v31 = vpop.eup %7645  ;;  %7657 = vlog2.f32 %v3004_v5  ;;  %v14433_v9 = vmax.f32 %v10638_v25, 0.0  ;;  %v10914_v30 = vmul.f32 0.6931472, %v7626_v48  ;;  %v3460_v23 = vadd.f32 %v14435_v2, %v3396_v27 }
 0x4fb   : > { %7659 = vlog2.f32 %v3128_v6  ;;  %v3461_v5 = vadd.f32 %v14437_v44, %v3397_v7  ;;  %v10922_v42 = vmul.f32 1e-08, %v3009_v1  ;;  %v4267_v26 = vmul.f32 0.6931472, %v7630_v51 }
 0x4fc   : > { %v10912_v19 = vadd.f32 %v4273_v56, %v14433_v9  ;;  %7661 = vlog2.f32 %v3129_v46  ;;  %v4150_v56 = vadd.f32 1.0, %v7646_v31  ;;  %v4269_v6 = vmul.f32 0.6931472, %v7636_v13  ;;  %v14443_v9 = vld [vmem:[#allocation57_spill] sm:$0xff] }
 0x4fd   : > { %6342 = vadd.xlane.f32.xlu0 %v9965_v49  ;;  %v7648_v49 = vpop.eup %7647  ;;  %7663 = vlog2.f32 %v3458_v38  ;;  %v3398_v27 = vmul.f32 %v10675_v59, %v3009_v1  ;;  %v10929_v46 = vadd.f32 %v14425_v62, %v10797_v14  ;;  %v3399_v51 = vmul.f32 %v10691_v17, %v3009_v1 }
 0x4fe   : > { %14434 = vst [vmem:[#allocation49_spill] sm:$0xff] %v10912_v19  ;;  %v10917_v3 = vpop.eup %7649  ;;  %v4151_v25 = vadd.f32 1.0, %v7648_v49  ;;  %7665 = vlog2.f32 %v3459_v61  ;;  %v10936_v31 = vadd.f32 %v14435_v2, %v10866_v16  ;;  %v3132_v38 = vadd.f32 %v9909_v37, %v10922_v42  ;;  %v3014_v61 = vpop.xlane.xlu0 %3013 }
 0x4ff   : > { %14436 = vst [vmem:[#allocation52_spill] sm:$0xff] %v10917_v3  ;;  %v7652_v24 = vpop.eup %7651  ;;  %7667 = vlog2.f32 %v3460_v23  ;;  %v3400_v13 = vmul.f32 %v10708_v28, %v3009_v1  ;;  %v14441_v49 = vmax.f32 %v10677_v58, 0.0  ;;  %v3133_v2 = vadd.f32 %v14443_v9, %v10922_v42  ;;  %v11018_v44 = vpop.xlane.xlu2 %3023 }
 0x500   : > { %v7654_v48 = vpop.eup %7653  ;;  %14438 = vst [vmem:[#allocation195_spill] sm:$0xff] %v10929_v46  ;;  %7669 = vlog2.f32 %v3461_v5  ;;  %v3401_v5 = vmul.f32 %v10713_v35, %v3009_v1  ;;  %v10953_v36 = vadd.f32 %v4269_v6, %v3827_v45  ;;  %v10956_v19 = vmul.f32 0.6931472, %v10868_v10 }
 0x501   : > { %v7656_v3 = vpop.eup %7655  ;;  %14439 = vst [vmem:[#allocation196_spill] sm:$0xff] %v10936_v31  ;;  %v10946_v23 = vadd.f32 %v4267_v26, %v14441_v49  ;;  %7671 = vlog2.f32 %v4150_v56  ;;  %v3523_v58 = vmul.f32 0.6931472, %v7644_v40  ;;  %v3463_v26 = vadd.f32 %v14443_v9, %v3399_v51  ;;  %v10975_v51 = vpop.xlane.xlu1 %3018 }
 0x502   : > { %v10932_v7 = vpop.eup %7657  ;;  %14445 = vst [vmem:[#allocation199_spill] sm:$0xff] %v10953_v36  ;;  %7673 = vlog2.f32 %v4151_v25  ;;  %v10960_v56 = vmul.f32 1e-08, %v3014_v61  ;;  %v3525_v4 = vmul.f32 0.6931472, %v7652_v24  ;;  %v3402_v45 = vmul.f32 %v10675_v59, %v3014_v61  ;;  %v14449_v25 = vld [vmem:[#allocation62_spill] sm:$0xff] }
 0x503   : > { %v10942_v62 = vpop.eup %7659  ;;  %14442 = vst [vmem:[#allocation198_spill] sm:$0xff] %v10946_v23  ;;  %7675 = vlog2.f32 %v3009_v1  ;;  %v3403_v40 = vmul.f32 %v10691_v17, %v3014_v61  ;;  %v3404_v9 = vmul.f32 %v10708_v28, %v3014_v61  ;;  %v3406_v36 = vmul.f32 %v10675_v59, %v10975_v51 }
 0x504   : > { %14440 = vst [vmem:[#allocation197_spill] sm:$0xff] %v10942_v62  ;;  %v10951_v15 = vpop.eup %7661  ;;  %7677 = vlog2.f32 %v3132_v38  ;;  %v14448_v62 = vld [vmem:[#allocation59_spill] sm:$0xff]  ;;  %v14451_v38 = vld [vmem:[#allocation61_spill] sm:$0xff]  ;;  %v11021_v47 = vmul.f32 0.6931472, %v10932_v7 }
 0x505   : > { %6351 = vadd.xlane.f32.xlu0 %v9969_v43  ;;  %14444 = vst [vmem:[#allocation57_spill] sm:$0xff] %v10951_v15  ;;  %v3462_v43 = vadd.f32 %v9909_v37, %v3398_v27  ;;  %v7664_v0 = vpop.eup %7663  ;;  %v3464_v15 = vadd.f32 %v14448_v62, %v3400_v13  ;;  %7679 = vlog2.f32 %v3133_v2  ;;  %v3465_v37 = vadd.f32 %v14449_v25, %v3401_v5  ;;  %v14454_v5 = vld [vmem:[#allocation67_spill] sm:$0xff] }
 0x506   : > { %14446 = vst [vmem:[#allocation200_spill] sm:$0xff] %v10956_v19  ;;  %v7666_v49 = vpop.eup %7665  ;;  %v10969_v27 = vmul.f32 0.6931472, %v10886_v22  ;;  %v10973_v24 = vadd.f32 %v14448_v62, %v10922_v42  ;;  %6297 = vrot.lane.b32.xlu1 %v14451_v38, %s14112_s27  ;;  %v10982_v2 = vsub.f32 %v3523_v58, %v10956_v19  ;;  %v3136_v22 = vadd.f32 %v14454_v5, %v10960_v56  ;;  %v14458_v58 = vld [vmem:[#allocation68_spill] sm:$0xff] }
 0x507   : > { %14447 = vst [vmem:[#allocation201_spill] sm:$0xff] %v10960_v56  ;;  %v7668_v6 = vpop.eup %7667  ;;  %7681 = vlog2.f32 %v3462_v43  ;;  %v10990_v62 = vsub.f32 %v3525_v4, %v10956_v19  ;;  %v3405_v43 = vmul.f32 %v10713_v35, %v3014_v61  ;;  %v3466_v38 = vadd.f32 %v14454_v5, %v3402_v45 }
 0x508   : > { %v7670_v1 = vpop.eup %7669  ;;  %14450 = vst [vmem:[#allocation59_spill] sm:$0xff] %v10969_v27  ;;  %7683 = vlog2.f32 %v3463_v26  ;;  %v3467_v26 = vadd.f32 %v14458_v58, %v3403_v40  ;;  %v3137_v4 = vadd.f32 %v14458_v58, %v10960_v56  ;;  %v14462_v40 = vld [vmem:[#allocation71_spill] sm:$0xff]  ;;  %v11016_v58 = vmul.f32 1e-08, %v10975_v51 }
 0x509   : > { %v10979_v13 = vpop.eup %7671  ;;  %14453 = vst [vmem:[#allocation61_spill] sm:$0xff] %v10982_v2  ;;  %7685 = vlog2.f32 %v3464_v15  ;;  %v3407_v15 = vmul.f32 %v10691_v17, %v10975_v51  ;;  %v3468_v5 = vadd.f32 %v14462_v40, %v3404_v9  ;;  %v3470_v9 = vadd.f32 %v10036_v53, %v3406_v36 }
 0x50a   : > { %14452 = vst [vmem:[#allocation62_spill] sm:$0xff] %v10979_v13  ;;  %v10987_v10 = vpop.eup %7673  ;;  %v10994_v13 = vmul.f32 0.6931472, %v7654_v48  ;;  %7687 = vlog2.f32 %v3465_v37  ;;  %v3531_v37 = vmul.f32 0.6931472, %v7664_v0  ;;  %v3408_v0 = vmul.f32 %v10708_v28, %v10975_v51 }
 0x50b   : > { %14455 = vst [vmem:[#allocation67_spill] sm:$0xff] %v10987_v10  ;;  %v7676_v27 = vpop.eup %7675  ;;  %v11001_v10 = vmul.f32 0.6931472, %v7656_v3  ;;  %7689 = vlog2.f32 %v3014_v61  ;;  %v3469_v61 = vadd.f32 %v10003_v32, %v3405_v43  ;;  %v3533_v3 = vmul.f32 0.6931472, %v7666_v49 }
 0x50c   : > { %14456 = vst [vmem:[#allocation202_spill] sm:$0xff] %v10990_v62  ;;  %v10999_v23 = vpop.eup %7677  ;;  %7691 = vlog2.f32 %v3136_v22  ;;  %v3409_v43 = vmul.f32 %v10713_v35, %v10975_v51  ;;  %v11030_v39 = vsub.f32 %v3531_v37, %v11021_v47  ;;  %v11034_v7 = vadd.f32 %v14462_v40, %v10960_v56  ;;  %v14468_v37 = vld [vmem:[#allocation63_spill] sm:$0xff] }
 0x50d   : > { %14457 = vst [vmem:[#allocation203_spill] sm:$0xff] %v10994_v13  ;;  %v11007_v45 = vpop.eup %7679  ;;  %7693 = vlog2.f32 %v3466_v38  ;;  %v3471_v38 = vadd.f32 %v10040_v11, %v3407_v15  ;;  %v3410_v36 = vmul.f32 %v10675_v59, %v11018_v44  ;;  %v11038_v49 = vmul.f32 0.6931472, %v7668_v6 }
 0x50e   : > { %14459 = vst [vmem:[#allocation68_spill] sm:$0xff] %v10999_v23  ;;  %v7682_v31 = vpop.eup %7681  ;;  %7695 = vlog2.f32 %v3467_v26  ;;  %v3411_v15 = vmul.f32 %v10691_v17, %v11018_v44  ;;  %v11048_v40 = vmul.f32 0.6931472, %v7670_v1  ;;  %v11057_v52 = vmul.f32 0.6931472, %v7676_v27 }
 0x50f   : > { %14460 = vst [vmem:[#allocation204_spill] sm:$0xff] %v11001_v10  ;;  %v7684_v16 = vpop.eup %7683  ;;  %7697 = vlog2.f32 %v3137_v4  ;;  %v3140_v4 = vadd.f32 %v10036_v53, %v11016_v58  ;;  %v14473_v53 = vld [vmem:[#allocation84_spill] sm:$0xff]  ;;  %v14521_v13 = vsub.f32 %v10744_v63, %v10895_v57 }
 0x510   : > { %14461 = vst [vmem:[#allocation205_spill] sm:$0xff] %v11007_v45  ;;  %v7686_v22 = vpop.eup %7685  ;;  %7699 = vlog2.f32 %v3468_v5  ;;  %6295 = vrot.lane.b32.xlu2 %v14468_v37, %s14112_s27  ;;  %v3539_v5 = vmul.f32 0.6931472, %v7682_v31  ;;  %v3473_v56 = vadd.f32 %v14473_v53, %v3409_v43  ;;  %v14474_v31 = vld [vmem:[#allocation88_spill] sm:$0xff] }
 0x511   : > { %14463 = vst [vmem:[#allocation71_spill] sm:$0xff] %v11016_v58  ;;  %v7688_v48 = vpop.eup %7687  ;;  %7701 = vlog2.f32 %v3469_v61  ;;  %v11052_v61 = vsub.f32 %v3533_v3, %v11021_v47  ;;  %v3474_v1 = vadd.f32 %v14474_v31, %v3410_v36  ;;  %v3141_v3 = vadd.f32 %v10040_v11, %v11016_v58 }
 0x512   : > { %14464 = vst [vmem:[#allocation206_spill] sm:$0xff] %v11021_v47  ;;  %v7690_v26 = vpop.eup %7689  ;;  %7703 = vlog2.f32 %v3470_v9  ;;  %v14477_v9 = vld [vmem:[#allocation91_spill] sm:$0xff]  ;;  %v11070_v37 = vsub.f32 %v3539_v5, %v11057_v52 }
 0x513   : > { %14465 = vst [vmem:[#allocation207_spill] sm:$0xff] %v11030_v39  ;;  %v11046_v60 = vpop.eup %7691  ;;  %7705 = vlog2.f32 %v3471_v38  ;;  %v3475_v43 = vadd.f32 %v14477_v9, %v3411_v15  ;;  %v11081_v5 = vmul.f32 0.6931472, %v7690_v26 }
 0x514   : > { %14466 = vst [vmem:[#allocation208_spill] sm:$0xff] %v11034_v7  ;;  %v14471_v7 = vld [vmem:[#allocation81_spill] sm:$0xff]  ;;  %v7694_v6 = vpop.eup %7693  ;;  %7707 = vlog2.f32 %v10975_v51  ;;  %v3412_v51 = vmul.f32 %v10708_v28, %v11018_v44 }
 0x515   : > { %14467 = vst [vmem:[#allocation209_spill] sm:$0xff] %v11038_v49  ;;  %v3472_v32 = vadd.f32 %v14471_v7, %v3408_v0  ;;  %v3541_v49 = vmul.f32 0.6931472, %v7684_v16  ;;  %v7696_v34 = vpop.eup %7695  ;;  %7709 = vlog2.f32 %v3140_v4  ;;  %v11066_v16 = vmul.f32 1e-08, %v11018_v44 }
 0x516   : > { %14469 = vst [vmem:[#allocation63_spill] sm:$0xff] %v11046_v60  ;;  %v11061_v0 = vpop.eup %7697  ;;  %v3547_v27 = vmul.f32 0.6931472, %v7694_v6  ;;  %v3549_v11 = vmul.f32 0.6931472, %v7696_v34  ;;  %v3413_v4 = vmul.f32 %v10713_v35, %v11018_v44  ;;  %v3034_v60 = vpop.xlane.xlu1 %3033 }
 0x517   : > { %14470 = vst [vmem:[#allocation210_spill] sm:$0xff] %v11048_v40  ;;  %v7700_v38 = vpop.eup %7699  ;;  %7711 = vlog2.f32 %v3472_v32  ;;  %v11075_v53 = vsub.f32 %v3541_v49, %v11057_v52  ;;  %v11085_v32 = vadd.f32 %v14471_v7, %v11016_v58  ;;  %v11087_v40 = vmul.f32 0.6931472, %v7686_v22  ;;  %v14481_v7 = vld [vmem:[#allocation93_spill] sm:$0xff] }
 0x518   : > { %14472 = vst [vmem:[#allocation81_spill] sm:$0xff] %v11052_v61  ;;  %v7702_v36 = vpop.eup %7701  ;;  %7713 = vlog2.f32 %v3473_v56  ;;  %v11089_v49 = vmul.f32 0.6931472, %v7688_v48  ;;  %v3144_v34 = vadd.f32 %v14474_v31, %v11066_v16  ;;  %v3029_v56 = vpop.xlane.xlu0 %3028  ;;  %v11096_v15 = vsub.f32 %v3547_v27, %v11081_v5 }
 0x519   : > { %14475 = vst [vmem:[#allocation88_spill] sm:$0xff] %v11061_v0  ;;  %v7704_v39 = vpop.eup %7703  ;;  %7715 = vlog2.f32 %v3474_v1  ;;  %v3476_v1 = vadd.f32 %v14481_v7, %v3412_v51  ;;  %v11105_v31 = vsub.f32 %v3549_v11, %v11081_v5  ;;  %v3145_v27 = vadd.f32 %v14477_v9, %v11066_v16 }
 0x51a   : > { %14476 = vst [vmem:[#allocation211_spill] sm:$0xff] %v11066_v16  ;;  %v7706_v6 = vpop.eup %7705  ;;  %7717 = vlog2.f32 %v3475_v43  ;;  %v14484_v43 = vld [vmem:[#allocation95_spill] sm:$0xff]  ;;  %v3555_v26 = vmul.f32 0.6931472, %v7704_v39  ;;  %v11112_v0 = vmul.f32 0.6931472, %v7700_v38  ;;  %v11118_v11 = vadd.f32 %v14481_v7, %v11066_v16 }
 0x51b   : > { %14478 = vst [vmem:[#allocation91_spill] sm:$0xff] %v11081_v5  ;;  %v7708_v47 = vpop.eup %7707  ;;  %7719 = vlog2.f32 %v11018_v44  ;;  %v3477_v58 = vadd.f32 %v14484_v43, %v3413_v4  ;;  %v3557_v61 = vmul.f32 0.6931472, %v7706_v6  ;;  %v11110_v44 = vmul.f32 1e-08, %v3029_v56  ;;  %v14494_v38 = vld [vmem:[#allocation101_spill] sm:$0xff] }
 0x51c   : > { %14479 = vst [vmem:[#allocation212_spill] sm:$0xff] %v11085_v32  ;;  %v11100_v22 = vpop.eup %7709  ;;  %7721 = vlog2.f32 %v3141_v3  ;;  %v11122_v4 = vmul.f32 0.6931472, %v7708_v47  ;;  %v3414_v9 = vmul.f32 %v10675_v59, %v3029_v56  ;;  %v3416_v7 = vmul.f32 %v10708_v28, %v3029_v56  ;;  %v14492_v47 = vld [vmem:[#allocation100_spill] sm:$0xff] }
 0x51d   : > { %14480 = vst [vmem:[#allocation213_spill] sm:$0xff] %v11096_v15  ;;  %v7712_v32 = vpop.eup %7711  ;;  %7723 = vlog2.f32 %v3144_v34 }
 0x51e   : > { %14482 = vst [vmem:[#allocation93_spill] sm:$0xff] %v11100_v22  ;;  %v7714_v51 = vpop.eup %7713  ;;  %v11114_v22 = vmul.f32 0.6931472, %v7702_v36  ;;  %7725 = vlog2.f32 %v3476_v1  ;;  %v3415_v36 = vmul.f32 %v10691_v17, %v3029_v56  ;;  %v11130_v34 = vsub.f32 %v3555_v26, %v11122_v4 }
 0x51f   : > { %14483 = vst [vmem:[#allocation214_spill] sm:$0xff] %v11105_v31  ;;  %v7716_v3 = vpop.eup %7715  ;;  %7727 = vlog2.f32 %v3477_v58  ;;  %v11133_v39 = vsub.f32 %v3557_v61, %v11122_v4  ;;  %v3148_v1 = vadd.f32 %v14492_v47, %v11110_v44  ;;  %v3149_v31 = vadd.f32 %v14494_v38, %v11110_v44  ;;  %v14496_v61 = vld [vmem:[#allocation2_spill] sm:$0xff] }
 0x520   : > { %14485 = vst [vmem:[#allocation215_spill] sm:$0xff] %v11110_v44  ;;  %v7718_v6 = vpop.eup %7717  ;;  %7729 = vlog2.f32 %v3029_v56  ;;  %v3563_v58 = vmul.f32 0.6931472, %v7716_v3  ;;  %v3478_v5 = vadd.f32 %v14492_v47, %v3414_v9  ;;  %v11151_v62 = vmul.f32 0.6931472, %v7714_v51  ;;  %v11304_v45 = vpop.xlane.xlu0 %3043 }
 0x521   : > { %14486 = vst [vmem:[#allocation216_spill] sm:$0xff] %v11112_v0  ;;  %v7720_v48 = vpop.eup %7719  ;;  %7731 = vlog2.f32 %v3145_v27  ;;  %v11142_v0 = vmul.f32 0.6931472, %v7712_v32  ;;  %v3565_v26 = vmul.f32 0.6931472, %v7718_v6  ;;  %v3479_v3 = vadd.f32 %v14494_v38, %v3415_v36 }
 0x522   : > { %14487 = vst [vmem:[#allocation217_spill] sm:$0xff] %v11114_v22  ;;  %v11137_v15 = vpop.eup %7721  ;;  %v3417_v22 = vmul.f32 %v10713_v35, %v3029_v56  ;;  %v11153_v27 = vmul.f32 0.6931472, %v7720_v48  ;;  %7733 = vlog2.f32 %v3148_v1  ;;  %v3480_v9 = vadd.f32 %v14496_v61, %v3416_v7  ;;  %v14503_v48 = vld [vmem:[#allocation104_spill] sm:$0xff] }
 0x523   : > { %14488 = vst [vmem:[#allocation218_spill] sm:$0xff] %v11118_v11  ;;  %v11149_v46 = vpop.eup %7723  ;;  %7735 = vlog2.f32 %v3149_v31  ;;  %v3418_v38 = vmul.f32 %v10675_v59, %v3034_v60  ;;  %v3419_v32 = vmul.f32 %v10691_v17, %v3034_v60  ;;  %v3420_v1 = vmul.f32 %v10708_v28, %v3034_v60  ;;  %v14507_v31 = vld [vmem:[#allocation109_spill] sm:$0xff] }
 0x524   : > { %14489 = vst [vmem:[#allocation219_spill] sm:$0xff] %v11122_v4  ;;  %v11146_v4 = vadd.f32 %v14496_v61, %v11110_v44  ;;  %v7726_v56 = vpop.eup %7725  ;;  %v11164_v51 = vsub.f32 %v3563_v58, %v11153_v27  ;;  %7737 = vlog2.f32 %v3478_v5  ;;  %v14510_v5 = vld [vmem:[#allocation6_spill] sm:$0xff] }
 0x525   : > { %14490 = vst [vmem:[#allocation220_spill] sm:$0xff] %v11130_v34  ;;  %v7728_v47 = vpop.eup %7727  ;;  %v11175_v7 = vmul.f32 0.6931472, %v7726_v56  ;;  %7739 = vlog2.f32 %v3479_v3  ;;  %v3421_v34 = vmul.f32 %v10713_v35, %v3034_v60  ;;  %v11192_v3 = vpop.xlane.xlu2 %3038  ;;  %v11205_v56 = vsub.f32 %v10914_v30, %v10841_v20 }
 0x526   : > { %14491 = vst [vmem:[#allocation221_spill] sm:$0xff] %v11133_v39  ;;  %v7730_v36 = vpop.eup %7729  ;;  %v11181_v39 = vmul.f32 0.6931472, %v7728_v47  ;;  %7741 = vlog2.f32 %v3480_v9  ;;  %v14515_v9 = vld [vmem:[#allocation11_spill] sm:$0xff]  ;;  %v11219_v30 = vperm.slane %v10723_v21, 3  ;;  %v3423_v29 = vmul.f32 %v10691_v17, %v11192_v3 }
 0x527   : > { %14493 = vst [vmem:[#allocation100_spill] sm:$0xff] %v11137_v15  ;;  %v11156_v15 = vmul.f32 1e-08, %v3034_v60  ;;  %v11173_v6 = vpop.eup %7731  ;;  %v3424_v14 = vmul.f32 %v10708_v28, %v11192_v3 }
 0x528   : > { %14495 = vst [vmem:[#allocation101_spill] sm:$0xff] %v11142_v0  ;;  %v11169_v0 = vsub.f32 %v3565_v26, %v11153_v27  ;;  %v11198_v47 = vpop.eup %7733 }
 0x529   : > { %14497 = vst [vmem:[#allocation2_spill] sm:$0xff] %v11146_v4  ;;  %v3152_v58 = vadd.f32 %v14507_v31, %v11156_v15  ;;  %v11185_v26 = vadd.f32 %v14510_v5, %v11156_v15  ;;  %v11190_v4 = vmul.f32 0.6931472, %v7730_v36  ;;  %v11207_v36 = vpop.eup %7735 }
 0x52a   : > { %14498 = vst [vmem:[#allocation222_spill] sm:$0xff] %v11149_v46 }
 0x52b   : > { %14499 = vst [vmem:[#allocation223_spill] sm:$0xff] %v11151_v62  ;;  %v3481_v62 = vadd.f32 %v14503_v48, %v3417_v22  ;;  %v14508_v22 = vld [vmem:[#allocation112_spill] sm:$0xff]  ;;  %v11196_v48 = vsub.f32 %v10902_v18, %v10841_v20  ;;  %v3484_v18 = vadd.f32 %v14510_v5, %v3420_v1  ;;  %v8177_v1 = vld [vmem:[%s13661_s11] sm:$0xf] }
 0x52c   : > { %14500 = vst [vmem:[#allocation224_spill] sm:$0xff] %v11153_v27  ;;  %v3153_v61 = vadd.f32 %v14508_v22, %v11156_v15  ;;  %v11235_v5 = vperm.slane %v8177_v1, 2 }
 0x52d   : > { %14501 = vst [vmem:[#allocation225_spill] sm:$0xff] %v11156_v15  ;;  %7743 = vlog2.f32 %v3481_v62  ;;  %v3483_v62 = vadd.f32 %v14508_v22, %v3419_v32  ;;  %v11212_v15 = vperm.slane %v10723_v21, 2  ;;  %v4358_v21 = vsub.f32 %v11219_v30, %v11205_v56 }
 0x52e   : > { %14502 = vst [vmem:[#allocation226_spill] sm:$0xff] %v11164_v51  ;;  %7745 = vlog2.f32 %v3034_v60  ;;  %v3485_v60 = vadd.f32 %v14515_v9, %v3421_v34  ;;  %v11229_v34 = vperm.slane %v8177_v1, 0  ;;  %v3422_v9 = vmul.f32 %v10675_v59, %v11192_v3 }
 0x52f   : > { %14504 = vst [vmem:[#allocation227_spill] sm:$0xff] %v11169_v0  ;;  %7747 = vlog2.f32 %v3152_v58  ;;  %v3123_v58 = vadd.f32 %v14403_v33, %v10687_v54  ;;  %v4357_v32 = vsub.f32 %v11212_v15, %v11196_v48  ;;  %v11237_v54 = vperm.slane %v8177_v1, 3  ;;  %v14528_v0 = vld [vmem:[#allocation48_spill] sm:$0xff] }
 0x530   : > { %14505 = vst [vmem:[#allocation228_spill] sm:$0xff] %v11173_v6  ;;  %7749 = vlog2.f32 %v3153_v61  ;;  %v11233_v61 = vperm.slane %v8177_v1, 1  ;;  %v14524_v6 = vld [vmem:[#allocation65_spill] sm:$0xff] }
 0x531   : > { %14506 = vst [vmem:[#allocation229_spill] sm:$0xff] %v11175_v7  ;;  %7751 = vlog2.f32 %v10819_v50  ;;  %v4430_v1 = vmul.f32 %v11235_v5, %v4357_v32  ;;  %6321 = vadd.xlane.f32.xlu1 %v14524_v6  ;;  %v14531_v6 = vld [vmem:[#allocation119_spill] sm:$0xff] }
 0x532   : > { %14509 = vst [vmem:[#allocation109_spill] sm:$0xff] %v11181_v39  ;;  %v4429_v19 = vmul.f32 %v11233_v61, %v14521_v13  ;;  %v14526_v13 = vld [vmem:[#allocation118_spill] sm:$0xff] }
 0x533   : > { %14511 = vst [vmem:[#allocation112_spill] sm:$0xff] %v11185_v26  ;;  %v3482_v26 = vadd.f32 %v14507_v31, %v3418_v38  ;;  %v11216_v38 = vmul.f32 1e-08, %v11192_v3  ;;  %v11269_v11 = vadd.f32 %v4430_v1, %v14528_v0  ;;  %v14535_v0 = vld [vmem:[#allocation120_spill] sm:$0xff] }
 0x534   : > { %14512 = vst [vmem:[#allocation6_spill] sm:$0xff] %v11190_v4 }
 0x535   : > { %14513 = vst [vmem:[#allocation230_spill] sm:$0xff] %v11198_v47  ;;  %v7738_v47 = vpop.eup %7737  ;;  %7753 = vlog2.f32 %v3482_v26  ;;  %v3156_v32 = vadd.f32 %v14526_v13, %v11216_v38  ;;  %v11288_v1 = vadd.f32 %v14535_v0, %v11216_v38 }
 0x536   : > { %14514 = vst [vmem:[#allocation231_spill] sm:$0xff] %v11207_v36  ;;  %v7740_v31 = vpop.eup %7739  ;;  %v3571_v50 = vmul.f32 0.6931472, %v7738_v47  ;;  %v14520_v36 = vsub.f32 %v10738_v55, %v10874_v41  ;;  %v4431_v47 = vmul.f32 %v11237_v54, %v4358_v21  ;;  %7755 = vlog2.f32 %v3123_v58  ;;  %v14527_v21 = vld [vmem:[#allocation53_spill] sm:$0xff] }
 0x537   : > { %14516 = vst [vmem:[#allocation232_spill] sm:$0xff] %v11216_v38  ;;  %v7742_v22 = vpop.eup %7741  ;;  %v3573_v10 = vmul.f32 0.6931472, %v7740_v31  ;;  %7757 = vlog2.f32 %v3483_v62  ;;  %v3157_v58 = vadd.f32 %v14531_v6, %v11216_v38 }
 0x538   : > { %14517 = vst [vmem:[#allocation233_spill] sm:$0xff] %v11219_v30  ;;  %v7744_v33 = vpop.eup %7743  ;;  %v4428_v44 = vmul.f32 %v11229_v34, %v14520_v36  ;;  %v14523_v36 = vld [vmem:[#allocation51_spill] sm:$0xff]  ;;  %v11271_v39 = vmul.f32 0.6931472, %v7742_v22  ;;  %7759 = vlog2.f32 %v3484_v18 }
 0x539   : > { %14518 = vst [vmem:[#allocation234_spill] sm:$0xff] %v11235_v5  ;;  %v7746_v2 = vpop.eup %7745  ;;  %7761 = vlog2.f32 %v3485_v60 }
 0x53a   : > { %14519 = vst [vmem:[#allocation235_spill] sm:$0xff] %v11237_v54  ;;  %v11251_v26 = vpop.eup %7747  ;;  %v11258_v31 = vadd.f32 %v4428_v44, %v14523_v36  ;;  %v11274_v44 = vsub.f32 %v3571_v50, %v11190_v4  ;;  %v14532_v36 = vld [vmem:[#allocation50_spill] sm:$0xff]  ;;  %v3185_v50 = vmul.f32 0.6931472, %v10755_v8  ;;  %7763 = vlog2.f32 %v11192_v3 }
 0x53b   : > { %14522 = vst [vmem:[#allocation236_spill] sm:$0xff] %v11251_v26  ;;  %v11261_v46 = vpop.eup %7749  ;;  %v11266_v26 = vadd.f32 %v4429_v19, %v14527_v21  ;;  %v11279_v62 = vadd.f32 %v4431_v47, %v14532_v36  ;;  %v11284_v19 = vsub.f32 %v3573_v10, %v11190_v4  ;;  %v3187_v47 = vmul.f32 0.6931472, %v10761_v12 }
 0x53c   : > { %14525 = vst [vmem:[#allocation51_spill] sm:$0xff] %v11261_v46  ;;  %v7752_v51 = vpop.eup %7751  ;;  %v11281_v46 = vmul.f32 0.6931472, %v7744_v33  ;;  %v4620_v21 = vand.u32 2147483647, %v11258_v31  ;;  %v3425_v33 = vmul.f32 %v10713_v35, %v11192_v3  ;;  %7765 = vlog2.f32 %v3156_v32 }
 0x53d   : > { %14529 = vst [vmem:[#allocation65_spill] sm:$0xff] %v11271_v39  ;;  %v7754_v22 = vpop.eup %7753  ;;  %v4621_v39 = vand.u32 2147483647, %v11266_v26  ;;  %v4622_v10 = vand.u32 2147483647, %v11269_v11  ;;  %7767 = vlog2.f32 %v3157_v58  ;;  %v3312_v12 = vsub.f32 %v3185_v50, %v10841_v20 }
 0x53e   : > { %14530 = vst [vmem:[#allocation118_spill] sm:$0xff] %v11274_v44  ;;  %v4623_v18 = vand.u32 2147483647, %v11279_v62  ;;  %v7756_v36 = vpop.eup %7755  ;;  %v4684_v60 = vsub.f32 0.0, %v4620_v21  ;;  %v11309_v32 = vmul.f32 0.6931472, %v7746_v2  ;;  %v3486_v58 = vadd.f32 %v14526_v13, %v3422_v9 }
 0x53f   : > { %14533 = vst [vmem:[#allocation53_spill] sm:$0xff] %v11281_v46  ;;  %v3189_v46 = vmul.f32 0.6931472, %v7752_v51  ;;  %v4685_v4 = vsub.f32 0.0, %v4621_v39  ;;  %v7758_v8 = vpop.eup %7757  ;;  %v4686_v38 = vsub.f32 0.0, %v4622_v10  ;;  %v3313_v39 = vsub.f32 %v3187_v47, %v10841_v20 }
 0x540   : > { %14534 = vst [vmem:[#allocation48_spill] sm:$0xff] %v11284_v19  ;;  %v4687_v7 = vsub.f32 0.0, %v4623_v18  ;;  %v4748_v27 = vmul.f32 1.442695, %v4684_v60  ;;  %v11302_v16 = vpop.eup %7759  ;;  %v3191_v51 = vmul.f32 0.6931472, %v7756_v36  ;;  %v3487_v10 = vadd.f32 %v14531_v6, %v3423_v29 }
 0x541   : > { %14536 = vst [vmem:[#allocation119_spill] sm:$0xff] %v11288_v1  ;;  %v4750_v43 = vmul.f32 1.442695, %v4685_v4  ;;  %v4752_v3 = vmul.f32 1.442695, %v4686_v38  ;;  %v11307_v23 = vpop.eup %7761  ;;  %v3314_v50 = vsub.f32 %v3189_v46, %v10841_v20  ;;  %v3488_v18 = vadd.f32 %v14535_v0, %v3424_v14  ;;  %v14545_v6 = vld [vmem:[#allocation77_spill] sm:$0xff] }
 0x542   : > { %v4754_v21 = vmul.f32 1.442695, %v4687_v7  ;;  %14537 = vst [vmem:[#allocation50_spill] sm:$0xff] %v11307_v23  ;;  %7769 = vpow2.f32 %v4748_v27  ;;  %v11318_v38 = vpop.eup %7763  ;;  %v14540_v7 = vld [vmem:[#allocation13_spill] sm:$0xff]  ;;  %v11322_v2 = vmul.f32 1e-08, %v11304_v45  ;;  %v5324_v46 = vsub.f32 %v3312_v12, %v10874_v41 }
 0x543   : > { %14538 = vst [vmem:[#allocation120_spill] sm:$0xff] %v11309_v32  ;;  %7771 = vpow2.f32 %v4750_v43  ;;  %v3489_v47 = vadd.f32 %v14540_v7, %v3425_v33  ;;  %v11325_v27 = vpop.eup %7765  ;;  %v11329_v9 = vmul.f32 %v10675_v59, %v11304_v45  ;;  %v3315_v29 = vsub.f32 %v3191_v51, %v10841_v20  ;;  %v14547_v33 = vld [vmem:[#allocation78_spill] sm:$0xff]  ;;  %v11372_v4 = vld [vmem:[%s8359_s16 + $0x8] sm:$0xff] }
 0x544   : > { %14539 = vst [vmem:[#allocation237_spill] sm:$0xff] %v11318_v38  ;;  %7773 = vpow2.f32 %v4752_v3  ;;  %v5325_v14 = vsub.f32 %v3313_v39, %v10895_v57  ;;  %v11333_v43 = vpop.eup %7767  ;;  %v11335_v13 = vmul.f32 0.6931472, %v7754_v22  ;;  %v11339_v41 = vmul.f32 %v10691_v17, %v11304_v45  ;;  %v11364_v3 = vld [vmem:[%s8359_s16] sm:$0xff] }
 0x545   : > { %14541 = vst [vmem:[#allocation238_spill] sm:$0xff] %v11322_v2  ;;  %7775 = vpow2.f32 %v4754_v21  ;;  %v5326_v20 = vsub.f32 %v3314_v50, %v11196_v48  ;;  %v11349_v57 = vmul.f32 %v10708_v28, %v11304_v45  ;;  %v14546_v0 = vsub.f32 0.0, %v14545_v6  ;;  %v14550_v48 = vld [vmem:[#allocation124_spill] sm:$0xff]  ;;  %v5516_v1 = vld [vmem:[%s11344_s18] sm:$0xff] }
 0x546   : > { %14542 = vst [vmem:[#allocation239_spill] sm:$0xff] %v11325_v27  ;;  %7777 = vlog2.f32 %v3486_v58  ;;  %v14548_v36 = vsub.f32 0.0, %v14547_v33  ;;  %v11357_v51 = vmul.f32 0.6931472, %v7758_v8  ;;  %v11361_v39 = vadd.f32 %v14550_v48, %v11322_v2 }
 0x547   : > { %14543 = vst [vmem:[#allocation240_spill] sm:$0xff] %v11333_v43  ;;  %7779 = vlog2.f32 %v3487_v10  ;;  %v5260_v22 = vadd.f32 %v14546_v0, %v11258_v31  ;;  %v5388_v21 = vmul.f32 %v11364_v3, %v5324_v46  ;;  %v14551_v10 = vld [vmem:[#allocation75_spill] sm:$0xff]  ;;  %v5327_v8 = vsub.f32 %v3315_v29, %v11205_v56  ;;  %v14553_v43 = vld [vmem:[#allocation76_spill] sm:$0xff] }
 0x548   : > { %14544 = vst [vmem:[#allocation241_spill] sm:$0xff] %v11349_v57  ;;  %v5261_v60 = vadd.f32 %v14548_v36, %v11266_v26  ;;  %v7770_v12 = vpop.eup %7769  ;;  %7781 = vlog2.f32 %v3488_v18  ;;  %v14552_v0 = vsub.f32 0.0, %v14551_v10  ;;  %v5389_v18 = vmul.f32 %v11372_v4, %v5325_v14 }
 0x549   : > { %14549 = vst [vmem:[#allocation77_spill] sm:$0xff] %v11357_v51  ;;  %v7772_v58 = vpop.eup %7771  ;;  %v4876_v50 = vadd.f32 1.0, %v7770_v12  ;;  %7783 = vlog2.f32 %v3489_v47  ;;  %v14554_v27 = vsub.f32 0.0, %v14553_v43  ;;  %v11380_v12 = vld [vmem:[%s8359_s16 + $0x10] sm:$0xff]  ;;  %v5452_v29 = vadd.f32 %v5388_v21, %v5260_v22 }
 0x54a   : > { %v5262_v36 = vadd.f32 %v14552_v0, %v11269_v11  ;;  %v7774_v19 = vpop.eup %7773  ;;  %v4877_v44 = vadd.f32 1.0, %v7772_v58  ;;  %v5390_v7 = vmul.f32 %v11380_v12, %v5326_v20  ;;  %v5517_v0 = vld [vmem:[%s11344_s18 + $0x8] sm:$0xff]  ;;  %v5453_v17 = vadd.f32 %v5389_v18, %v5261_v60 }
 0x54b   : > { %v5263_v46 = vadd.f32 %v14554_v27, %v11279_v62  ;;  %v7776_v28 = vpop.eup %7775  ;;  %v4878_v56 = vadd.f32 1.0, %v7774_v19  ;;  %7785 = vlog2.f32 %v4876_v50  ;;  %v5548_v47 = vunpack.c.l.bf16 %v5516_v1  ;;  %v11389_v27 = vld [vmem:[%s8359_s16 + $0x18] sm:$0xff]  ;;  %v14555_v19 = vld [vmem:[#allocation126_spill] sm:$0xff] }
 0x54c   : > { %v11384_v14 = vpop.eup %7777  ;;  %v4879_v59 = vadd.f32 1.0, %v7776_v28  ;;  %7787 = vlog2.f32 %v4877_v44  ;;  %v5549_v58 = vunpack.c.h.bf16 %v5516_v1  ;;  %v5391_v57 = vmul.f32 %v11389_v27, %v5327_v8 }
 0x54d   : > { %v11386_v23 = vpop.eup %7779  ;;  %7789 = vlog2.f32 %v4878_v56  ;;  %v5454_v20 = vadd.f32 %v5390_v7, %v5262_v36  ;;  %v5550_v38 = vunpack.c.l.bf16 %v5517_v0  ;;  %v11396_v22 = vadd.f32 %v14555_v19, %v11322_v2 }
 0x54e   : > { %v11392_v51 = vpop.eup %7781  ;;  %v4556_v28 = vmax.f32 %v11258_v31, 0.0  ;;  %v4557_v44 = vmax.f32 %v11266_v26, 0.0  ;;  %7791 = vlog2.f32 %v4879_v59  ;;  %v5455_v1 = vadd.f32 %v5391_v57, %v5263_v46 }
 0x54f   : > { %v5551_v60 = vunpack.c.h.bf16 %v5517_v0  ;;  %v11402_v21 = vsub.f32 %v11087_v40, %v11057_v52  ;;  %v11406_v7 = vsub.f32 %v11089_v49, %v11057_v52  ;;  %v11408_v50 = vpop.eup %7783  ;;  %v4558_v36 = vmax.f32 %v11269_v11, 0.0 }
 0x550   : > { %v4559_v8 = vmax.f32 %v11279_v62, 0.0  ;;  %v5612_v31 = vadd.f32 %v5548_v47, %v5452_v29  ;;  %v5613_v18 = vadd.f32 %v5549_v58, %v5453_v17  ;;  %v5614_v59 = vadd.f32 %v5550_v38, %v5454_v20 }
 0x551   : > { %v7786_v26 = vpop.eup %7785  ;;  %vm5676_vm2 = vcmp.lt.f32.partialorder %v11364_v3, 1e-08  ;;  %vm5677_vm3 = vcmp.lt.f32.partialorder %v11372_v4, 1e-08  ;;  %vm5678_vm4 = vcmp.lt.f32.partialorder %v11380_v12, 1e-08  ;;  %v4369_v49 = vsub.f32 %v11212_v15, %v11402_v21 }
 0x552   : > { %v7788_v40 = vpop.eup %7787  ;;  %v4941_v57 = vmul.f32 0.6931472, %v7786_v26  ;;  %vm5679_vm5 = vcmp.lt.f32.partialorder %v11389_v27, 1e-08  ;;  %v4370_v11 = vsub.f32 %v11219_v30, %v11406_v7  ;;  %v5615_v46 = vadd.f32 %v5551_v60, %v5455_v1 }
 0x553   : > { %v7790_v62 = vpop.eup %7789  ;;  %v4943_v17 = vmul.f32 0.6931472, %v7788_v40  ;;  %vm5804_vm6 = vcmp.gt.f32.partialorder %v11364_v3, 1e-08  ;;  %vm5805_vm7 = vcmp.gt.f32.partialorder %v11372_v4, 1e-08  ;;  %v14556_v29 = vsub.f32 %v10738_v55, %v11070_v37 }
 0x554   : > { %v7792_v38 = vpop.eup %7791  ;;  %v4945_v0 = vmul.f32 0.6931472, %v7790_v62  ;;  %v5068_v56 = vadd.f32 %v4941_v57, %v4556_v28  ;;  %vm5806_vm8 = vcmp.gt.f32.partialorder %v11380_v12, 1e-08  ;;  %vm5807_vm9 = vcmp.gt.f32.partialorder %v11389_v27, 1e-08 }
 0x555   : > { %v4440_v47 = vmul.f32 %v11229_v34, %v14556_v29  ;;  %v4947_v58 = vmul.f32 0.6931472, %v7792_v38  ;;  %v5069_v20 = vadd.f32 %v4943_v17, %v4557_v44  ;;  %v14557_v1 = vsub.f32 %v10744_v63, %v11075_v53 }
 0x556   : > { %v5070_v26 = vadd.f32 %v4945_v0, %v4558_v36  ;;  %v5132_v40 = vsub.f32 %v5068_v56, %v14545_v6  ;;  %v4442_v28 = vmul.f32 %v11235_v5, %v4369_v49  ;;  %v4443_v57 = vmul.f32 %v11237_v54, %v4370_v11  ;;  %v14558_v49 = vld [vmem:[#allocation79_spill] sm:$0xff]  ;;  %v14559_v11 = vld [vmem:[#allocation80_spill] sm:$0xff] }
 0x557   : > { %v4441_v60 = vmul.f32 %v11233_v61, %v14557_v1  ;;  %v5071_v62 = vadd.f32 %v4947_v58, %v4559_v8  ;;  %v5133_v30 = vsub.f32 %v5069_v20, %v14547_v33  ;;  %v5868_v44 = vsel %vm5804_vm6, %v5612_v31, 0.0 }
 0x558   : > { %v5869_v17 = vsel %vm5805_vm7, %v5613_v18, 0.0  ;;  %v5134_v38 = vsub.f32 %v5070_v26, %v14551_v10  ;;  %v5740_v36 = vsel %vm5676_vm2, %v5132_v40, 0.0  ;;  %v3135_v6 = vadd.f32 %v14449_v25, %v10922_v42  ;;  %v14560_v18 = vld [vmem:[#allocation73_spill] sm:$0xff]  ;;  %v14561_v42 = vld [vmem:[#allocation74_spill] sm:$0xff] }
 0x559   : > { %v11446_v0 = vadd.f32 %v4440_v47, %v14558_v49  ;;  %v5135_v8 = vsub.f32 %v5071_v62, %v14553_v43  ;;  %v5741_v33 = vsel %vm5677_vm3, %v5133_v30, 0.0  ;;  %v5932_v31 = vadd.f32 %v5868_v44, %v5740_v36  ;;  %v14566_v49 = vld [vmem:[#allocation68_spill] sm:$0xff] }
 0x55a   : > { %v11452_v56 = vadd.f32 %v4441_v60, %v14559_v11  ;;  %v5742_v10 = vsel %vm5678_vm4, %v5134_v38, 0.0  ;;  %v5933_v3 = vadd.f32 %v5869_v17, %v5741_v33  ;;  %v11457_v29 = vadd.f32 %v4442_v28, %v14560_v18  ;;  %v14567_v33 = vld [vmem:[#allocation205_spill] sm:$0xff] }
 0x55b   : > { %v11460_v25 = vadd.f32 %v4443_v57, %v14561_v42  ;;  %v11463_v47 = vmul.f32 0.6931472, %v11302_v16  ;;  %v5743_v30 = vsel %vm5679_vm5, %v5135_v8, 0.0  ;;  %v5870_v4 = vsel %vm5806_vm8, %v5614_v59, 0.0 }
 0x55c   : > { %7793 = vlog2.f32 %v10973_v24  ;;  %v3490_v43 = vadd.f32 %v14550_v48, %v11329_v9  ;;  %v5934_v58 = vadd.f32 %v5870_v4, %v5742_v10  ;;  %v5996_v20 = vadd.f32 %v5933_v3, %v5932_v31  ;;  %v14570_v10 = vld [vmem:[#allocation241_spill] sm:$0xff]  ;;  %v14571_v3 = vld [vmem:[#allocation14_spill] sm:$0xff] }
 0x55d   : > { %14562 = vst [vmem:[#allocation78_spill] sm:$0xff] %v11463_v47  ;;  %7795 = vlog2.f32 %v3135_v6  ;;  %v3491_v1 = vadd.f32 %v14555_v19, %v11339_v41  ;;  %v5871_v16 = vsel %vm5807_vm9, %v5615_v46, 0.0  ;;  %v4632_v60 = vand.u32 2147483647, %v11446_v0 }
 0x55e   : > { %v4633_v26 = vand.u32 2147483647, %v11452_v56  ;;  %v5935_v12 = vadd.f32 %v5871_v16, %v5743_v30  ;;  %v5997_v59 = vadd.f32 %v5996_v20, %v5934_v58  ;;  %v4634_v24 = vand.u32 2147483647, %v11457_v29 }
 0x55f   : > { %v4635_v40 = vand.u32 2147483647, %v11460_v25  ;;  %7797 = vlog2.f32 %v11304_v45  ;;  %v3429_v9 = vmul.f32 %v10713_v35, %v11304_v45  ;;  %v4696_v48 = vsub.f32 0.0, %v4632_v60 }
 0x560   : > { %v4697_v41 = vsub.f32 0.0, %v4633_v26  ;;  %7799 = vlog2.f32 %v11361_v39  ;;  %v5998_v27 = vadd.f32 %v5997_v59, %v5935_v12  ;;  %v4698_v19 = vsub.f32 0.0, %v4634_v24  ;;  %v14564_v39 = vld [vmem:[#allocation77_spill] sm:$0xff] }
 0x561   : > { %v4699_v46 = vsub.f32 0.0, %v4635_v40  ;;  %v11486_v57 = vsub.f32 %v11335_v13, %v11309_v32  ;;  %7801 = vlog2.f32 %v3490_v43  ;;  %v4772_v62 = vmul.f32 1.442695, %v4696_v48  ;;  %v14568_v13 = vld [vmem:[#allocation237_spill] sm:$0xff] }
 0x562   : > { %v7794_v28 = vpop.eup %7793  ;;  %v4774_v44 = vmul.f32 1.442695, %v4697_v41  ;;  %v3587_v38 = vmul.f32 0.6931472, %v11384_v14  ;;  %7803 = vlog2.f32 %v3491_v1  ;;  %5999 = vadd.xlane.f32.xlu0 %v5998_v27  ;;  %v4776_v45 = vmul.f32 1.442695, %v4698_v19 }
 0x563   : > { %14563 = vst [vmem:[#allocation124_spill] sm:$0xff] %v11486_v57  ;;  %v7796_v17 = vpop.eup %7795  ;;  %v4778_v36 = vmul.f32 1.442695, %v4699_v46  ;;  %v11491_v6 = vsub.f32 %v14564_v39, %v11309_v32  ;;  %v3209_v8 = vmul.f32 0.6931472, %v14566_v49  ;;  %7805 = vpow2.f32 %v4772_v62  ;;  %v14572_v14 = vld [vmem:[#allocation17_spill] sm:$0xff] }
 0x564   : > { %v3211_v31 = vmul.f32 0.6931472, %v14567_v33  ;;  %v11496_v11 = vmul.f32 0.6931472, %v14568_v13  ;;  %v3492_v18 = vadd.f32 %v14571_v3, %v14570_v10  ;;  %v3493_v42 = vadd.f32 %v14572_v14, %v3429_v9  ;;  %v14574_v1 = vld [vmem:[#allocation50_spill] sm:$0xff]  ;;  %v14584_v39 = vld [vmem:[#allocation108_spill] sm:$0xff] }
 0x565   : > { %14565 = vst [vmem:[#allocation75_spill] sm:$0xff] %v11491_v6  ;;  %7807 = vpow2.f32 %v4774_v44  ;;  %v7798_v30 = vpop.eup %7797  ;;  %v3589_v4 = vmul.f32 0.6931472, %v11386_v23  ;;  %v3213_v43 = vmul.f32 0.6931472, %v7794_v28  ;;  %v11512_v26 = vadd.f32 %v14571_v3, %v11322_v2  ;;  %v14586_v10 = vld [vmem:[#allocation12_spill] sm:$0xff] }
 0x566   : > { %14569 = vst [vmem:[#allocation76_spill] sm:$0xff] %v11496_v11  ;;  %v3215_v58 = vmul.f32 0.6931472, %v7796_v17  ;;  %7809 = vpow2.f32 %v4776_v45  ;;  %v11502_v20 = vpop.eup %7799  ;;  %v11505_v16 = vmul.f32 0.6931472, %v14574_v1  ;;  %v11508_v60 = vsub.f32 %v3587_v38, %v11496_v11  ;;  %v14593_v57 = vld [vmem:[#allocation18_spill] sm:$0xff] }
 0x567   : > { %14573 = vst [vmem:[#allocation126_spill] sm:$0xff] %v11502_v20  ;;  %7811 = vpow2.f32 %v4778_v36  ;;  %v7802_v12 = vpop.eup %7801  ;;  %v3324_v59 = vsub.f32 %v3209_v8, %v11057_v52  ;;  %v3325_v24 = vsub.f32 %v3211_v31, %v11057_v52  ;;  %v11522_v48 = vmul.f32 0.6931472, %v11392_v51  ;;  %v14642_v20 = vld [vmem:[#allocation25_spill] sm:$0xff] }
 0x568   : > { %14575 = vst [vmem:[#allocation79_spill] sm:$0xff] %v11505_v16  ;;  %7813 = vlog2.f32 %v11396_v22  ;;  %v7804_v40 = vpop.eup %7803  ;;  %v11525_v41 = vmul.f32 0.6931472, %v11408_v50  ;;  %v11528_v19 = vsub.f32 %v3589_v4, %v11496_v11  ;;  %v3326_v22 = vsub.f32 %v3213_v43, %v11057_v52  ;;  %v14582_v50 = vld [vmem:[#allocation7_spill] sm:$0xff] }
 0x569   : > { %14576 = vst [vmem:[#allocation80_spill] sm:$0xff] %v11508_v60  ;;  %7815 = vlog2.f32 %v3492_v18  ;;  %v7806_v27 = vpop.eup %7805  ;;  %v3327_v46 = vsub.f32 %v3215_v58, %v11057_v52  ;;  %v11534_v44 = vmul.f32 0.6931472, %v7798_v30  ;;  %v14583_v17 = vsub.f32 0.0, %v14582_v50  ;;  %v14587_v18 = vld [vmem:[#allocation22_spill] sm:$0xff] }
 0x56a   : > { %14577 = vst [vmem:[#allocation73_spill] sm:$0xff] %v11512_v26  ;;  %7817 = vlog2.f32 %v3493_v42  ;;  %v4888_v51 = vadd.f32 1.0, %v7806_v27  ;;  %v14585_v49 = vsub.f32 0.0, %v14584_v39  ;;  %v5336_v52 = vsub.f32 %v3324_v59, %v11070_v37 }
 0x56b   : > { %14578 = vst [vmem:[#allocation74_spill] sm:$0xff] %v11522_v48  ;;  %v7808_v28 = vpop.eup %7807  ;;  %v5272_v38 = vadd.f32 %v14583_v17, %v11446_v0  ;;  %v5337_v33 = vsub.f32 %v3325_v24, %v11075_v53  ;;  %v6317_v3 = vsel %vm1786_vm0, %v14586_v10, 0.0  ;;  %v6329_v42 = vsel %vm1786_vm0, %v14587_v18, 0.0  ;;  %v5522_v53 = vld [vmem:[%s11344_s18 + $0x30] sm:$0xff]  ;;  %v14589_v24 = vld [vmem:[#allocation105_spill] sm:$0xff] }
 0x56c   : > { %14579 = vst [vmem:[#allocation77_spill] sm:$0xff] %v11525_v41  ;;  %v7810_v45 = vpop.eup %7809  ;;  %v4889_v36 = vadd.f32 1.0, %v7808_v28  ;;  %v5273_v8 = vadd.f32 %v14585_v49, %v11452_v56  ;;  %7819 = vlog2.f32 %v4888_v51  ;;  %v5338_v43 = vsub.f32 %v3326_v22, %v11402_v21  ;;  %6318 = vadd.xlane.f32.xlu2 %v6317_v3  ;;  %6330 = vadd.xlane.f32.xlu1 %v6329_v42  ;;  %v8182_v51 = vld [vmem:[%s8359_s16 + $0x60] sm:$0xff]  ;;  %v8184_v10 = vld [vmem:[%s8359_s16 + $0x70] sm:$0xff]  ;;  %v11574_v18 = vld [vmem:[%s8359_s16 + $0x78] sm:$0xff] }
 0x56d   : > { %14580 = vst [vmem:[#allocation68_spill] sm:$0xff] %v11528_v19  ;;  %v7812_v31 = vpop.eup %7811  ;;  %v4890_v13 = vadd.f32 1.0, %v7810_v45  ;;  %v5339_v37 = vsub.f32 %v3327_v46, %v11406_v7  ;;  %v11555_v1 = vmul.f32 0.6931472, %v7802_v12  ;;  %v11557_v59 = vmul.f32 0.6931472, %v7804_v40 }
 0x56e   : > { %14581 = vst [vmem:[#allocation205_spill] sm:$0xff] %v11534_v44  ;;  %v11548_v30 = vpop.eup %7813  ;;  %v4891_v4 = vadd.f32 1.0, %v7812_v31  ;;  %7821 = vlog2.f32 %v4889_v36  ;;  %v14590_v27 = vsub.f32 0.0, %v14589_v24  ;;  %v14591_v7 = vld [vmem:[#allocation106_spill] sm:$0xff]  ;;  %v5400_v17 = vmul.f32 %v8182_v51, %v5336_v52  ;;  %v8183_v12 = vld [vmem:[%s8359_s16 + $0x68] sm:$0xff]  ;;  %v5523_v36 = vld [vmem:[%s11344_s18 + $0x38] sm:$0xff] }
 0x56f   : > { %14588 = vst [vmem:[#allocation237_spill] sm:$0xff] %v11548_v30  ;;  %v11553_v58 = vpop.eup %7815  ;;  %7823 = vlog2.f32 %v4890_v13  ;;  %v14592_v22 = vsub.f32 0.0, %v14591_v7  ;;  %v5401_v45 = vmul.f32 %v8183_v12, %v5337_v33  ;;  %v4568_v40 = vmax.f32 %v11446_v0, 0.0 }
 0x570   : > { %v5274_v28 = vadd.f32 %v14590_v27, %v11457_v29  ;;  %v11562_v21 = vpop.eup %7817  ;;  %7825 = vlog2.f32 %v4891_v4  ;;  %v4569_v49 = vmax.f32 %v11452_v56, 0.0  ;;  %v5560_v31 = vunpack.c.l.bf16 %v5522_v53 }
 0x571   : > { %v5275_v46 = vadd.f32 %v14592_v22, %v11460_v25  ;;  %v5561_v13 = vunpack.c.h.bf16 %v5522_v53  ;;  %v5402_v3 = vmul.f32 %v8184_v10, %v5338_v43  ;;  %v5403_v42 = vmul.f32 %v11574_v18, %v5339_v37 }
 0x572   : > { %v5464_v4 = vadd.f32 %v5400_v17, %v5272_v38  ;;  %v5465_v27 = vadd.f32 %v5401_v45, %v5273_v8  ;;  %v7820_v22 = vpop.eup %7819  ;;  %v4570_v52 = vmax.f32 %v11457_v29, 0.0  ;;  %v4571_v33 = vmax.f32 %v11460_v25, 0.0  ;;  %v14594_v38 = vld [vmem:[#allocation28_spill] sm:$0xff] }
 0x573   : > { %v5562_v9 = vunpack.c.l.bf16 %v5523_v36  ;;  %v5563_v23 = vunpack.c.h.bf16 %v5523_v36  ;;  %v4965_v62 = vmul.f32 0.6931472, %v7820_v22  ;;  %v5466_v56 = vadd.f32 %v5402_v3, %v5274_v28 }
 0x574   : > { %v7822_v0 = vpop.eup %7821  ;;  %v5467_v6 = vadd.f32 %v5403_v42, %v5275_v46  ;;  %vm5688_vm10 = vcmp.lt.f32.partialorder %v8182_v51, 1e-08  ;;  %vm5689_vm11 = vcmp.lt.f32.partialorder %v8183_v12, 1e-08  ;;  %v6326_v37 = vsel %vm1786_vm0, %v14593_v57, 0.0 }
 0x575   : > { %v7824_v53 = vpop.eup %7823  ;;  %v4967_v43 = vmul.f32 0.6931472, %v7822_v0  ;;  %v6338_v8 = vsel %vm1786_vm0, %v14594_v38, 0.0  ;;  %v5080_v45 = vadd.f32 %v4965_v62, %v4568_v40  ;;  %v5624_v25 = vadd.f32 %v5560_v31, %v5464_v4  ;;  %6327 = vadd.xlane.f32.xlu2 %v6326_v37  ;;  %v3049_v62 = vpop.xlane.xlu1 %3048  ;;  %v14601_v37 = vld [vmem:[#allocation34_spill] sm:$0xff] }
 0x576   : > { %v7826_v17 = vpop.eup %7825  ;;  %v4969_v29 = vmul.f32 0.6931472, %v7824_v53  ;;  %v5625_v16 = vadd.f32 %v5561_v13, %v5465_v27  ;;  %6339 = vadd.xlane.f32.xlu1 %v6338_v8  ;;  %vm5690_vm12 = vcmp.lt.f32.partialorder %v8184_v10, 1e-08  ;;  %vm5816_vm13 = vcmp.gt.f32.partialorder %v8182_v51, 1e-08 }
 0x577   : > { %v4971_v36 = vmul.f32 0.6931472, %v7826_v17  ;;  %v5081_v28 = vadd.f32 %v4967_v43, %v4569_v49  ;;  %v5144_v3 = vsub.f32 %v5080_v45, %v14582_v50  ;;  %vm5691_vm14 = vcmp.lt.f32.partialorder %v11574_v18, 1e-08  ;;  %v14598_v51 = vld [vmem:[#allocation178_spill] sm:$0xff]  ;;  %v14602_v17 = vld [vmem:[#allocation211_spill] sm:$0xff] }
 0x578   : > { %v5082_v46 = vadd.f32 %v4969_v29, %v4570_v52  ;;  %vm5817_vm15 = vcmp.gt.f32.partialorder %v8183_v12, 1e-08  ;;  %v5626_v22 = vadd.f32 %v5562_v9, %v5466_v56  ;;  %v5627_v0 = vadd.f32 %v5563_v23, %v5467_v6  ;;  %v14603_v29 = vld [vmem:[#allocation95_spill] sm:$0xff] }
 0x579   : > { %v5083_v57 = vadd.f32 %v4971_v36, %v4571_v33  ;;  %v5145_v42 = vsub.f32 %v5081_v28, %v14584_v39  ;;  %v5752_v31 = vsel %vm5688_vm10, %v5144_v3, 0.0  ;;  %vm5818_vm1 = vcmp.gt.f32.partialorder %v8184_v10, 1e-08  ;;  %v14604_v45 = vld [vmem:[#allocation19_spill] sm:$0xff]  ;;  %v14605_v28 = vld [vmem:[#allocation224_spill] sm:$0xff]  ;;  %v14607_v3 = vld [vmem:[#allocation109_spill] sm:$0xff] }
 0x57a   : > { %v5146_v40 = vsub.f32 %v5082_v46, %v14589_v24  ;;  %v5880_v49 = vsel %vm5816_vm13, %v5624_v25, 0.0  ;;  %v5881_v50 = vsel %vm5817_vm15, %v5625_v16, 0.0  ;;  %vm5819_vm2 = vcmp.gt.f32.partialorder %v11574_v18, 1e-08  ;;  %v14606_v46 = vld [vmem:[#allocation229_spill] sm:$0xff] }
 0x57b   : > { %v5147_v13 = vsub.f32 %v5083_v57, %v14591_v7  ;;  %v5753_v4 = vsel %vm5689_vm11, %v5145_v42, 0.0  ;;  %v5944_v27 = vadd.f32 %v5880_v49, %v5752_v31  ;;  %v11595_v23 = vmul.f32 0.6931472, %v11553_v58  ;;  %v14600_v58 = vld [vmem:[#allocation181_spill] sm:$0xff]  ;;  %v14608_v42 = vld [vmem:[#allocation20_spill] sm:$0xff]  ;;  %v14609_v31 = vld [vmem:[#allocation226_spill] sm:$0xff] }
 0x57c   : > { %v5754_v39 = vsel %vm5690_vm12, %v5146_v40, 0.0  ;;  %v5945_v6 = vadd.f32 %v5881_v50, %v5753_v4  ;;  %v11597_v9 = vmul.f32 1e-08, %v3049_v62  ;;  %v5882_v7 = vsel %vm5818_vm1, %v5626_v22, 0.0  ;;  %v14611_v4 = vld [vmem:[#allocation218_spill] sm:$0xff] }
 0x57d   : > { %14595 = vst [vmem:[#allocation241_spill] sm:$0xff] %v11595_v23  ;;  %v5755_v24 = vsel %vm5691_vm14, %v5147_v13, 0.0  ;;  %v11603_v16 = vsub.f32 %v11555_v1, %v11534_v44  ;;  %v3430_v12 = vmul.f32 %v14598_v51, %v3049_v62  ;;  %v5946_v10 = vadd.f32 %v5882_v7, %v5754_v39 }
 0x57e   : > { %14596 = vst [vmem:[#allocation14_spill] sm:$0xff] %v11597_v9  ;;  %v6011_v33 = vadd.f32 %v5945_v6, %v5944_v27  ;;  %v11608_v56 = vsub.f32 %v11557_v59, %v11534_v44  ;;  %7827 = vlog2.f32 %v3049_v62  ;;  %v3431_v53 = vmul.f32 %v14600_v58, %v3049_v62  ;;  %v14612_v27 = vld [vmem:[#allocation233_spill] sm:$0xff]  ;;  %v14613_v6 = vld [vmem:[#allocation227_spill] sm:$0xff] }
 0x57f   : > { %14597 = vst [vmem:[#allocation50_spill] sm:$0xff] %v11603_v16  ;;  %v5883_v43 = vsel %vm5819_vm2, %v5627_v0, 0.0  ;;  %v3432_v18 = vmul.f32 %v14601_v37, %v3049_v62  ;;  %v3147_v1 = vadd.f32 %v14603_v29, %v14602_v17  ;;  %v3164_v25 = vadd.f32 %v14604_v45, %v11597_v9  ;;  %v14617_v17 = vld [vmem:[#allocation32_spill] sm:$0xff] }
 0x580   : > { %14599 = vst [vmem:[#allocation7_spill] sm:$0xff] %v11608_v56  ;;  %v5947_v38 = vadd.f32 %v5883_v43, %v5755_v24  ;;  %v6012_v8 = vadd.f32 %v6011_v33, %v5946_v10  ;;  %v3433_v36 = vmul.f32 %v10713_v35, %v3049_v62  ;;  %v11619_v59 = vsub.f32 %v14606_v46, %v14605_v28  ;;  %v14616_v33 = vld [vmem:[#allocation27_spill] sm:$0xff] }
 0x581   : > { %v11623_v57 = vsub.f32 %v14607_v3, %v14605_v28  ;;  %v3165_v22 = vadd.f32 %v14608_v42, %v11597_v9  ;;  %v3494_v0 = vadd.f32 %v14604_v45, %v3430_v12  ;;  %v14610_v49 = vsub.f32 %v10738_v55, %v14609_v31  ;;  %v14615_v12 = vld [vmem:[#allocation111_spill] sm:$0xff]  ;;  %v14619_v45 = vld [vmem:[#allocation222_spill] sm:$0xff]  ;;  %v14620_v3 = vld [vmem:[#allocation5_spill] sm:$0xff] }
 0x582   : > { %v6013_v40 = vadd.f32 %v6012_v8, %v5947_v38  ;;  %v3495_v62 = vadd.f32 %v14608_v42, %v3431_v53  ;;  %7829 = vlog2.f32 %v14611_v4  ;;  %v4381_v50 = vsub.f32 %v11212_v15, %v11619_v59  ;;  %v14623_v4 = vld [vmem:[#allocation107_spill] sm:$0xff] }
 0x583   : > { %v4452_v13 = vmul.f32 %v11229_v34, %v14610_v49  ;;  %v4382_v39 = vsub.f32 %v14612_v27, %v11623_v57  ;;  %7831 = vlog2.f32 %v3147_v1  ;;  %v14614_v24 = vsub.f32 %v10744_v63, %v14613_v6  ;;  %v14622_v49 = vld [vmem:[#allocation4_spill] sm:$0xff] }
 0x584   : > { %6014 = vadd.xlane.f32.xlu0 %v6013_v40  ;;  %v6335_v53 = vsel %vm1786_vm0, %v14616_v33, 0.0  ;;  %v7828_v43 = vpop.eup %7827  ;;  %7833 = vlog2.f32 %v3164_v25  ;;  %v4454_v38 = vmul.f32 %v11235_v5, %v4381_v50  ;;  %v6347_v29 = vsel %vm1786_vm0, %v14617_v17, 0.0  ;;  %v14621_v40 = vld [vmem:[#allocation228_spill] sm:$0xff] }
 0x585   : > { %v4453_v7 = vmul.f32 %v11233_v61, %v14614_v24  ;;  %v11643_v10 = vadd.f32 %v4452_v13, %v14615_v12  ;;  %v4455_v8 = vmul.f32 %v11237_v54, %v4382_v39  ;;  %6336 = vadd.xlane.f32.xlu2 %v6335_v53  ;;  %v11652_v1 = vmul.f32 0.6931472, %v11562_v21  ;;  %6348 = vadd.xlane.f32.xlu1 %v6347_v29  ;;  %v14624_v12 = vld [vmem:[#allocation26_spill] sm:$0xff] }
 0x586   : > { %7835 = vlog2.f32 %v3165_v22  ;;  %v3233_v46 = vmul.f32 0.6931472, %v14619_v45  ;;  %v3235_v25 = vmul.f32 0.6931472, %v14621_v40  ;;  %v11660_v13 = vadd.f32 %v4454_v38, %v14622_v49  ;;  %v14626_v38 = vld [vmem:[#allocation136_spill] sm:$0xff] }
 0x587   : > { %14618 = vst [vmem:[#allocation108_spill] sm:$0xff] %v11652_v1  ;;  %v11656_v42 = vadd.f32 %v4453_v7, %v14620_v3  ;;  %v11663_v50 = vadd.f32 %v4455_v8, %v14623_v4  ;;  %v4644_v39 = vand.u32 2147483647, %v11643_v10  ;;  %7837 = vlog2.f32 %v3494_v0  ;;  %v11752_v1 = vld [vmem:[%s8359_s16 + $0xd8] sm:$0xff] }
 0x588   : > { %v7830_v7 = vpop.eup %7829  ;;  %v11673_v33 = vadd.f32 %v14624_v12, %v11597_v9  ;;  %v3496_v53 = vadd.f32 %v14624_v12, %v3432_v18  ;;  %v3497_v8 = vadd.f32 %v14626_v38, %v3433_v36  ;;  %7839 = vlog2.f32 %v3495_v62 }
 0x589   : > { %v4645_v24 = vand.u32 2147483647, %v11656_v42  ;;  %v7832_v17 = vpop.eup %7831  ;;  %v3237_v29 = vmul.f32 0.6931472, %v7830_v7  ;;  %v3336_v45 = vsub.f32 %v3233_v46, %v14605_v28  ;;  %v4646_v3 = vand.u32 2147483647, %v11660_v13 }
 0x58a   : > { %14625 = vst [vmem:[#allocation12_spill] sm:$0xff] %v11673_v33  ;;  %v4647_v0 = vand.u32 2147483647, %v11663_v50  ;;  %v11680_v40 = vpop.eup %7833  ;;  %v3239_v49 = vmul.f32 0.6931472, %v7832_v17  ;;  %v3337_v4 = vsub.f32 %v3235_v25, %v14605_v28  ;;  %v4708_v22 = vsub.f32 0.0, %v4644_v39  ;;  %v11691_v25 = vpop.xlane.xlu2 %3053 }
 0x58b   : > { %14627 = vst [vmem:[#allocation22_spill] sm:$0xff] %v11680_v40  ;;  %v4709_v21 = vsub.f32 0.0, %v4645_v24  ;;  %v3338_v18 = vsub.f32 %v3237_v29, %v14605_v28  ;;  %v4710_v36 = vsub.f32 0.0, %v4646_v3  ;;  %v14629_v7 = vld [vmem:[#allocation31_spill] sm:$0xff]  ;;  %7841 = vlog2.f32 %v3496_v53 }
 0x58c   : > { %v11683_v52 = vpop.eup %7835  ;;  %v4711_v62 = vsub.f32 0.0, %v4647_v0  ;;  %v6344_v46 = vsel %vm1786_vm0, %v14629_v7, 0.0  ;;  %v3339_v12 = vsub.f32 %v3239_v49, %v14605_v28  ;;  %v4796_v33 = vmul.f32 1.442695, %v4708_v22  ;;  %14630 = vst [vmem:[#allocation106_spill] sm:$0xff] %v11691_v25  ;;  %v14631_v28 = vld [vmem:[#allocation131_spill] sm:$0xff] }
 0x58d   : > { %14628 = vst [vmem:[#allocation105_spill] sm:$0xff] %v11683_v52  ;;  %v4798_v38 = vmul.f32 1.442695, %v4709_v21  ;;  %6345 = vadd.xlane.f32.xlu2 %v6344_v46  ;;  %v11689_v17 = vpop.eup %7837  ;;  %7843 = vlog2.f32 %v3497_v8  ;;  %v4800_v39 = vmul.f32 1.442695, %v4710_v36  ;;  %v5348_v29 = vsub.f32 %v3336_v45, %v14609_v31  ;;  %v14634_v49 = vld [vmem:[#allocation132_spill] sm:$0xff] }
 0x58e   : > { %v4802_v24 = vmul.f32 1.442695, %v4711_v62  ;;  %v11694_v3 = vpop.eup %7839  ;;  %7845 = vpow2.f32 %v4796_v33  ;;  %v14632_v22 = vsub.f32 0.0, %v14631_v28  ;;  %v5349_v53 = vsub.f32 %v3337_v4, %v14613_v6  ;;  %v14636_v36 = vld [vmem:[#allocation128_spill] sm:$0xff]  ;;  %v5528_v7 = vld [vmem:[%s11344_s18 + $0x60] sm:$0xff] }
 0x58f   : > { %v5350_v8 = vsub.f32 %v3338_v18, %v11619_v59  ;;  %v11701_v0 = vmul.f32 0.6931472, %v7828_v43  ;;  %7847 = vpow2.f32 %v4798_v38  ;;  %v14635_v31 = vsub.f32 0.0, %v14634_v49  ;;  %v11715_v59 = vld [vmem:[%s8359_s16 + $0xc0] sm:$0xff]  ;;  %v11719_v38 = vld [vmem:[%s11344_s18 + $0x68] sm:$0xff] }
 0x590   : > { %v5284_v21 = vadd.f32 %v14632_v22, %v11643_v10  ;;  %v14637_v33 = vsub.f32 0.0, %v14636_v36  ;;  %v11711_v46 = vmul.f32 1e-08, %v11691_v25  ;;  %7849 = vpow2.f32 %v4800_v39  ;;  %v11726_v18 = vld [vmem:[%s8359_s16 + $0xc8] sm:$0xff] }
 0x591   : > { %14633 = vst [vmem:[#allocation18_spill] sm:$0xff] %v11701_v0  ;;  %v5285_v45 = vadd.f32 %v14635_v31, %v11656_v42  ;;  %v5351_v6 = vsub.f32 %v3339_v12, %v11623_v57  ;;  %v5412_v43 = vmul.f32 %v11715_v59, %v5348_v29  ;;  %v11723_v4 = vmul.f32 %v14598_v51, %v11691_v25  ;;  %v11730_v31 = vld [vmem:[%s8359_s16 + $0xd0] sm:$0xff]  ;;  %v11733_v12 = vpop.eup %7841  ;;  %v14639_v29 = vld [vmem:[#allocation15_spill] sm:$0xff] }
 0x592   : > { %v5286_v62 = vadd.f32 %v14637_v33, %v11660_v13  ;;  %14638 = vst [vmem:[#allocation28_spill] sm:$0xff] %v11711_v46  ;;  %7851 = vpow2.f32 %v4802_v24  ;;  %v5413_v22 = vmul.f32 %v11726_v18, %v5349_v53  ;;  %v5414_v57 = vmul.f32 %v11730_v31, %v5350_v8 }
 0x593   : > { %v11737_v39 = vmul.f32 %v14600_v58, %v11691_v25  ;;  %v14640_v33 = vsub.f32 0.0, %v14639_v29  ;;  %v5476_v24 = vadd.f32 %v5412_v43, %v5284_v21  ;;  %v5572_v40 = vunpack.c.l.bf16 %v5528_v7  ;;  %v11742_v9 = vpop.eup %7843 }
 0x594   : > { %14641 = vst [vmem:[#allocation211_spill] sm:$0xff] %v11742_v9  ;;  %v5477_v53 = vadd.f32 %v5413_v22, %v5285_v45  ;;  %v5478_v47 = vadd.f32 %v5414_v57, %v5286_v62  ;;  %v5573_v32 = vunpack.c.h.bf16 %v5528_v7  ;;  %v5574_v30 = vunpack.c.l.bf16 %v11719_v38  ;;  %v7846_v8 = vpop.eup %7845  ;;  %v14643_v45 = vld [vmem:[#allocation45_spill] sm:$0xff]  ;;  %v14644_v62 = vld [vmem:[#allocation46_spill] sm:$0xff] }
 0x595   : > { %v5287_v52 = vadd.f32 %v14640_v33, %v11663_v50  ;;  %7853 = vlog2.f32 %v11691_v25  ;;  %v11748_v56 = vadd.f32 %v14642_v20, %v11711_v46  ;;  %v4580_v16 = vmax.f32 %v11643_v10, 0.0  ;;  %v7848_v43 = vpop.eup %7847 }
 0x596   : > { %v5415_v21 = vmul.f32 %v11752_v1, %v5351_v6  ;;  %v4900_v22 = vadd.f32 1.0, %v7846_v8  ;;  %v7850_v57 = vpop.eup %7849  ;;  %v4901_v33 = vadd.f32 1.0, %v7848_v43  ;;  %v5575_v44 = vunpack.c.h.bf16 %v11719_v38  ;;  %v14645_v8 = vld [vmem:[#allocation200_spill] sm:$0xff] }
 0x597   : > { %v5636_v26 = vadd.f32 %v5572_v40, %v5476_v24  ;;  %v4902_v10 = vadd.f32 1.0, %v7850_v57  ;;  %v5637_v2 = vadd.f32 %v5573_v32, %v5477_v53  ;;  %v5638_v58 = vadd.f32 %v5574_v30, %v5478_v47  ;;  %v14647_v40 = vld [vmem:[#allocation204_spill] sm:$0xff]  ;;  %v14648_v32 = vld [vmem:[#allocation61_spill] sm:$0xff]  ;;  %v14651_v24 = vld [vmem:[#allocation202_spill] sm:$0xff] }
 0x598   : > { %v5479_v23 = vadd.f32 %v5415_v21, %v5287_v52  ;;  %v7852_v14 = vpop.eup %7851  ;;  %7855 = vlog2.f32 %v4900_v22  ;;  %vm5828_vm3 = vcmp.gt.f32.partialorder %v11715_v59, 1e-08  ;;  %v3127_v51 = vadd.f32 %v14644_v62, %v14643_v45  ;;  %v14646_v52 = vld [vmem:[#allocation203_spill] sm:$0xff]  ;;  %v14654_v57 = vld [vmem:[#allocation58_spill] sm:$0xff] }
 0x599   : > { %v4903_v6 = vadd.f32 1.0, %v7852_v14  ;;  %7857 = vlog2.f32 %v4901_v33  ;;  %vm5700_vm4 = vcmp.lt.f32.partialorder %v11715_v59, 1e-08  ;;  %v11765_v21 = vsub.f32 %v14646_v52, %v14645_v8  ;;  %v14653_v45 = vld [vmem:[#allocation195_spill] sm:$0xff]  ;;  %v14656_v52 = vld [vmem:[#allocation60_spill] sm:$0xff] }
 0x59a   : > { %7859 = vlog2.f32 %v4902_v10  ;;  %v11769_v38 = vsub.f32 %v14647_v40, %v14645_v8  ;;  %v14649_v47 = vsub.f32 %v10738_v55, %v14648_v32  ;;  %vm5701_vm5 = vcmp.lt.f32.partialorder %v11726_v18, 1e-08  ;;  %v14655_v10 = vld [vmem:[#allocation44_spill] sm:$0xff] }
 0x59b   : > { %v11775_v30 = vpop.eup %7853  ;;  %7861 = vlog2.f32 %v4903_v6  ;;  %vm5829_vm6 = vcmp.gt.f32.partialorder %v11726_v18, 1e-08  ;;  %vm5830_vm7 = vcmp.gt.f32.partialorder %v11730_v31, 1e-08  ;;  %v14652_v53 = vsub.f32 %v10744_v63, %v14651_v24 }
 0x59c   : > { %v4432_v14 = vmul.f32 %v11229_v34, %v14649_v47  ;;  %14650 = vst [vmem:[#allocation95_spill] sm:$0xff] %v11775_v30  ;;  %vm5702_vm8 = vcmp.lt.f32.partialorder %v11730_v31, 1e-08  ;;  %7863 = vlog2.f32 %v14653_v45  ;;  %v4361_v62 = vsub.f32 %v11212_v15, %v11765_v21  ;;  %v14657_v47 = vld [vmem:[#allocation33_spill] sm:$0xff] }
 0x59d   : > { %v4433_v43 = vmul.f32 %v11233_v61, %v14652_v53  ;;  %v4362_v22 = vsub.f32 %v14612_v27, %v11769_v38  ;;  %vm5703_vm9 = vcmp.lt.f32.partialorder %v11752_v1, 1e-08  ;;  %v11795_v6 = vmul.f32 0.6931472, %v14655_v10 }
 0x59e   : > { %v11791_v33 = vadd.f32 %v4432_v14, %v14654_v57  ;;  %7865 = vlog2.f32 %v3127_v51  ;;  %v6353_v53 = vsel %vm1786_vm0, %v14657_v47, 0.0  ;;  %v7856_v45 = vpop.eup %7855  ;;  %v5639_v7 = vadd.f32 %v5575_v44, %v5479_v23  ;;  %v14659_v47 = vld [vmem:[#allocation56_spill] sm:$0xff] }
 0x59f   : > { %v11798_v40 = vadd.f32 %v4433_v43, %v14656_v52  ;;  %v4434_v30 = vmul.f32 %v11235_v5, %v4361_v62  ;;  %v4435_v9 = vmul.f32 %v11237_v54, %v4362_v22  ;;  %6354 = vadd.xlane.f32.xlu2 %v6353_v53  ;;  %v7858_v57 = vpop.eup %7857  ;;  %v4989_v19 = vmul.f32 0.6931472, %v7856_v45  ;;  %v14658_v22 = vld [vmem:[#allocation55_spill] sm:$0xff] }
 0x5a0   : > { %v4624_v14 = vand.u32 2147483647, %v11791_v33  ;;  %vm5831_vm10 = vcmp.gt.f32.partialorder %v11752_v1, 1e-08  ;;  %v5892_v51 = vsel %vm5828_vm3, %v5636_v26, 0.0  ;;  %v5893_v43 = vsel %vm5829_vm6, %v5637_v2, 0.0  ;;  %v7860_v44 = vpop.eup %7859 }
 0x5a1   : > { %v4625_v10 = vand.u32 2147483647, %v11798_v40  ;;  %v4991_v23 = vmul.f32 0.6931472, %v7858_v57  ;;  %v5894_v62 = vsel %vm5830_vm7, %v5638_v58, 0.0  ;;  %v11814_v52 = vadd.f32 %v4434_v30, %v14658_v22  ;;  %v7862_v45 = vpop.eup %7861  ;;  %v14660_v26 = vld [vmem:[#allocation47_spill] sm:$0xff] }
 0x5a2   : > { %v11817_v53 = vadd.f32 %v4435_v9, %v14659_v47  ;;  %v4993_v60 = vmul.f32 0.6931472, %v7860_v44  ;;  %v5092_v41 = vadd.f32 %v4989_v19, %v4580_v16  ;;  %v3195_v48 = vmul.f32 0.6931472, %v14660_v26  ;;  %v7864_v11 = vpop.eup %7863 }
 0x5a3   : > { %v3316_v2 = vsub.f32 %v11795_v6, %v14645_v8  ;;  %v4995_v35 = vmul.f32 0.6931472, %v7862_v45  ;;  %v14661_v57 = vmax.f32 %v11656_v42, 0.0  ;;  %v4688_v58 = vsub.f32 0.0, %v4624_v14 }
 0x5a4   : > { %v4689_v25 = vsub.f32 0.0, %v4625_v10  ;;  %v7866_v30 = vpop.eup %7865  ;;  %v14662_v22 = vmax.f32 %v11660_v13, 0.0  ;;  %v5156_v47 = vsub.f32 %v5092_v41, %v14631_v28  ;;  %v3197_v44 = vmul.f32 0.6931472, %v7864_v11 }
 0x5a5   : > { %v5093_v37 = vadd.f32 %v4991_v23, %v14661_v57  ;;  %v4626_v19 = vand.u32 2147483647, %v11814_v52  ;;  %v14663_v16 = vmax.f32 %v11663_v50, 0.0  ;;  %v3199_v45 = vmul.f32 0.6931472, %v7866_v30  ;;  %v14664_v30 = vld [vmem:[#allocation138_spill] sm:$0xff] }
 0x5a6   : > { %v5094_v9 = vadd.f32 %v4993_v60, %v14662_v22  ;;  %v4627_v42 = vand.u32 2147483647, %v11817_v53  ;;  %v5764_v10 = vsel %vm5700_vm4, %v5156_v47, 0.0  ;;  %v3317_v60 = vsub.f32 %v3195_v48, %v14645_v8 }
 0x5a7   : > { %v5095_v26 = vadd.f32 %v4995_v35, %v14663_v16  ;;  %v5157_v6 = vsub.f32 %v5093_v37, %v14634_v49  ;;  %v4690_v13 = vsub.f32 0.0, %v4626_v19  ;;  %v5956_v50 = vadd.f32 %v5892_v51, %v5764_v10 }
 0x5a8   : > { %v5158_v14 = vsub.f32 %v5094_v9, %v14636_v36  ;;  %v3318_v35 = vsub.f32 %v3197_v44, %v14645_v8  ;;  %v4691_v49 = vsub.f32 0.0, %v4627_v42  ;;  %v4756_v36 = vmul.f32 1.442695, %v4688_v58 }
 0x5a9   : > { %v5159_v11 = vsub.f32 %v5095_v26, %v14639_v29  ;;  %v5765_v41 = vsel %vm5701_vm5, %v5157_v6, 0.0  ;;  %v3319_v48 = vsub.f32 %v3199_v45, %v14645_v8  ;;  %v4758_v23 = vmul.f32 1.442695, %v4689_v25  ;;  %v5519_v26 = vld [vmem:[%s11344_s18 + $0x18] sm:$0xff] }
 0x5aa   : > { %v5766_v37 = vsel %vm5702_vm8, %v5158_v14, 0.0  ;;  %v5957_v28 = vadd.f32 %v5893_v43, %v5765_v41  ;;  %v4760_v57 = vmul.f32 1.442695, %v4690_v13  ;;  %7867 = vpow2.f32 %v4756_v36  ;;  %v11878_v14 = vld [vmem:[%s8359_s16 + $0x20] sm:$0xff]  ;;  %v11890_v36 = vld [vmem:[%s8359_s16 + $0x38] sm:$0xff] }
 0x5ab   : > { %v5767_v59 = vsel %vm5703_vm9, %v5159_v11, 0.0  ;;  %v5958_v29 = vadd.f32 %v5894_v62, %v5766_v37  ;;  %v4762_v51 = vmul.f32 1.442695, %v4691_v49  ;;  %v3169_v22 = vadd.f32 %v14664_v30, %v11711_v46  ;;  %v11882_v11 = vld [vmem:[%s8359_s16 + $0x28] sm:$0xff] }
 0x5ac   : > { %v6026_v18 = vadd.f32 %v5957_v28, %v5956_v50  ;;  %v3498_v31 = vadd.f32 %v14642_v20, %v11723_v4  ;;  %v5895_v43 = vsel %vm5831_vm10, %v5639_v7, 0.0  ;;  %7869 = vpow2.f32 %v4758_v23  ;;  %v5518_v20 = vld [vmem:[%s11344_s18 + $0x10] sm:$0xff]  ;;  %v14665_v4 = vld [vmem:[#allocation87_spill] sm:$0xff] }
 0x5ad   : > { %v5959_v58 = vadd.f32 %v5895_v43, %v5767_v59  ;;  %7871 = vpow2.f32 %v4760_v57  ;;  %v5328_v25 = vsub.f32 %v3316_v2, %v14648_v32  ;;  %v11853_v8 = vmul.f32 0.6931472, %v11689_v17  ;;  %v11886_v50 = vld [vmem:[%s8359_s16 + $0x30] sm:$0xff] }
 0x5ae   : > { %v6027_v9 = vadd.f32 %v6026_v18, %v5958_v29  ;;  %7873 = vpow2.f32 %v4762_v51  ;;  %v5329_v62 = vsub.f32 %v3317_v60, %v14651_v24  ;;  %v5330_v47 = vsub.f32 %v3318_v35, %v11765_v21  ;;  %v14667_v24 = vld [vmem:[#allocation89_spill] sm:$0xff] }
 0x5af   : > { %7875 = vlog2.f32 %v11748_v56  ;;  %v14666_v7 = vsub.f32 0.0, %v14665_v4  ;;  %v5331_v32 = vsub.f32 %v3319_v48, %v11769_v38  ;;  %v11865_v17 = vadd.f32 %v14664_v30, %v11737_v39  ;;  %v14669_v56 = vld [vmem:[#allocation83_spill] sm:$0xff]  ;;  %v14671_v38 = vld [vmem:[#allocation85_spill] sm:$0xff] }
 0x5b0   : > { %v6028_v1 = vadd.f32 %v6027_v9, %v5959_v58  ;;  %7877 = vlog2.f32 %v3169_v22  ;;  %v14668_v21 = vsub.f32 0.0, %v14667_v24  ;;  %v14670_v19 = vsub.f32 0.0, %v14669_v56  ;;  %v7868_v6 = vpop.eup %7867 }
 0x5b1   : > { %v5264_v44 = vadd.f32 %v14666_v7, %v11791_v33  ;;  %7879 = vlog2.f32 %v3498_v31  ;;  %v14672_v45 = vsub.f32 0.0, %v14671_v38  ;;  %v5392_v39 = vmul.f32 %v11878_v14, %v5328_v25  ;;  %v14675_v7 = vld [vmem:[#allocation201_spill] sm:$0xff] }
 0x5b2   : > { %v5265_v2 = vadd.f32 %v14668_v21, %v11798_v40  ;;  %v5266_v16 = vadd.f32 %v14670_v19, %v11814_v52  ;;  %6029 = vadd.xlane.f32.xlu0 %v6028_v1  ;;  %v5552_v10 = vunpack.c.l.bf16 %v5518_v20  ;;  %v7870_v60 = vpop.eup %7869  ;;  %v4880_v13 = vadd.f32 1.0, %v7868_v6  ;;  %v14678_v21 = vld [vmem:[#allocation91_spill] sm:$0xff]  ;;  %v14680_v19 = vld [vmem:[#allocation217_spill] sm:$0xff] }
 0x5b3   : > { %v5267_v42 = vadd.f32 %v14672_v45, %v11817_v53  ;;  %v5393_v41 = vmul.f32 %v11882_v11, %v5329_v62  ;;  %v5394_v35 = vmul.f32 %v11886_v50, %v5330_v47  ;;  %v5553_v37 = vunpack.c.h.bf16 %v5518_v20  ;;  %v7872_v28 = vpop.eup %7871 }
 0x5b4   : > { %v4881_v49 = vadd.f32 1.0, %v7870_v60  ;;  %v5395_v59 = vmul.f32 %v11890_v36, %v5331_v32  ;;  %v5456_v48 = vadd.f32 %v5392_v39, %v5264_v44  ;;  %v5554_v23 = vunpack.c.l.bf16 %v5519_v26  ;;  %v7874_v57 = vpop.eup %7873  ;;  %v14676_v44 = vld [vmem:[#allocation72_spill] sm:$0xff] }
 0x5b5   : > { %v4882_v29 = vadd.f32 1.0, %v7872_v28  ;;  %7881 = vlog2.f32 %v4880_v13  ;;  %v5457_v18 = vadd.f32 %v5393_v41, %v5265_v2  ;;  %v5458_v51 = vadd.f32 %v5394_v35, %v5266_v16  ;;  %v11893_v30 = vpop.eup %7875  ;;  %v14677_v32 = vld [vmem:[#allocation208_spill] sm:$0xff]  ;;  %v14683_v28 = vld [vmem:[#allocation214_spill] sm:$0xff] }
 0x5b6   : > { %14673 = vst [vmem:[#allocation19_spill] sm:$0xff] %v11893_v30  ;;  %v4560_v22 = vmax.f32 %v11791_v33, 0.0  ;;  %v4561_v31 = vmax.f32 %v11798_v40, 0.0  ;;  %v4883_v43 = vadd.f32 1.0, %v7874_v57  ;;  %7883 = vlog2.f32 %v4881_v49  ;;  %v11897_v58 = vpop.eup %7877  ;;  %v14679_v2 = vld [vmem:[#allocation216_spill] sm:$0xff] }
 0x5b7   : > { %14674 = vst [vmem:[#allocation224_spill] sm:$0xff] %v11897_v58  ;;  %v4562_v9 = vmax.f32 %v11814_v52, 0.0  ;;  %7885 = vlog2.f32 %v4882_v29  ;;  %v5459_v25 = vadd.f32 %v5395_v59, %v5267_v42  ;;  %v5555_v62 = vunpack.c.h.bf16 %v5519_v26  ;;  %v11900_v47 = vpop.eup %7879  ;;  %v14681_v26 = vld [vmem:[#allocation213_spill] sm:$0xff] }
 0x5b8   : > { %v4563_v20 = vmax.f32 %v11817_v53, 0.0  ;;  %7887 = vlog2.f32 %v4883_v43  ;;  %vm5680_vm11 = vcmp.lt.f32.partialorder %v11878_v14, 1e-08  ;;  %vm5681_vm12 = vcmp.lt.f32.partialorder %v11882_v11, 1e-08 }
 0x5b9   : > { %v5616_v33 = vadd.f32 %v5552_v10, %v5456_v48  ;;  %v5617_v40 = vadd.f32 %v5553_v37, %v5457_v18  ;;  %v5618_v1 = vadd.f32 %v5554_v23, %v5458_v51  ;;  %vm5682_vm13 = vcmp.lt.f32.partialorder %v11886_v50, 1e-08  ;;  %v14685_v48 = vld [vmem:[#allocation90_spill] sm:$0xff] }
 0x5ba   : > { %v3139_v52 = vadd.f32 %v14676_v44, %v14675_v7  ;;  %vm5683_vm14 = vcmp.lt.f32.partialorder %v11890_v36, 1e-08  ;;  %7889 = vlog2.f32 %v14677_v32  ;;  %v11912_v53 = vsub.f32 %v14679_v2, %v14678_v21 }
 0x5bb   : > { %v11916_v16 = vsub.f32 %v14680_v19, %v14678_v21  ;;  %v14682_v6 = vsub.f32 %v10738_v55, %v14681_v26  ;;  %v7882_v42 = vpop.eup %7881  ;;  %v5619_v39 = vadd.f32 %v5555_v62, %v5459_v25  ;;  %vm5808_vm15 = vcmp.gt.f32.partialorder %v11878_v14, 1e-08 }
 0x5bc   : > { %vm5809_vm1 = vcmp.gt.f32.partialorder %v11882_v11, 1e-08  ;;  %7891 = vlog2.f32 %v3139_v52  ;;  %v7884_v10 = vpop.eup %7883  ;;  %v4949_v60 = vmul.f32 0.6931472, %v7882_v42  ;;  %vm5810_vm2 = vcmp.gt.f32.partialorder %v11886_v50, 1e-08 }
 0x5bd   : > { %v4444_v45 = vmul.f32 %v11229_v34, %v14682_v6  ;;  %v4373_v13 = vsub.f32 %v11212_v15, %v11912_v53  ;;  %v4374_v41 = vsub.f32 %v14612_v27, %v11916_v16  ;;  %v7886_v35 = vpop.eup %7885  ;;  %v4951_v37 = vmul.f32 0.6931472, %v7884_v10 }
 0x5be   : > { %vm5811_vm3 = vcmp.gt.f32.partialorder %v11890_v36, 1e-08  ;;  %v14684_v49 = vsub.f32 %v10744_v63, %v14683_v28  ;;  %v7888_v57 = vpop.eup %7887  ;;  %v4953_v29 = vmul.f32 0.6931472, %v7886_v35  ;;  %v5072_v18 = vadd.f32 %v4949_v60, %v4560_v22  ;;  %v14686_v22 = vld [vmem:[#allocation63_spill] sm:$0xff] }
 0x5bf   : > { %v11935_v23 = vadd.f32 %v4444_v45, %v14685_v48  ;;  %v4446_v51 = vmul.f32 %v11235_v5, %v4373_v13  ;;  %v4447_v43 = vmul.f32 %v11237_v54, %v4374_v41  ;;  %v4955_v25 = vmul.f32 0.6931472, %v7888_v57 }
 0x5c0   : > { %v4445_v59 = vmul.f32 %v11233_v61, %v14684_v49  ;;  %v5073_v62 = vadd.f32 %v4951_v37, %v4561_v31  ;;  %v5872_v7 = vsel %vm5808_vm15, %v5616_v33, 0.0  ;;  %v5873_v44 = vsel %vm5809_vm1, %v5617_v40, 0.0  ;;  %v7890_v52 = vpop.eup %7889  ;;  %v14687_v31 = vld [vmem:[#allocation92_spill] sm:$0xff]  ;;  %v14688_v33 = vld [vmem:[#allocation82_spill] sm:$0xff] }
 0x5c1   : > { %v5074_v32 = vadd.f32 %v4953_v29, %v4562_v9  ;;  %v5136_v2 = vsub.f32 %v5072_v18, %v14665_v4  ;;  %v5874_v19 = vsel %vm5810_vm2, %v5618_v1, 0.0  ;;  %v3217_v6 = vmul.f32 0.6931472, %v14686_v22  ;;  %v14689_v9 = vld [vmem:[#allocation86_spill] sm:$0xff]  ;;  %v14690_v37 = vld [vmem:[#allocation88_spill] sm:$0xff] }
 0x5c2   : > { %v7892_v45 = vpop.eup %7891  ;;  %v5075_v42 = vadd.f32 %v4955_v25, %v4563_v20  ;;  %v5137_v10 = vsub.f32 %v5073_v62, %v14667_v24  ;;  %v11949_v60 = vadd.f32 %v4445_v59, %v14687_v31  ;;  %v11952_v13 = vadd.f32 %v4446_v51, %v14688_v33 }
 0x5c3   : > { %v5138_v40 = vsub.f32 %v5074_v32, %v14669_v56  ;;  %v5744_v4 = vsel %vm5680_vm11, %v5136_v2, 0.0  ;;  %v11958_v41 = vadd.f32 %v4447_v43, %v14689_v9  ;;  %v4636_v1 = vand.u32 2147483647, %v11935_v23  ;;  %v14694_v9 = vld [vmem:[#allocation34_spill] sm:$0xff] }
 0x5c4   : > { %v5139_v20 = vsub.f32 %v5075_v42, %v14671_v38  ;;  %v5745_v24 = vsel %vm5681_vm12, %v5137_v10, 0.0  ;;  %v5936_v35 = vadd.f32 %v5872_v7, %v5744_v4  ;;  %v3219_v49 = vmul.f32 0.6931472, %v14690_v37  ;;  %v14693_v4 = vld [vmem:[#allocation106_spill] sm:$0xff] }
 0x5c5   : > { %v5746_v59 = vsel %vm5682_vm13, %v5138_v40, 0.0  ;;  %v5937_v56 = vadd.f32 %v5873_v44, %v5745_v24  ;;  %v3221_v48 = vmul.f32 0.6931472, %v7890_v52  ;;  %v3223_v14 = vmul.f32 0.6931472, %v7892_v45  ;;  %v5524_v37 = vld [vmem:[%s11344_s18 + $0x40] sm:$0xff] }
 0x5c6   : > { %v5747_v57 = vsel %vm5683_vm14, %v5139_v20, 0.0  ;;  %v3328_v29 = vsub.f32 %v3217_v6, %v14678_v21  ;;  %v4637_v18 = vand.u32 2147483647, %v11949_v60  ;;  %v4638_v38 = vand.u32 2147483647, %v11952_v13  ;;  %v14697_v20 = vld [vmem:[#allocation116_spill] sm:$0xff] }
 0x5c7   : > { %v5938_v11 = vadd.f32 %v5874_v19, %v5746_v59  ;;  %v6001_v51 = vadd.f32 %v5937_v56, %v5936_v35  ;;  %v4639_v43 = vand.u32 2147483647, %v11958_v41  ;;  %v4700_v25 = vsub.f32 0.0, %v4636_v1 }
 0x5c8   : > { %v5875_v50 = vsel %vm5811_vm3, %v5619_v39, 0.0  ;;  %v3329_v62 = vsub.f32 %v3219_v49, %v14678_v21  ;;  %v4701_v7 = vsub.f32 0.0, %v4637_v18  ;;  %v4702_v44 = vsub.f32 0.0, %v4638_v38  ;;  %v14699_v49 = vld [vmem:[#allocation36_spill] sm:$0xff]  ;;  %v14702_v18 = vld [vmem:[#allocation113_spill] sm:$0xff] }
 0x5c9   : > { %v5939_v52 = vadd.f32 %v5875_v50, %v5747_v57  ;;  %v6002_v32 = vadd.f32 %v6001_v51, %v5938_v11  ;;  %v4703_v2 = vsub.f32 0.0, %v4639_v43  ;;  %v4780_v22 = vmul.f32 1.442695, %v4700_v25  ;;  %v12021_v51 = vld [vmem:[%s8359_s16 + $0x88] sm:$0xff]  ;;  %v14719_v50 = vld [vmem:[#allocation21_spill] sm:$0xff] }
 0x5ca   : > { %v3330_v6 = vsub.f32 %v3221_v48, %v14678_v21  ;;  %v3331_v45 = vsub.f32 %v3223_v14, %v14678_v21  ;;  %v4782_v19 = vmul.f32 1.442695, %v4701_v7  ;;  %v4784_v42 = vmul.f32 1.442695, %v4702_v44  ;;  %v12010_v48 = vld [vmem:[%s8359_s16 + $0x80] sm:$0xff]  ;;  %v5525_v43 = vld [vmem:[%s11344_s18 + $0x48] sm:$0xff] }
 0x5cb   : > { %v6003_v10 = vadd.f32 %v6002_v32, %v5939_v52  ;;  %7893 = vpow2.f32 %v4780_v22  ;;  %v4786_v31 = vmul.f32 1.442695, %v4703_v2  ;;  %v5340_v36 = vsub.f32 %v3328_v29, %v14681_v26  ;;  %v12027_v2 = vld [vmem:[%s8359_s16 + $0x90] sm:$0xff] }
 0x5cc   : > { %v11980_v39 = vmul.f32 0.6931472, %v11694_v3  ;;  %v11983_v33 = vmul.f32 0.6931472, %v11733_v12  ;;  %7895 = vpow2.f32 %v4782_v19  ;;  %v5341_v40 = vsub.f32 %v3329_v62, %v14683_v28  ;;  %v14695_v3 = vld [vmem:[#allocation115_spill] sm:$0xff] }
 0x5cd   : > { %v11988_v21 = vsub.f32 %v11853_v8, %v11701_v0  ;;  %v11992_v1 = vmul.f32 %v14694_v9, %v14693_v4  ;;  %6004 = vadd.xlane.f32.xlu1 %v6003_v10  ;;  %7897 = vpow2.f32 %v4784_v42  ;;  %v14696_v26 = vsub.f32 0.0, %v14695_v3 }
 0x5ce   : > { %14691 = vst [vmem:[#allocation229_spill] sm:$0xff] %v11983_v33  ;;  %7899 = vpow2.f32 %v4786_v31  ;;  %v14698_v28 = vsub.f32 0.0, %v14697_v20  ;;  %v5342_v8 = vsub.f32 %v3330_v6, %v11912_v53  ;;  %v5343_v35 = vsub.f32 %v3331_v45, %v11916_v16  ;;  %v14700_v53 = vld [vmem:[#allocation110_spill] sm:$0xff]  ;;  %v12031_v6 = vld [vmem:[%s8359_s16 + $0x98] sm:$0xff] }
 0x5cf   : > { %14692 = vst [vmem:[#allocation109_spill] sm:$0xff] %v11988_v21  ;;  %v5276_v12 = vadd.f32 %v14696_v26, %v11935_v23  ;;  %v12005_v59 = vmul.f32 %v14699_v49, %v14693_v4  ;;  %7901 = vlog2.f32 %v11865_v17  ;;  %v4572_v56 = vmax.f32 %v11935_v23, 0.0 }
 0x5d0   : > { %v5277_v24 = vadd.f32 %v14698_v28, %v11949_v60  ;;  %v5404_v14 = vmul.f32 %v12010_v48, %v5340_v36  ;;  %v14701_v16 = vsub.f32 0.0, %v14700_v53  ;;  %v14703_v38 = vsub.f32 0.0, %v14702_v18 }
 0x5d1   : > { %v5405_v17 = vmul.f32 %v12021_v51, %v5341_v40  ;;  %v7894_v25 = vpop.eup %7893  ;;  %v5564_v7 = vunpack.c.l.bf16 %v5524_v37  ;;  %v5565_v44 = vunpack.c.h.bf16 %v5524_v37  ;;  %v5406_v22 = vmul.f32 %v12027_v2, %v5342_v8 }
 0x5d2   : > { %v5278_v29 = vadd.f32 %v14701_v16, %v11952_v13  ;;  %v5279_v11 = vadd.f32 %v14703_v38, %v11958_v41  ;;  %v5468_v62 = vadd.f32 %v5404_v14, %v5276_v12  ;;  %v7896_v52 = vpop.eup %7895  ;;  %v4892_v32 = vadd.f32 1.0, %v7894_v25  ;;  %v14704_v16 = vld [vmem:[#allocation232_spill] sm:$0xff]  ;;  %v14705_v38 = vld [vmem:[#allocation13_spill] sm:$0xff] }
 0x5d3   : > { %v5407_v45 = vmul.f32 %v12031_v6, %v5343_v35  ;;  %v5469_v19 = vadd.f32 %v5405_v17, %v5277_v24  ;;  %v7898_v42 = vpop.eup %7897  ;;  %v4893_v31 = vadd.f32 1.0, %v7896_v52  ;;  %v5566_v36 = vunpack.c.l.bf16 %v5525_v43  ;;  %v14706_v17 = vld [vmem:[#allocation76_spill] sm:$0xff] }
 0x5d4   : > { %v5567_v40 = vunpack.c.h.bf16 %v5525_v43  ;;  %v7900_v4 = vpop.eup %7899  ;;  %v4894_v26 = vadd.f32 1.0, %v7898_v42  ;;  %7903 = vlog2.f32 %v4892_v32  ;;  %v5470_v12 = vadd.f32 %v5406_v22, %v5278_v29  ;;  %v14707_v43 = vld [vmem:[#allocation74_spill] sm:$0xff]  ;;  %v14708_v29 = vld [vmem:[#allocation77_spill] sm:$0xff]  ;;  %v14711_v52 = vld [vmem:[#allocation68_spill] sm:$0xff] }
 0x5d5   : > { %v5471_v28 = vadd.f32 %v5407_v45, %v5279_v11  ;;  %v12035_v37 = vpop.eup %7901  ;;  %v4895_v14 = vadd.f32 1.0, %v7900_v4  ;;  %7905 = vlog2.f32 %v4893_v31  ;;  %v5628_v8 = vadd.f32 %v5564_v7, %v5468_v62  ;;  %v14709_v62 = vld [vmem:[#allocation80_spill] sm:$0xff]  ;;  %v14714_v4 = vld [vmem:[#allocation23_spill] sm:$0xff] }
 0x5d6   : > { %v3159_v35 = vadd.f32 %v14705_v38, %v14704_v16  ;;  %7907 = vlog2.f32 %v4894_v26  ;;  %v5629_v24 = vadd.f32 %v5565_v44, %v5469_v19  ;;  %vm5692_vm4 = vcmp.lt.f32.partialorder %v12010_v48, 1e-08  ;;  %v14713_v19 = vld [vmem:[#allocation119_spill] sm:$0xff] }
 0x5d7   : > { %vm5820_vm5 = vcmp.gt.f32.partialorder %v12010_v48, 1e-08  ;;  %v12043_v25 = vsub.f32 %v14707_v43, %v14706_v17  ;;  %7909 = vlog2.f32 %v4895_v14  ;;  %vm5693_vm6 = vcmp.lt.f32.partialorder %v12021_v51, 1e-08  ;;  %v14715_v14 = vld [vmem:[#allocation239_spill] sm:$0xff] }
 0x5d8   : > { %v12048_v11 = vsub.f32 %v14708_v29, %v14706_v17  ;;  %v14710_v7 = vsub.f32 %v10738_v55, %v14709_v62  ;;  %v14712_v32 = vsub.f32 %v10744_v63, %v14711_v52  ;;  %v5630_v45 = vadd.f32 %v5566_v36, %v5470_v12  ;;  %v14716_v43 = vld [vmem:[#allocation135_spill] sm:$0xff] }
 0x5d9   : > { %vm5694_vm7 = vcmp.lt.f32.partialorder %v12027_v2, 1e-08  ;;  %vm5821_vm8 = vcmp.gt.f32.partialorder %v12021_v51, 1e-08  ;;  %7911 = vlog2.f32 %v14713_v19  ;;  %v4393_v42 = vsub.f32 %v11212_v15, %v12043_v25 }
 0x5da   : > { %v4464_v44 = vmul.f32 %v11229_v34, %v14710_v7  ;;  %v4465_v22 = vmul.f32 %v11233_v61, %v14712_v32  ;;  %vm5695_vm9 = vcmp.lt.f32.partialorder %v12031_v6, 1e-08  ;;  %vm5822_vm10 = vcmp.gt.f32.partialorder %v12027_v2, 1e-08  ;;  %v7904_v36 = vpop.eup %7903 }
 0x5db   : > { %7913 = vlog2.f32 %v3159_v35  ;;  %v4394_v31 = vsub.f32 %v14612_v27, %v12048_v11  ;;  %v5631_v12 = vadd.f32 %v5567_v40, %v5471_v28  ;;  %v12071_v16 = vmul.f32 0.6931472, %v14715_v14  ;;  %v7906_v7 = vpop.eup %7905  ;;  %v14718_v14 = vld [vmem:[#allocation130_spill] sm:$0xff] }
 0x5dc   : > { %v12068_v26 = vadd.f32 %v4464_v44, %v14714_v4  ;;  %v4466_v38 = vmul.f32 %v11235_v5, %v4393_v42  ;;  %v12075_v29 = vadd.f32 %v4465_v22, %v14716_v43  ;;  %v4973_v32 = vmul.f32 0.6931472, %v7904_v36  ;;  %v7908_v28 = vpop.eup %7907  ;;  %v14717_v4 = vld [vmem:[#allocation240_spill] sm:$0xff] }
 0x5dd   : > { %vm5823_vm11 = vcmp.gt.f32.partialorder %v12031_v6, 1e-08  ;;  %v5884_v35 = vsel %vm5820_vm5, %v5628_v8, 0.0  ;;  %v5885_v44 = vsel %vm5821_vm8, %v5629_v24, 0.0  ;;  %v4467_v40 = vmul.f32 %v11237_v54, %v4394_v31  ;;  %v7910_v36 = vpop.eup %7909 }
 0x5de   : > { %v4975_v19 = vmul.f32 0.6931472, %v7906_v7  ;;  %v5886_v42 = vsel %vm5822_vm10, %v5630_v45, 0.0  ;;  %v3259_v22 = vmul.f32 0.6931472, %v14717_v4  ;;  %v12087_v43 = vadd.f32 %v4466_v38, %v14718_v14 }
 0x5df   : > { %v4977_v10 = vmul.f32 0.6931472, %v7908_v28  ;;  %v5084_v8 = vadd.f32 %v4973_v32, %v4572_v56  ;;  %v12092_v57 = vadd.f32 %v4467_v40, %v14719_v50  ;;  %v4656_v24 = vand.u32 2147483647, %v12068_v26  ;;  %v7912_v31 = vpop.eup %7911 }
 0x5e0   : > { %v4979_v7 = vmul.f32 0.6931472, %v7910_v36  ;;  %v14720_v33 = vmax.f32 %v11949_v60, 0.0  ;;  %v3348_v4 = vsub.f32 %v12071_v16, %v14706_v17  ;;  %v4657_v38 = vand.u32 2147483647, %v12075_v29 }
 0x5e1   : > { %v7914_v14 = vpop.eup %7913  ;;  %v14721_v28 = vmax.f32 %v11952_v13, 0.0  ;;  %v5148_v56 = vsub.f32 %v5084_v8, %v14695_v3  ;;  %v3261_v50 = vmul.f32 0.6931472, %v7912_v31  ;;  %v4658_v32 = vand.u32 2147483647, %v12087_v43 }
 0x5e2   : > { %v5085_v45 = vadd.f32 %v4975_v19, %v14720_v33  ;;  %v14722_v40 = vmax.f32 %v11958_v41, 0.0  ;;  %v3263_v33 = vmul.f32 0.6931472, %v7914_v14  ;;  %v4659_v19 = vand.u32 2147483647, %v12092_v57 }
 0x5e3   : > { %v5086_v23 = vadd.f32 %v4977_v10, %v14721_v28  ;;  %v5756_v58 = vsel %vm5692_vm4, %v5148_v56, 0.0  ;;  %v3349_v13 = vsub.f32 %v3259_v22, %v14706_v17  ;;  %v4720_v10 = vsub.f32 0.0, %v4656_v24 }
 0x5e4   : > { %v5087_v36 = vadd.f32 %v4979_v7, %v14722_v40  ;;  %v5149_v60 = vsub.f32 %v5085_v45, %v14697_v20  ;;  %v5948_v41 = vadd.f32 %v5884_v35, %v5756_v58  ;;  %v3350_v31 = vsub.f32 %v3261_v50, %v14706_v17  ;;  %v14723_v58 = vld [vmem:[#allocation141_spill] sm:$0xff]  ;;  %v12127_v50 = vpop.xlane.xlu0 %3058 }
 0x5e5   : > { %v5150_v16 = vsub.f32 %v5086_v23, %v14700_v53  ;;  %v4721_v45 = vsub.f32 0.0, %v4657_v38  ;;  %v4722_v53 = vsub.f32 0.0, %v4658_v32  ;;  %v3351_v22 = vsub.f32 %v3263_v33, %v14706_v17  ;;  %v14724_v38 = vld [vmem:[#allocation142_spill] sm:$0xff] }
 0x5e6   : > { %v5151_v3 = vsub.f32 %v5087_v36, %v14702_v18  ;;  %v5757_v8 = vsel %vm5693_vm6, %v5149_v60, 0.0  ;;  %v4723_v24 = vsub.f32 0.0, %v4659_v19  ;;  %v4820_v14 = vmul.f32 1.442695, %v4720_v10  ;;  %v5534_v60 = vld [vmem:[%s11344_s18 + $0x90] sm:$0xff] }
 0x5e7   : > { %v5758_v20 = vsel %vm5694_vm7, %v5150_v16, 0.0  ;;  %v5949_v7 = vadd.f32 %v5885_v44, %v5757_v8  ;;  %v4822_v51 = vmul.f32 1.442695, %v4721_v45  ;;  %v4824_v23 = vmul.f32 1.442695, %v4722_v53 }
 0x5e8   : > { %v5759_v48 = vsel %vm5695_vm9, %v5151_v3, 0.0  ;;  %v5950_v18 = vadd.f32 %v5886_v42, %v5758_v20  ;;  %v3500_v35 = vadd.f32 %v14723_v58, %v11992_v1  ;;  %v5887_v2 = vsel %vm5823_vm11, %v5631_v12, 0.0  ;;  %v14725_v42 = vld [vmem:[#allocation211_spill] sm:$0xff]  ;;  %v5535_v3 = vld [vmem:[%s11344_s18 + $0x98] sm:$0xff] }
 0x5e9   : > { %v6016_v28 = vadd.f32 %v5949_v7, %v5948_v41  ;;  %7915 = vpow2.f32 %v4820_v14  ;;  %v4826_v44 = vmul.f32 1.442695, %v4723_v24  ;;  %v3501_v56 = vadd.f32 %v14724_v38, %v12005_v59  ;;  %v14734_v41 = vld [vmem:[#allocation158_spill] sm:$0xff]  ;;  %v14736_v7 = vld [vmem:[#allocation160_spill] sm:$0xff] }
 0x5ea   : > { %v5951_v17 = vadd.f32 %v5887_v2, %v5759_v48  ;;  %7917 = vpow2.f32 %v4822_v51  ;;  %v12130_v40 = vmul.f32 0.6931472, %v14725_v42  ;;  %v5360_v1 = vsub.f32 %v3348_v4, %v14709_v62  ;;  %v14729_v62 = vld [vmem:[#allocation163_spill] sm:$0xff]  ;;  %v12163_v48 = vld [vmem:[%s8359_s16 + $0x120] sm:$0xff]  ;;  %v12175_v2 = vld [vmem:[%s8359_s16 + $0x138] sm:$0xff] }
 0x5eb   : > { %v6017_v32 = vadd.f32 %v6016_v28, %v5950_v18  ;;  %7919 = vpow2.f32 %v4824_v23  ;;  %v5361_v6 = vsub.f32 %v3349_v13, %v14711_v52  ;;  %v5362_v36 = vsub.f32 %v3350_v31, %v12043_v25  ;;  %v14731_v25 = vld [vmem:[#allocation178_spill] sm:$0xff]  ;;  %v12167_v28 = vld [vmem:[%s8359_s16 + $0x128] sm:$0xff]  ;;  %v12171_v23 = vld [vmem:[%s8359_s16 + $0x130] sm:$0xff] }
 0x5ec   : > { %14726 = vst [vmem:[#allocation20_spill] sm:$0xff] %v12130_v40  ;;  %7921 = vpow2.f32 %v4826_v44  ;;  %v5363_v59 = vsub.f32 %v3351_v22, %v12048_v11  ;;  %v12139_v33 = vsub.f32 %v11980_v39, %v11701_v0  ;;  %v12142_v19 = vmul.f32 1e-08, %v12127_v50  ;;  %v14732_v11 = vld [vmem:[#allocation166_spill] sm:$0xff] }
 0x5ed   : > { %v6018_v12 = vadd.f32 %v6017_v32, %v5951_v17  ;;  %7923 = vlog2.f32 %v3500_v35  ;;  %v14730_v4 = vsub.f32 0.0, %v14729_v62  ;;  %v12149_v16 = vmul.f32 %v14731_v25, %v12127_v50 }
 0x5ee   : > { %14727 = vst [vmem:[#allocation226_spill] sm:$0xff] %v12139_v33  ;;  %7925 = vlog2.f32 %v3501_v56  ;;  %v14733_v13 = vsub.f32 0.0, %v14732_v11  ;;  %v14735_v31 = vsub.f32 0.0, %v14734_v41  ;;  %v14737_v45 = vsub.f32 0.0, %v14736_v7 }
 0x5ef   : > { %14728 = vst [vmem:[#allocation218_spill] sm:$0xff] %v12142_v19  ;;  %v5296_v52 = vadd.f32 %v14730_v4, %v12068_v26  ;;  %6019 = vadd.xlane.f32.xlu1 %v6018_v12  ;;  %v7916_v8 = vpop.eup %7915  ;;  %v5424_v22 = vmul.f32 %v12163_v48, %v5360_v1  ;;  %v5584_v24 = vunpack.c.l.bf16 %v5534_v60  ;;  %v5425_v51 = vmul.f32 %v12167_v28, %v5361_v6 }
 0x5f0   : > { %v5297_v10 = vadd.f32 %v14733_v13, %v12075_v29  ;;  %v5298_v20 = vadd.f32 %v14735_v31, %v12087_v43  ;;  %v5299_v53 = vadd.f32 %v14737_v45, %v12092_v57  ;;  %v7918_v14 = vpop.eup %7917  ;;  %v4912_v18 = vadd.f32 1.0, %v7916_v8 }
 0x5f1   : > { %v5426_v35 = vmul.f32 %v12171_v23, %v5362_v36  ;;  %v5427_v44 = vmul.f32 %v12175_v2, %v5363_v59  ;;  %v7920_v56 = vpop.eup %7919  ;;  %v4913_v17 = vadd.f32 1.0, %v7918_v14  ;;  %v5488_v32 = vadd.f32 %v5424_v22, %v5296_v52 }
 0x5f2   : > { %v5585_v42 = vunpack.c.h.bf16 %v5534_v60  ;;  %v5586_v1 = vunpack.c.l.bf16 %v5535_v3  ;;  %v7922_v12 = vpop.eup %7921  ;;  %v4914_v4 = vadd.f32 1.0, %v7920_v56  ;;  %7927 = vlog2.f32 %v4912_v18  ;;  %v14742_v18 = vld [vmem:[#allocation54_spill] sm:$0xff] }
 0x5f3   : > { %v5489_v13 = vadd.f32 %v5425_v51, %v5297_v10  ;;  %v5587_v8 = vunpack.c.h.bf16 %v5535_v3  ;;  %v12178_v31 = vpop.eup %7923  ;;  %v4915_v6 = vadd.f32 1.0, %v7922_v12  ;;  %7929 = vlog2.f32 %v4913_v17  ;;  %v14738_v3 = vld [vmem:[#allocation206_spill] sm:$0xff] }
 0x5f4   : > { %v5490_v45 = vadd.f32 %v5426_v35, %v5298_v20  ;;  %v5491_v36 = vadd.f32 %v5427_v44, %v5299_v53  ;;  %v12180_v39 = vpop.eup %7925  ;;  %v4593_v59 = vmax.f32 %v12075_v29, 0.0  ;;  %v4594_v14 = vmax.f32 %v12087_v43, 0.0  ;;  %v14739_v20 = vld [vmem:[#allocation209_spill] sm:$0xff]  ;;  %v14740_v29 = vld [vmem:[#allocation210_spill] sm:$0xff]  ;;  %v14743_v35 = vld [vmem:[#allocation207_spill] sm:$0xff] }
 0x5f5   : > { %v4595_v60 = vmax.f32 %v12092_v57, 0.0  ;;  %7931 = vlog2.f32 %v4914_v4  ;;  %v5648_v52 = vadd.f32 %v5584_v24, %v5488_v32  ;;  %vm5712_vm12 = vcmp.lt.f32.partialorder %v12163_v48, 1e-08  ;;  %v14741_v24 = vld [vmem:[#allocation193_spill] sm:$0xff]  ;;  %v14745_v4 = vld [vmem:[#allocation196_spill] sm:$0xff] }
 0x5f6   : > { %7933 = vlog2.f32 %v4915_v6  ;;  %vm5713_vm13 = vcmp.lt.f32.partialorder %v12167_v28, 1e-08  ;;  %v5649_v10 = vadd.f32 %v5585_v42, %v5489_v13  ;;  %vm5714_vm14 = vcmp.lt.f32.partialorder %v12171_v23, 1e-08  ;;  %v14746_v13 = vld [vmem:[#allocation81_spill] sm:$0xff] }
 0x5f7   : > { %v12190_v53 = vsub.f32 %v14739_v20, %v14738_v3  ;;  %v12194_v22 = vsub.f32 %v14740_v29, %v14738_v3  ;;  %v5650_v43 = vadd.f32 %v5586_v1, %v5490_v45  ;;  %v5651_v57 = vadd.f32 %v5587_v8, %v5491_v36 }
 0x5f8   : > { %vm5715_vm15 = vcmp.lt.f32.partialorder %v12175_v2, 1e-08  ;;  %v3131_v51 = vadd.f32 %v14742_v18, %v14741_v24  ;;  %v14744_v44 = vsub.f32 %v10738_v55, %v14743_v35  ;;  %v7928_v17 = vpop.eup %7927  ;;  %vm5840_vm1 = vcmp.gt.f32.partialorder %v12163_v48, 1e-08  ;;  %v14748_v24 = vld [vmem:[#allocation69_spill] sm:$0xff] }
 0x5f9   : > { %vm5841_vm2 = vcmp.gt.f32.partialorder %v12167_v28, 1e-08  ;;  %v4365_v32 = vsub.f32 %v11212_v15, %v12190_v53  ;;  %v4366_v42 = vsub.f32 %v14612_v27, %v12194_v22  ;;  %v7930_v1 = vpop.eup %7929  ;;  %v5013_v12 = vmul.f32 0.6931472, %v7928_v17 }
 0x5fa   : > { %v4436_v56 = vmul.f32 %v11229_v34, %v14744_v44  ;;  %vm5842_vm3 = vcmp.gt.f32.partialorder %v12171_v23, 1e-08  ;;  %7935 = vlog2.f32 %v14745_v4  ;;  %v14747_v8 = vsub.f32 %v10744_v63, %v14746_v13 }
 0x5fb   : > { %v7932_v45 = vpop.eup %7931  ;;  %v5015_v36 = vmul.f32 0.6931472, %v7930_v1  ;;  %v4438_v20 = vmul.f32 %v11235_v5, %v4365_v32  ;;  %v4439_v29 = vmul.f32 %v11237_v54, %v4366_v42  ;;  %v14749_v40 = vmax.f32 %v12068_v26, 0.0 }
 0x5fc   : > { %v4437_v6 = vmul.f32 %v11233_v61, %v14747_v8  ;;  %v12218_v18 = vadd.f32 %v4436_v56, %v14748_v24  ;;  %v7934_v44 = vpop.eup %7933  ;;  %v5017_v17 = vmul.f32 0.6931472, %v7932_v45  ;;  %vm5843_vm4 = vcmp.gt.f32.partialorder %v12175_v2, 1e-08  ;;  %v14750_v8 = vld [vmem:[#allocation70_spill] sm:$0xff]  ;;  %v14751_v45 = vld [vmem:[#allocation64_spill] sm:$0xff] }
 0x5fd   : > { %v5104_v0 = vadd.f32 %v5013_v12, %v14749_v40  ;;  %7937 = vlog2.f32 %v3131_v51  ;;  %v5019_v4 = vmul.f32 0.6931472, %v7934_v44  ;;  %v5105_v30 = vadd.f32 %v5015_v36, %v4593_v59  ;;  %v14752_v12 = vld [vmem:[#allocation66_spill] sm:$0xff] }
 0x5fe   : > { %v5904_v1 = vsel %vm5840_vm1, %v5648_v52, 0.0  ;;  %v5905_v32 = vsel %vm5841_vm2, %v5649_v10, 0.0  ;;  %v5106_v42 = vadd.f32 %v5017_v17, %v4594_v14  ;;  %v12229_v24 = vadd.f32 %v4437_v6, %v14750_v8  ;;  %v14753_v14 = vld [vmem:[#allocation197_spill] sm:$0xff] }
 0x5ff   : > { %v5168_v56 = vsub.f32 %v5104_v0, %v14729_v62  ;;  %v12232_v26 = vadd.f32 %v4438_v20, %v14751_v45  ;;  %v5107_v40 = vadd.f32 %v5019_v4, %v4595_v60  ;;  %v5169_v51 = vsub.f32 %v5105_v30, %v14732_v11  ;;  %v14754_v20 = vld [vmem:[#allocation57_spill] sm:$0xff] }
 0x600   : > { %v12236_v59 = vadd.f32 %v4439_v29, %v14752_v12  ;;  %v4628_v52 = vand.u32 2147483647, %v12218_v18  ;;  %v7936_v36 = vpop.eup %7935  ;;  %v5170_v10 = vsub.f32 %v5106_v42, %v14734_v41  ;;  %v5906_v62 = vsel %vm5842_vm3, %v5650_v43, 0.0 }
 0x601   : > { %v5776_v0 = vsel %vm5712_vm12, %v5168_v56, 0.0  ;;  %v3201_v6 = vmul.f32 0.6931472, %v14753_v14  ;;  %v5171_v60 = vsub.f32 %v5107_v40, %v14736_v7  ;;  %v5777_v30 = vsel %vm5713_vm13, %v5169_v51, 0.0 }
 0x602   : > { %v5968_v11 = vadd.f32 %v5904_v1, %v5776_v0  ;;  %v3203_v29 = vmul.f32 0.6931472, %v14754_v20  ;;  %v5778_v41 = vsel %vm5714_vm14, %v5170_v10, 0.0  ;;  %v5969_v17 = vadd.f32 %v5905_v32, %v5777_v30 }
 0x603   : > { %v7938_v44 = vpop.eup %7937  ;;  %v4629_v48 = vand.u32 2147483647, %v12229_v24  ;;  %v4630_v4 = vand.u32 2147483647, %v12232_v26  ;;  %v5779_v43 = vsel %vm5715_vm15, %v5171_v60, 0.0  ;;  %v4692_v28 = vsub.f32 0.0, %v4628_v52 }
 0x604   : > { %v3205_v42 = vmul.f32 0.6931472, %v7936_v36  ;;  %v4631_v7 = vand.u32 2147483647, %v12236_v59  ;;  %v5970_v56 = vadd.f32 %v5906_v62, %v5778_v41  ;;  %v6041_v1 = vadd.f32 %v5969_v17, %v5968_v11  ;;  %v14755_v62 = vld [vmem:[#allocation146_spill] sm:$0xff] }
 0x605   : > { %v4693_v8 = vsub.f32 0.0, %v4629_v48  ;;  %v4694_v45 = vsub.f32 0.0, %v4630_v4  ;;  %v5907_v23 = vsel %vm5843_vm4, %v5651_v57, 0.0  ;;  %v3207_v40 = vmul.f32 0.6931472, %v7938_v44  ;;  %v14756_v57 = vld [vmem:[#allocation147_spill] sm:$0xff] }
 0x606   : > { %v4695_v32 = vsub.f32 0.0, %v4631_v7  ;;  %v4764_v51 = vmul.f32 1.442695, %v4692_v28  ;;  %v5971_v12 = vadd.f32 %v5907_v23, %v5779_v43  ;;  %v6042_v10 = vadd.f32 %v6041_v1, %v5970_v56  ;;  %v14757_v44 = vld [vmem:[#allocation181_spill] sm:$0xff]  ;;  %v5520_v1 = vld [vmem:[%s11344_s18 + $0x20] sm:$0xff] }
 0x607   : > { %v4766_v0 = vmul.f32 1.442695, %v4693_v8  ;;  %v4768_v14 = vmul.f32 1.442695, %v4694_v45  ;;  %v3320_v60 = vsub.f32 %v3201_v6, %v14738_v3  ;;  %v3321_v36 = vsub.f32 %v3203_v29, %v14738_v3 }
 0x608   : > { %7939 = vpow2.f32 %v4764_v51  ;;  %v4770_v52 = vmul.f32 1.442695, %v4695_v32  ;;  %v3172_v30 = vadd.f32 %v14755_v62, %v12142_v19  ;;  %v6043_v11 = vadd.f32 %v6042_v10, %v5971_v12  ;;  %v14762_v32 = vld [vmem:[#allocation102_spill] sm:$0xff] }
 0x609   : > { %v3322_v2 = vsub.f32 %v3205_v42, %v14738_v3  ;;  %7941 = vpow2.f32 %v4766_v0  ;;  %v3173_v20 = vadd.f32 %v14756_v57, %v12142_v19  ;;  %v3439_v41 = vmul.f32 %v14757_v44, %v12127_v50  ;;  %v14758_v42 = vld [vmem:[#allocation95_spill] sm:$0xff]  ;;  %v14764_v12 = vld [vmem:[#allocation94_spill] sm:$0xff] }
 0x60a   : > { %v3323_v6 = vsub.f32 %v3207_v40, %v14738_v3  ;;  %7943 = vpow2.f32 %v4768_v14  ;;  %v3440_v48 = vmul.f32 %v14694_v9, %v12127_v50  ;;  %6044 = vadd.xlane.f32.xlu0 %v6043_v11  ;;  %v12277_v4 = vmul.f32 %v14699_v49, %v12127_v50  ;;  %v14766_v14 = vld [vmem:[#allocation96_spill] sm:$0xff]  ;;  %v12311_v11 = vld [vmem:[%s8359_s16 + $0x48] sm:$0xff] }
 0x60b   : > { %7945 = vpow2.f32 %v4770_v52  ;;  %v5332_v3 = vsub.f32 %v3320_v60, %v14743_v35  ;;  %v5333_v43 = vsub.f32 %v3321_v36, %v14746_v13  ;;  %v12282_v7 = vmul.f32 0.6931472, %v14758_v42  ;;  %v14760_v35 = vld [vmem:[#allocation99_spill] sm:$0xff]  ;;  %v12316_v42 = vld [vmem:[%s8359_s16 + $0x50] sm:$0xff] }
 0x60c   : > { %7947 = vlog2.f32 %v12127_v50  ;;  %v12286_v28 = vadd.f32 %v14755_v62, %v12149_v16  ;;  %v5334_v56 = vsub.f32 %v3322_v2, %v12190_v53  ;;  %v12291_v50 = vadd.f32 %v14756_v57, %v3439_v41  ;;  %v5521_v57 = vld [vmem:[%s11344_s18 + $0x28] sm:$0xff] }
 0x60d   : > { %14759 = vst [vmem:[#allocation233_spill] sm:$0xff] %v12282_v7  ;;  %7949 = vlog2.f32 %v3172_v30  ;;  %v14761_v13 = vsub.f32 0.0, %v14760_v35  ;;  %v5335_v23 = vsub.f32 %v3323_v6, %v12194_v22  ;;  %v14763_v53 = vsub.f32 0.0, %v14762_v32  ;;  %v12307_v30 = vld [vmem:[%s8359_s16 + $0x40] sm:$0xff] }
 0x60e   : > { %v7940_v8 = vpop.eup %7939  ;;  %7951 = vlog2.f32 %v3173_v20  ;;  %v14765_v10 = vsub.f32 0.0, %v14764_v12  ;;  %v14767_v60 = vsub.f32 0.0, %v14766_v14  ;;  %v5396_v22 = vmul.f32 %v12307_v30, %v5332_v3 }
 0x60f   : > { %v5268_v45 = vadd.f32 %v14761_v13, %v12218_v18  ;;  %v7942_v40 = vpop.eup %7941  ;;  %v4884_v16 = vadd.f32 1.0, %v7940_v8  ;;  %v5269_v51 = vadd.f32 %v14763_v53, %v12229_v24  ;;  %v5397_v2 = vmul.f32 %v12311_v11, %v5333_v43 }
 0x610   : > { %v5270_v0 = vadd.f32 %v14765_v10, %v12232_v26  ;;  %v5271_v36 = vadd.f32 %v14767_v60, %v12236_v59  ;;  %v7944_v52 = vpop.eup %7943  ;;  %v4885_v62 = vadd.f32 1.0, %v7942_v40  ;;  %v5556_v20 = vunpack.c.l.bf16 %v5520_v1  ;;  %v12322_v10 = vld [vmem:[%s8359_s16 + $0x58] sm:$0xff] }
 0x611   : > { %v7946_v41 = vpop.eup %7945  ;;  %v4886_v6 = vadd.f32 1.0, %v7944_v52  ;;  %7953 = vlog2.f32 %v4884_v16  ;;  %v5398_v8 = vmul.f32 %v12316_v42, %v5334_v56  ;;  %v5557_v13 = vunpack.c.h.bf16 %v5520_v1  ;;  %v14770_v1 = vld [vmem:[#allocation150_spill] sm:$0xff] }
 0x612   : > { %v12319_v40 = vpop.eup %7947  ;;  %v4887_v53 = vadd.f32 1.0, %v7946_v41  ;;  %7955 = vlog2.f32 %v4885_v62  ;;  %v5399_v3 = vmul.f32 %v12322_v10, %v5335_v23  ;;  %v5460_v60 = vadd.f32 %v5396_v22, %v5268_v45 }
 0x613   : > { %v12325_v43 = vpop.eup %7949  ;;  %7957 = vlog2.f32 %v4886_v6  ;;  %v5461_v17 = vadd.f32 %v5397_v2, %v5269_v51  ;;  %v5462_v52 = vadd.f32 %v5398_v8, %v5270_v0  ;;  %v5558_v16 = vunpack.c.l.bf16 %v5521_v57 }
 0x614   : > { %14768 = vst [vmem:[#allocation227_spill] sm:$0xff] %v12325_v43  ;;  %v12327_v29 = vpop.eup %7951  ;;  %v12330_v56 = vmul.f32 0.6931472, %v11900_v47  ;;  %v12333_v33 = vadd.f32 %v14770_v1, %v3440_v48  ;;  %v4564_v62 = vmax.f32 %v12218_v18, 0.0  ;;  %7959 = vlog2.f32 %v4887_v53 }
 0x615   : > { %14769 = vst [vmem:[#allocation111_spill] sm:$0xff] %v12327_v29  ;;  %v4565_v23 = vmax.f32 %v12229_v24, 0.0  ;;  %v4566_v45 = vmax.f32 %v12232_v26, 0.0  ;;  %v5463_v22 = vadd.f32 %v5399_v3, %v5271_v36  ;;  %v5559_v41 = vunpack.c.h.bf16 %v5521_v57  ;;  %v14771_v26 = vld [vmem:[#allocation6_spill] sm:$0xff]  ;;  %v14772_v36 = vld [vmem:[#allocation65_spill] sm:$0xff] }
 0x616   : > { %v4567_v51 = vmax.f32 %v12236_v59, 0.0  ;;  %v5620_v0 = vadd.f32 %v5556_v20, %v5460_v60  ;;  %vm5684_vm5 = vcmp.lt.f32.partialorder %v12307_v30, 1e-08  ;;  %vm5685_vm6 = vcmp.lt.f32.partialorder %v12311_v11, 1e-08  ;;  %v14773_v59 = vld [vmem:[#allocation53_spill] sm:$0xff] }
 0x617   : > { %v7954_v47 = vpop.eup %7953  ;;  %v5621_v2 = vadd.f32 %v5557_v13, %v5461_v17  ;;  %v5622_v48 = vadd.f32 %v5558_v16, %v5462_v52  ;;  %vm5686_vm7 = vcmp.lt.f32.partialorder %v12316_v42, 1e-08  ;;  %vm5687_vm8 = vcmp.lt.f32.partialorder %v12322_v10, 1e-08  ;;  %v14774_v60 = vld [vmem:[#allocation215_spill] sm:$0xff]  ;;  %v14775_v52 = vld [vmem:[#allocation104_spill] sm:$0xff] }
 0x618   : > { %v7956_v18 = vpop.eup %7955  ;;  %v4957_v24 = vmul.f32 0.6931472, %v7954_v47  ;;  %vm5812_vm9 = vcmp.gt.f32.partialorder %v12307_v30, 1e-08  ;;  %v12346_v57 = vsub.f32 %v14772_v36, %v14771_v26  ;;  %v12350_v20 = vsub.f32 %v14773_v59, %v14771_v26 }
 0x619   : > { %v7958_v6 = vpop.eup %7957  ;;  %v4959_v8 = vmul.f32 0.6931472, %v7956_v18  ;;  %v5623_v17 = vadd.f32 %v5559_v41, %v5463_v22  ;;  %vm5813_vm10 = vcmp.gt.f32.partialorder %v12311_v11, 1e-08  ;;  %vm5814_vm11 = vcmp.gt.f32.partialorder %v12316_v42, 1e-08 }
 0x61a   : > { %v7960_v13 = vpop.eup %7959  ;;  %v4961_v53 = vmul.f32 0.6931472, %v7958_v6  ;;  %v5076_v3 = vadd.f32 %v4957_v24, %v4564_v62  ;;  %vm5815_vm12 = vcmp.gt.f32.partialorder %v12322_v10, 1e-08  ;;  %v3151_v16 = vadd.f32 %v14775_v52, %v14774_v60  ;;  %v14776_v24 = vld [vmem:[#allocation2_spill] sm:$0xff] }
 0x61b   : > { %v4963_v47 = vmul.f32 0.6931472, %v7960_v13  ;;  %v5077_v36 = vadd.f32 %v4959_v8, %v4565_v23  ;;  %v5876_v29 = vsel %vm5812_vm9, %v5620_v0, 0.0  ;;  %v4385_v59 = vsub.f32 %v11212_v15, %v12346_v57  ;;  %v14777_v60 = vld [vmem:[#allocation118_spill] sm:$0xff] }
 0x61c   : > { %v5078_v18 = vadd.f32 %v4961_v53, %v4566_v45  ;;  %v5140_v22 = vsub.f32 %v5076_v3, %v14760_v35  ;;  %v5877_v41 = vsel %vm5813_vm10, %v5621_v2, 0.0  ;;  %v4386_v43 = vsub.f32 %v14612_v27, %v12350_v20  ;;  %v14779_v35 = vld [vmem:[#allocation48_spill] sm:$0xff] }
 0x61d   : > { %v5079_v6 = vadd.f32 %v4963_v47, %v4567_v51  ;;  %v5141_v62 = vsub.f32 %v5077_v36, %v14762_v32  ;;  %7961 = vlog2.f32 %v14776_v24  ;;  %v14778_v13 = vsub.f32 %v10738_v55, %v14777_v60  ;;  %v14781_v47 = vld [vmem:[#allocation153_spill] sm:$0xff] }
 0x61e   : > { %v5142_v0 = vsub.f32 %v5078_v18, %v14764_v12  ;;  %v5748_v45 = vsel %vm5684_vm5, %v5140_v22, 0.0  ;;  %7963 = vlog2.f32 %v3151_v16  ;;  %v14780_v2 = vsub.f32 %v10744_v63, %v14779_v35 }
 0x61f   : > { %v4456_v23 = vmul.f32 %v11229_v34, %v14778_v13  ;;  %v5143_v32 = vsub.f32 %v5079_v6, %v14766_v14  ;;  %v5749_v8 = vsel %vm5685_vm6, %v5141_v62, 0.0  ;;  %v5940_v53 = vadd.f32 %v5876_v29, %v5748_v45  ;;  %v14785_v62 = vld [vmem:[#allocation8_spill] sm:$0xff]  ;;  %v14786_v13 = vld [vmem:[#allocation231_spill] sm:$0xff] }
 0x620   : > { %v4457_v51 = vmul.f32 %v11233_v61, %v14780_v2  ;;  %v4458_v3 = vmul.f32 %v11235_v5, %v4385_v59  ;;  %v3613_v52 = vmul.f32 0.6931472, %v12035_v37  ;;  %v5750_v12 = vsel %vm5686_vm7, %v5142_v0, 0.0 }
 0x621   : > { %v5941_v30 = vadd.f32 %v5877_v41, %v5749_v8  ;;  %v4459_v16 = vmul.f32 %v11237_v54, %v4386_v43  ;;  %v3505_v36 = vadd.f32 %v14781_v47, %v12277_v4  ;;  %7965 = vlog2.f32 %v12286_v28  ;;  %v14782_v43 = vld [vmem:[#allocation230_spill] sm:$0xff]  ;;  %v14783_v41 = vld [vmem:[#allocation117_spill] sm:$0xff] }
 0x622   : > { %v5751_v14 = vsel %vm5687_vm8, %v5143_v32, 0.0  ;;  %v5878_v29 = vsel %vm5814_vm11, %v5622_v48, 0.0  ;;  %7967 = vlog2.f32 %v12291_v50  ;;  %v5879_v37 = vsel %vm5815_vm12, %v5623_v17, 0.0  ;;  %v14784_v28 = vld [vmem:[#allocation9_spill] sm:$0xff]  ;;  %v14787_v17 = vld [vmem:[#allocation114_spill] sm:$0xff] }
 0x623   : > { %v5942_v11 = vadd.f32 %v5878_v29, %v5750_v12  ;;  %v6006_v59 = vadd.f32 %v5941_v30, %v5940_v53  ;;  %v7962_v18 = vpop.eup %7961  ;;  %v3241_v22 = vmul.f32 0.6931472, %v14782_v43  ;;  %v12395_v4 = vadd.f32 %v4456_v23, %v14783_v41 }
 0x624   : > { %v12398_v6 = vadd.f32 %v4457_v51, %v14784_v28  ;;  %v12401_v24 = vadd.f32 %v4458_v3, %v14785_v62  ;;  %v7964_v42 = vpop.eup %7963  ;;  %v5943_v48 = vadd.f32 %v5879_v37, %v5751_v14  ;;  %v3243_v10 = vmul.f32 0.6931472, %v14786_v13 }
 0x625   : > { %v6007_v50 = vadd.f32 %v6006_v59, %v5942_v11  ;;  %v12405_v0 = vadd.f32 %v4459_v16, %v14787_v17  ;;  %v12409_v45 = vadd.f32 %v14723_v58, %v11711_v46  ;;  %v12413_v23 = vadd.f32 %v14770_v1, %v12142_v19 }
 0x626   : > { %7969 = vlog2.f32 %v12333_v33  ;;  %v3245_v2 = vmul.f32 0.6931472, %v7962_v18  ;;  %v12418_v51 = vsub.f32 %v12330_v56, %v12282_v7  ;;  %v3247_v8 = vmul.f32 0.6931472, %v7964_v42 }
 0x627   : > { %14788 = vst [vmem:[#allocation27_spill] sm:$0xff] %v12409_v45  ;;  %7971 = vlog2.f32 %v3505_v36  ;;  %v6008_v32 = vadd.f32 %v6007_v50, %v5943_v48  ;;  %v7966_v53 = vpop.eup %7965  ;;  %v3340_v3 = vsub.f32 %v3241_v22, %v14771_v26  ;;  %v4648_v58 = vand.u32 2147483647, %v12395_v4 }
 0x628   : > { %14789 = vst [vmem:[#allocation32_spill] sm:$0xff] %v12413_v23  ;;  %v4649_v12 = vand.u32 2147483647, %v12398_v6  ;;  %v4650_v1 = vand.u32 2147483647, %v12401_v24  ;;  %v7968_v30 = vpop.eup %7967  ;;  %v12428_v16 = vsub.f32 %v3613_v52, %v12282_v7  ;;  %v3341_v56 = vsub.f32 %v3243_v10, %v14771_v26  ;;  %v14807_v23 = vld [vmem:[#allocation219_spill] sm:$0xff] }
 0x629   : > { %14790 = vst [vmem:[#allocation222_spill] sm:$0xff] %v12418_v51  ;;  %v12425_v33 = vmul.f32 0.6931472, %v12178_v31  ;;  %6009 = vadd.xlane.f32.xlu2 %v6008_v32  ;;  %v4651_v36 = vand.u32 2147483647, %v12405_v0  ;;  %v3342_v14 = vsub.f32 %v3245_v2, %v14771_v26  ;;  %v4712_v29 = vsub.f32 0.0, %v4648_v58 }
 0x62a   : > { %14792 = vst [vmem:[#allocation228_spill] sm:$0xff] %v12428_v16  ;;  %v4713_v37 = vsub.f32 0.0, %v4649_v12  ;;  %v4714_v11 = vsub.f32 0.0, %v4650_v1  ;;  %v12434_v59 = vmul.f32 0.6931472, %v12180_v39  ;;  %v3343_v18 = vsub.f32 %v3247_v8, %v14771_v26  ;;  %v14795_v26 = vld [vmem:[#allocation137_spill] sm:$0xff] }
 0x62b   : > { %14791 = vst [vmem:[#allocation5_spill] sm:$0xff] %v12425_v33  ;;  %v4715_v52 = vsub.f32 0.0, %v4651_v36  ;;  %v4804_v22 = vmul.f32 1.442695, %v4712_v29  ;;  %v5352_v62 = vsub.f32 %v3340_v3, %v14777_v60  ;;  %v12443_v39 = vmul.f32 0.6931472, %v12319_v40 }
 0x62c   : > { %14793 = vst [vmem:[#allocation4_spill] sm:$0xff] %v12434_v59  ;;  %v7970_v43 = vpop.eup %7969  ;;  %v4806_v41 = vmul.f32 1.442695, %v4713_v37  ;;  %v4808_v28 = vmul.f32 1.442695, %v4714_v11  ;;  %v14796_v10 = vsub.f32 0.0, %v14795_v26  ;;  %v5353_v2 = vsub.f32 %v3341_v56, %v14779_v35 }
 0x62d   : > { %v7972_v42 = vpop.eup %7971  ;;  %14794 = vst [vmem:[#allocation107_spill] sm:$0xff] %v12443_v39  ;;  %v3619_v50 = vmul.f32 0.6931472, %v7966_v53  ;;  %v4810_v13 = vmul.f32 1.442695, %v4715_v52  ;;  %7973 = vpow2.f32 %v4804_v22  ;;  %v5354_v60 = vsub.f32 %v3342_v14, %v12346_v57  ;;  %v5530_v53 = vld [vmem:[%s11344_s18 + $0x70] sm:$0xff] }
 0x62e   : > { %v5288_v17 = vadd.f32 %v14796_v10, %v12395_v4  ;;  %v12450_v32 = vmul.f32 0.6931472, %v7968_v30  ;;  %v12452_v8 = vmul.f32 0.6931472, %v7970_v43  ;;  %7975 = vpow2.f32 %v4806_v41  ;;  %v14798_v3 = vld [vmem:[#allocation139_spill] sm:$0xff]  ;;  %v14800_v35 = vld [vmem:[#allocation133_spill] sm:$0xff] }
 0x62f   : > { %v5355_v40 = vsub.f32 %v3343_v18, %v12350_v20  ;;  %7977 = vpow2.f32 %v4808_v28  ;;  %v14799_v58 = vsub.f32 0.0, %v14798_v3  ;;  %v14801_v1 = vsub.f32 0.0, %v14800_v35  ;;  %v12463_v57 = vld [vmem:[%s8359_s16 + $0xe0] sm:$0xff]  ;;  %v12475_v11 = vld [vmem:[%s8359_s16 + $0xe8] sm:$0xff]  ;;  %v12479_v52 = vld [vmem:[%s8359_s16 + $0xf0] sm:$0xff] }
 0x630   : > { %14797 = vst [vmem:[#allocation26_spill] sm:$0xff] %v12452_v8  ;;  %v5416_v30 = vmul.f32 %v12463_v57, %v5352_v62  ;;  %v12466_v36 = vmul.f32 0.6931472, %v7972_v42  ;;  %v12469_v20 = vsub.f32 %v3619_v50, %v12443_v39  ;;  %7979 = vpow2.f32 %v4810_v13  ;;  %v14804_v14 = vld [vmem:[#allocation134_spill] sm:$0xff]  ;;  %v12483_v41 = vld [vmem:[%s11344_s18 + $0x78] sm:$0xff]  ;;  %v14806_v8 = vld [vmem:[#allocation212_spill] sm:$0xff] }
 0x631   : > { %v5289_v12 = vadd.f32 %v14799_v58, %v12398_v6  ;;  %v5290_v56 = vadd.f32 %v14801_v1, %v12401_v24  ;;  %v14805_v29 = vsub.f32 0.0, %v14804_v14  ;;  %v5417_v18 = vmul.f32 %v12475_v11, %v5353_v2  ;;  %v12489_v13 = vld [vmem:[%s8359_s16 + $0xf8] sm:$0xff] }
 0x632   : > { %14802 = vst [vmem:[#allocation31_spill] sm:$0xff] %v12466_v36  ;;  %v5418_v43 = vmul.f32 %v12479_v52, %v5354_v60  ;;  %v5480_v22 = vadd.f32 %v5416_v30, %v5288_v17  ;;  %v5576_v28 = vunpack.c.l.bf16 %v5530_v53  ;;  %v5419_v10 = vmul.f32 %v12489_v13, %v5355_v40  ;;  %v14808_v40 = vld [vmem:[#allocation101_spill] sm:$0xff] }
 0x633   : > { %14803 = vst [vmem:[#allocation131_spill] sm:$0xff] %v12469_v20  ;;  %v5291_v37 = vadd.f32 %v14805_v29, %v12405_v0  ;;  %v7974_v58 = vpop.eup %7973  ;;  %v5481_v1 = vadd.f32 %v5417_v18, %v5289_v12  ;;  %v5577_v60 = vunpack.c.h.bf16 %v5530_v53  ;;  %v5578_v31 = vunpack.c.l.bf16 %v12483_v41  ;;  %v14809_v53 = vld [vmem:[#allocation71_spill] sm:$0xff] }
 0x634   : > { %v5482_v29 = vadd.f32 %v5418_v43, %v5290_v56  ;;  %v7976_v17 = vpop.eup %7975  ;;  %v4904_v30 = vadd.f32 1.0, %v7974_v58  ;;  %v5579_v62 = vunpack.c.h.bf16 %v12483_v41  ;;  %v5640_v50 = vadd.f32 %v5576_v28, %v5480_v22  ;;  %v14810_v56 = vld [vmem:[#allocation84_spill] sm:$0xff] }
 0x635   : > { %v5483_v48 = vadd.f32 %v5419_v10, %v5291_v37  ;;  %v7978_v42 = vpop.eup %7977  ;;  %v4905_v36 = vadd.f32 1.0, %v7976_v17  ;;  %7981 = vlog2.f32 %v14806_v8  ;;  %v12498_v47 = vsub.f32 %v14808_v40, %v14807_v23  ;;  %v14811_v37 = vld [vmem:[#allocation223_spill] sm:$0xff]  ;;  %v14812_v28 = vld [vmem:[#allocation220_spill] sm:$0xff]  ;;  %v14814_v17 = vld [vmem:[#allocation221_spill] sm:$0xff] }
 0x636   : > { %v7980_v2 = vpop.eup %7979  ;;  %v4906_v12 = vadd.f32 1.0, %v7978_v42  ;;  %7983 = vlog2.f32 %v4904_v30  ;;  %v3143_v18 = vadd.f32 %v14810_v56, %v14809_v53  ;;  %v12504_v43 = vsub.f32 %v14811_v37, %v14807_v23  ;;  %v14818_v37 = vld [vmem:[#allocation97_spill] sm:$0xff] }
 0x637   : > { %v4907_v41 = vadd.f32 1.0, %v7980_v2  ;;  %7985 = vlog2.f32 %v4905_v36  ;;  %v5641_v10 = vadd.f32 %v5577_v60, %v5481_v1  ;;  %v4377_v8 = vsub.f32 %v11212_v15, %v12498_v47  ;;  %v14816_v60 = vld [vmem:[#allocation103_spill] sm:$0xff] }
 0x638   : > { %7987 = vlog2.f32 %v4906_v12  ;;  %vm5704_vm13 = vcmp.lt.f32.partialorder %v12463_v57, 1e-08  ;;  %v4378_v22 = vsub.f32 %v14612_v27, %v12504_v43  ;;  %v14813_v42 = vsub.f32 %v10738_v55, %v14812_v28  ;;  %v14817_v12 = vld [vmem:[#allocation3_spill] sm:$0xff] }
 0x639   : > { %v14815_v30 = vsub.f32 %v10744_v63, %v14814_v17  ;;  %7989 = vlog2.f32 %v4907_v41  ;;  %vm5705_vm14 = vcmp.lt.f32.partialorder %v12475_v11, 1e-08  ;;  %vm5832_vm15 = vcmp.gt.f32.partialorder %v12463_v57, 1e-08 }
 0x63a   : > { %v4448_v58 = vmul.f32 %v11229_v34, %v14813_v42  ;;  %vm5833_vm1 = vcmp.gt.f32.partialorder %v12475_v11, 1e-08  ;;  %v4450_v2 = vmul.f32 %v11235_v5, %v4377_v8  ;;  %7991 = vlog2.f32 %v3143_v18  ;;  %v14819_v42 = vld [vmem:[#allocation98_spill] sm:$0xff] }
 0x63b   : > { %v4449_v36 = vmul.f32 %v11233_v61, %v14815_v30  ;;  %v4451_v1 = vmul.f32 %v11237_v54, %v4378_v22  ;;  %v7982_v56 = vpop.eup %7981  ;;  %vm5706_vm2 = vcmp.lt.f32.partialorder %v12479_v52, 1e-08  ;;  %vm5707_vm3 = vcmp.lt.f32.partialorder %v12489_v13, 1e-08 }
 0x63c   : > { %v12525_v40 = vadd.f32 %v4448_v58, %v14816_v60  ;;  %vm5834_vm4 = vcmp.gt.f32.partialorder %v12479_v52, 1e-08  ;;  %v12534_v41 = vadd.f32 %v4450_v2, %v14818_v37  ;;  %v7984_v8 = vpop.eup %7983  ;;  %vm5835_vm5 = vcmp.gt.f32.partialorder %v12489_v13, 1e-08  ;;  %v14821_v37 = vld [vmem:[#allocation100_spill] sm:$0xff] }
 0x63d   : > { %v12528_v53 = vadd.f32 %v4449_v36, %v14817_v12  ;;  %v5896_v18 = vsel %vm5832_vm15, %v5640_v50, 0.0  ;;  %v5897_v22 = vsel %vm5833_vm1, %v5641_v10, 0.0  ;;  %v12538_v58 = vadd.f32 %v4451_v1, %v14819_v42  ;;  %v7986_v30 = vpop.eup %7985  ;;  %v14820_v12 = vld [vmem:[#allocation93_spill] sm:$0xff] }
 0x63e   : > { %v4997_v36 = vmul.f32 0.6931472, %v7984_v8  ;;  %v5642_v60 = vadd.f32 %v5578_v31, %v5482_v29  ;;  %v12541_v19 = vmul.f32 0.6931472, %v14820_v12  ;;  %v4640_v21 = vand.u32 2147483647, %v12525_v40  ;;  %v7988_v16 = vpop.eup %7987 }
 0x63f   : > { %v4999_v51 = vmul.f32 0.6931472, %v7986_v30  ;;  %v5643_v2 = vadd.f32 %v5579_v62, %v5483_v48  ;;  %v3227_v59 = vmul.f32 0.6931472, %v14821_v37  ;;  %v4641_v33 = vand.u32 2147483647, %v12528_v53  ;;  %v7990_v50 = vpop.eup %7989 }
 0x640   : > { %v5001_v10 = vmul.f32 0.6931472, %v7988_v16  ;;  %v14822_v1 = vmax.f32 %v12395_v4, 0.0  ;;  %v4642_v8 = vand.u32 2147483647, %v12534_v41  ;;  %v7992_v29 = vpop.eup %7991  ;;  %v14823_v7 = vmax.f32 %v12398_v6, 0.0 }
 0x641   : > { %v4643_v31 = vand.u32 2147483647, %v12538_v58  ;;  %v5003_v12 = vmul.f32 0.6931472, %v7990_v50  ;;  %v4704_v30 = vsub.f32 0.0, %v4640_v21  ;;  %v4705_v48 = vsub.f32 0.0, %v4641_v33 }
 0x642   : > { %v5096_v42 = vadd.f32 %v4997_v36, %v14822_v1  ;;  %v5097_v45 = vadd.f32 %v4999_v51, %v14823_v7  ;;  %v14824_v62 = vmax.f32 %v12401_v24, 0.0  ;;  %v3229_v16 = vmul.f32 0.6931472, %v7982_v56 }
 0x643   : > { %v4706_v46 = vsub.f32 0.0, %v4642_v8  ;;  %v14825_v4 = vmax.f32 %v12405_v0, 0.0  ;;  %v4707_v54 = vsub.f32 0.0, %v4643_v31  ;;  %v4788_v5 = vmul.f32 1.442695, %v4704_v30 }
 0x644   : > { %v5098_v37 = vadd.f32 %v5001_v10, %v14824_v62  ;;  %v5160_v38 = vsub.f32 %v5096_v42, %v14795_v26  ;;  %v5161_v1 = vsub.f32 %v5097_v45, %v14798_v3  ;;  %v3231_v7 = vmul.f32 0.6931472, %v7992_v29  ;;  %v5526_v62 = vld [vmem:[%s11344_s18 + $0x50] sm:$0xff] }
 0x645   : > { %v5099_v36 = vadd.f32 %v5003_v12, %v14825_v4  ;;  %v4790_v6 = vmul.f32 1.442695, %v4705_v48  ;;  %7993 = vpow2.f32 %v4788_v5  ;;  %v4792_v26 = vmul.f32 1.442695, %v4706_v46  ;;  %v14828_v4 = vld [vmem:[#allocation123_spill] sm:$0xff] }
 0x646   : > { %v5162_v50 = vsub.f32 %v5098_v37, %v14800_v35  ;;  %v5768_v21 = vsel %vm5704_vm13, %v5160_v38, 0.0  ;;  %v5769_v51 = vsel %vm5705_vm14, %v5161_v1, 0.0  ;;  %v5898_v38 = vsel %vm5834_vm4, %v5642_v60, 0.0  ;;  %v14830_v1 = vld [vmem:[#allocation127_spill] sm:$0xff] }
 0x647   : > { %v5163_v24 = vsub.f32 %v5099_v36, %v14804_v14  ;;  %v5960_v33 = vadd.f32 %v5896_v18, %v5768_v21  ;;  %v5961_v45 = vadd.f32 %v5897_v22, %v5769_v51  ;;  %7995 = vpow2.f32 %v4790_v6  ;;  %v3064_v14 = vpop.xlane.xlu1 %3063  ;;  %v14832_v21 = vld [vmem:[#allocation10_spill] sm:$0xff] }
 0x648   : > { %v5770_v0 = vsel %vm5706_vm2, %v5162_v50, 0.0  ;;  %v5899_v35 = vsel %vm5835_vm5, %v5643_v2, 0.0  ;;  %v4794_v57 = vmul.f32 1.442695, %v4707_v54  ;;  %v3332_v5 = vsub.f32 %v12541_v19, %v14807_v23 }
 0x649   : > { %v5771_v3 = vsel %vm5707_vm3, %v5163_v24, 0.0  ;;  %v5962_v11 = vadd.f32 %v5898_v38, %v5770_v0  ;;  %v6031_v56 = vadd.f32 %v5961_v45, %v5960_v33  ;;  %7997 = vpow2.f32 %v4792_v26  ;;  %v14834_v24 = vld [vmem:[#allocation122_spill] sm:$0xff]  ;;  %v5527_v0 = vld [vmem:[%s11344_s18 + $0x58] sm:$0xff]  ;;  %v14836_v45 = vld [vmem:[#allocation40_spill] sm:$0xff] }
 0x64a   : > { %v3333_v18 = vsub.f32 %v3227_v59, %v14807_v23  ;;  %v3334_v46 = vsub.f32 %v3229_v16, %v14807_v23  ;;  %v3335_v22 = vsub.f32 %v3231_v7, %v14807_v23  ;;  %7999 = vpow2.f32 %v4794_v57  ;;  %v8210_v38 = vld [vmem:[%s8359_s16 + $0xa0] sm:$0xff] }
 0x64b   : > { %v12579_v52 = vsub.f32 %v12450_v32, %v12443_v39  ;;  %v5963_v13 = vadd.f32 %v5899_v35, %v5771_v3  ;;  %v6032_v60 = vadd.f32 %v6031_v56, %v5962_v11  ;;  %v7994_v2 = vpop.eup %7993  ;;  %v12583_v19 = vmul.f32 1e-08, %v3064_v14  ;;  %v8212_v56 = vld [vmem:[%s8359_s16 + $0xb0] sm:$0xff] }
 0x64c   : > { %v3442_v59 = vmul.f32 %v14731_v25, %v3064_v14  ;;  %v3443_v10 = vmul.f32 %v14757_v44, %v3064_v14  ;;  %v3444_v23 = vmul.f32 %v14694_v9, %v3064_v14  ;;  %8001 = vlog2.f32 %v3064_v14 }
 0x64d   : > { %14826 = vst [vmem:[#allocation132_spill] sm:$0xff] %v12579_v52  ;;  %v7996_v42 = vpop.eup %7995  ;;  %v6033_v8 = vadd.f32 %v6032_v60, %v5963_v13  ;;  %v4896_v32 = vadd.f32 1.0, %v7994_v2  ;;  %v5344_v31 = vsub.f32 %v3332_v5, %v14812_v28  ;;  %v5345_v12 = vsub.f32 %v3333_v18, %v14814_v17  ;;  %v12617_v18 = vld [vmem:[%s8359_s16 + $0xb8] sm:$0xff] }
 0x64e   : > { %14827 = vst [vmem:[#allocation128_spill] sm:$0xff] %v12583_v19  ;;  %v4897_v29 = vadd.f32 1.0, %v7996_v42  ;;  %v5346_v30 = vsub.f32 %v3334_v46, %v12498_v47  ;;  %v5347_v48 = vsub.f32 %v3335_v22, %v12504_v43  ;;  %v12594_v16 = vmul.f32 %v14699_v49, %v3064_v14  ;;  %v8211_v14 = vld [vmem:[%s8359_s16 + $0xa8] sm:$0xff] }
 0x64f   : > { %v7998_v37 = vpop.eup %7997  ;;  %6034 = vadd.xlane.f32.xlu1 %v6033_v8  ;;  %8003 = vlog2.f32 %v4896_v32  ;;  %v14829_v28 = vsub.f32 0.0, %v14828_v4  ;;  %v14831_v17 = vsub.f32 0.0, %v14830_v1  ;;  %v14833_v7 = vsub.f32 0.0, %v14832_v21 }
 0x650   : > { %v8000_v50 = vpop.eup %7999  ;;  %v4898_v43 = vadd.f32 1.0, %v7998_v37  ;;  %8005 = vlog2.f32 %v4897_v29  ;;  %v14835_v51 = vsub.f32 0.0, %v14834_v24  ;;  %v12611_v26 = vadd.f32 %v14836_v45, %v12583_v19  ;;  %v14837_v37 = vld [vmem:[#allocation42_spill] sm:$0xff] }
 0x651   : > { %v5280_v36 = vadd.f32 %v14829_v28, %v12525_v40  ;;  %v5281_v47 = vadd.f32 %v14831_v17, %v12528_v53  ;;  %v5282_v6 = vadd.f32 %v14833_v7, %v12534_v41  ;;  %v4899_v3 = vadd.f32 1.0, %v8000_v50 }
 0x652   : > { %v5283_v33 = vadd.f32 %v14835_v51, %v12538_v58  ;;  %v5408_v35 = vmul.f32 %v8210_v38, %v5344_v31  ;;  %v5568_v57 = vunpack.c.l.bf16 %v5526_v62  ;;  %8007 = vlog2.f32 %v4898_v43  ;;  %v12620_v22 = vpop.eup %8001 }
 0x653   : > { %v5409_v11 = vmul.f32 %v8211_v14, %v5345_v12  ;;  %v5410_v5 = vmul.f32 %v8212_v56, %v5346_v30  ;;  %v5411_v46 = vmul.f32 %v12617_v18, %v5347_v48  ;;  %8009 = vlog2.f32 %v4899_v3  ;;  %v14838_v48 = vld [vmem:[#allocation38_spill] sm:$0xff] }
 0x654   : > { %v5472_v13 = vadd.f32 %v5408_v35, %v5280_v36  ;;  %v5569_v60 = vunpack.c.h.bf16 %v5526_v62  ;;  %v5570_v2 = vunpack.c.l.bf16 %v5527_v0  ;;  %v5571_v31 = vunpack.c.h.bf16 %v5527_v0 }
 0x655   : > { %v5473_v42 = vadd.f32 %v5409_v11, %v5281_v47  ;;  %v5474_v8 = vadd.f32 %v5410_v5, %v5282_v6  ;;  %v5475_v32 = vadd.f32 %v5411_v46, %v5283_v33  ;;  %v8004_v29 = vpop.eup %8003  ;;  %v3177_v12 = vadd.f32 %v14837_v37, %v12583_v19  ;;  %v14839_v46 = vld [vmem:[#allocation238_spill] sm:$0xff] }
 0x656   : > { %v3506_v30 = vadd.f32 %v14836_v45, %v3442_v59  ;;  %v12626_v28 = vadd.f32 %v14837_v37, %v3443_v10  ;;  %v12629_v17 = vadd.f32 %v14838_v48, %v3444_v23  ;;  %v8006_v50 = vpop.eup %8005  ;;  %v4576_v62 = vmax.f32 %v12525_v40, 0.0  ;;  %v14843_v37 = vld [vmem:[#allocation241_spill] sm:$0xff] }
 0x657   : > { %v4577_v36 = vmax.f32 %v12528_v53, 0.0  ;;  %v4578_v47 = vmax.f32 %v12534_v41, 0.0  ;;  %v4981_v43 = vmul.f32 0.6931472, %v8004_v29  ;;  %v4579_v7 = vmax.f32 %v12538_v58, 0.0  ;;  %v14842_v29 = vld [vmem:[#allocation205_spill] sm:$0xff] }
 0x658   : > { %v4983_v6 = vmul.f32 0.6931472, %v8006_v50  ;;  %v5632_v51 = vadd.f32 %v5568_v57, %v5472_v13  ;;  %vm5696_vm6 = vcmp.lt.f32.partialorder %v8210_v38, 1e-08  ;;  %v8008_v59 = vpop.eup %8007  ;;  %v5633_v10 = vadd.f32 %v5569_v60, %v5473_v42  ;;  %v14840_v13 = vld [vmem:[#allocation17_spill] sm:$0xff] }
 0x659   : > { %v5088_v33 = vadd.f32 %v4981_v43, %v4576_v62  ;;  %v5634_v0 = vadd.f32 %v5570_v2, %v5474_v8  ;;  %v5635_v45 = vadd.f32 %v5571_v31, %v5475_v32  ;;  %v8010_v23 = vpop.eup %8009  ;;  %v4985_v3 = vmul.f32 0.6931472, %v8008_v59  ;;  %v14845_v43 = vld [vmem:[#allocation50_spill] sm:$0xff]  ;;  %v14847_v59 = vld [vmem:[#allocation7_spill] sm:$0xff] }
 0x65a   : > { %v5089_v35 = vadd.f32 %v4983_v6, %v4577_v36  ;;  %vm5697_vm7 = vcmp.lt.f32.partialorder %v8211_v14, 1e-08  ;;  %vm5824_vm8 = vcmp.gt.f32.partialorder %v8210_v38, 1e-08  ;;  %v4987_v40 = vmul.f32 0.6931472, %v8010_v23 }
 0x65b   : > { %v5152_v53 = vsub.f32 %v5088_v33, %v14828_v4  ;;  %vm5698_vm9 = vcmp.lt.f32.partialorder %v8212_v56, 1e-08  ;;  %vm5825_vm10 = vcmp.gt.f32.partialorder %v8211_v14, 1e-08  ;;  %v5090_v41 = vadd.f32 %v4985_v3, %v4578_v47  ;;  %v14841_v38 = vld [vmem:[#allocation73_spill] sm:$0xff]  ;;  %v14850_v3 = vld [vmem:[#allocation234_spill] sm:$0xff] }
 0x65c   : > { %v5153_v58 = vsub.f32 %v5089_v35, %v14830_v1  ;;  %vm5699_vm11 = vcmp.lt.f32.partialorder %v12617_v18, 1e-08  ;;  %vm5826_vm12 = vcmp.gt.f32.partialorder %v8212_v56, 1e-08  ;;  %v5091_v57 = vadd.f32 %v4987_v40, %v4579_v7 }
 0x65d   : > { %v5760_v11 = vsel %vm5696_vm6, %v5152_v53, 0.0  ;;  %v5888_v5 = vsel %vm5824_vm8, %v5632_v51, 0.0  ;;  %v3163_v60 = vadd.f32 %v14840_v13, %v14839_v46  ;;  %v5154_v2 = vsub.f32 %v5090_v41, %v14832_v21  ;;  %v14851_v41 = vld [vmem:[#allocation237_spill] sm:$0xff]  ;;  %v14854_v13 = vld [vmem:[#allocation186_spill] sm:$0xff] }
 0x65e   : > { %v5761_v42 = vsel %vm5697_vm7, %v5153_v58, 0.0  ;;  %v5889_v8 = vsel %vm5825_vm10, %v5633_v10, 0.0  ;;  %v5952_v4 = vadd.f32 %v5888_v5, %v5760_v11  ;;  %8011 = vlog2.f32 %v3506_v30  ;;  %v14853_v11 = vld [vmem:[#allocation30_spill] sm:$0xff] }
 0x65f   : > { %v5155_v14 = vsub.f32 %v5091_v57, %v14834_v24  ;;  %vm5827_vm13 = vcmp.gt.f32.partialorder %v12617_v18, 1e-08  ;;  %v5953_v1 = vadd.f32 %v5889_v8, %v5761_v42  ;;  %v5762_v32 = vsel %vm5698_vm9, %v5154_v2, 0.0  ;;  %v14844_v24 = vld [vmem:[#allocation108_spill] sm:$0xff]  ;;  %v14852_v57 = vld [vmem:[#allocation29_spill] sm:$0xff] }
 0x660   : > { %v5890_v31 = vsel %vm5826_vm12, %v5634_v0, 0.0  ;;  %8013 = vlog2.f32 %v14841_v38  ;;  %v12648_v50 = vsub.f32 %v14843_v37, %v14842_v29  ;;  %v5891_v30 = vsel %vm5827_vm13, %v5635_v45, 0.0  ;;  %v14849_v0 = vld [vmem:[#allocation126_spill] sm:$0xff]  ;;  %v14856_v42 = vld [vmem:[#allocation24_spill] sm:$0xff] }
 0x661   : > { %v5763_v21 = vsel %vm5699_vm11, %v5155_v14, 0.0  ;;  %v5954_v62 = vadd.f32 %v5890_v31, %v5762_v32  ;;  %v6021_v36 = vadd.f32 %v5953_v1, %v5952_v4  ;;  %8015 = vlog2.f32 %v3163_v60  ;;  %v14855_v60 = vld [vmem:[#allocation235_spill] sm:$0xff]  ;;  %v14859_v38 = vld [vmem:[#allocation140_spill] sm:$0xff]  ;;  %v14875_v14 = vld [vmem:[#allocation78_spill] sm:$0xff] }
 0x662   : > { %v3685_v47 = vsub.f32 %v14844_v24, %v14842_v29  ;;  %v4397_v56 = vsub.f32 %v11212_v15, %v12648_v50  ;;  %v14846_v7 = vsub.f32 %v10738_v55, %v14845_v43  ;;  %8017 = vlog2.f32 %v12611_v26 }
 0x663   : > { %v5955_v51 = vadd.f32 %v5891_v30, %v5763_v21  ;;  %v6022_v18 = vadd.f32 %v6021_v36, %v5954_v62  ;;  %v14848_v33 = vsub.f32 %v10744_v63, %v14847_v59  ;;  %8019 = vlog2.f32 %v3177_v12 }
 0x664   : > { %v4468_v6 = vmul.f32 %v11229_v34, %v14846_v7  ;;  %v3265_v45 = vmul.f32 0.6931472, %v14849_v0  ;;  %v4398_v23 = vsub.f32 %v14612_v27, %v3685_v47  ;;  %v4470_v35 = vmul.f32 %v14850_v3, %v4397_v56  ;;  %v8012_v40 = vpop.eup %8011  ;;  %v14862_v0 = vld [vmem:[#allocation170_spill] sm:$0xff] }
 0x665   : > { %v4469_v10 = vmul.f32 %v11233_v61, %v14848_v33  ;;  %v6023_v53 = vadd.f32 %v6022_v18, %v5955_v51  ;;  %v3267_v58 = vmul.f32 0.6931472, %v14851_v41  ;;  %v3509_v12 = vadd.f32 %v14854_v13, %v12594_v16 }
 0x666   : > { %v12670_v26 = vadd.f32 %v4468_v6, %v14852_v57  ;;  %v8014_v46 = vpop.eup %8013  ;;  %8021 = vlog2.f32 %v12626_v28  ;;  %v4471_v2 = vmul.f32 %v14855_v60, %v4398_v23  ;;  %v12680_v8 = vadd.f32 %v4470_v35, %v14856_v42  ;;  %v14864_v35 = vld [vmem:[#allocation172_spill] sm:$0xff]  ;;  %v14866_v42 = vld [vmem:[#allocation167_spill] sm:$0xff] }
 0x667   : > { %v12673_v5 = vadd.f32 %v4469_v10, %v14853_v11  ;;  %v8016_v4 = vpop.eup %8015  ;;  %v12686_v1 = vadd.f32 %v14838_v48, %v12583_v19  ;;  %8023 = vlog2.f32 %v12629_v17  ;;  %6024 = vadd.xlane.f32.xlu2 %v6023_v53  ;;  %v3269_v32 = vmul.f32 0.6931472, %v8014_v46 }
 0x668   : > { %v12690_v16 = vmul.f32 0.6931472, %v12620_v22  ;;  %v3271_v28 = vmul.f32 0.6931472, %v8016_v4  ;;  %v3352_v31 = vsub.f32 %v3265_v45, %v14842_v29  ;;  %v12694_v37 = vadd.f32 %v4471_v2, %v14859_v38  ;;  %v12696_v21 = vpop.eup %8017 }
 0x669   : > { %14857 = vst [vmem:[#allocation15_spill] sm:$0xff] %v12686_v1  ;;  %v3353_v62 = vsub.f32 %v3267_v58, %v14842_v29  ;;  %v4660_v48 = vand.u32 2147483647, %v12670_v26  ;;  %v4661_v36 = vand.u32 2147483647, %v12673_v5  ;;  %v12702_v30 = vpop.eup %8019  ;;  %8025 = vlog2.f32 %v3509_v12 }
 0x66a   : > { %14858 = vst [vmem:[#allocation25_spill] sm:$0xff] %v12690_v16  ;;  %v4662_v17 = vand.u32 2147483647, %v12680_v8  ;;  %v3354_v22 = vsub.f32 %v3269_v32, %v14842_v29  ;;  %v3355_v24 = vsub.f32 %v3271_v28, %v14842_v29  ;;  %v4663_v56 = vand.u32 2147483647, %v12694_v37  ;;  %v5536_v29 = vld [vmem:[%s11344_s18 + $0xa0] sm:$0xff] }
 0x66b   : > { %14860 = vst [vmem:[#allocation45_spill] sm:$0xff] %v12696_v21  ;;  %v3627_v7 = vmul.f32 0.6931472, %v8012_v40  ;;  %v4724_v6 = vsub.f32 0.0, %v4660_v48  ;;  %v4725_v51 = vsub.f32 0.0, %v4661_v36  ;;  %v14863_v45 = vsub.f32 0.0, %v14862_v0 }
 0x66c   : > { %14861 = vst [vmem:[#allocation46_spill] sm:$0xff] %v12702_v30  ;;  %v4726_v18 = vsub.f32 0.0, %v4662_v17  ;;  %v8022_v33 = vpop.eup %8021  ;;  %v4727_v10 = vsub.f32 0.0, %v4663_v56  ;;  %v14865_v53 = vsub.f32 0.0, %v14864_v35  ;;  %v5364_v58 = vsub.f32 %v3352_v31, %v14845_v43  ;;  %v14868_v31 = vld [vmem:[#allocation168_spill] sm:$0xff]  ;;  %v12724_v17 = vld [vmem:[%s8359_s16 + $0x140] sm:$0xff] }
 0x66d   : > { %v5300_v23 = vadd.f32 %v14863_v45, %v12670_v26  ;;  %v8024_v57 = vpop.eup %8023  ;;  %v4828_v40 = vmul.f32 1.442695, %v4724_v6  ;;  %v4830_v11 = vmul.f32 1.442695, %v4725_v51  ;;  %v5365_v12 = vsub.f32 %v3353_v62, %v14847_v59  ;;  %v5537_v59 = vld [vmem:[%s11344_s18 + $0xa8] sm:$0xff]  ;;  %v12738_v51 = vpop.xlane.xlu2 %3068 }
 0x66e   : > { %v5301_v41 = vadd.f32 %v14865_v53, %v12673_v5  ;;  %v4832_v46 = vmul.f32 1.442695, %v4726_v18  ;;  %v4834_v2 = vmul.f32 1.442695, %v4727_v10  ;;  %v14867_v4 = vsub.f32 0.0, %v14866_v42  ;;  %v12731_v6 = vld [vmem:[%s8359_s16 + $0x148] sm:$0xff] }
 0x66f   : > { %v5366_v28 = vsub.f32 %v3354_v22, %v12648_v50  ;;  %v5367_v38 = vsub.f32 %v3355_v24, %v3685_v47  ;;  %v3629_v43 = vmul.f32 0.6931472, %v8022_v33  ;;  %8027 = vpow2.f32 %v4828_v40  ;;  %v12728_v62 = vpop.eup %8025  ;;  %v12735_v47 = vld [vmem:[%s8359_s16 + $0x150] sm:$0xff]  ;;  %v12741_v18 = vld [vmem:[%s8359_s16 + $0x158] sm:$0xff] }
 0x670   : > { %v5302_v32 = vadd.f32 %v14867_v4, %v12680_v8  ;;  %v14869_v48 = vsub.f32 0.0, %v14868_v31  ;;  %v5428_v56 = vmul.f32 %v12724_v17, %v5364_v58  ;;  %14870 = vst [vmem:[#allocation200_spill] sm:$0xff] %v12728_v62  ;;  %8029 = vpow2.f32 %v4830_v11 }
 0x671   : > { %v5429_v50 = vmul.f32 %v12731_v6, %v5365_v12  ;;  %v5430_v22 = vmul.f32 %v12735_v47, %v5366_v28  ;;  %v5588_v24 = vunpack.c.l.bf16 %v5536_v29  ;;  %8031 = vpow2.f32 %v4832_v46 }
 0x672   : > { %v5303_v36 = vadd.f32 %v14869_v48, %v12694_v37  ;;  %v5431_v33 = vmul.f32 %v12741_v18, %v5367_v38  ;;  %v5492_v10 = vadd.f32 %v5428_v56, %v5300_v23  ;;  %v5589_v45 = vunpack.c.h.bf16 %v5536_v29 }
 0x673   : > { %8033 = vpow2.f32 %v4834_v2  ;;  %v5493_v53 = vadd.f32 %v5429_v50, %v5301_v41  ;;  %v5494_v58 = vadd.f32 %v5430_v22, %v5302_v32  ;;  %v5590_v40 = vunpack.c.l.bf16 %v5537_v59  ;;  %v14886_v2 = vld [vmem:[#allocation112_spill] sm:$0xff] }
 0x674   : > { %v12744_v11 = vmul.f32 0.6931472, %v8024_v57  ;;  %v12747_v12 = vsub.f32 %v3627_v7, %v12690_v16  ;;  %v5495_v4 = vadd.f32 %v5431_v33, %v5303_v36  ;;  %v5591_v28 = vunpack.c.h.bf16 %v5537_v59  ;;  %v14874_v33 = vld [vmem:[#allocation120_spill] sm:$0xff]  ;;  %v14887_v57 = vld [vmem:[#allocation125_spill] sm:$0xff] }
 0x675   : > { %v12750_v48 = vsub.f32 %v3629_v43, %v12690_v16  ;;  %8035 = vlog2.f32 %v12738_v51  ;;  %v12754_v46 = vmul.f32 1e-08, %v12738_v51  ;;  %v12758_v23 = vmul.f32 %v14731_v25, %v12738_v51  ;;  %v8028_v41 = vpop.eup %8027 }
 0x676   : > { %14871 = vst [vmem:[#allocation203_spill] sm:$0xff] %v12744_v11  ;;  %v4596_v29 = vmax.f32 %v12670_v26, 0.0  ;;  %v8030_v32 = vpop.eup %8029  ;;  %v4916_v38 = vadd.f32 1.0, %v8028_v41  ;;  %v5652_v43 = vadd.f32 %v5588_v24, %v5492_v10  ;;  %v5653_v36 = vadd.f32 %v5589_v45, %v5493_v53  ;;  %v14876_v41 = vld [vmem:[#allocation79_spill] sm:$0xff]  ;;  %v14877_v45 = vld [vmem:[#allocation225_spill] sm:$0xff] }
 0x677   : > { %14872 = vst [vmem:[#allocation204_spill] sm:$0xff] %v12747_v12  ;;  %v5654_v56 = vadd.f32 %v5590_v40, %v5494_v58  ;;  %v8032_v59 = vpop.eup %8031  ;;  %v4917_v50 = vadd.f32 1.0, %v8030_v32  ;;  %v12764_v22 = vadd.f32 %v5591_v28, %v5495_v4  ;;  %vm5844_vm14 = vcmp.gt.f32.partialorder %v12724_v17, 1e-08  ;;  %v14878_v53 = vld [vmem:[#allocation11_spill] sm:$0xff]  ;;  %v14880_v28 = vld [vmem:[#allocation124_spill] sm:$0xff] }
 0x678   : > { %14873 = vst [vmem:[#allocation61_spill] sm:$0xff] %v12750_v48  ;;  %vm5845_vm15 = vcmp.gt.f32.partialorder %v12731_v6, 1e-08  ;;  %v4918_v26 = vadd.f32 1.0, %v8032_v59  ;;  %8037 = vlog2.f32 %v4916_v38  ;;  %v12770_v54 = vsub.f32 %v14875_v14, %v14874_v33  ;;  %v14882_v59 = vld [vmem:[#allocation236_spill] sm:$0xff] }
 0x679   : > { %v8034_v25 = vpop.eup %8033  ;;  %v12774_v24 = vsub.f32 %v14876_v41, %v14874_v33  ;;  %8039 = vlog2.f32 %v4917_v50  ;;  %vm5846_vm1 = vcmp.gt.f32.partialorder %v12735_v47, 1e-08  ;;  %v3155_v58 = vadd.f32 %v14878_v53, %v14877_v45  ;;  %v14884_v41 = vld [vmem:[#allocation75_spill] sm:$0xff] }
 0x67a   : > { %v4919_v10 = vadd.f32 1.0, %v8034_v25  ;;  %8041 = vlog2.f32 %v4918_v26  ;;  %vm5716_vm2 = vcmp.lt.f32.partialorder %v12724_v17, 1e-08  ;;  %v4389_v14 = vsub.f32 %v11212_v15, %v12770_v54  ;;  %v14883_v25 = vld [vmem:[#allocation51_spill] sm:$0xff]  ;;  %v14894_v17 = vld [vmem:[#allocation156_spill] sm:$0xff] }
 0x67b   : > { %v12779_v40 = vpop.eup %8035  ;;  %v4390_v4 = vsub.f32 %v14612_v27, %v12774_v24  ;;  %v14881_v32 = vsub.f32 %v10738_v55, %v14880_v28  ;;  %vm5717_vm3 = vcmp.lt.f32.partialorder %v12731_v6, 1e-08  ;;  %v12792_v50 = vmul.f32 0.6931472, %v14882_v59  ;;  %v14888_v59 = vld [vmem:[#allocation129_spill] sm:$0xff] }
 0x67c   : > { %14879 = vst [vmem:[#allocation202_spill] sm:$0xff] %v12779_v40  ;;  %8043 = vlog2.f32 %v4919_v10  ;;  %v12795_v26 = vmul.f32 0.6931472, %v14883_v25  ;;  %v14885_v45 = vsub.f32 %v10744_v63, %v14884_v41  ;;  %vm5718_vm4 = vcmp.lt.f32.partialorder %v12735_v47, 1e-08 }
 0x67d   : > { %v4460_v38 = vmul.f32 %v11229_v34, %v14881_v32  ;;  %8045 = vlog2.f32 %v14886_v2  ;;  %v4462_v32 = vmul.f32 %v14850_v3, %v4389_v14  ;;  %v4463_v10 = vmul.f32 %v14855_v60, %v4390_v4  ;;  %v14889_v2 = vld [vmem:[#allocation121_spill] sm:$0xff]  ;;  %v14890_v14 = vld [vmem:[#allocation16_spill] sm:$0xff] }
 0x67e   : > { %v4461_v53 = vmul.f32 %v11233_v61, %v14885_v45  ;;  %vm5719_vm5 = vcmp.lt.f32.partialorder %v12741_v18, 1e-08  ;;  %vm5847_vm6 = vcmp.gt.f32.partialorder %v12741_v18, 1e-08  ;;  %8047 = vlog2.f32 %v3155_v58  ;;  %v8038_v45 = vpop.eup %8037 }
 0x67f   : > { %v12806_v7 = vadd.f32 %v4460_v38, %v14887_v57  ;;  %v5908_v30 = vsel %vm5844_vm14, %v5652_v43, 0.0  ;;  %v12816_v21 = vadd.f32 %v4462_v32, %v14889_v2  ;;  %v12819_v4 = vadd.f32 %v4463_v10, %v14890_v14  ;;  %v8040_v38 = vpop.eup %8039 }
 0x680   : > { %v12811_v25 = vadd.f32 %v4461_v53, %v14888_v59  ;;  %v5021_v1 = vmul.f32 0.6931472, %v8038_v45  ;;  %v5909_v58 = vsel %vm5845_vm15, %v5653_v36, 0.0  ;;  %v5910_v53 = vsel %vm5846_vm1, %v5654_v56, 0.0  ;;  %v8042_v11 = vpop.eup %8041 }
 0x681   : > { %v4652_v57 = vand.u32 2147483647, %v12806_v7  ;;  %v5023_v43 = vmul.f32 0.6931472, %v8040_v38  ;;  %v3344_v32 = vsub.f32 %v12792_v50, %v14874_v33  ;;  %v3345_v10 = vsub.f32 %v12795_v26, %v14874_v33 }
 0x682   : > { %v4653_v59 = vand.u32 2147483647, %v12811_v25  ;;  %v4654_v2 = vand.u32 2147483647, %v12816_v21  ;;  %v8044_v14 = vpop.eup %8043  ;;  %v5025_v45 = vmul.f32 0.6931472, %v8042_v11  ;;  %v5108_v16 = vadd.f32 %v5021_v1, %v4596_v29 }
 0x683   : > { %v4655_v36 = vand.u32 2147483647, %v12819_v4  ;;  %v4716_v13 = vsub.f32 0.0, %v4652_v57  ;;  %v8046_v19 = vpop.eup %8045  ;;  %v5027_v56 = vmul.f32 0.6931472, %v8044_v14  ;;  %v14891_v48 = vmax.f32 %v12673_v5, 0.0 }
 0x684   : > { %v4717_v38 = vsub.f32 0.0, %v4653_v59  ;;  %v4718_v12 = vsub.f32 0.0, %v4654_v2  ;;  %v8048_v62 = vpop.eup %8047  ;;  %v14892_v50 = vmax.f32 %v12680_v8, 0.0  ;;  %v5172_v26 = vsub.f32 %v5108_v16, %v14862_v0 }
 0x685   : > { %v5109_v40 = vadd.f32 %v5023_v43, %v14891_v48  ;;  %v3253_v20 = vmul.f32 0.6931472, %v8046_v19  ;;  %v4719_v39 = vsub.f32 0.0, %v4655_v36  ;;  %v14893_v1 = vmax.f32 %v12694_v37, 0.0 }
 0x686   : > { %v5110_v52 = vadd.f32 %v5025_v45, %v14892_v50  ;;  %v3255_v57 = vmul.f32 0.6931472, %v8048_v62  ;;  %v4812_v14 = vmul.f32 1.442695, %v4716_v13  ;;  %v5780_v48 = vsel %vm5716_vm2, %v5172_v26, 0.0  ;;  %v5533_v45 = vld [vmem:[%s11344_s18 + $0x88] sm:$0xff] }
 0x687   : > { %v5111_v11 = vadd.f32 %v5027_v56, %v14893_v1  ;;  %v5173_v29 = vsub.f32 %v5109_v40, %v14864_v35  ;;  %v3346_v59 = vsub.f32 %v3253_v20, %v14874_v33  ;;  %v4814_v8 = vmul.f32 1.442695, %v4717_v38  ;;  %v14898_v56 = vld [vmem:[#allocation151_spill] sm:$0xff] }
 0x688   : > { %v5174_v5 = vsub.f32 %v5110_v52, %v14866_v42  ;;  %v5972_v16 = vadd.f32 %v5908_v30, %v5780_v48  ;;  %v3347_v37 = vsub.f32 %v3255_v57, %v14874_v33  ;;  %8049 = vpow2.f32 %v4812_v14  ;;  %v12883_v1 = vld [vmem:[%s8359_s16 + $0x108] sm:$0xff] }
 0x689   : > { %v5175_v43 = vsub.f32 %v5111_v11, %v14868_v31  ;;  %v5781_v19 = vsel %vm5717_vm3, %v5173_v29, 0.0  ;;  %v4816_v52 = vmul.f32 1.442695, %v4718_v12  ;;  %v5911_v20 = vsel %vm5847_vm6, %v12764_v22, 0.0  ;;  %v14896_v12 = vld [vmem:[#allocation157_spill] sm:$0xff]  ;;  %v5532_v22 = vld [vmem:[%s11344_s18 + $0x80] sm:$0xff] }
 0x68a   : > { %v5782_v0 = vsel %vm5718_vm4, %v5174_v5, 0.0  ;;  %v5973_v13 = vadd.f32 %v5909_v58, %v5781_v19  ;;  %8051 = vpow2.f32 %v4814_v8  ;;  %v4818_v42 = vmul.f32 1.442695, %v4719_v39  ;;  %v12887_v5 = vld [vmem:[%s8359_s16 + $0x110] sm:$0xff] }
 0x68b   : > { %v5783_v35 = vsel %vm5719_vm5, %v5175_v43, 0.0  ;;  %v5974_v30 = vadd.f32 %v5910_v53, %v5782_v0  ;;  %8053 = vpow2.f32 %v4816_v52  ;;  %v14895_v62 = vsub.f32 0.0, %v14894_v17 }
 0x68c   : > { %v6046_v31 = vadd.f32 %v5973_v13, %v5972_v16  ;;  %v5975_v47 = vadd.f32 %v5911_v20, %v5783_v35  ;;  %8055 = vpow2.f32 %v4818_v42  ;;  %v14897_v33 = vsub.f32 0.0, %v14896_v12 }
 0x68d   : > { %v5292_v6 = vadd.f32 %v14895_v62, %v12806_v7  ;;  %v5356_v18 = vsub.f32 %v3344_v32, %v14880_v28  ;;  %v5357_v39 = vsub.f32 %v3345_v10, %v14884_v41  ;;  %v5358_v53 = vsub.f32 %v3346_v59, %v12770_v54  ;;  %v14900_v28 = vld [vmem:[#allocation154_spill] sm:$0xff]  ;;  %v12891_v59 = vld [vmem:[%s8359_s16 + $0x118] sm:$0xff] }
 0x68e   : > { %v5293_v40 = vadd.f32 %v14897_v33, %v12811_v25  ;;  %v6047_v58 = vadd.f32 %v6046_v31, %v5974_v30  ;;  %v5359_v2 = vsub.f32 %v3347_v37, %v12774_v24  ;;  %v12870_v36 = vmul.f32 %v14757_v44, %v12738_v51  ;;  %v12879_v41 = vld [vmem:[%s8359_s16 + $0x100] sm:$0xff]  ;;  %v8050_v10 = vpop.eup %8049 }
 0x68f   : > { %v14899_v38 = vsub.f32 0.0, %v14898_v56  ;;  %v14901_v32 = vsub.f32 0.0, %v14900_v28  ;;  %v5420_v54 = vmul.f32 %v12879_v41, %v5356_v18  ;;  %v5421_v11 = vmul.f32 %v12883_v1, %v5357_v39  ;;  %v14905_v39 = vld [vmem:[#allocation233_spill] sm:$0xff] }
 0x690   : > { %v6048_v24 = vadd.f32 %v6047_v58, %v5975_v47  ;;  %v5580_v44 = vunpack.c.l.bf16 %v5532_v22  ;;  %v5581_v29 = vunpack.c.h.bf16 %v5532_v22  ;;  %v8052_v57 = vpop.eup %8051  ;;  %v4908_v14 = vadd.f32 1.0, %v8050_v10  ;;  %v14904_v58 = vld [vmem:[#allocation27_spill] sm:$0xff] }
 0x691   : > { %v5294_v50 = vadd.f32 %v14899_v38, %v12816_v21  ;;  %v5295_v26 = vadd.f32 %v14901_v32, %v12819_v4  ;;  %v5422_v48 = vmul.f32 %v12887_v5, %v5358_v53  ;;  %v5423_v8 = vmul.f32 %v12891_v59, %v5359_v2  ;;  %v8054_v19 = vpop.eup %8053  ;;  %v14906_v53 = vld [vmem:[#allocation5_spill] sm:$0xff] }
 0x692   : > { %v5582_v43 = vunpack.c.l.bf16 %v5533_v45  ;;  %6049 = vadd.xlane.f32.xlu1 %v6048_v24  ;;  %v4909_v16 = vadd.f32 1.0, %v8052_v57  ;;  %v5484_v37 = vadd.f32 %v5420_v54, %v5292_v6  ;;  %v5485_v0 = vadd.f32 %v5421_v11, %v5293_v40  ;;  %v8056_v52 = vpop.eup %8055  ;;  %v14908_v54 = vld [vmem:[#allocation222_spill] sm:$0xff] }
 0x693   : > { %v5583_v13 = vunpack.c.h.bf16 %v5533_v45  ;;  %v4910_v35 = vadd.f32 1.0, %v8054_v19  ;;  %8057 = vlog2.f32 %v4908_v14  ;;  %v5486_v20 = vadd.f32 %v5422_v48, %v5294_v50  ;;  %v14907_v45 = vld [vmem:[#allocation4_spill] sm:$0xff] }
 0x694   : > { %v5487_v42 = vadd.f32 %v5423_v8, %v5295_v26  ;;  %v4588_v30 = vmax.f32 %v12806_v7, 0.0  ;;  %v4589_v31 = vmax.f32 %v12811_v25, 0.0  ;;  %v4911_v62 = vadd.f32 1.0, %v8056_v52  ;;  %v14903_v7 = vld [vmem:[#allocation142_spill] sm:$0xff]  ;;  %v14910_v14 = vld [vmem:[#allocation228_spill] sm:$0xff] }
 0x695   : > { %8059 = vlog2.f32 %v4909_v16  ;;  %v4590_v47 = vmax.f32 %v12816_v21, 0.0  ;;  %v4591_v33 = vmax.f32 %v12819_v4, 0.0  ;;  %vm5708_vm7 = vcmp.lt.f32.partialorder %v12879_v41, 1e-08  ;;  %v14902_v21 = vld [vmem:[#allocation28_spill] sm:$0xff] }
 0x696   : > { %8061 = vlog2.f32 %v4910_v35  ;;  %v5644_v6 = vadd.f32 %v5580_v44, %v5484_v37  ;;  %v5645_v40 = vadd.f32 %v5581_v29, %v5485_v0  ;;  %vm5709_vm8 = vcmp.lt.f32.partialorder %v12883_v1, 1e-08  ;;  %v14912_v0 = vld [vmem:[#allocation19_spill] sm:$0xff] }
 0x697   : > { %8063 = vlog2.f32 %v4911_v62  ;;  %v5646_v18 = vadd.f32 %v5582_v43, %v5486_v20  ;;  %v5647_v22 = vadd.f32 %v5583_v13, %v5487_v42  ;;  %vm5710_vm9 = vcmp.lt.f32.partialorder %v12887_v5, 1e-08 }
 0x698   : > { %vm5836_vm10 = vcmp.gt.f32.partialorder %v12879_v41, 1e-08  ;;  %vm5711_vm11 = vcmp.lt.f32.partialorder %v12891_v59, 1e-08  ;;  %vm5837_vm12 = vcmp.gt.f32.partialorder %v12883_v1, 1e-08  ;;  %v3171_v25 = vadd.f32 %v14903_v7, %v14902_v21 }
 0x699   : > { %vm5838_vm13 = vcmp.gt.f32.partialorder %v12887_v5, 1e-08  ;;  %v8058_v4 = vpop.eup %8057  ;;  %vm5839_vm14 = vcmp.gt.f32.partialorder %v12891_v59, 1e-08  ;;  %8065 = vlog2.f32 %v14904_v58  ;;  %v12911_v2 = vsub.f32 %v14906_v53, %v14905_v39  ;;  %v14913_v21 = vld [vmem:[#allocation224_spill] sm:$0xff]  ;;  %v14915_v53 = vld [vmem:[#allocation159_spill] sm:$0xff] }
 0x69a   : > { %v12915_v38 = vsub.f32 %v14907_v45, %v14905_v39  ;;  %v5005_v32 = vmul.f32 0.6931472, %v8058_v4  ;;  %v5900_v26 = vsel %vm5836_vm10, %v5644_v6, 0.0  ;;  %8067 = vlog2.f32 %v3171_v25  ;;  %v14914_v25 = vld [vmem:[#allocation155_spill] sm:$0xff] }
 0x69b   : > { %v8060_v50 = vpop.eup %8059  ;;  %v14909_v10 = vsub.f32 %v10738_v55, %v14908_v54  ;;  %v4405_v29 = vsub.f32 %v11212_v15, %v12911_v2  ;;  %v14911_v48 = vsub.f32 %v10744_v63, %v14910_v14  ;;  %v5901_v37 = vsel %vm5837_vm12, %v5645_v40, 0.0 }
 0x69c   : > { %v8062_v11 = vpop.eup %8061  ;;  %v5007_v44 = vmul.f32 0.6931472, %v8060_v50  ;;  %v4406_v57 = vsub.f32 %v14612_v27, %v12915_v38  ;;  %v5100_v16 = vadd.f32 %v5005_v32, %v4588_v30  ;;  %v3281_v13 = vmul.f32 0.6931472, %v14912_v0 }
 0x69d   : > { %v4476_v24 = vmul.f32 %v11229_v34, %v14909_v10  ;;  %v4477_v8 = vmul.f32 %v11233_v61, %v14911_v48  ;;  %v8064_v43 = vpop.eup %8063  ;;  %v5009_v19 = vmul.f32 0.6931472, %v8062_v11  ;;  %v4478_v20 = vmul.f32 %v14850_v3, %v4405_v29  ;;  %v14917_v11 = vld [vmem:[#allocation152_spill] sm:$0xff] }
 0x69e   : > { %v5011_v52 = vmul.f32 0.6931472, %v8064_v43  ;;  %v5101_v35 = vadd.f32 %v5007_v44, %v4589_v31  ;;  %v4479_v42 = vmul.f32 %v14855_v60, %v4406_v57  ;;  %v5164_v6 = vsub.f32 %v5100_v16, %v14894_v17  ;;  %v14916_v31 = vld [vmem:[#allocation149_spill] sm:$0xff] }
 0x69f   : > { %v5102_v62 = vadd.f32 %v5009_v19, %v4590_v47  ;;  %v3283_v7 = vmul.f32 0.6931472, %v14913_v21  ;;  %v12937_v4 = vadd.f32 %v4476_v24, %v14914_v25  ;;  %v8066_v30 = vpop.eup %8065  ;;  %v12941_v45 = vadd.f32 %v4477_v8, %v14915_v53  ;;  %v14920_v21 = vld [vmem:[#allocation185_spill] sm:$0xff] }
 0x6a0   : > { %v5103_v58 = vadd.f32 %v5011_v52, %v4591_v33  ;;  %v5165_v40 = vsub.f32 %v5101_v35, %v14896_v12  ;;  %v12944_v50 = vadd.f32 %v4478_v20, %v14916_v31  ;;  %v8068_v32 = vpop.eup %8067  ;;  %v5772_v17 = vsel %vm5708_vm7, %v5164_v6, 0.0  ;;  %v14918_v35 = vld [vmem:[#allocation184_spill] sm:$0xff] }
 0x6a1   : > { %v5166_v47 = vsub.f32 %v5102_v62, %v14898_v56  ;;  %v3285_v10 = vmul.f32 0.6931472, %v8066_v30  ;;  %v12950_v24 = vadd.f32 %v4479_v42, %v14917_v11  ;;  %v5964_v44 = vadd.f32 %v5900_v26, %v5772_v17  ;;  %v14922_v11 = vld [vmem:[#allocation39_spill] sm:$0xff] }
 0x6a2   : > { %v5167_v33 = vsub.f32 %v5103_v58, %v14900_v28  ;;  %v5773_v12 = vsel %vm5709_vm8, %v5165_v40, 0.0  ;;  %v3287_v29 = vmul.f32 0.6931472, %v8068_v32  ;;  %v5902_v56 = vsel %vm5838_vm13, %v5646_v18, 0.0 }
 0x6a3   : > { %v5774_v57 = vsel %vm5710_vm9, %v5166_v47, 0.0  ;;  %v5903_v41 = vsel %vm5839_vm14, %v5647_v22, 0.0  ;;  %v5965_v48 = vadd.f32 %v5901_v37, %v5773_v12  ;;  %v3360_v28 = vsub.f32 %v3281_v13, %v14905_v39 }
 0x6a4   : > { %v5775_v8 = vsel %vm5711_vm11, %v5167_v33, 0.0  ;;  %v3361_v1 = vsub.f32 %v3283_v7, %v14905_v39  ;;  %v3362_v26 = vsub.f32 %v3285_v10, %v14905_v39  ;;  %v5966_v43 = vadd.f32 %v5902_v56, %v5774_v57  ;;  %v5540_v10 = vld [vmem:[%s11344_s18 + $0xc0] sm:$0xff]  ;;  %v14923_v33 = vld [vmem:[#allocation177_spill] sm:$0xff] }
 0x6a5   : > { %v6036_v19 = vadd.f32 %v5965_v48, %v5964_v44  ;;  %v4668_v16 = vand.u32 2147483647, %v12937_v4  ;;  %v4669_v5 = vand.u32 2147483647, %v12941_v45  ;;  %v5967_v18 = vadd.f32 %v5903_v41, %v5775_v8  ;;  %v12997_v48 = vld [vmem:[%s8359_s16 + $0x188] sm:$0xff] }
 0x6a6   : > { %v3363_v0 = vsub.f32 %v3287_v29, %v14905_v39  ;;  %v4670_v22 = vand.u32 2147483647, %v12944_v50  ;;  %v4671_v59 = vand.u32 2147483647, %v12950_v24  ;;  %v14919_v20 = vsub.f32 0.0, %v14918_v35 }
 0x6a7   : > { %v6037_v37 = vadd.f32 %v6036_v19, %v5966_v43  ;;  %v4732_v13 = vsub.f32 0.0, %v4668_v16  ;;  %v4733_v52 = vsub.f32 0.0, %v4669_v5  ;;  %v14921_v7 = vsub.f32 0.0, %v14920_v21  ;;  %v13006_v43 = vld [vmem:[%s8359_s16 + $0x198] sm:$0xff] }
 0x6a8   : > { %v5308_v42 = vadd.f32 %v14919_v20, %v12937_v4  ;;  %v4734_v62 = vsub.f32 0.0, %v4670_v22  ;;  %v4735_v6 = vsub.f32 0.0, %v4671_v59  ;;  %v5372_v39 = vsub.f32 %v3360_v28, %v14908_v54  ;;  %v5541_v28 = vld [vmem:[%s11344_s18 + $0xc8] sm:$0xff] }
 0x6a9   : > { %v5309_v25 = vadd.f32 %v14921_v7, %v12941_v45  ;;  %v6038_v30 = vadd.f32 %v6037_v37, %v5967_v18  ;;  %v4844_v58 = vmul.f32 1.442695, %v4732_v13  ;;  %v4846_v40 = vmul.f32 1.442695, %v4733_v52 }
 0x6aa   : > { %v5373_v53 = vsub.f32 %v3361_v1, %v14910_v14  ;;  %v4848_v31 = vmul.f32 1.442695, %v4734_v62  ;;  %v4850_v32 = vmul.f32 1.442695, %v4735_v6  ;;  %v5374_v47 = vsub.f32 %v3362_v26, %v12911_v2  ;;  %v14925_v14 = vld [vmem:[#allocation180_spill] sm:$0xff]  ;;  %v14927_v2 = vld [vmem:[#allocation191_spill] sm:$0xff] }
 0x6ab   : > { %v5375_v17 = vsub.f32 %v3363_v0, %v12915_v38  ;;  %v3180_v54 = vadd.f32 %v14922_v11, %v12754_v46  ;;  %6039 = vadd.xlane.f32.xlu2 %v6038_v30  ;;  %8069 = vpow2.f32 %v4844_v58  ;;  %v14924_v12 = vsub.f32 0.0, %v14923_v33  ;;  %v12993_v38 = vld [vmem:[%s8359_s16 + $0x180] sm:$0xff]  ;;  %v13002_v1 = vld [vmem:[%s8359_s16 + $0x190] sm:$0xff] }
 0x6ac   : > { %v14926_v29 = vsub.f32 0.0, %v14925_v14  ;;  %v3181_v56 = vadd.f32 %v14927_v2, %v12754_v46  ;;  %8071 = vpow2.f32 %v4846_v40  ;;  %v5436_v41 = vmul.f32 %v12993_v38, %v5372_v39 }
 0x6ad   : > { %v5310_v44 = vadd.f32 %v14924_v12, %v12944_v50  ;;  %v5437_v8 = vmul.f32 %v12997_v48, %v5373_v53  ;;  %8073 = vpow2.f32 %v4848_v31  ;;  %v5438_v26 = vmul.f32 %v13002_v1, %v5374_v47  ;;  %v14929_v47 = vld [vmem:[#allocation229_spill] sm:$0xff] }
 0x6ae   : > { %v5311_v57 = vadd.f32 %v14926_v29, %v12950_v24  ;;  %v5439_v19 = vmul.f32 %v13006_v43, %v5375_v17  ;;  %v5596_v16 = vunpack.c.l.bf16 %v5540_v10  ;;  %8075 = vpow2.f32 %v4850_v32 }
 0x6af   : > { %v5500_v5 = vadd.f32 %v5436_v41, %v5308_v42  ;;  %v5501_v18 = vadd.f32 %v5437_v8, %v5309_v25  ;;  %v5597_v0 = vunpack.c.h.bf16 %v5540_v10  ;;  %v5502_v22 = vadd.f32 %v5438_v26, %v5310_v44  ;;  %v14932_v44 = vld [vmem:[#allocation20_spill] sm:$0xff] }
 0x6b0   : > { %v5503_v59 = vadd.f32 %v5439_v19, %v5311_v57  ;;  %v5598_v37 = vunpack.c.l.bf16 %v5541_v28  ;;  %v5599_v13 = vunpack.c.h.bf16 %v5541_v28  ;;  %8077 = vlog2.f32 %v3180_v54  ;;  %v14931_v54 = vld [vmem:[#allocation136_spill] sm:$0xff]  ;;  %v14936_v19 = vld [vmem:[#allocation226_spill] sm:$0xff] }
 0x6b1   : > { %v13011_v52 = vmul.f32 %v14694_v9, %v12738_v51  ;;  %v13015_v20 = vmul.f32 %v14699_v49, %v12738_v51  ;;  %v13019_v62 = vadd.f32 %v14922_v11, %v12758_v23  ;;  %v8070_v42 = vpop.eup %8069  ;;  %8079 = vlog2.f32 %v3181_v56  ;;  %v14930_v11 = vld [vmem:[#allocation14_spill] sm:$0xff]  ;;  %v14933_v56 = vld [vmem:[#allocation109_spill] sm:$0xff] }
 0x6b2   : > { %v13023_v6 = vadd.f32 %v14927_v2, %v12870_v36  ;;  %v4604_v7 = vmax.f32 %v12937_v4, 0.0  ;;  %v4605_v25 = vmax.f32 %v12941_v45, 0.0  ;;  %v8072_v9 = vpop.eup %8071  ;;  %v4606_v39 = vmax.f32 %v12944_v50, 0.0  ;;  %v14928_v4 = vld [vmem:[#allocation18_spill] sm:$0xff] }
 0x6b3   : > { %v4607_v49 = vmax.f32 %v12950_v24, 0.0  ;;  %v4924_v51 = vadd.f32 1.0, %v8070_v42  ;;  %v5660_v30 = vadd.f32 %v5596_v16, %v5500_v5  ;;  %v8074_v58 = vpop.eup %8073  ;;  %v4925_v23 = vadd.f32 1.0, %v8072_v9  ;;  %v14941_v42 = vld [vmem:[#allocation105_spill] sm:$0xff] }
 0x6b4   : > { %v5661_v40 = vadd.f32 %v5597_v0, %v5501_v18  ;;  %v5662_v53 = vadd.f32 %v5598_v37, %v5502_v22  ;;  %v13029_v31 = vadd.f32 %v5599_v13, %v5503_v59  ;;  %v8076_v32 = vpop.eup %8075  ;;  %v4926_v36 = vadd.f32 1.0, %v8074_v58  ;;  %v14938_v18 = vld [vmem:[#allocation22_spill] sm:$0xff]  ;;  %v14939_v22 = vld [vmem:[#allocation12_spill] sm:$0xff]  ;;  %v14940_v37 = vld [vmem:[#allocation145_spill] sm:$0xff] }
 0x6b5   : > { %8081 = vlog2.f32 %v4924_v51  ;;  %vm5852_vm15 = vcmp.gt.f32.partialorder %v12993_v38, 1e-08  ;;  %v13034_v17 = vsub.f32 %v14929_v47, %v14928_v4  ;;  %v4927_v10 = vadd.f32 1.0, %v8076_v32  ;;  %v14942_v58 = vld [vmem:[#allocation148_spill] sm:$0xff] }
 0x6b6   : > { %8083 = vlog2.f32 %v4925_v23  ;;  %v3167_v12 = vadd.f32 %v14931_v54, %v14930_v11  ;;  %v13040_v29 = vsub.f32 %v14932_v44, %v14928_v4  ;;  %v13042_v57 = vpop.eup %8077  ;;  %vm5724_vm1 = vcmp.lt.f32.partialorder %v12993_v38, 1e-08 }
 0x6b7   : > { %8085 = vlog2.f32 %v4926_v36  ;;  %vm5853_vm2 = vcmp.gt.f32.partialorder %v12997_v48, 1e-08  ;;  %v4401_v2 = vsub.f32 %v11212_v15, %v13034_v17  ;;  %v14934_v41 = vsub.f32 %v10738_v55, %v14933_v56  ;;  %v13052_v28 = vpop.eup %8079 }
 0x6b8   : > { %14935 = vst [vmem:[#allocation195_spill] sm:$0xff] %v13052_v28  ;;  %8087 = vlog2.f32 %v4927_v10  ;;  %vm5725_vm3 = vcmp.lt.f32.partialorder %v12997_v48, 1e-08  ;;  %vm5854_vm4 = vcmp.gt.f32.partialorder %v13002_v1, 1e-08  ;;  %v4402_v26 = vsub.f32 %v14612_v27, %v13040_v29  ;;  %v14943_v10 = vld [vmem:[#allocation143_spill] sm:$0xff] }
 0x6b9   : > { %v4472_v8 = vmul.f32 %v11229_v34, %v14934_v41  ;;  %v14937_v16 = vsub.f32 %v10744_v63, %v14936_v19  ;;  %vm5726_vm5 = vcmp.lt.f32.partialorder %v13002_v1, 1e-08  ;;  %v13064_v0 = vmul.f32 0.6931472, %v14938_v18  ;;  %v14944_v41 = vld [vmem:[#allocation144_spill] sm:$0xff]  ;;  %v14945_v1 = vld [vmem:[#allocation175_spill] sm:$0xff] }
 0x6ba   : > { %8089 = vlog2.f32 %v14939_v22  ;;  %v4474_v59 = vmul.f32 %v14850_v3, %v4401_v2  ;;  %vm5727_vm6 = vcmp.lt.f32.partialorder %v13006_v43, 1e-08  ;;  %vm5855_vm7 = vcmp.gt.f32.partialorder %v13006_v43, 1e-08 }
 0x6bb   : > { %v4473_v5 = vmul.f32 %v11233_v61, %v14937_v16  ;;  %v13069_v13 = vadd.f32 %v4472_v8, %v14940_v37  ;;  %v13074_v9 = vmul.f32 0.6931472, %v14941_v42  ;;  %8091 = vlog2.f32 %v3167_v12  ;;  %v8082_v32 = vpop.eup %8081 }
 0x6bc   : > { %v4475_v51 = vmul.f32 %v14855_v60, %v4402_v26  ;;  %v5916_v36 = vsel %vm5852_vm15, %v5660_v30, 0.0  ;;  %v5917_v47 = vsel %vm5853_vm2, %v5661_v40, 0.0  ;;  %v13085_v11 = vadd.f32 %v4474_v59, %v14943_v10  ;;  %v8084_v44 = vpop.eup %8083 }
 0x6bd   : > { %v13078_v23 = vadd.f32 %v4473_v5, %v14942_v58  ;;  %v4664_v54 = vand.u32 2147483647, %v13069_v13  ;;  %v5037_v2 = vmul.f32 0.6931472, %v8082_v32  ;;  %v5918_v12 = vsel %vm5854_vm4, %v5662_v53, 0.0  ;;  %v8086_v16 = vpop.eup %8085 }
 0x6be   : > { %v13091_v8 = vadd.f32 %v4475_v51, %v14944_v41  ;;  %v5039_v30 = vmul.f32 0.6931472, %v8084_v44  ;;  %v3356_v40 = vsub.f32 %v13064_v0, %v14928_v4  ;;  %v4666_v5 = vand.u32 2147483647, %v13085_v11  ;;  %v8088_v22 = vpop.eup %8087 }
 0x6bf   : > { %v4665_v26 = vand.u32 2147483647, %v13078_v23  ;;  %v4728_v18 = vsub.f32 0.0, %v4664_v54  ;;  %v5041_v59 = vmul.f32 0.6931472, %v8086_v16  ;;  %v5116_v37 = vadd.f32 %v5037_v2, %v4604_v7 }
 0x6c0   : > { %v3357_v42 = vsub.f32 %v13074_v9, %v14928_v4  ;;  %v4667_v53 = vand.u32 2147483647, %v13091_v8  ;;  %v8090_v51 = vpop.eup %8089  ;;  %v5043_v58 = vmul.f32 0.6931472, %v8088_v22  ;;  %v5117_v32 = vadd.f32 %v5039_v30, %v4605_v25 }
 0x6c1   : > { %v4729_v10 = vsub.f32 0.0, %v4665_v26  ;;  %v4730_v44 = vsub.f32 0.0, %v4666_v5  ;;  %v8092_v41 = vpop.eup %8091  ;;  %v5118_v0 = vadd.f32 %v5041_v59, %v4606_v39  ;;  %v5180_v54 = vsub.f32 %v5116_v37, %v14918_v35 }
 0x6c2   : > { %v3277_v16 = vmul.f32 0.6931472, %v8090_v51  ;;  %v4731_v7 = vsub.f32 0.0, %v4667_v53  ;;  %v5119_v9 = vadd.f32 %v5043_v58, %v4607_v49  ;;  %v5181_v2 = vsub.f32 %v5117_v32, %v14920_v21  ;;  %v5539_v32 = vld [vmem:[%s11344_s18 + $0xb8] sm:$0xff] }
 0x6c3   : > { %v3279_v28 = vmul.f32 0.6931472, %v8092_v41  ;;  %v4836_v22 = vmul.f32 1.442695, %v4728_v18  ;;  %v5182_v45 = vsub.f32 %v5118_v0, %v14923_v33  ;;  %v5788_v25 = vsel %vm5724_vm1, %v5180_v54, 0.0  ;;  %v14947_v18 = vld [vmem:[#allocation176_spill] sm:$0xff] }
 0x6c4   : > { %v3358_v26 = vsub.f32 %v3277_v16, %v14928_v4  ;;  %v4838_v50 = vmul.f32 1.442695, %v4729_v10  ;;  %v5183_v39 = vsub.f32 %v5119_v9, %v14925_v14  ;;  %v5789_v35 = vsel %vm5725_vm3, %v5181_v2, 0.0  ;;  %v14949_v10 = vld [vmem:[#allocation173_spill] sm:$0xff]  ;;  %v14951_v0 = vld [vmem:[#allocation174_spill] sm:$0xff]  ;;  %v13147_v16 = vld [vmem:[%s8359_s16 + $0x168] sm:$0xff] }
 0x6c5   : > { %v5980_v30 = vadd.f32 %v5916_v36, %v5788_v25  ;;  %v3359_v24 = vsub.f32 %v3279_v28, %v14928_v4  ;;  %v5790_v21 = vsel %vm5726_vm5, %v5182_v45, 0.0  ;;  %v5981_v49 = vadd.f32 %v5917_v47, %v5789_v35  ;;  %v13143_v54 = vld [vmem:[%s8359_s16 + $0x160] sm:$0xff]  ;;  %v13155_v25 = vld [vmem:[%s8359_s16 + $0x178] sm:$0xff] }
 0x6c6   : > { %8093 = vpow2.f32 %v4836_v22  ;;  %v4840_v33 = vmul.f32 1.442695, %v4730_v44  ;;  %v5791_v38 = vsel %vm5727_vm6, %v5183_v39, 0.0  ;;  %v5919_v14 = vsel %vm5855_vm7, %v13029_v31, 0.0  ;;  %v5538_v31 = vld [vmem:[%s11344_s18 + $0xb0] sm:$0xff] }
 0x6c7   : > { %8095 = vpow2.f32 %v4838_v50  ;;  %v4842_v48 = vmul.f32 1.442695, %v4731_v7  ;;  %v5982_v36 = vadd.f32 %v5918_v12, %v5790_v21  ;;  %v6056_v5 = vadd.f32 %v5981_v49, %v5980_v30  ;;  %v13151_v22 = vld [vmem:[%s8359_s16 + $0x170] sm:$0xff] }
 0x6c8   : > { %8097 = vpow2.f32 %v4840_v33  ;;  %v14946_v4 = vsub.f32 0.0, %v14945_v1  ;;  %v5983_v47 = vadd.f32 %v5919_v14, %v5791_v38  ;;  %v14948_v59 = vsub.f32 0.0, %v14947_v18 }
 0x6c9   : > { %8099 = vpow2.f32 %v4842_v48  ;;  %v5368_v43 = vsub.f32 %v3356_v40, %v14933_v56  ;;  %v6057_v53 = vadd.f32 %v6056_v5, %v5982_v36  ;;  %v5369_v12 = vsub.f32 %v3357_v42, %v14936_v19  ;;  %v14953_v48 = vld [vmem:[#allocation41_spill] sm:$0xff]  ;;  %v14954_v5 = vld [vmem:[#allocation192_spill] sm:$0xff] }
 0x6ca   : > { %v5304_v28 = vadd.f32 %v14946_v4, %v13069_v13  ;;  %v5305_v37 = vadd.f32 %v14948_v59, %v13078_v23  ;;  %v5370_v51 = vsub.f32 %v3358_v26, %v13034_v17  ;;  %v5371_v58 = vsub.f32 %v3359_v24, %v13040_v29 }
 0x6cb   : > { %8101 = vlog2.f32 %v13019_v62  ;;  %v14950_v44 = vsub.f32 0.0, %v14949_v10  ;;  %v14952_v56 = vsub.f32 0.0, %v14951_v0  ;;  %v5432_v19 = vmul.f32 %v13143_v54, %v5368_v43 }
 0x6cc   : > { %v8094_v17 = vpop.eup %8093  ;;  %v6058_v42 = vadd.f32 %v6057_v53, %v5983_v47  ;;  %v5433_v29 = vmul.f32 %v13147_v16, %v5369_v12  ;;  %v5592_v7 = vunpack.c.l.bf16 %v5538_v31  ;;  %v5593_v62 = vunpack.c.h.bf16 %v5538_v31 }
 0x6cd   : > { %v5306_v41 = vadd.f32 %v14950_v44, %v13085_v11  ;;  %v5307_v40 = vadd.f32 %v14952_v56, %v13091_v8  ;;  %v8096_v9 = vpop.eup %8095  ;;  %v4920_v2 = vadd.f32 1.0, %v8094_v17  ;;  %v5434_v45 = vmul.f32 %v13151_v22, %v5370_v51 }
 0x6ce   : > { %v5435_v26 = vmul.f32 %v13155_v25, %v5371_v58  ;;  %v5594_v50 = vunpack.c.l.bf16 %v5539_v32  ;;  %v8098_v39 = vpop.eup %8097  ;;  %6059 = vadd.xlane.f32.xlu0 %v6058_v42  ;;  %v4921_v35 = vadd.f32 1.0, %v8096_v9  ;;  %v5496_v30 = vadd.f32 %v5432_v19, %v5304_v28  ;;  %v14958_v58 = vld [vmem:[#allocation107_spill] sm:$0xff] }
 0x6cf   : > { %v5497_v24 = vadd.f32 %v5433_v29, %v5305_v37  ;;  %v5595_v21 = vunpack.c.h.bf16 %v5539_v32  ;;  %v8100_v49 = vpop.eup %8099  ;;  %v4922_v33 = vadd.f32 1.0, %v8098_v39  ;;  %8103 = vlog2.f32 %v4920_v2  ;;  %v14959_v32 = vld [vmem:[#allocation26_spill] sm:$0xff] }
 0x6d0   : > { %v5498_v38 = vadd.f32 %v5434_v45, %v5306_v41  ;;  %v5499_v14 = vadd.f32 %v5435_v26, %v5307_v40  ;;  %v13160_v36 = vadd.f32 %v14953_v48, %v13011_v52  ;;  %v13164_v4 = vadd.f32 %v14954_v5, %v13015_v20  ;;  %v14960_v41 = vld [vmem:[#allocation31_spill] sm:$0xff] }
 0x6d1   : > { %v4923_v47 = vadd.f32 1.0, %v8100_v49  ;;  %8105 = vlog2.f32 %v4921_v35  ;;  %v13166_v59 = vpop.eup %8101  ;;  %v4600_v28 = vmax.f32 %v13069_v13, 0.0  ;;  %v4601_v37 = vmax.f32 %v13078_v23, 0.0  ;;  %v14955_v13 = vld [vmem:[#allocation218_spill] sm:$0xff]  ;;  %v14956_v23 = vld [vmem:[#allocation153_spill] sm:$0xff]  ;;  %v14963_v35 = vld [vmem:[#allocation132_spill] sm:$0xff] }
 0x6d2   : > { %v4602_v43 = vmax.f32 %v13085_v11, 0.0  ;;  %8107 = vlog2.f32 %v4922_v33  ;;  %v4603_v31 = vmax.f32 %v13091_v8, 0.0  ;;  %v5656_v52 = vadd.f32 %v5592_v7, %v5496_v30  ;;  %v14957_v8 = vld [vmem:[#allocation32_spill] sm:$0xff] }
 0x6d3   : > { %8109 = vlog2.f32 %v4923_v47  ;;  %vm5720_vm8 = vcmp.lt.f32.partialorder %v13143_v54, 1e-08  ;;  %v5657_v53 = vadd.f32 %v5593_v62, %v5497_v24  ;;  %v5658_v20 = vadd.f32 %v5594_v50, %v5498_v38  ;;  %v14961_v62 = vld [vmem:[#allocation131_spill] sm:$0xff] }
 0x6d4   : > { %v5659_v12 = vadd.f32 %v5595_v21, %v5499_v14  ;;  %vm5721_vm9 = vcmp.lt.f32.partialorder %v13147_v16, 1e-08  ;;  %vm5722_vm10 = vcmp.lt.f32.partialorder %v13151_v22, 1e-08  ;;  %vm5723_vm11 = vcmp.lt.f32.partialorder %v13155_v25, 1e-08 }
 0x6d5   : > { %vm5848_vm12 = vcmp.gt.f32.partialorder %v13143_v54, 1e-08  ;;  %v3175_v11 = vadd.f32 %v14956_v23, %v14955_v13  ;;  %v8104_v51 = vpop.eup %8103  ;;  %vm5849_vm13 = vcmp.gt.f32.partialorder %v13147_v16, 1e-08  ;;  %8111 = vlog2.f32 %v14957_v8  ;;  %v14965_v13 = vld [vmem:[#allocation227_spill] sm:$0xff] }
 0x6d6   : > { %v13183_v44 = vsub.f32 %v14959_v32, %v14958_v58  ;;  %v13187_v56 = vsub.f32 %v14960_v41, %v14958_v58  ;;  %v5029_v19 = vmul.f32 0.6931472, %v8104_v51  ;;  %vm5850_vm14 = vcmp.gt.f32.partialorder %v13151_v22, 1e-08  ;;  %v14966_v8 = vld [vmem:[#allocation111_spill] sm:$0xff]  ;;  %v14967_v41 = vld [vmem:[#allocation164_spill] sm:$0xff] }
 0x6d7   : > { %v8106_v40 = vpop.eup %8105  ;;  %vm5851_vm15 = vcmp.gt.f32.partialorder %v13155_v25, 1e-08  ;;  %8113 = vlog2.f32 %v3175_v11  ;;  %v14962_v9 = vsub.f32 %v10738_v55, %v14961_v62  ;;  %v5912_v39 = vsel %vm5848_vm12, %v5656_v52, 0.0 }
 0x6d8   : > { %v8108_v17 = vpop.eup %8107  ;;  %v5031_v42 = vmul.f32 0.6931472, %v8106_v40  ;;  %v4409_v29 = vsub.f32 %v11212_v15, %v13183_v44  ;;  %v4410_v7 = vsub.f32 %v14612_v27, %v13187_v56  ;;  %v5112_v50 = vadd.f32 %v5029_v19, %v4600_v28 }
 0x6d9   : > { %v4480_v2 = vmul.f32 %v11229_v34, %v14962_v9  ;;  %v8110_v45 = vpop.eup %8109  ;;  %v5033_v26 = vmul.f32 0.6931472, %v8108_v17  ;;  %v14964_v30 = vsub.f32 %v10744_v63, %v14963_v35  ;;  %v5913_v28 = vsel %vm5849_vm13, %v5657_v53, 0.0  ;;  %v14969_v53 = vld [vmem:[#allocation161_spill] sm:$0xff] }
 0x6da   : > { %v5035_v21 = vmul.f32 0.6931472, %v8110_v45  ;;  %v5113_v49 = vadd.f32 %v5031_v42, %v4601_v37  ;;  %v4482_v33 = vmul.f32 %v14850_v3, %v4409_v29  ;;  %v4483_v38 = vmul.f32 %v14855_v60, %v4410_v7  ;;  %v14970_v7 = vld [vmem:[#allocation162_spill] sm:$0xff] }
 0x6db   : > { %v4481_v24 = vmul.f32 %v11233_v61, %v14964_v30  ;;  %v5114_v14 = vadd.f32 %v5033_v26, %v4602_v43  ;;  %v5176_v47 = vsub.f32 %v5112_v50, %v14945_v1  ;;  %v3289_v23 = vmul.f32 0.6931472, %v14965_v13  ;;  %v8112_v52 = vpop.eup %8111  ;;  %v14968_v43 = vld [vmem:[#allocation165_spill] sm:$0xff] }
 0x6dc   : > { %v5115_v11 = vadd.f32 %v5035_v21, %v4603_v31  ;;  %v5177_v51 = vsub.f32 %v5113_v49, %v14947_v18  ;;  %v3291_v32 = vmul.f32 0.6931472, %v14966_v8  ;;  %v13214_v37 = vadd.f32 %v4480_v2, %v14967_v41  ;;  %v13231_v2 = vpop.permute.xlu0 %6299 }
 0x6dd   : > { %v8114_v40 = vpop.eup %8113  ;;  %v5178_v19 = vsub.f32 %v5114_v14, %v14949_v10  ;;  %v5784_v1 = vsel %vm5720_vm8, %v5176_v47, 0.0  ;;  %v13220_v17 = vadd.f32 %v4481_v24, %v14968_v43  ;;  %v13223_v42 = vadd.f32 %v4482_v33, %v14969_v53  ;;  %v14972_v43 = vld [vmem:[#allocation204_spill] sm:$0xff] }
 0x6de   : > { %v5179_v31 = vsub.f32 %v5115_v11, %v14951_v0  ;;  %v5785_v18 = vsel %vm5721_vm9, %v5177_v51, 0.0  ;;  %v5976_v29 = vadd.f32 %v5912_v39, %v5784_v1  ;;  %v13229_v9 = vadd.f32 %v4483_v38, %v14970_v7 }
 0x6df   : > { %8115 = vlog2.f32 %v13023_v6  ;;  %v5786_v10 = vsel %vm5722_vm10, %v5178_v19, 0.0  ;;  %v5914_v54 = vsel %vm5850_vm14, %v5658_v20, 0.0  ;;  %v5977_v45 = vadd.f32 %v5913_v28, %v5785_v18 }
 0x6e0   : > { %v5787_v0 = vsel %vm5723_vm11, %v5179_v31, 0.0  ;;  %v5915_v16 = vsel %vm5851_vm15, %v5659_v12, 0.0  ;;  %v3293_v26 = vmul.f32 0.6931472, %v8112_v52  ;;  %v3295_v50 = vmul.f32 0.6931472, %v8114_v40 }
 0x6e1   : > { %v5978_v39 = vadd.f32 %v5914_v54, %v5786_v10  ;;  %v6051_v30 = vadd.f32 %v5977_v45, %v5976_v29  ;;  %v4672_v24 = vand.u32 2147483647, %v13214_v37  ;;  %v4673_v6 = vand.u32 2147483647, %v13220_v17  ;;  %v14971_v40 = vld [vmem:[#allocation200_spill] sm:$0xff] }
 0x6e2   : > { %v3364_v21 = vsub.f32 %v3289_v23, %v14958_v58  ;;  %v3365_v22 = vsub.f32 %v3291_v32, %v14958_v58  ;;  %v4674_v20 = vand.u32 2147483647, %v13223_v42  ;;  %v4675_v49 = vand.u32 2147483647, %v13229_v9  ;;  %v5542_v45 = vld [vmem:[%s11344_s18 + $0xd0] sm:$0xff] }
 0x6e3   : > { %v5979_v33 = vadd.f32 %v5915_v16, %v5787_v0  ;;  %v6052_v38 = vadd.f32 %v6051_v30, %v5978_v39  ;;  %v4736_v25 = vsub.f32 0.0, %v4672_v24  ;;  %v4737_v12 = vsub.f32 0.0, %v4673_v6  ;;  %v14978_v16 = vld [vmem:[#allocation61_spill] sm:$0xff]  ;;  %v13279_v39 = vld [vmem:[%s8359_s16 + $0x1a0] sm:$0xff] }
 0x6e4   : > { %8117 = vlog2.f32 %v13160_v36  ;;  %v3366_v14 = vsub.f32 %v3293_v26, %v14958_v58  ;;  %v4738_v47 = vsub.f32 0.0, %v4674_v20  ;;  %v4739_v28 = vsub.f32 0.0, %v4675_v49  ;;  %v13292_v49 = vld [vmem:[%s8359_s16 + $0x1a8] sm:$0xff] }
 0x6e5   : > { %v8116_v13 = vpop.eup %8115  ;;  %v6053_v52 = vadd.f32 %v6052_v38, %v5979_v33  ;;  %v3367_v23 = vsub.f32 %v3295_v50, %v14958_v58  ;;  %v4852_v11 = vmul.f32 1.442695, %v4736_v25  ;;  %v4854_v51 = vmul.f32 1.442695, %v4737_v12  ;;  %v6325_v58 = vpop.xlane.xlu0 %6324  ;;  %v13296_v38 = vld [vmem:[%s11344_s18 + $0xd8] sm:$0xff] }
 0x6e6   : > { %8119 = vlog2.f32 %v13164_v4  ;;  %v4856_v8 = vmul.f32 1.442695, %v4738_v47  ;;  %v4858_v32 = vmul.f32 1.442695, %v4739_v28  ;;  %v5376_v41 = vsub.f32 %v3364_v21, %v14961_v62  ;;  %v14973_v4 = vld [vmem:[#allocation202_spill] sm:$0xff]  ;;  %v14974_v62 = vld [vmem:[#allocation189_spill] sm:$0xff] }
 0x6e7   : > { %v13254_v19 = vmul.f32 0.6931472, %v14971_v40  ;;  %v3635_v36 = vmul.f32 0.6931472, %v13166_v59  ;;  %6054 = vadd.xlane.f32.xlu2 %v6053_v52  ;;  %8121 = vpow2.f32 %v4852_v11  ;;  %v5377_v1 = vsub.f32 %v3365_v22, %v14963_v35  ;;  %v14976_v59 = vld [vmem:[#allocation190_spill] sm:$0xff]  ;;  %v14981_v21 = vld [vmem:[#allocation188_spill] sm:$0xff] }
 0x6e8   : > { %v4411_v53 = vsub.f32 %v10738_v55, %v14972_v43  ;;  %v13261_v31 = vmul.f32 0.6931472, %v14973_v4  ;;  %8123 = vpow2.f32 %v4854_v51  ;;  %v14975_v18 = vsub.f32 0.0, %v14974_v62  ;;  %v13303_v52 = vld [vmem:[%s8359_s16 + $0x1b0] sm:$0xff]  ;;  %v13307_v11 = vld [vmem:[%s8359_s16 + $0x1b8] sm:$0xff] }
 0x6e9   : > { %8125 = vpow2.f32 %v4856_v8  ;;  %v14977_v7 = vsub.f32 0.0, %v14976_v59  ;;  %v5378_v35 = vsub.f32 %v3366_v14, %v13183_v44  ;;  %v5379_v54 = vsub.f32 %v3367_v23, %v13187_v56  ;;  %v14979_v44 = vld [vmem:[#allocation187_spill] sm:$0xff] }
 0x6ea   : > { %v5312_v29 = vadd.f32 %v14975_v18, %v13214_v37  ;;  %v13272_v0 = vpop.eup %8117  ;;  %v4412_v26 = vsub.f32 %v10744_v63, %v14978_v16  ;;  %v13276_v50 = vmul.f32 0.6931472, %v8116_v13  ;;  %8127 = vpow2.f32 %v4858_v32 }
 0x6eb   : > { %v5313_v10 = vadd.f32 %v14977_v7, %v13220_v17  ;;  %v5440_v30 = vmul.f32 %v13279_v39, %v5376_v41  ;;  %v13283_v24 = vsub.f32 %v3635_v36, %v13261_v31  ;;  %v14980_v56 = vsub.f32 0.0, %v14979_v44  ;;  %v14984_v36 = vld [vmem:[#allocation186_spill] sm:$0xff] }
 0x6ec   : > { %v14982_v22 = vsub.f32 0.0, %v14981_v21  ;;  %v5441_v33 = vmul.f32 %v13292_v49, %v5377_v1  ;;  %v13298_v25 = vpop.eup %8119  ;;  %v4608_v12 = vmax.f32 %v13214_v37, 0.0  ;;  %v4609_v14 = vmax.f32 %v13220_v17, 0.0 }
 0x6ed   : > { %v5314_v6 = vadd.f32 %v14980_v56, %v13223_v42  ;;  %v5504_v47 = vadd.f32 %v5440_v30, %v5312_v29  ;;  %v5600_v28 = vunpack.c.l.bf16 %v5542_v45  ;;  %v8122_v13 = vpop.eup %8121  ;;  %v5442_v23 = vmul.f32 %v13303_v52, %v5378_v35  ;;  %v6334_v35 = vpop.xlane.xlu0 %6333 }
 0x6ee   : > { %v5315_v20 = vadd.f32 %v14982_v22, %v13229_v9  ;;  %v5443_v51 = vmul.f32 %v13307_v11, %v5379_v54  ;;  %v5505_v8 = vadd.f32 %v5441_v33, %v5313_v10  ;;  %v5601_v32 = vunpack.c.h.bf16 %v5542_v45  ;;  %v8124_v41 = vpop.eup %8123 }
 0x6ef   : > { %v4928_v1 = vadd.f32 1.0, %v8122_v13  ;;  %v5602_v4 = vunpack.c.l.bf16 %v13296_v38  ;;  %v8126_v18 = vpop.eup %8125  ;;  %v4929_v29 = vadd.f32 1.0, %v8124_v41  ;;  %v5506_v7 = vadd.f32 %v5442_v23, %v5314_v6  ;;  %v14983_v13 = vld [vmem:[#allocation128_spill] sm:$0xff]  ;;  %v14985_v6 = vld [vmem:[#allocation25_spill] sm:$0xff] }
 0x6f0   : > { %v5507_v10 = vadd.f32 %v5443_v51, %v5315_v20  ;;  %vm6092_vm1 = vcmask 7168   ;;  %v8128_v54 = vpop.eup %8127  ;;  %v4930_v45 = vadd.f32 1.0, %v8126_v18  ;;  %v5603_v30 = vunpack.c.h.bf16 %v13296_v38  ;;  %v14986_v20 = vld [vmem:[#allocation203_spill] sm:$0xff] }
 0x6f1   : > { %8129 = vlog2.f32 %v4928_v1  ;;  %v5664_v56 = vadd.f32 %v5600_v28, %v5504_v47  ;;  %6367 = vst.msk [vmem:[%s13314_s22 + $0x10] sm:$0xff] %vm6092_vm1, %v6325_v58  ;;  %v4931_v22 = vadd.f32 1.0, %v8128_v54  ;;  %v5665_v33 = vadd.f32 %v5601_v32, %v5505_v8  ;;  %v14987_v51 = vld [vmem:[#allocation15_spill] sm:$0xff] }
 0x6f2   : > { %8131 = vlog2.f32 %v4929_v29  ;;  %6370 = vst.msk [vmem:[%s13314_s22 + $0x28] sm:$0xff] %vm6092_vm1, %v6334_v35  ;;  %v3179_v41 = vadd.f32 %v14984_v36, %v14983_v13  ;;  %vm5728_vm2 = vcmp.lt.f32.partialorder %v13279_v39, 1e-08  ;;  %v13329_v23 = vsub.f32 %v14986_v20, %v14985_v6  ;;  %v14988_v32 = vld [vmem:[#allocation179_spill] sm:$0xff] }
 0x6f3   : > { %8133 = vlog2.f32 %v4930_v45  ;;  %v13333_v38 = vsub.f32 %v13254_v19, %v14985_v6  ;;  %v4484_v58 = vmul.f32 %v11229_v34, %v4411_v53  ;;  %v5666_v47 = vadd.f32 %v5602_v4, %v5506_v7  ;;  %v14990_v4 = vld [vmem:[#allocation45_spill] sm:$0xff] }
 0x6f4   : > { %8135 = vlog2.f32 %v4931_v22  ;;  %vm5729_vm3 = vcmp.lt.f32.partialorder %v13292_v49, 1e-08  ;;  %vm5856_vm4 = vcmp.gt.f32.partialorder %v13279_v39, 1e-08  ;;  %v4485_v28 = vmul.f32 %v11233_v61, %v4412_v26  ;;  %v14989_v26 = vld [vmem:[#allocation182_spill] sm:$0xff] }
 0x6f5   : > { %vm5730_vm5 = vcmp.lt.f32.partialorder %v13303_v52, 1e-08  ;;  %8137 = vlog2.f32 %v14987_v51  ;;  %v4413_v8 = vsub.f32 %v11212_v15, %v13329_v23  ;;  %v4414_v19 = vsub.f32 %v14612_v27, %v13333_v38 }
 0x6f6   : > { %v13346_v53 = vadd.f32 %v4484_v58, %v14988_v32  ;;  %vm5731_vm6 = vcmp.lt.f32.partialorder %v13307_v11, 1e-08  ;;  %vm5857_vm7 = vcmp.gt.f32.partialorder %v13292_v49, 1e-08  ;;  %vm5858_vm8 = vcmp.gt.f32.partialorder %v13303_v52, 1e-08 }
 0x6f7   : > { %8139 = vlog2.f32 %v3179_v41  ;;  %v13352_v36 = vadd.f32 %v4485_v28, %v14989_v26  ;;  %v8130_v1 = vpop.eup %8129  ;;  %v13355_v18 = vmul.f32 0.6931472, %v14990_v4  ;;  %v4486_v29 = vmul.f32 %v14850_v3, %v4413_v8  ;;  %v6343_v41 = vpop.xlane.xlu0 %6342  ;;  %v14991_v8 = vld [vmem:[#allocation169_spill] sm:$0xff]  ;;  %v14992_v32 = vld [vmem:[#allocation171_spill] sm:$0xff]  ;;  %v14993_v4 = vld [vmem:[#allocation46_spill] sm:$0xff] }
 0x6f8   : > { %v4487_v7 = vmul.f32 %v14855_v60, %v4414_v19  ;;  %v4676_v35 = vand.u32 2147483647, %v13346_v53  ;;  %v8132_v54 = vpop.eup %8131  ;;  %v5045_v45 = vmul.f32 0.6931472, %v8130_v1  ;;  %v5667_v22 = vadd.f32 %v5603_v30, %v5507_v10  ;;  %6373 = vst.msk [vmem:[%s13314_s22 + $0x40] sm:$0xff] %vm6092_vm1, %v6343_v41 }
 0x6f9   : > { %vm5859_vm9 = vcmp.gt.f32.partialorder %v13307_v11, 1e-08  ;;  %v5920_v13 = vsel %vm5856_vm4, %v5664_v56, 0.0  ;;  %v4677_v20 = vand.u32 2147483647, %v13352_v36  ;;  %v8134_v58 = vpop.eup %8133  ;;  %v5921_v51 = vsel %vm5857_vm7, %v5665_v33, 0.0 }
 0x6fa   : > { %v5047_v28 = vmul.f32 0.6931472, %v8132_v54  ;;  %v13369_v19 = vadd.f32 %v4486_v29, %v14991_v8  ;;  %v13372_v10 = vadd.f32 %v4487_v7, %v14992_v32  ;;  %v8136_v30 = vpop.eup %8135  ;;  %v5049_v26 = vmul.f32 0.6931472, %v8134_v58 }
 0x6fb   : > { %v5120_v56 = vadd.f32 %v5045_v45, %v4608_v12  ;;  %v5922_v1 = vsel %vm5858_vm8, %v5666_v47, 0.0  ;;  %v3299_v54 = vmul.f32 0.6931472, %v14993_v4  ;;  %v8138_v40 = vpop.eup %8137  ;;  %v5051_v33 = vmul.f32 0.6931472, %v8136_v30 }
 0x6fc   : > { %v5121_v41 = vadd.f32 %v5047_v28, %v4609_v14  ;;  %v3368_v29 = vsub.f32 %v13355_v18, %v14985_v6  ;;  %v4740_v7 = vsub.f32 0.0, %v4676_v35  ;;  %v14994_v58 = vmax.f32 %v13223_v42, 0.0 }
 0x6fd   : > { %v8140_v8 = vpop.eup %8139  ;;  %v5184_v37 = vsub.f32 %v5120_v56, %v14974_v62  ;;  %v4678_v12 = vand.u32 2147483647, %v13369_v19  ;;  %v4741_v47 = vsub.f32 0.0, %v4677_v20  ;;  %v14995_v45 = vmax.f32 %v13229_v9, 0.0 }
 0x6fe   : > { %v5122_v32 = vadd.f32 %v5049_v26, %v14994_v58  ;;  %v5185_v30 = vsub.f32 %v5121_v41, %v14976_v59  ;;  %v3301_v17 = vmul.f32 0.6931472, %v8138_v40  ;;  %v4679_v14 = vand.u32 2147483647, %v13372_v10 }
 0x6ff   : > { %v5123_v4 = vadd.f32 %v5051_v33, %v14995_v45  ;;  %v5792_v42 = vsel %vm5728_vm2, %v5184_v37, 0.0  ;;  %v3369_v35 = vsub.f32 %v3299_v54, %v14985_v6  ;;  %v4742_v62 = vsub.f32 0.0, %v4678_v12  ;;  %v6352_v56 = vpop.xlane.xlu0 %6351  ;;  %v6296_v37 = vpop.permute.xlu2 %6295 }
 0x700   : > { %v5186_v18 = vsub.f32 %v5122_v32, %v14979_v44  ;;  %v5793_v9 = vsel %vm5729_vm3, %v5185_v30, 0.0  ;;  %v5984_v20 = vadd.f32 %v5920_v13, %v5792_v42  ;;  %v3303_v26 = vmul.f32 0.6931472, %v8140_v8  ;;  %6376 = vst.msk [vmem:[%s13314_s22 + $0x58] sm:$0xff] %vm6092_vm1, %v6352_v56  ;;  %v14996_v8 = vld [vmem:[#allocation52_spill] sm:$0xff]  ;;  %v5544_v30 = vld [vmem:[%s11344_s18 + $0xe0] sm:$0xff] }
 0x701   : > { %v5187_v28 = vsub.f32 %v5123_v4, %v14981_v21  ;;  %v5985_v40 = vadd.f32 %v5921_v51, %v5793_v9  ;;  %v4743_v33 = vsub.f32 0.0, %v4679_v14  ;;  %v4860_v44 = vmul.f32 1.442695, %v4740_v7  ;;  %v5545_v9 = vld [vmem:[%s11344_s18 + $0xe8] sm:$0xff]  ;;  %v13446_v56 = vld [vmem:[%s8359_s16 + $0x1c0] sm:$0xff] }
 0x702   : > { %v5794_v59 = vsel %vm5730_vm5, %v5186_v18, 0.0  ;;  %v3370_v54 = vsub.f32 %v3301_v17, %v14985_v6  ;;  %v4862_v21 = vmul.f32 1.442695, %v4741_v47  ;;  %v4864_v41 = vmul.f32 1.442695, %v4742_v62  ;;  %v14999_v18 = vld [vmem:[#allocation199_spill] sm:$0xff] }
 0x703   : > { %v5795_v39 = vsel %vm5731_vm6, %v5187_v28, 0.0  ;;  %v5986_v49 = vadd.f32 %v5922_v1, %v5794_v59  ;;  %v6061_v58 = vadd.f32 %v5985_v40, %v5984_v20  ;;  %8141 = vpow2.f32 %v4860_v44 }
 0x704   : > { %v4866_v13 = vmul.f32 1.442695, %v4743_v33  ;;  %v13407_v52 = vsub.f32 %v13276_v50, %v13261_v31  ;;  %v5923_v51 = vsel %vm5859_vm9, %v5667_v22, 0.0  ;;  %v3371_v7 = vsub.f32 %v3303_v26, %v14985_v6  ;;  %v15003_v26 = vld [vmem:[#allocation49_spill] sm:$0xff] }
 0x705   : > { %8143 = vpow2.f32 %v4862_v21  ;;  %v13413_v32 = vmul.f32 0.6931472, %v14996_v8  ;;  %v5987_v12 = vadd.f32 %v5923_v51, %v5795_v39  ;;  %v6062_v1 = vadd.f32 %v6061_v58, %v5986_v49  ;;  %v13450_v21 = vld [vmem:[%s8359_s16 + $0x1c8] sm:$0xff]  ;;  %v13454_v49 = vld [vmem:[%s8359_s16 + $0x1d0] sm:$0xff]  ;;  %v13458_v8 = vld [vmem:[%s8359_s16 + $0x1d8] sm:$0xff] }
 0x706   : > { %8145 = vpow2.f32 %v4864_v41  ;;  %v13417_v47 = vadd.f32 %v14953_v48, %v12754_v46  ;;  %v3639_v50 = vmul.f32 0.6931472, %v13272_v0  ;;  %v5380_v11 = vsub.f32 %v3368_v29, %v14972_v43 }
 0x707   : > { %8147 = vpow2.f32 %v4866_v13  ;;  %v3641_v6 = vmul.f32 0.6931472, %v13298_v25  ;;  %v6063_v22 = vadd.f32 %v6062_v1, %v5987_v12  ;;  %v5381_v45 = vsub.f32 %v3369_v35, %v14978_v16  ;;  %v14997_v25 = vld [vmem:[#allocation198_spill] sm:$0xff] }
 0x708   : > { %v5382_v4 = vsub.f32 %v3370_v54, %v13329_v23  ;;  %v4415_v17 = vsub.f32 %v10738_v55, %v13283_v24  ;;  %v4416_v48 = vsub.f32 %v10744_v63, %v13407_v52  ;;  %v6356_v0 = vsel %vm1786_vm0, %v6296_v37, 0.0  ;;  %v15001_v35 = vld [vmem:[#allocation194_spill] sm:$0xff] }
 0x709   : > { %v5383_v43 = vsub.f32 %v3371_v7, %v13333_v38  ;;  %v8142_v29 = vpop.eup %8141  ;;  %6064 = vadd.xlane.f32.xlu1 %v6063_v22  ;;  %v4612_v16 = vmax.f32 %v13346_v53, 0.0  ;;  %v14998_v23 = vsub.f32 0.0, %v14997_v25  ;;  %v15000_v55 = vsub.f32 0.0, %v14999_v18 }
 0x70a   : > { %v15002_v62 = vsub.f32 0.0, %v15001_v35  ;;  %v4932_v20 = vadd.f32 1.0, %v8142_v29  ;;  %v15004_v59 = vsub.f32 0.0, %v15003_v26  ;;  %v5444_v33 = vmul.f32 %v13446_v56, %v5380_v11  ;;  %v6000_v29 = vpop.xlane.xlu0 %5999 }
 0x70b   : > { %v5316_v14 = vadd.f32 %v14998_v23, %v13346_v53  ;;  %v5317_v42 = vadd.f32 %v15000_v55, %v13352_v36  ;;  %v8144_v38 = vpop.eup %8143  ;;  %v5604_v44 = vunpack.c.l.bf16 %v5544_v30  ;;  %v5445_v41 = vmul.f32 %v13450_v21, %v5381_v45 }
 0x70c   : > { %v5318_v28 = vadd.f32 %v15002_v62, %v13369_v19  ;;  %v5319_v40 = vadd.f32 %v15004_v59, %v13372_v10  ;;  %v8146_v39 = vpop.eup %8145  ;;  %v4933_v54 = vadd.f32 1.0, %v8144_v38  ;;  %v5446_v58 = vmul.f32 %v13454_v49, %v5382_v4 }
 0x70d   : > { %v5605_v13 = vunpack.c.h.bf16 %v5544_v30  ;;  %v8148_v51 = vpop.eup %8147  ;;  %v4934_v7 = vadd.f32 1.0, %v8146_v39  ;;  %8149 = vlog2.f32 %v4932_v20  ;;  %v5447_v37 = vmul.f32 %v13458_v8, %v5383_v43 }
 0x70e   : > { %v5606_v12 = vunpack.c.l.bf16 %v5545_v9  ;;  %v4935_v1 = vadd.f32 1.0, %v8148_v51  ;;  %8151 = vlog2.f32 %v4933_v54  ;;  %v5508_v11 = vadd.f32 %v5444_v33, %v5316_v14 }
 0x70f   : > { %v5607_v22 = vunpack.c.h.bf16 %v5545_v9  ;;  %8153 = vlog2.f32 %v4934_v7  ;;  %v5509_v45 = vadd.f32 %v5445_v41, %v5317_v42  ;;  %v5510_v23 = vadd.f32 %v5446_v58, %v5318_v28 }
 0x710   : > { %v5511_v55 = vadd.f32 %v5447_v37, %v5319_v40  ;;  %v4613_v4 = vmax.f32 %v13352_v36, 0.0  ;;  %v4614_v30 = vmax.f32 %v13369_v19, 0.0  ;;  %8155 = vlog2.f32 %v4935_v1  ;;  %v15005_v40 = vld [vmem:[#allocation37_spill] sm:$0xff] }
 0x711   : > { %vm5732_vm10 = vcmp.lt.f32.partialorder %v13446_v56, 1e-08  ;;  %v4615_v43 = vmax.f32 %v13372_v10, 0.0  ;;  %vm5733_vm11 = vcmp.lt.f32.partialorder %v13450_v21, 1e-08  ;;  %v6076_v14 = vsub.f32 0.0, %v6000_v29  ;;  %6357 = vadd.xlane.f32.xlu1 %v6356_v0 }
 0x712   : > { %vm5734_vm12 = vcmp.lt.f32.partialorder %v13454_v49, 1e-08  ;;  %v5668_v36 = vadd.f32 %v5604_v44, %v5508_v11  ;;  %v13474_v19 = vsub.f32 %v3639_v50, %v13261_v31  ;;  %v13477_v42 = vsub.f32 %v3641_v6, %v13261_v31  ;;  %v15008_v11 = vld [vmem:[#allocation35_spill] sm:$0xff] }
 0x713   : > { %v4488_v62 = vmul.f32 %v11229_v34, %v4415_v17  ;;  %v8150_v28 = vpop.eup %8149  ;;  %v5669_v9 = vadd.f32 %v5605_v13, %v5509_v45  ;;  %v5670_v38 = vadd.f32 %v5606_v12, %v5510_v23  ;;  %v5671_v20 = vadd.f32 %v5607_v22, %v5511_v55  ;;  %6093 = vst.msk [vmem:[%s13468_s25] sm:$0xff] %vm6092_vm1, %v6076_v14  ;;  %v13513_v12 = vpop.permute.xlu1 %6297 }
 0x714   : > { %vm5735_vm13 = vcmp.lt.f32.partialorder %v13458_v8, 1e-08  ;;  %v8152_v10 = vpop.eup %8151  ;;  %v5053_v59 = vmul.f32 0.6931472, %v8150_v28  ;;  %vm5860_vm14 = vcmp.gt.f32.partialorder %v13446_v56, 1e-08  ;;  %v4417_v50 = vsub.f32 %v11212_v15, %v13474_v19 }
 0x715   : > { %v4418_v6 = vsub.f32 %v14612_v27, %v13477_v42  ;;  %v8154_v0 = vpop.eup %8153  ;;  %v5055_v34 = vmul.f32 0.6931472, %v8152_v10  ;;  %vm5861_vm15 = vcmp.gt.f32.partialorder %v13450_v21, 1e-08  ;;  %v4489_v17 = vmul.f32 %v11233_v61, %v4416_v48 }
 0x716   : > { %v13494_v33 = vadd.f32 %v4488_v62, %v15005_v40  ;;  %v8156_v44 = vpop.eup %8155  ;;  %v5057_v39 = vmul.f32 0.6931472, %v8154_v0  ;;  %v5124_v15 = vadd.f32 %v5053_v59, %v4612_v16  ;;  %v4490_v54 = vmul.f32 %v14850_v3, %v4417_v50  ;;  %v15006_v3 = vld [vmem:[#allocation43_spill] sm:$0xff] }
 0x717   : > { %v4491_v27 = vmul.f32 %v14855_v60, %v4418_v6  ;;  %v5059_v41 = vmul.f32 0.6931472, %v8156_v44  ;;  %v5125_v58 = vadd.f32 %v5055_v34, %v4613_v4  ;;  %vm5862_vm2 = vcmp.gt.f32.partialorder %v13454_v49, 1e-08  ;;  %v15007_v60 = vld [vmem:[#allocation183_spill] sm:$0xff] }
 0x718   : > { %v5924_v63 = vsel %vm5860_vm14, %v5668_v36, 0.0  ;;  %v5126_v61 = vadd.f32 %v5057_v39, %v4614_v30  ;;  %v5188_v48 = vsub.f32 %v5124_v15, %v14997_v25  ;;  %v5925_v13 = vsel %vm5861_vm15, %v5669_v9, 0.0  ;;  %v6015_v15 = vpop.xlane.xlu0 %6014 }
 0x719   : > { %v3183_v51 = vadd.f32 %v14954_v5, %v12754_v46  ;;  %v5127_v53 = vadd.f32 %v5059_v41, %v4615_v43  ;;  %v5189_v16 = vsub.f32 %v5125_v58, %v14999_v18  ;;  %v13508_v7 = vadd.f32 %v4489_v17, %v15006_v3  ;;  %v15009_v43 = vld [vmem:[#allocation62_spill] sm:$0xff]  ;;  %v15011_v41 = vld [vmem:[#allocation195_spill] sm:$0xff] }
 0x71a   : > { %v13511_v37 = vadd.f32 %v4490_v54, %v15007_v60  ;;  %v5190_v1 = vsub.f32 %v5126_v61, %v15001_v35  ;;  %v5796_v25 = vsel %vm5732_vm10, %v5188_v48, 0.0  ;;  %v13519_v22 = vadd.f32 %v4491_v27, %v15008_v11  ;;  %v15013_v48 = vld [vmem:[#allocation59_spill] sm:$0xff] }
 0x71b   : > { %v4680_v46 = vand.u32 2147483647, %v13494_v33  ;;  %v5191_v5 = vsub.f32 %v5127_v53, %v15003_v26  ;;  %v5797_v18 = vsel %vm5733_vm11, %v5189_v16, 0.0  ;;  %v5988_v29 = vadd.f32 %v5924_v63, %v5796_v25  ;;  %v6319_v63 = vpop.xlane.xlu2 %6318 }
 0x71c   : > { %8157 = vlog2.f32 %v13417_v47  ;;  %v5798_v45 = vsel %vm5734_vm12, %v5190_v1, 0.0  ;;  %vm5863_vm3 = vcmp.gt.f32.partialorder %v13458_v8, 1e-08  ;;  %v5989_v35 = vadd.f32 %v5925_v13, %v5797_v18  ;;  %6365 = vst.msk [vmem:[%s13314_s22] sm:$0xff] %vm6092_vm1, %v6319_v63 }
 0x71d   : > { %8159 = vlog2.f32 %v3183_v51  ;;  %v5799_v56 = vsel %vm5735_vm13, %v5191_v5, 0.0  ;;  %v5926_v23 = vsel %vm5862_vm2, %v5670_v38, 0.0  ;;  %v4681_v26 = vand.u32 2147483647, %v13508_v7  ;;  %v15010_v38 = vld [vmem:[#allocation67_spill] sm:$0xff] }
 0x71e   : > { %v4682_v21 = vand.u32 2147483647, %v13511_v37  ;;  %v5990_v55 = vadd.f32 %v5926_v23, %v5798_v45  ;;  %v6066_v4 = vadd.f32 %v5989_v35, %v5988_v29  ;;  %v4683_v47 = vand.u32 2147483647, %v13519_v22 }
 0x71f   : > { %v4744_v30 = vsub.f32 0.0, %v4680_v46  ;;  %v4275_v14 = vmul.f32 0.6931472, %v15009_v43  ;;  %v5927_v36 = vsel %vm5863_vm3, %v5671_v20, 0.0  ;;  %v4745_v62 = vsub.f32 0.0, %v4681_v26  ;;  %v6322_v20 = vpop.xlane.xlu1 %6321 }
 0x720   : > { %v4746_v28 = vsub.f32 0.0, %v4682_v21  ;;  %v5991_v9 = vadd.f32 %v5927_v36, %v5799_v56  ;;  %v6067_v8 = vadd.f32 %v6066_v4, %v5990_v55  ;;  %v4747_v10 = vsub.f32 0.0, %v4683_v47  ;;  %6366 = vst.msk [vmem:[%s13314_s22 + $0x8] sm:$0xff] %vm6092_vm1, %v6322_v20  ;;  %v6030_v4 = vpop.xlane.xlu0 %6029 }
 0x721   : > { %v4868_v59 = vmul.f32 1.442695, %v4744_v30  ;;  %v4277_v50 = vmul.f32 0.6931472, %v15010_v38  ;;  %v4870_v6 = vmul.f32 1.442695, %v4745_v62 }
 0x722   : > { %v8158_v49 = vpop.eup %8157  ;;  %v4872_v0 = vmul.f32 1.442695, %v4746_v28  ;;  %v6068_v17 = vadd.f32 %v6067_v8, %v5991_v9  ;;  %v3305_v44 = vmul.f32 0.6931472, %v13042_v57  ;;  %v4874_v39 = vmul.f32 1.442695, %v4747_v10 }
 0x723   : > { %v8160_v34 = vpop.eup %8159  ;;  %8161 = vpow2.f32 %v4868_v59  ;;  %v3833_v54 = vmax.f32 %v15008_v11, 0.0  ;;  %v3830_v27 = vmax.f32 %v15005_v40, 0.0  ;;  %v3307_v58 = vmul.f32 0.6931472, %v15011_v41  ;;  %v5546_v28 = vld [vmem:[%s11344_s18 + $0xf0] sm:$0xff] }
 0x724   : > { %8163 = vpow2.f32 %v4870_v6  ;;  %v15012_v61 = vmax.f32 %v15007_v60, 0.0  ;;  %v3831_v57 = vmax.f32 %v15006_v3, 0.0  ;;  %6069 = vadd.xlane.f32.xlu2 %v6068_v17  ;;  %v3309_v51 = vmul.f32 0.6931472, %v8158_v49  ;;  %v5547_v49 = vld [vmem:[%s11344_s18 + $0xf8] sm:$0xff]  ;;  %v8239_v6 = vld [vmem:[%s8359_s16 + $0x1e8] sm:$0xff] }
 0x725   : > { %8165 = vpow2.f32 %v4872_v0  ;;  %v13553_v40 = vadd.f32 %v13413_v32, %v3833_v54  ;;  %v13555_v53 = vadd.f32 %v4275_v14, %v3830_v27  ;;  %v3311_v16 = vmul.f32 0.6931472, %v8160_v34  ;;  %v6328_v14 = vpop.xlane.xlu2 %6327  ;;  %v8240_v34 = vld [vmem:[%s8359_s16 + $0x1f0] sm:$0xff] }
 0x726   : > { %v13547_v13 = vadd.f32 %v15013_v48, %v15012_v61  ;;  %8167 = vpow2.f32 %v4874_v39  ;;  %v13557_v1 = vadd.f32 %v4277_v50, %v3831_v57  ;;  %v3372_v60 = vsub.f32 %v3305_v44, %v13261_v31  ;;  %6368 = vst.msk [vmem:[%s13314_s22 + $0x18] sm:$0xff] %vm6092_vm1, %v6328_v14 }
 0x727   : > { %v3373_v25 = vsub.f32 %v3307_v58, %v13261_v31  ;;  %v3374_v46 = vsub.f32 %v3309_v51, %v13261_v31  ;;  %v5259_v18 = vsub.f32 0.0, %v13553_v40  ;;  %v5256_v32 = vsub.f32 0.0, %v13555_v53  ;;  %v6331_v55 = vpop.xlane.xlu1 %6330 }
 0x728   : > { %v5258_v3 = vsub.f32 0.0, %v13547_v13  ;;  %v3375_v29 = vsub.f32 %v3311_v16, %v13261_v31  ;;  %v5257_v56 = vsub.f32 0.0, %v13557_v1  ;;  %v5384_v26 = vsub.f32 %v3372_v60, %v13283_v24  ;;  %6369 = vst.msk [vmem:[%s13314_s22 + $0x20] sm:$0xff] %vm6092_vm1, %v6331_v55  ;;  %v6045_v57 = vpop.xlane.xlu0 %6044 }
 0x729   : > { %v8162_v11 = vpop.eup %8161  ;;  %v6362_v21 = vsel %vm1786_vm0, %v13231_v2, 0.0  ;;  %v5320_v43 = vadd.f32 %v5256_v32, %v13494_v33  ;;  %v5385_v31 = vsub.f32 %v3373_v25, %v13407_v52  ;;  %v5386_v2 = vsub.f32 %v3374_v46, %v13474_v19  ;;  %v8238_v19 = vld [vmem:[%s8359_s16 + $0x1e0] sm:$0xff] }
 0x72a   : > { %v8164_v5 = vpop.eup %8163  ;;  %v4936_v45 = vadd.f32 1.0, %v8162_v11  ;;  %v6079_v24 = vsub.f32 0.0, %v6015_v15  ;;  %v5321_v62 = vadd.f32 %v5257_v56, %v13508_v7  ;;  %v5387_v52 = vsub.f32 %v3375_v29, %v13477_v42  ;;  %v8241_v15 = vld [vmem:[%s8359_s16 + $0x1f8] sm:$0xff] }
 0x72b   : > { %v8166_v35 = vpop.eup %8165  ;;  %v4937_v23 = vadd.f32 1.0, %v8164_v5  ;;  %v6082_v9 = vsub.f32 0.0, %v6030_v4  ;;  %v4616_v8 = vmax.f32 %v13494_v33, 0.0  ;;  %v5322_v10 = vadd.f32 %v5258_v3, %v13511_v37 }
 0x72c   : > { %v8168_v47 = vpop.eup %8167  ;;  %v4938_v30 = vadd.f32 1.0, %v8166_v35  ;;  %8169 = vlog2.f32 %v4936_v45  ;;  %6363 = vadd.xlane.f32.xlu2 %v6362_v21  ;;  %v5448_v59 = vmul.f32 %v8238_v19, %v5384_v26  ;;  %6096 = vst.msk [vmem:[%s13468_s25 + $0x18] sm:$0xff] %vm6092_vm1, %v6079_v24  ;;  %v4617_v38 = vmax.f32 %v13508_v7, 0.0 }
 0x72d   : > { %v4939_v36 = vadd.f32 1.0, %v8168_v47  ;;  %8171 = vlog2.f32 %v4937_v23  ;;  %v4618_v50 = vmax.f32 %v13511_v37, 0.0  ;;  %v5323_v42 = vadd.f32 %v5259_v18, %v13519_v22  ;;  %6099 = vst.msk [vmem:[%s13468_s25 + $0x30] sm:$0xff] %vm6092_vm1, %v6082_v9  ;;  %v6337_v60 = vpop.xlane.xlu2 %6336 }
 0x72e   : > { %8173 = vlog2.f32 %v4938_v30  ;;  %v5449_v0 = vmul.f32 %v8239_v6, %v5385_v31  ;;  %v4619_v33 = vmax.f32 %v13519_v22, 0.0  ;;  %v5450_v17 = vmul.f32 %v8240_v34, %v5386_v2  ;;  %6371 = vst.msk [vmem:[%s13314_s22 + $0x30] sm:$0xff] %vm6092_vm1, %v6337_v60 }
 0x72f   : > { %8175 = vlog2.f32 %v4939_v36  ;;  %v5512_v44 = vadd.f32 %v5448_v59, %v5320_v43  ;;  %v5608_v39 = vunpack.c.l.bf16 %v5546_v28  ;;  %v5451_v54 = vmul.f32 %v8241_v15, %v5387_v52  ;;  %v6340_v48 = vpop.xlane.xlu1 %6339 }
 0x730   : > { %v5513_v27 = vadd.f32 %v5449_v0, %v5321_v62  ;;  %v5609_v7 = vunpack.c.h.bf16 %v5546_v28  ;;  %v5610_v41 = vunpack.c.l.bf16 %v5547_v49  ;;  %v5514_v63 = vadd.f32 %v5450_v17, %v5322_v10  ;;  %6372 = vst.msk [vmem:[%s13314_s22 + $0x38] sm:$0xff] %vm6092_vm1, %v6340_v48 }
 0x731   : > { %v5611_v61 = vunpack.c.h.bf16 %v5547_v49  ;;  %vm5736_vm4 = vcmp.lt.f32.partialorder %v8238_v19, 1e-08  ;;  %v5515_v16 = vadd.f32 %v5451_v54, %v5323_v42  ;;  %vm5737_vm5 = vcmp.lt.f32.partialorder %v8239_v6, 1e-08 }
 0x732   : > { %v8170_v20 = vpop.eup %8169  ;;  %v6085_v25 = vsub.f32 0.0, %v6045_v57  ;;  %v5672_v5 = vadd.f32 %v5608_v39, %v5512_v44  ;;  %vm5738_vm6 = vcmp.lt.f32.partialorder %v8240_v34, 1e-08  ;;  %v5673_v29 = vadd.f32 %v5609_v7, %v5513_v27 }
 0x733   : > { %v8172_v37 = vpop.eup %8171  ;;  %v5061_v58 = vmul.f32 0.6931472, %v8170_v20  ;;  %vm5864_vm7 = vcmp.gt.f32.partialorder %v8238_v19, 1e-08  ;;  %vm5739_vm8 = vcmp.lt.f32.partialorder %v8241_v15, 1e-08  ;;  %v5674_v26 = vadd.f32 %v5610_v41, %v5514_v63 }
 0x734   : > { %v8174_v22 = vpop.eup %8173  ;;  %v5063_v51 = vmul.f32 0.6931472, %v8172_v37  ;;  %6102 = vst.msk [vmem:[%s13468_s25 + $0x48] sm:$0xff] %vm6092_vm1, %v6085_v25  ;;  %vm5865_vm9 = vcmp.gt.f32.partialorder %v8239_v6, 1e-08  ;;  %v5675_v21 = vadd.f32 %v5611_v61, %v5515_v16  ;;  %v5928_v47 = vsel %vm5864_vm7, %v5672_v5, 0.0 }
 0x735   : > { %v8176_v11 = vpop.eup %8175  ;;  %v5065_v3 = vmul.f32 0.6931472, %v8174_v22  ;;  %v5128_v46 = vadd.f32 %v5061_v58, %v4616_v8  ;;  %vm5866_vm10 = vcmp.gt.f32.partialorder %v8240_v34, 1e-08  ;;  %vm5867_vm11 = vcmp.gt.f32.partialorder %v8241_v15, 1e-08  ;;  %v6346_v24 = vpop.xlane.xlu2 %6345 }
 0x736   : > { %v5067_v18 = vmul.f32 0.6931472, %v8176_v11  ;;  %v5129_v32 = vadd.f32 %v5063_v51, %v4617_v38  ;;  %6374 = vst.msk [vmem:[%s13314_s22 + $0x48] sm:$0xff] %vm6092_vm1, %v6346_v24  ;;  %v5931_v52 = vsel %vm5867_vm11, %v5675_v21, 0.0 }
 0x737   : > { %v5130_v45 = vadd.f32 %v5065_v3, %v4618_v50  ;;  %v5192_v35 = vsub.f32 %v5128_v46, %v13555_v53  ;;  %v5929_v53 = vsel %vm5865_vm9, %v5673_v29, 0.0  ;;  %v6349_v36 = vpop.xlane.xlu1 %6348  ;;  %v6359_v50 = vsel %vm1786_vm0, %v13513_v12, 0.0 }
 0x738   : > { %v5131_v56 = vadd.f32 %v5067_v18, %v4619_v33  ;;  %v5193_v23 = vsub.f32 %v5129_v32, %v13557_v1  ;;  %6375 = vst.msk [vmem:[%s13314_s22 + $0x50] sm:$0xff] %vm6092_vm1, %v6349_v36 }
 0x739   : > { %v5194_v55 = vsub.f32 %v5130_v45, %v13547_v13  ;;  %v5800_v4 = vsel %vm5736_vm4, %v5192_v35, 0.0  ;;  %v5930_v13 = vsel %vm5866_vm10, %v5674_v26, 0.0 }
 0x73a   : > { %v5195_v30 = vsub.f32 %v5131_v56, %v13553_v40  ;;  %v5801_v43 = vsel %vm5737_vm5, %v5193_v23, 0.0  ;;  %v5992_v31 = vadd.f32 %v5928_v47, %v5800_v4 }
 0x73b   : > { %v5802_v14 = vsel %vm5738_vm6, %v5194_v55, 0.0  ;;  %v5993_v1 = vadd.f32 %v5929_v53, %v5801_v43 }
 0x73c   : > { %v5803_v2 = vsel %vm5739_vm8, %v5195_v30, 0.0  ;;  %v5994_v62 = vadd.f32 %v5930_v13, %v5802_v14 }
 0x73d   : > { %v6071_v40 = vadd.f32 %v5993_v1, %v5992_v31  ;;  %v5995_v28 = vadd.f32 %v5931_v52, %v5803_v2  ;;  %v6355_v59 = vpop.xlane.xlu2 %6354 }
 0x73e   : > { %6377 = vst.msk [vmem:[%s13314_s22 + $0x60] sm:$0xff] %vm6092_vm1, %v6355_v59 }
 0x73f   : > { %v6072_v9 = vadd.f32 %v6071_v40, %v5994_v62  ;;  %v6005_v10 = vpop.xlane.xlu1 %6004 }
 0x740   : > { %v6077_v19 = vsub.f32 0.0, %v6005_v10 }
 0x741   : > { %v6073_v8 = vadd.f32 %v6072_v9, %v5995_v28  ;;  %v6060_v49 = vpop.xlane.xlu0 %6059 }
 0x742   : > { %6094 = vst.msk [vmem:[%s13468_s25 + $0x8] sm:$0xff] %vm6092_vm1, %v6077_v19  ;;  %v6088_v38 = vsub.f32 0.0, %v6060_v49 }
 0x743   : > { %6074 = vadd.xlane.f32.xlu0 %v6073_v8 }
 0x744   : > { %6105 = vst.msk [vmem:[%s13468_s25 + $0x60] sm:$0xff] %vm6092_vm1, %v6088_v38 }
 0x745   : > { %v6010_v0 = vpop.xlane.xlu2 %6009 }
 0x746   : > { %v6078_v33 = vsub.f32 0.0, %v6010_v0 }
 0x747   : > { %v6020_v42 = vpop.xlane.xlu1 %6019 }
 0x748   : > { %v6080_v6 = vsub.f32 0.0, %v6020_v42  ;;  %6095 = vst.msk [vmem:[%s13468_s25 + $0x10] sm:$0xff] %vm6092_vm1, %v6078_v33 }
 0x74a   : > { %6097 = vst.msk [vmem:[%s13468_s25 + $0x20] sm:$0xff] %vm6092_vm1, %v6080_v6 }
 0x74b   : > { %6360 = vadd.xlane.f32.xlu0 %v6359_v50 }
 0x74d   : > { %v6025_v44 = vpop.xlane.xlu2 %6024 }
 0x74e   : > { %v6081_v39 = vsub.f32 0.0, %v6025_v44 }
 0x74f   : > { %v6035_v34 = vpop.xlane.xlu1 %6034 }
 0x750   : > { %v6083_v17 = vsub.f32 0.0, %v6035_v34  ;;  %6098 = vst.msk [vmem:[%s13468_s25 + $0x28] sm:$0xff] %vm6092_vm1, %v6081_v39 }
 0x752   : > { %6100 = vst.msk [vmem:[%s13468_s25 + $0x38] sm:$0xff] %vm6092_vm1, %v6083_v17 }
 0x755   : > { %v6040_v15 = vpop.xlane.xlu2 %6039 }
 0x756   : > { %v6084_v54 = vsub.f32 0.0, %v6040_v15 }
 0x757   : > { %v6050_v12 = vpop.xlane.xlu1 %6049 }
 0x758   : > { %v6086_v20 = vsub.f32 0.0, %v6050_v12  ;;  %6101 = vst.msk [vmem:[%s13468_s25 + $0x40] sm:$0xff] %vm6092_vm1, %v6084_v54 }
 0x75a   : > { %6103 = vst.msk [vmem:[%s13468_s25 + $0x50] sm:$0xff] %vm6092_vm1, %v6086_v20 }
 0x75d   : > { %v6055_v27 = vpop.xlane.xlu2 %6054 }
 0x75e   : > { %v6087_v7 = vsub.f32 0.0, %v6055_v27 }
 0x760   : > { %6104 = vst.msk [vmem:[%s13468_s25 + $0x58] sm:$0xff] %vm6092_vm1, %v6087_v7 }
 0x77c   : > { %v6065_v41 = vpop.xlane.xlu1 %6064 }
 0x77d   : > { %v6089_v37 = vsub.f32 0.0, %v6065_v41 }
 0x77f   : > { %6106 = vst.msk [vmem:[%s13468_s25 + $0x68] sm:$0xff] %vm6092_vm1, %v6089_v37 }
 0x784   : > { %v6358_v58 = vpop.xlane.xlu1 %6357 }
 0x785   : > { %6378 = vst.msk [vmem:[%s13314_s22 + $0x68] sm:$0xff] %vm6092_vm1, %v6358_v58 }
 0x797   : > { %v6070_v63 = vpop.xlane.xlu2 %6069 }
 0x798   : > { %v6090_v61 = vsub.f32 0.0, %v6070_v63 }
 0x79a   : > { %6107 = vst.msk [vmem:[%s13468_s25 + $0x70] sm:$0xff] %vm6092_vm1, %v6090_v61 }
 0x79f   : > { %v6364_v48 = vpop.xlane.xlu2 %6363 }
 0x7a0   : > { %6380 = vst.msk [vmem:[%s13314_s22 + $0x78] sm:$0xff] %vm6092_vm1, %v6364_v48 }
 0x7b6   : > { %v6075_v57 = vpop.xlane.xlu0 %6074 }
 0x7b7   : > { %v6091_v22 = vsub.f32 0.0, %v6075_v57 }
 0x7b9   : > { %6108 = vst.msk [vmem:[%s13468_s25 + $0x78] sm:$0xff] %vm6092_vm1, %v6091_v22 }
 0x7be   : > { %v6361_v51 = vpop.xlane.xlu0 %6360 }
 0x7bf   : > { %6379 = vst.msk [vmem:[%s13314_s22 + $0x70] sm:$0xff] %vm6092_vm1, %v6361_v51 }
 0x7c0 PF: > { %s25_s29 = sadd.s32 1, %s8248_s29  }
 0x7c1   : > { %p22_p4 = scmp.ge.s32.totalorder %s25_s29, 4  }
 0x7c3   :  { %24 = sbr.rel (!%p22_p4) target bundleno = 1 (0x1), region = 120 }

</bundles_post_ra>
